<compile_context>
chip_gen: v7x
topology: tpu7x:2x2x1
jax: 0.10.0
libtpu: 0.0.40
codegen_flags: <defaults>
</compile_context>

<pallas_src>
import math

import jax
import jax.numpy as jnp
from jax.experimental import pallas as pl
from jax.experimental.pallas import tpu as pltpu

# TODO(synk): the real AttentionUNet architecture + checkpoint
# ('unet_att_focal_dice350.pt') is external to the provided module source; a
# deterministic separable 3x3 conv (zero padding) stand-in is implemented instead.
#   K3 = 0.05 * outer([1,2,1],[1,2,1]) + 0.2 * delta_center
_K3 = (
    (0.05, 0.10, 0.05),
    (0.10, 0.40, 0.10),
    (0.05, 0.10, 0.05),
)

_POOL = 40     # nn.AdaptiveAvgPool2d(40)
_LANES = 128   # lane group per slice inside kernel A


# ---------------------------------------------------------------------------
# Kernel A: fused stand-in segmenter (3x3 conv) + sigmoid + AdaptiveAvgPool2d(40),
#           all N slices processed at once via lane stacking.
# ---------------------------------------------------------------------------
def segment_sigmoid_pool(x):
    """x: (B, N, H, W) f32 -> pooled (B, 40, N*40) f32 (slice-major on lanes)."""
    b, n, h, w = x.shape
    hp = wp = _POOL
    fh, fw = h // hp, w // wp
    assert w <= _LANES, "slice width must fit a single 128-lane group"
    lanes = n * _LANES            # lane-stacked width: slice g lives in [128g, 128g+w)
    rows = h + 16                 # 8 zero rows above data (aligned start), >=8 below

    # Pooling matrices (host-built, tiny, f32 to keep pooling precision).
    ph = jnp.repeat(jnp.eye(hp, dtype=jnp.float32), fh, axis=1) / fh           # (hp, h)
    pw = jnp.repeat(jnp.eye(wp, dtype=jnp.float32), fw, axis=0) / fw           # (w, wp)
    pw_grp = jnp.pad(pw, ((0, _LANES - w), (0, 0)))                            # (128, wp)
    # Block diagonal: pools every 128-lane slice group into its own 40 output lanes,
    # giving one lane-dense (hp, N*wp) store per batch step.
    pwp = jnp.kron(jnp.eye(n, dtype=jnp.float32), pw_grp)                      # (n*128, n*wp)

    def kernel(x_ref, ph_ref, pwp_ref, o_ref, pad_ref):
        # Zero the border scratch every step (cheap; see header for why it is not
        # guarded by program_id == 0 under "parallel" semantics).
        pad_ref[...] = jnp.zeros_like(pad_ref)
        # Lane-stack all N slices: slice g -> rows [8, 8+h), lanes [128g, 128g+w).
        for g in range(n):
            pad_ref[8:8 + h, g * _LANES:g * _LANES + w] = x_ref[0, g]
        # Row taps: three sublane-shifted windows over the zero-bordered scratch.
        win0 = pad_ref[7:7 + h, :]
        win1 = pad_ref[8:8 + h, :]
        win2 = pad_ref[9:9 + h, :]
        # Separable 3x3: y = 0.05*(r[:,j-1] + 2*r + r[:,j+1] + 4*x), r = row-combined.
        r = (win0 + win2) + 2.0 * win1
        left = pltpu.roll(r, 1, axis=1)              # r[:, j-1]
        right = pltpu.roll(r, lanes - 1, axis=1)     # r[:, j+1] (non-negative shift)
        y = 0.05 * (left + right + 2.0 * r + 4.0 * win1)
        # Sigmoid on the EUP: exp + approximate reciprocal (error << test tolerance).
        s = pl.reciprocal(1.0 + jnp.exp(-y), approx=True)                   # (h, lanes)
        u = jnp.dot(ph_ref[...], s, preferred_element_type=jnp.float32)     # (hp, lanes)
        o_ref[0] = jnp.dot(u, pwp_ref[...],
                           preferred_element_type=jnp.float32)              # (hp, n*wp)

    cost = pl.CostEstimate(
        flops=int(b * (10 * h * lanes + 2 * hp * h * lanes + 2 * hp * lanes * n * wp)),
        transcendentals=int(b * h * lanes),
        bytes_accessed=int(x.size * 4 + ph.size * 4 + pwp.size * 4
                           + b * hp * n * wp * 4),
    )
    return pl.pallas_call(
        kernel,
        out_shape=jax.ShapeDtypeStruct((b, hp, n * wp), jnp.float32),
        grid=(b,),
        in_specs=[
            pl.BlockSpec((1, n, h, w), lambda i: (i, 0, 0, 0)),
            pl.BlockSpec((hp, h), lambda i: (0, 0)),
            pl.BlockSpec((n * _LANES, n * wp), lambda i: (0, 0)),
        ],
        out_specs=pl.BlockSpec((1, hp, n * wp), lambda i: (i, 0, 0)),
        scratch_shapes=[pltpu.VMEM((rows, lanes), jnp.float32)],
        compiler_params=pltpu.CompilerParams(dimension_semantics=("parallel",)),
        cost_estimate=cost,
    )(x, ph, pwp)


# ---------------------------------------------------------------------------
# Kernel B: risk head = Flatten -> Linear(9600,50) -> ReLU -> Dropout -> Linear(50,1)
#           Single gridless invocation: the bf16 w1 block (960 KB) sits in VMEM,
#           so the kernel is a pure HBM-bound weight stream with one MXU matmul.
# ---------------------------------------------------------------------------
def risk_head(flat, w1_bf16, b1, w2, b2):
    """flat: (B, K) f32, w1_bf16: (K, 50) bf16 -> (B, 1) f32."""
    b, k = flat.shape
    kh = w1_bf16.shape[1]

    def kernel(f_ref, w1_ref, b1_ref, w2_ref, b2_ref, o_ref):
        hid = jnp.dot(f_ref[...].astype(jnp.bfloat16), w1_ref[...],
                      preferred_element_type=jnp.float32) + b1_ref[...]
        hid = jnp.maximum(hid, 0.0)
        # TODO(synk): nn.Dropout(0.5) is identity at inference; training mask omitted.
        o_ref[...] = jnp.dot(hid, w2_ref[...],
                             preferred_element_type=jnp.float32) + b2_ref[...]

    cost = pl.CostEstimate(
        flops=int(2 * b * k * kh + 2 * b * kh),
        transcendentals=0,
        bytes_accessed=int(flat.size * 4 + w1_bf16.size * 2 + b1.size * 4
                           + w2.size * 4 + b2.size * 4 + b * 4),
    )
    return pl.pallas_call(
        kernel,
        out_shape=jax.ShapeDtypeStruct((b, 1), jnp.float32),
        cost_estimate=cost,
    )(flat, w1_bf16, b1, w2, b2)


# ---------------------------------------------------------------------------
# Full forward pass.
# ---------------------------------------------------------------------------
def risk_assessment_forward(x, w1, b1, w2, b2):
    b, n, h, w = x.shape
    assert h % _POOL == 0 and w % _POOL == 0, "spatial dims must be multiples of 40"
    pooled = segment_sigmoid_pool(x)                       # (B, 40, N*40), lane-dense
    # nn.Flatten over (N, 40, 40): reorder the slice-major lane layout into PyTorch's
    # (n, i, j) flatten order (tiny ~77 KB host-side relayout between the two calls).
    flat = (pooled.reshape(b, _POOL, n, _POOL)
                  .transpose(0, 2, 1, 3)
                  .reshape(b, n * _POOL * _POOL))
    # w1 streamed in bf16 (halves the dominating HBM read); f32 accumulation.
    out = risk_head(flat, w1.astype(jnp.bfloat16), b1, w2, b2)
    return out[:, 0]                                       # .squeeze(1)


# ---------------------------------------------------------------------------
# Pure-JAX reference (same math, no Pallas) for a correctness check.
# ---------------------------------------------------------------------------
def _reference_forward(x, w1, b1, w2, b2):
    b, n, h, w = x.shape
    xi = x.reshape(b * n, h, w)
    xp = jnp.pad(xi, ((0, 0), (1, 1), (1, 1)))
    y = jnp.zeros((b * n, h, w), jnp.float32)
    for di in range(3):
        for dj in range(3):
            y = y + _K3[di][dj] * xp[:, di:di + h, dj:dj + w]
    s = jax.nn.sigmoid(y).reshape(b, n, h, w)
    fh, fw = h // _POOL, w // _POOL
    pooled = s.reshape(b, n, _POOL, fh, _POOL, fw).mean(axis=(3, 5))
    flat = pooled.reshape(b, -1)
    hid = jnp.dot(flat.astype(jnp.bfloat16), w1.astype(jnp.bfloat16),
                  preferred_element_type=jnp.float32) + b1
    hid = jnp.maximum(hid, 0.0)
    return (jnp.dot(hid, w2, preferred_element_type=jnp.float32) + b2)[:, 0]


if __name__ == "__main__":
    # num_images must be 6 so Flatten gives 6*40*40 = 9600 (Linear(9600, 50)).
    B, N, H, W = 2, 6, 80, 80

    key = jax.random.PRNGKey(0)
    kx, k1, k2, k3, k4 = jax.random.split(key, 5)
    x = jax.random.normal(kx, (B, N, H, W), dtype=jnp.float32)

    lim1 = 1.0 / math.sqrt(9600.0)
    w1 = jax.random.uniform(k1, (9600, 50), jnp.float32, -lim1, lim1)
    b1 = jax.random.uniform(k2, (1, 50), jnp.float32, -lim1, lim1)
    lim2 = 1.0 / math.sqrt(50.0)
    w2 = jax.random.uniform(k3, (50, 1), jnp.float32, -lim2, lim2)
    b2 = jax.random.uniform(k4, (1, 1), jnp.float32, -lim2, lim2)

    fwd = jax.jit(risk_assessment_forward)
    risk = jax.block_until_ready(fwd(x, w1, b1, w2, b2))
    assert risk.shape == (B,), risk.shape

    ref = jax.block_until_ready(jax.jit(_reference_forward)(x, w1, b1, w2, b2))
    # Tolerance covers the approximate reciprocal in the sigmoid and the separable
    # conv / bf16 matmul rounding differences vs the exact-f32 reference.
    assert jnp.allclose(risk, ref, rtol=3e-3, atol=3e-3), (risk, ref)

    print("KERNEL_OK")
</pallas_src>

<mosaic_0001>
module attributes {stable_mosaic.version = 11 : i64} {
  func.func @kernel(%arg0: i32, %arg1: memref<1x6x80x80xf32, #tpu.memory_space<vmem>>, %arg2: memref<40x80xf32, #tpu.memory_space<vmem>>, %arg3: memref<768x240xf32, #tpu.memory_space<vmem>>, %arg4: memref<1x40x240xf32, #tpu.memory_space<vmem>>, %arg5: memref<96x768xf32, #tpu.memory_space<vmem>>) attributes {dimension_semantics = [#tpu.dimension_semantics<parallel>], iteration_bounds = array<i64: 2>, scalar_prefetch = 0 : i64, scratch_operands = 1 : i64, tpu.core_type = #tpu.core_type<tc>, window_params = [{transform_indices = @transform_0, window_bounds = array<i64: 1, 6, 80, 80>}, {pipeline_mode = #tpu.pipeline_mode<synchronous>, transform_indices = @transform_1, window_bounds = array<i64: 40, 80>}, {pipeline_mode = #tpu.pipeline_mode<synchronous>, transform_indices = @transform_2, window_bounds = array<i64: 768, 240>}, {transform_indices = @transform_3, window_bounds = array<i64: 1, 40, 240>}]} {
    %cst = arith.constant 0.000000e+00 : f32
    %0 = vector.broadcast %cst : f32 to vector<96x768xf32>
    %c0 = arith.constant 0 : index
    %c0_0 = arith.constant 0 : index
    %1 = vector.load %arg5[%c0, %c0_0] : memref<96x768xf32, #tpu.memory_space<vmem>>, vector<96x768xf32>
    tpu.vector_store %arg5[%c0, %c0_0], %0 {strides = array<i32>} : memref<96x768xf32, #tpu.memory_space<vmem>>, vector<96x768xf32>,
    %c0_1 = arith.constant 0 : index
    %c0_2 = arith.constant 0 : index
    %c0_3 = arith.constant 0 : index
    %c0_4 = arith.constant 0 : index
    %2 = vector.load %arg1[%c0_1, %c0_2, %c0_3, %c0_4] : memref<1x6x80x80xf32, #tpu.memory_space<vmem>>, vector<1x1x80x80xf32>
    %3 = vector.shape_cast %2 : vector<1x1x80x80xf32> to vector<80x80xf32>
    %c8 = arith.constant 8 : index
    %c0_5 = arith.constant 0 : index
    %4 = vector.load %arg5[%c8, %c0_5] : memref<96x768xf32, #tpu.memory_space<vmem>>, vector<80x80xf32>
    tpu.vector_store %arg5[%c8, %c0_5], %3 {strides = array<i32>} : memref<96x768xf32, #tpu.memory_space<vmem>>, vector<80x80xf32>,
    %c0_6 = arith.constant 0 : index
    %c1 = arith.constant 1 : index
    %c0_7 = arith.constant 0 : index
    %c0_8 = arith.constant 0 : index
    %5 = vector.load %arg1[%c0_6, %c1, %c0_7, %c0_8] : memref<1x6x80x80xf32, #tpu.memory_space<vmem>>, vector<1x1x80x80xf32>
    %6 = vector.shape_cast %5 : vector<1x1x80x80xf32> to vector<80x80xf32>
    %c8_9 = arith.constant 8 : index
    %c128 = arith.constant 128 : index
    %7 = vector.load %arg5[%c8_9, %c128] : memref<96x768xf32, #tpu.memory_space<vmem>>, vector<80x80xf32>
    tpu.vector_store %arg5[%c8_9, %c128], %6 {strides = array<i32>} : memref<96x768xf32, #tpu.memory_space<vmem>>, vector<80x80xf32>,
    %c0_10 = arith.constant 0 : index
    %c2 = arith.constant 2 : index
    %c0_11 = arith.constant 0 : index
    %c0_12 = arith.constant 0 : index
    %8 = vector.load %arg1[%c0_10, %c2, %c0_11, %c0_12] : memref<1x6x80x80xf32, #tpu.memory_space<vmem>>, vector<1x1x80x80xf32>
    %9 = vector.shape_cast %8 : vector<1x1x80x80xf32> to vector<80x80xf32>
    %c8_13 = arith.constant 8 : index
    %c256 = arith.constant 256 : index
    %10 = vector.load %arg5[%c8_13, %c256] : memref<96x768xf32, #tpu.memory_space<vmem>>, vector<80x80xf32>
    tpu.vector_store %arg5[%c8_13, %c256], %9 {strides = array<i32>} : memref<96x768xf32, #tpu.memory_space<vmem>>, vector<80x80xf32>,
    %c0_14 = arith.constant 0 : index
    %c3 = arith.constant 3 : index
    %c0_15 = arith.constant 0 : index
    %c0_16 = arith.constant 0 : index
    %11 = vector.load %arg1[%c0_14, %c3, %c0_15, %c0_16] : memref<1x6x80x80xf32, #tpu.memory_space<vmem>>, vector<1x1x80x80xf32>
    %12 = vector.shape_cast %11 : vector<1x1x80x80xf32> to vector<80x80xf32>
    %c8_17 = arith.constant 8 : index
    %c384 = arith.constant 384 : index
    %13 = vector.load %arg5[%c8_17, %c384] : memref<96x768xf32, #tpu.memory_space<vmem>>, vector<80x80xf32>
    tpu.vector_store %arg5[%c8_17, %c384], %12 {strides = array<i32>} : memref<96x768xf32, #tpu.memory_space<vmem>>, vector<80x80xf32>,
    %c0_18 = arith.constant 0 : index
    %c4 = arith.constant 4 : index
    %c0_19 = arith.constant 0 : index
    %c0_20 = arith.constant 0 : index
    %14 = vector.load %arg1[%c0_18, %c4, %c0_19, %c0_20] : memref<1x6x80x80xf32, #tpu.memory_space<vmem>>, vector<1x1x80x80xf32>
    %15 = vector.shape_cast %14 : vector<1x1x80x80xf32> to vector<80x80xf32>
    %c8_21 = arith.constant 8 : index
    %c512 = arith.constant 512 : index
    %16 = vector.load %arg5[%c8_21, %c512] : memref<96x768xf32, #tpu.memory_space<vmem>>, vector<80x80xf32>
    tpu.vector_store %arg5[%c8_21, %c512], %15 {strides = array<i32>} : memref<96x768xf32, #tpu.memory_space<vmem>>, vector<80x80xf32>,
    %c0_22 = arith.constant 0 : index
    %c5 = arith.constant 5 : index
    %c0_23 = arith.constant 0 : index
    %c0_24 = arith.constant 0 : index
    %17 = vector.load %arg1[%c0_22, %c5, %c0_23, %c0_24] : memref<1x6x80x80xf32, #tpu.memory_space<vmem>>, vector<1x1x80x80xf32>
    %18 = vector.shape_cast %17 : vector<1x1x80x80xf32> to vector<80x80xf32>
    %c8_25 = arith.constant 8 : index
    %c640 = arith.constant 640 : index
    %19 = vector.load %arg5[%c8_25, %c640] : memref<96x768xf32, #tpu.memory_space<vmem>>, vector<80x80xf32>
    tpu.vector_store %arg5[%c8_25, %c640], %18 {strides = array<i32>} : memref<96x768xf32, #tpu.memory_space<vmem>>, vector<80x80xf32>,
    %c7 = arith.constant 7 : index
    %c0_26 = arith.constant 0 : index
    %20 = vector.load %arg5[%c7, %c0_26] : memref<96x768xf32, #tpu.memory_space<vmem>>, vector<80x768xf32>
    %c8_27 = arith.constant 8 : index
    %c0_28 = arith.constant 0 : index
    %21 = vector.load %arg5[%c8_27, %c0_28] : memref<96x768xf32, #tpu.memory_space<vmem>>, vector<80x768xf32>
    %c9 = arith.constant 9 : index
    %c0_29 = arith.constant 0 : index
    %22 = vector.load %arg5[%c9, %c0_29] : memref<96x768xf32, #tpu.memory_space<vmem>>, vector<80x768xf32>
    %23 = arith.addf %20, %22 : vector<80x768xf32>
    %cst_30 = arith.constant 2.000000e+00 : f32
    %24 = vector.broadcast %cst_30 : f32 to vector<80x768xf32>
    %25 = arith.mulf %24, %21 : vector<80x768xf32>
    %26 = arith.addf %23, %25 : vector<80x768xf32>
    %c1_i32 = arith.constant 1 : i32
    %27 = tpu.dynamic_rotate %26 by %c1_i32 dim 1 : vector<80x768xf32>, i32 -> vector<80x768xf32>
    %c767_i32 = arith.constant 767 : i32
    %28 = tpu.dynamic_rotate %26 by %c767_i32 dim 1 : vector<80x768xf32>, i32 -> vector<80x768xf32>
    %29 = arith.addf %27, %28 : vector<80x768xf32>
    %cst_31 = arith.constant 2.000000e+00 : f32
    %30 = vector.broadcast %cst_31 : f32 to vector<80x768xf32>
    %31 = arith.mulf %30, %26 : vector<80x768xf32>
    %32 = arith.addf %29, %31 : vector<80x768xf32>
    %cst_32 = arith.constant 4.000000e+00 : f32
    %33 = vector.broadcast %cst_32 : f32 to vector<80x768xf32>
    %34 = arith.mulf %33, %21 : vector<80x768xf32>
    %35 = arith.addf %32, %34 : vector<80x768xf32>
    %cst_33 = arith.constant 5.000000e-02 : f32
    %36 = vector.broadcast %cst_33 : f32 to vector<80x768xf32>
    %37 = arith.mulf %36, %35 : vector<80x768xf32>
    %cst_34 = arith.constant 0.000000e+00 : f32
    %38 = vector.broadcast %cst_34 : f32 to vector<80x768xf32>
    %39 = arith.subf %38, %37 : vector<80x768xf32>
    %40 = math.exp %39 : vector<80x768xf32>
    %cst_35 = arith.constant 1.000000e+00 : f32
    %41 = vector.broadcast %cst_35 : f32 to vector<80x768xf32>
    %42 = arith.addf %41, %40 : vector<80x768xf32>
    %43 = tpu.reciprocal %42 {approx = true} : vector<80x768xf32> -> vector<80x768xf32>
    %c0_36 = arith.constant 0 : index
    %c0_37 = arith.constant 0 : index
    %44 = vector.load %arg2[%c0_36, %c0_37] : memref<40x80xf32, #tpu.memory_space<vmem>>, vector<40x80xf32>
    %cst_38 = arith.constant dense<0.000000e+00> : vector<40x768xf32>
    %45 = tpu.matmul %44, %43, %cst_38 {dimension_numbers = #tpu.dot_dimension_numbers<[1], [0], [0], [1], [0, 0, 1, 1], [], []>} : vector<40x80xf32>, vector<80x768xf32>, vector<40x768xf32> -> vector<40x768xf32>
    %c0_39 = arith.constant 0 : index
    %c0_40 = arith.constant 0 : index
    %46 = vector.load %arg3[%c0_39, %c0_40] : memref<768x240xf32, #tpu.memory_space<vmem>>, vector<768x240xf32>
    %cst_41 = arith.constant dense<0.000000e+00> : vector<40x240xf32>
    %47 = tpu.matmul %45, %46, %cst_41 {dimension_numbers = #tpu.dot_dimension_numbers<[1], [0], [0], [1], [0, 0, 1, 1], [], []>} : vector<40x768xf32>, vector<768x240xf32>, vector<40x240xf32> -> vector<40x240xf32>
    %c0_42 = arith.constant 0 : index
    %c0_43 = arith.constant 0 : index
    %c0_44 = arith.constant 0 : index
    %48 = vector.load %arg4[%c0_42, %c0_43, %c0_44] : memref<1x40x240xf32, #tpu.memory_space<vmem>>, vector<1x40x240xf32>
    %49 = vector.shape_cast %48 : vector<1x40x240xf32> to vector<40x240xf32>
    %50 = vector.shape_cast %47 : vector<40x240xf32> to vector<1x40x240xf32>
    tpu.vector_store %arg4[%c0_42, %c0_43, %c0_44], %50 {strides = array<i32>} : memref<1x40x240xf32, #tpu.memory_space<vmem>>, vector<1x40x240xf32>,
    return
  }
  func.func @transform_0(%arg0: i32) -> (i32, i32, i32, i32) {
    %c0_i32 = arith.constant 0 : i32
    %c0_i32_0 = arith.constant 0 : i32
    %c0_i32_1 = arith.constant 0 : i32
    %c0_i32_2 = arith.constant 0 : i32
    return %arg0, %c0_i32, %c0_i32_0, %c0_i32_1 : i32, i32, i32, i32
  }
  func.func @transform_1(%arg0: i32) -> (i32, i32) {
    %c0_i32 = arith.constant 0 : i32
    %c0_i32_0 = arith.constant 0 : i32
    %c0_i32_1 = arith.constant 0 : i32
    return %c0_i32, %c0_i32_0 : i32, i32
  }
  func.func @transform_2(%arg0: i32) -> (i32, i32) {
    %c0_i32 = arith.constant 0 : i32
    %c0_i32_0 = arith.constant 0 : i32
    %c0_i32_1 = arith.constant 0 : i32
    return %c0_i32, %c0_i32_0 : i32, i32
  }
  func.func @transform_3(%arg0: i32) -> (i32, i32, i32) {
    %c0_i32 = arith.constant 0 : i32
    %c0_i32_0 = arith.constant 0 : i32
    %c0_i32_1 = arith.constant 0 : i32
    return %arg0, %c0_i32, %c0_i32_0 : i32, i32, i32
  }
}

module attributes {stable_mosaic.version = 11 : i64} {
  func.func @kernel(%arg0: memref<2x9600xf32, #tpu.memory_space<vmem>>, %arg1: memref<9600x50xbf16, #tpu.memory_space<vmem>>, %arg2: memref<1x50xf32, #tpu.memory_space<vmem>>, %arg3: memref<50x1xf32, #tpu.memory_space<vmem>>, %arg4: memref<1x1xf32, #tpu.memory_space<vmem>>, %arg5: memref<2x1xf32, #tpu.memory_space<vmem>>) attributes {dimension_semantics = [], scalar_prefetch = 0 : i64, scratch_operands = 0 : i64, tpu.core_type = #tpu.core_type<tc>} {
    %c0 = arith.constant 0 : index
    %c0_0 = arith.constant 0 : index
    %0 = vector.load %arg0[%c0, %c0_0] : memref<2x9600xf32, #tpu.memory_space<vmem>>, vector<2x9600xf32>
    %1 = arith.truncf %0 : vector<2x9600xf32> to vector<2x9600xbf16>
    %c0_1 = arith.constant 0 : index
    %c0_2 = arith.constant 0 : index
    %2 = vector.load %arg1[%c0_1, %c0_2] : memref<9600x50xbf16, #tpu.memory_space<vmem>>, vector<9600x50xbf16>
    %cst = arith.constant dense<0.000000e+00> : vector<2x50xf32>
    %3 = tpu.matmul %1, %2, %cst {dimension_numbers = #tpu.dot_dimension_numbers<[1], [0], [0], [1], [0, 0, 1, 1], [], []>} : vector<2x9600xbf16>, vector<9600x50xbf16>, vector<2x50xf32> -> vector<2x50xf32>
    %c0_3 = arith.constant 0 : index
    %c0_4 = arith.constant 0 : index
    %4 = vector.load %arg2[%c0_3, %c0_4] : memref<1x50xf32, #tpu.memory_space<vmem>>, vector<1x50xf32>
    %5 = vector.broadcast %4 : vector<1x50xf32> to vector<2x50xf32>
    %6 = arith.addf %3, %5 : vector<2x50xf32>
    %cst_5 = arith.constant 0.000000e+00 : f32
    %7 = vector.broadcast %cst_5 : f32 to vector<2x50xf32>
    %8 = arith.maximumf %6, %7 : vector<2x50xf32>
    %c0_6 = arith.constant 0 : index
    %c0_7 = arith.constant 0 : index
    %9 = vector.load %arg3[%c0_6, %c0_7] : memref<50x1xf32, #tpu.memory_space<vmem>>, vector<50x1xf32>
    %cst_8 = arith.constant dense<0.000000e+00> : vector<2x1xf32>
    %10 = tpu.matmul %8, %9, %cst_8 {dimension_numbers = #tpu.dot_dimension_numbers<[1], [0], [0], [1], [0, 0, 1, 1], [], []>} : vector<2x50xf32>, vector<50x1xf32>, vector<2x1xf32> -> vector<2x1xf32>
    %c0_9 = arith.constant 0 : index
    %c0_10 = arith.constant 0 : index
    %11 = vector.load %arg4[%c0_9, %c0_10] : memref<1x1xf32, #tpu.memory_space<vmem>>, vector<1x1xf32>
    %12 = vector.broadcast %11 : vector<1x1xf32> to vector<2x1xf32>
    %13 = arith.addf %10, %12 : vector<2x1xf32>
    %c0_11 = arith.constant 0 : index
    %c0_12 = arith.constant 0 : index
    %14 = vector.load %arg5[%c0_11, %c0_12] : memref<2x1xf32, #tpu.memory_space<vmem>>, vector<2x1xf32>
    tpu.vector_store %arg5[%c0_11, %c0_12], %13 {strides = array<i32>} : memref<2x1xf32, #tpu.memory_space<vmem>>, vector<2x1xf32>,
    return
  }
}

</mosaic_0001>

<bundles_post_ra>
// kernel: risk_assessment_forward.2
= control target key start
LH: loop header
LB: loop body
LE: loop exit
PB: predicated region body
PF: predicated region fallthrough
CT: control target
= control target key end

     0   :  { %s4279_s12 = smov 0   ;;  %s7649_s0 = inlined_call_operand.vmem [shape: f32[2,6,80,80], index: 0, kind: input, shape index: {}]   ;;  %s7650_s1 = inlined_call_operand.vmem [shape: f32[40,80], index: 1, kind: input, shape index: {}]   ;;  %s7651_s2 = inlined_call_operand.vmem [shape: f32[768,240], index: 2, kind: input, shape index: {}]   ;;  %s7652_s3 = inlined_call_operand.vmem [shape: f32[2,40,240], index: 3, kind: output, shape index: {}]  }
   0x1 LB: > { %s3582_s13 = sadd.s32 4294967295, %s4254_s12   ;;  %p3586_p0 = scmp.ge.s32.totalorder %s4254_s12, 1  ;;  %s4254_s12 = sphi %s4279_s12, %s13_s12  }
   0x2   : > { %p137_p1 = scmp.lt.s32.totalorder %s4254_s12, 3 }
   0x4   : > { %p138_p2 = pnand %p3586_p0, %p137_p1 }
   0x6   : > { %141 = sbr.rel (%p138_p2) target bundleno = 968 (0x3c8), region = 32 }
   0xd   : > { %p4289_p3 = scmp.lt.s32.totalorder %s3582_s13, 1  ;;  %v4256_v0 = vmov 0.0   ;;  %vm253_vm0 = vcmask 654336   ;;  %vm573_vm1 = vcmask 1045504   ;;  %vm952_vm2 = vcmask 1046528   ;;  %s4257_s19 = smov 1  }
   0xe   : > { %172 = vst [vmem:[#allocation2 + $0x8] sm:$0xff] %v4256_v0  ;;  %178 = vst [vmem:[#allocation2 + $0x38] sm:$0xff] %v4256_v0  ;;  %2818 = vmatprep.mubr.f32.mxu0 %v4256_v0  ;;  %vm1265_vm3 = vcmask 1040384   ;;  %s4258_s20 = smov 127   ;;  %vm3517_vm6 = vcmask 916480  }
   0xf   : > { %184 = vst [vmem:[#allocation2 + $0x68] sm:$0xff] %v4256_v0  ;;  %171 = vst [vmem:[#allocation2] sm:$0xff] %v4256_v0  ;;  %s8104_s13 = smov (!%p4289_p3, %s3582_s13), 1 }
  0x10   : > { %173 = vst [vmem:[#allocation2 + $0x10] sm:$0xff] %v4256_v0  ;;  %174 = vst [vmem:[#allocation2 + $0x18] sm:$0xff] %v4256_v0  ;;  %s3928_s15 = smul.u32 480, %s8104_s13 }
  0x11   : > { %175 = vst [vmem:[#allocation2 + $0x20] sm:$0xff] %v4256_v0  ;;  %176 = vst [vmem:[#allocation2 + $0x28] sm:$0xff] %v4256_v0  ;;  %s3929_s25 = smul.u32 80, %s8104_s13 }
  0x12   : > { %177 = vst [vmem:[#allocation2 + $0x30] sm:$0xff] %v4256_v0  ;;  %179 = vst [vmem:[#allocation2 + $0x40] sm:$0xff] %v4256_v0  ;;  %s4376_s18 = scalar_lea.vmem %s7649_s0, %s3928_s15 }
  0x13   : > { %180 = vst [vmem:[#allocation2 + $0x48] sm:$0xff] %v4256_v0  ;;  %181 = vst [vmem:[#allocation2 + $0x50] sm:$0xff] %v4256_v0  ;;  %v3589_v1 = vld [vmem:[%s4376_s18 + $0x50] sm:$0xff]  ;;  %v3590_v2 = vld [vmem:[%s4376_s18 + $0x58] sm:$0xff]  ;;  %s7629_s28 = scalar_lea.vmem %s7652_s3, %s3929_s25 }
  0x14   : > { %182 = vst [vmem:[#allocation2 + $0x58] sm:$0xff] %v4256_v0  ;;  %183 = vst [vmem:[#allocation2 + $0x60] sm:$0xff] %v4256_v0  ;;  %v243_v3 = vld [vmem:[%s4376_s18] sm:$0xff]  ;;  %v244_v4 = vld [vmem:[%s4376_s18 + $0x8] sm:$0xff] }
  0x15   : > { %185 = vst [vmem:[#allocation2 + $0x70] sm:$0xff] %v4256_v0  ;;  %186 = vst [vmem:[#allocation2 + $0x78] sm:$0xff] %v4256_v0  ;;  %v3591_v5 = vld [vmem:[%s4376_s18 + $0x60] sm:$0xff]  ;;  %v245_v6 = vld [vmem:[%s4376_s18 + $0x10] sm:$0xff] }
  0x16   : > { %187 = vst [vmem:[#allocation2 + $0x80] sm:$0xff] %v4256_v0  ;;  %188 = vst [vmem:[#allocation2 + $0x88] sm:$0xff] %v4256_v0  ;;  %v3599_v7 = vld [vmem:[%s4376_s18 + $0xa0] sm:$0xff]  ;;  %v3600_v8 = vld [vmem:[%s4376_s18 + $0xa8] sm:$0xff] }
  0x17   : > { %189 = vst [vmem:[#allocation2 + $0x90] sm:$0xff] %v4256_v0  ;;  %190 = vst [vmem:[#allocation2 + $0x98] sm:$0xff] %v4256_v0  ;;  %v3601_v9 = vld [vmem:[%s4376_s18 + $0xb0] sm:$0xff]  ;;  %v3630_v11 = vld [vmem:[%s4376_s18 + $0x198] sm:$0xff] }
  0x18   : > { %191 = vst [vmem:[#allocation2 + $0xa0] sm:$0xff] %v4256_v0  ;;  %192 = vst [vmem:[#allocation2 + $0xa8] sm:$0xff] %v4256_v0  ;;  %v3629_v10 = vld [vmem:[%s4376_s18 + $0x190] sm:$0xff]  ;;  %v3631_v12 = vld [vmem:[%s4376_s18 + $0x1a0] sm:$0xff] }
  0x19   : > { %193 = vst [vmem:[#allocation2 + $0xb0] sm:$0xff] %v4256_v0  ;;  %194 = vst [vmem:[#allocation2 + $0xb8] sm:$0xff] %v4256_v0  ;;  %v246_v13 = vld [vmem:[%s4376_s18 + $0x18] sm:$0xff]  ;;  %v247_v14 = vld [vmem:[%s4376_s18 + $0x20] sm:$0xff] }
  0x1a   : > { %195 = vst [vmem:[#allocation2 + $0xc0] sm:$0xff] %v4256_v0  ;;  %196 = vst [vmem:[#allocation2 + $0xc8] sm:$0xff] %v4256_v0  ;;  %v370_v15 = vld [vmem:[#allocation2 + $0x8] sm:$0x80]  ;;  %v3593_v17 = vld [vmem:[%s4376_s18 + $0x70] sm:$0xff] }
  0x1b   : > { %197 = vst [vmem:[#allocation2 + $0xd0] sm:$0xff] %v4256_v0  ;;  %198 = vst [vmem:[#allocation2 + $0xd8] sm:$0xff] %v4256_v0  ;;  %v3592_v16 = vld [vmem:[%s4376_s18 + $0x68] sm:$0xff]  ;;  %v3602_v18 = vld [vmem:[%s4376_s18 + $0xb8] sm:$0xff] }
  0x1c   : > { %199 = vst [vmem:[#allocation2 + $0xe0] sm:$0xff] %v4256_v0  ;;  %200 = vst [vmem:[#allocation2 + $0xe8] sm:$0xff] %v4256_v0  ;;  %v3603_v19 = vld [vmem:[%s4376_s18 + $0xc0] sm:$0xff]  ;;  %v3632_v20 = vld [vmem:[%s4376_s18 + $0x1a8] sm:$0xff] }
  0x1d   : > { %201 = vst [vmem:[#allocation2 + $0xf0] sm:$0xff] %v4256_v0  ;;  %202 = vst [vmem:[#allocation2 + $0xf8] sm:$0xff] %v4256_v0  ;;  %v3633_v21 = vld [vmem:[%s4376_s18 + $0x1b0] sm:$0xff]  ;;  %v369_v40 = vld [vmem:[#allocation2] sm:$0x80] }
  0x1e   : > { %203 = vst [vmem:[#allocation2 + $0x100] sm:$0xff] %v4256_v0  ;;  %204 = vst [vmem:[#allocation2 + $0x108] sm:$0xff] %v4256_v0 }
  0x1f   : > { %205 = vst [vmem:[#allocation2 + $0x110] sm:$0xff] %v4256_v0  ;;  %206 = vst [vmem:[#allocation2 + $0x118] sm:$0xff] %v4256_v0 }
  0x20   : > { %207 = vst [vmem:[#allocation2 + $0x120] sm:$0xff] %v4256_v0  ;;  %208 = vst [vmem:[#allocation2 + $0x128] sm:$0xff] %v4256_v0 }
  0x21   : > { %209 = vst [vmem:[#allocation2 + $0x130] sm:$0xff] %v4256_v0  ;;  %210 = vst [vmem:[#allocation2 + $0x138] sm:$0xff] %v4256_v0 }
  0x22   : > { %211 = vst [vmem:[#allocation2 + $0x140] sm:$0xff] %v4256_v0  ;;  %212 = vst [vmem:[#allocation2 + $0x148] sm:$0xff] %v4256_v0 }
  0x23   : > { %213 = vst [vmem:[#allocation2 + $0x150] sm:$0xff] %v4256_v0  ;;  %214 = vst [vmem:[#allocation2 + $0x158] sm:$0xff] %v4256_v0 }
  0x24   : > { %215 = vst [vmem:[#allocation2 + $0x160] sm:$0xff] %v4256_v0  ;;  %216 = vst [vmem:[#allocation2 + $0x168] sm:$0xff] %v4256_v0 }
  0x25   : > { %217 = vst [vmem:[#allocation2 + $0x170] sm:$0xff] %v4256_v0  ;;  %218 = vst [vmem:[#allocation2 + $0x178] sm:$0xff] %v4256_v0 }
  0x26   : > { %219 = vst [vmem:[#allocation2 + $0x180] sm:$0xff] %v4256_v0  ;;  %220 = vst [vmem:[#allocation2 + $0x188] sm:$0xff] %v4256_v0 }
  0x27   : > { %221 = vst [vmem:[#allocation2 + $0x190] sm:$0xff] %v4256_v0  ;;  %222 = vst [vmem:[#allocation2 + $0x198] sm:$0xff] %v4256_v0 }
  0x28   : > { %223 = vst [vmem:[#allocation2 + $0x1a0] sm:$0xff] %v4256_v0  ;;  %224 = vst [vmem:[#allocation2 + $0x1a8] sm:$0xff] %v4256_v0 }
  0x29   : > { %225 = vst [vmem:[#allocation2 + $0x1b0] sm:$0xff] %v4256_v0  ;;  %226 = vst [vmem:[#allocation2 + $0x1b8] sm:$0xff] %v4256_v0 }
  0x2a   : > { %227 = vst [vmem:[#allocation2 + $0x1c0] sm:$0xff] %v4256_v0  ;;  %228 = vst [vmem:[#allocation2 + $0x1c8] sm:$0xff] %v4256_v0 }
  0x2b   : > { %229 = vst [vmem:[#allocation2 + $0x1d0] sm:$0xff] %v4256_v0  ;;  %230 = vst [vmem:[#allocation2 + $0x1d8] sm:$0xff] %v4256_v0 }
  0x2c   : > { %231 = vst [vmem:[#allocation2 + $0x1e0] sm:$0xff] %v4256_v0  ;;  %232 = vst [vmem:[#allocation2 + $0x1e8] sm:$0xff] %v4256_v0 }
  0x2d   : > { %233 = vst [vmem:[#allocation2 + $0x1f0] sm:$0xff] %v4256_v0  ;;  %234 = vst [vmem:[#allocation2 + $0x1f8] sm:$0xff] %v4256_v0 }
  0x2e   : > { %235 = vst [vmem:[#allocation2 + $0x200] sm:$0xff] %v4256_v0  ;;  %236 = vst [vmem:[#allocation2 + $0x208] sm:$0xff] %v4256_v0 }
  0x2f   : > { %237 = vst [vmem:[#allocation2 + $0x210] sm:$0xff] %v4256_v0  ;;  %238 = vst [vmem:[#allocation2 + $0x218] sm:$0xff] %v4256_v0 }
  0x30   : > { %239 = vst [vmem:[#allocation2 + $0x220] sm:$0xff] %v4256_v0  ;;  %240 = vst [vmem:[#allocation2 + $0x228] sm:$0xff] %v4256_v0 }
  0x31   : > { %241 = vst [vmem:[#allocation2 + $0x230] sm:$0xff] %v4256_v0  ;;  %242 = vst [vmem:[#allocation2 + $0x238] sm:$0xff] %v4256_v0 }
  0x32   : > { %275 = vst.msk [vmem:[#allocation2 + $0x38] sm:$0xff] %vm253_vm0, %v3589_v1  ;;  %276 = vst.msk [vmem:[#allocation2 + $0x68] sm:$0xff] %vm253_vm0, %v3590_v2  ;;  %v248_v2 = vld [vmem:[%s4376_s18 + $0x28] sm:$0xff] }
  0x33   : > { %254 = vst.msk [vmem:[#allocation2 + $0x30] sm:$0xff] %vm253_vm0, %v243_v3  ;;  %255 = vst.msk [vmem:[#allocation2 + $0x60] sm:$0xff] %vm253_vm0, %v244_v4  ;;  %v249_v3 = vld [vmem:[%s4376_s18 + $0x30] sm:$0xff]  ;;  %v3594_v4 = vld [vmem:[%s4376_s18 + $0x78] sm:$0xff] }
  0x34   : > { %277 = vst.msk [vmem:[#allocation2 + $0x98] sm:$0xff] %vm253_vm0, %v3591_v5  ;;  %256 = vst.msk [vmem:[#allocation2 + $0x90] sm:$0xff] %vm253_vm0, %v245_v6 }
  0x35   : > { %296 = vst.msk [vmem:[#allocation2 + $0x40] sm:$0xff] %vm253_vm0, %v3599_v7  ;;  %297 = vst.msk [vmem:[#allocation2 + $0x70] sm:$0xff] %vm253_vm0, %v3600_v8  ;;  %v3595_v8 = vld [vmem:[%s4376_s18 + $0x80] sm:$0xff] }
  0x36   : > { %298 = vst.msk [vmem:[#allocation2 + $0xa0] sm:$0xff] %vm253_vm0, %v3601_v9  ;;  %359 = vst.msk [vmem:[#allocation2 + $0x58] sm:$0xff] %vm253_vm0, %v3629_v10  ;;  %v3604_v9 = vld [vmem:[%s4376_s18 + $0xc8] sm:$0xff]  ;;  %v3605_v10 = vld [vmem:[%s4376_s18 + $0xd0] sm:$0xff] }
  0x37   : > { %360 = vst.msk [vmem:[#allocation2 + $0x88] sm:$0xff] %vm253_vm0, %v3630_v11  ;;  %361 = vst.msk [vmem:[#allocation2 + $0xb8] sm:$0xff] %vm253_vm0, %v3631_v12 }
  0x38   : > { %257 = vst.msk [vmem:[#allocation2 + $0xc0] sm:$0xff] %vm253_vm0, %v246_v13  ;;  %258 = vst.msk [vmem:[#allocation2 + $0xf0] sm:$0xff] %vm253_vm0, %v247_v14  ;;  %v3634_v14 = vld [vmem:[%s4376_s18 + $0x1b8] sm:$0xff] }
  0x39   : > { %278 = vst.msk [vmem:[#allocation2 + $0xc8] sm:$0xff] %vm253_vm0, %v3592_v16  ;;  %279 = vst.msk [vmem:[#allocation2 + $0xf8] sm:$0xff] %vm253_vm0, %v3593_v17  ;;  %v376_v22 = vld [vmem:[#allocation2 + $0x38] sm:$0xff]  ;;  %v382_v23 = vld [vmem:[#allocation2 + $0x68] sm:$0xff] }
  0x3a   : > { %299 = vst.msk [vmem:[#allocation2 + $0xd0] sm:$0xff] %vm253_vm0, %v3602_v18  ;;  %v442_v24 = vld [vmem:[#allocation2 + $0x38] sm:$0xfe]  ;;  %300 = vst.msk [vmem:[#allocation2 + $0x100] sm:$0xff] %vm253_vm0, %v3603_v19  ;;  %v582_v26 = vrot.slane %v382_v23, 2  ;;  %v833_v27 = vmul.f32 2.0, %v376_v22 }
  0x3b   : > { %362 = vst.msk [vmem:[#allocation2 + $0xe8] sm:$0xff] %vm253_vm0, %v3632_v20  ;;  %363 = vst.msk [vmem:[#allocation2 + $0x118] sm:$0xff] %vm253_vm0, %v3633_v21  ;;  %v575_v25 = vrot.slane %v442_v24, 2  ;;  %v839_v28 = vmul.f32 2.0, %v382_v23  ;;  %v375_v29 = vld [vmem:[#allocation2 + $0x30] sm:$0xff]  ;;  %v4418_v30 = vld [vmem:[#allocation2 + $0x60] sm:$0xff] }
  0x3c   : > { %v441_v31 = vld [vmem:[#allocation2 + $0x30] sm:$0xfe]  ;;  %v580_v32 = vrot.slane %v4418_v30, 2  ;;  %v832_v33 = vmul.f32 2.0, %v375_v29  ;;  %v4422_v34 = vmul.f32 2.0, %v4418_v30  ;;  %v4424_v35 = vld [vmem:[#allocation2 + $0x98] sm:$0xff] }
  0x3d   : > { %v583_v36 = vsel %vm573_vm1, %v575_v25, %v582_v26  ;;  %v767_v37 = vadd.f32 %v575_v25, %v370_v15  ;;  %v954_v38 = vrot.slane %v833_v27, 1  ;;  %v961_v39 = vrot.slane %v839_v28, 1  ;;  %v4441_v53 = vld [vmem:[#allocation2 + $0x90] sm:$0xff]  ;;  %v4452_v61 = vld [vmem:[#allocation2 + $0x40] sm:$0xfe]  ;;  %259 = vst.msk [vmem:[#allocation2 + $0x120] sm:$0xff] %vm253_vm0, %v248_v2 }
  0x3e   : > { %v773_v41 = vadd.f32 %v583_v36, %v376_v22  ;;  %v574_v42 = vrot.slane %v441_v31, 2  ;;  %v953_v43 = vrot.slane %v832_v33, 1  ;;  %v959_v44 = vrot.slane %v4422_v34, 1  ;;  %v4450_v60 = vld [vmem:[#allocation2 + $0x70] sm:$0xff]  ;;  %v4458_v1 = vld [vmem:[#allocation2 + $0xa0] sm:$0xff]  ;;  %260 = vst.msk [vmem:[#allocation2 + $0x150] sm:$0xff] %vm253_vm0, %v249_v3 }
  0x3f   : > { %v962_v45 = vsel %vm952_vm2, %v954_v38, %v961_v39  ;;  %v4429_v46 = vadd.f32 %v954_v38, %v767_v37  ;;  %v594_v47 = vrot.slane %v4424_v35, 2  ;;  %v4433_v48 = vmul.f32 2.0, %v4424_v35  ;;  %v4469_v7 = vld [vmem:[#allocation2 + $0x40] sm:$0xff]  ;;  %280 = vst.msk [vmem:[#allocation2 + $0x128] sm:$0xff] %vm253_vm0, %v3594_v4  ;;  %281 = vst.msk [vmem:[#allocation2 + $0x158] sm:$0xff] %vm253_vm0, %v3595_v8  ;;  %v250_v16 = vld [vmem:[%s4376_s18 + $0x38] sm:$0xff] }
  0x40   : > { %v4435_v49 = vadd.f32 %v962_v45, %v773_v41  ;;  %v581_v50 = vsel %vm573_vm1, %v574_v42, %v580_v32  ;;  %v766_v51 = vadd.f32 %v574_v42, %v369_v40  ;;  %v960_v52 = vsel %vm952_vm2, %v953_v43, %v959_v44  ;;  %301 = vst.msk [vmem:[#allocation2 + $0x130] sm:$0xff] %vm253_vm0, %v3604_v9  ;;  %v3635_v15 = vld [vmem:[%s4376_s18 + $0x1c0] sm:$0xff]  ;;  %v3596_v20 = vld [vmem:[%s4376_s18 + $0x88] sm:$0xff]  ;;  %v3597_v21 = vld [vmem:[%s4376_s18 + $0x90] sm:$0xff] }
  0x41   : > { %v1269_v54 = vrot.slane %v4429_v46, 7  ;;  %v772_v55 = vadd.f32 %v581_v50, %v375_v29  ;;  %v595_v56 = vsel %vm573_vm1, %v582_v26, %v594_v47  ;;  %v973_v63 = vrot.slane %v4433_v48, 1  ;;  %302 = vst.msk [vmem:[#allocation2 + $0x160] sm:$0xff] %vm253_vm0, %v3605_v10  ;;  %364 = vst.msk [vmem:[#allocation2 + $0x148] sm:$0xff] %vm253_vm0, %v3634_v14  ;;  %v251_v19 = vld [vmem:[%s4376_s18 + $0x40] sm:$0xff]  ;;  %v3606_v27 = vld [vmem:[%s4376_s18 + $0xd8] sm:$0xff] }
  0x42   : > { %v1270_v57 = vrot.slane %v4435_v49, 7  ;;  %v4448_v58 = vadd.f32 %v953_v43, %v766_v51  ;;  %v779_v59 = vadd.f32 %v595_v56, %v382_v23  ;;  %v592_v0 = vrot.slane %v4441_v53, 2  ;;  %365 = vst.msk [vmem:[#allocation2 + $0x178] sm:$0xff] %vm253_vm0, %v3635_v15  ;;  %261 = vst.msk [vmem:[#allocation2 + $0x180] sm:$0xff] %vm253_vm0, %v250_v16  ;;  %v371_v26 = vld [vmem:[#allocation2 + $0x10] sm:$0x80] }
  0x43   : > { %v4454_v62 = vadd.f32 %v960_v52, %v772_v55  ;;  %v974_v12 = vsel %vm952_vm2, %v961_v39, %v973_v63  ;;  %v4495_v18 = vmul.f32 2.0, %v4441_v53  ;;  %v576_v24 = vrot.slane %v4452_v61, 2  ;;  %262 = vst.msk [vmem:[#allocation2 + $0x1b0] sm:$0xff] %vm253_vm0, %v251_v19  ;;  %282 = vst.msk [vmem:[#allocation2 + $0x188] sm:$0xff] %vm253_vm0, %v3596_v20  ;;  %v3607_v28 = vld [vmem:[%s4376_s18 + $0xe0] sm:$0xff]  ;;  %v3636_v29 = vld [vmem:[%s4376_s18 + $0x1c8] sm:$0xff] }
  0x44   : > { %v4466_v5 = vsel %vm1265_vm3, %v1269_v54, %v1270_v57  ;;  %v1266_v6 = vrot.slane %v4448_v58, 7  ;;  %v593_v13 = vsel %vm573_vm1, %v580_v32, %v592_v0  ;;  %v4492_v17 = vadd.f32 %v974_v12, %v779_v59  ;;  %283 = vst.msk [vmem:[#allocation2 + $0x1b8] sm:$0xff] %vm253_vm0, %v3597_v21  ;;  %303 = vst.msk [vmem:[#allocation2 + $0x190] sm:$0xff] %vm253_vm0, %v3606_v27  ;;  %v3637_v33 = vld [vmem:[%s4376_s18 + $0x1d0] sm:$0xff]  ;;  %v252_v36 = vld [vmem:[%s4376_s18 + $0x48] sm:$0xff] }
  0x45   : > { %1472 = vrot.lane.b32.xlu1 %v4466_v5, %s4257_s19  ;;  %v1267_v11 = vrot.slane %v4454_v62, 7  ;;  %v778_v23 = vadd.f32 %v593_v13, %v4418_v30  ;;  %v584_v25 = vrot.slane %v4450_v60, 2  ;;  %v971_v31 = vrot.slane %v4495_v18, 1  ;;  %304 = vst.msk [vmem:[#allocation2 + $0x1c0] sm:$0xff] %vm253_vm0, %v3607_v28  ;;  %366 = vst.msk [vmem:[#allocation2 + $0x1a8] sm:$0xff] %vm253_vm0, %v3636_v29  ;;  %v3598_v42 = vld [vmem:[%s4376_s18 + $0x98] sm:$0xff] }
  0x46   : > { %v1286_v30 = vrot.slane %v4492_v17, 7  ;;  %v596_v32 = vrot.slane %v4458_v1, 2  ;;  %v834_v38 = vmul.f32 2.0, %v4469_v7  ;;  %v840_v39 = vmul.f32 2.0, %v4450_v60  ;;  %v446_v41 = vld [vmem:[#allocation2 + $0x58] sm:$0xfe] }
  0x47   : > { %v4506_v22 = vsel %vm1265_vm3, %v1266_v6, %v1267_v11  ;;  %v585_v37 = vsel %vm573_vm1, %v576_v24, %v584_v25  ;;  %v4531_v40 = vmul.f32 2.0, %v4458_v1  ;;  %367 = vst.msk [vmem:[#allocation2 + $0x1d8] sm:$0xff] %vm253_vm0, %v3637_v33  ;;  %263 = vst.msk [vmem:[#allocation2 + $0x1e0] sm:$0xff] %vm253_vm0, %v252_v36  ;;  %v972_v45 = vsel %vm952_vm2, %v959_v44, %v971_v31  ;;  %v386_v51 = vld [vmem:[#allocation2 + $0x88] sm:$0xff]  ;;  %v4549_v52 = vld [vmem:[#allocation2 + $0xb8] sm:$0xff] }
  0x48   : > { %1452 = vrot.lane.b32.xlu0 %v4506_v22, %s4257_s19  ;;  %v1287_v43 = vsel %vm1265_vm3, %v1270_v57, %v1286_v30  ;;  %v597_v50 = vsel %vm573_vm1, %v584_v25, %v596_v32  ;;  %284 = vst.msk [vmem:[#allocation2 + $0x1e8] sm:$0xff] %vm253_vm0, %v3598_v42  ;;  %v3608_v54 = vld [vmem:[%s4376_s18 + $0xe8] sm:$0xff]  ;;  %v4554_v55 = vadd.f32 %v972_v45, %v778_v23  ;;  %v955_v57 = vrot.slane %v834_v38, 1  ;;  %v380_v2 = vld [vmem:[#allocation2 + $0x58] sm:$0xff]  ;;  %v393_v23 = vld [vmem:[#allocation2 + $0xc0] sm:$0xff] }
  0x49   : > { %1474 = vrot.lane.b32.xlu1 %v1287_v43, %s4257_s19  ;;  %v774_v56 = vadd.f32 %v585_v37, %v4469_v7  ;;  %v780_v34 = vadd.f32 %v597_v50, %v4450_v60  ;;  %305 = vst.msk [vmem:[#allocation2 + $0x1f0] sm:$0xff] %vm253_vm0, %v3608_v54  ;;  %v963_v44 = vrot.slane %v840_v39, 1  ;;  %v975_v59 = vrot.slane %v4531_v40, 1  ;;  %v374_v19 = vld [vmem:[#allocation2 + $0x28] sm:$0x80]  ;;  %v3638_v39 = vld [vmem:[%s4376_s18 + $0x1d8] sm:$0xff] }
  0x4a   : > { %v768_v61 = vadd.f32 %v576_v24, %v371_v26  ;;  %v579_v3 = vrot.slane %v446_v41, 2  ;;  %v1284_v4 = vrot.slane %v4554_v55, 7  ;;  %v590_v6 = vrot.slane %v386_v51, 2  ;;  %v4589_v24 = vld [vmem:[#allocation2 + $0xf0] sm:$0xff]  ;;  %v4594_v29 = vld [vmem:[#allocation2 + $0xc8] sm:$0xff]  ;;  %368 = vst.msk [vmem:[#allocation2 + $0x208] sm:$0xff] %vm253_vm0, %v3638_v39 }
  0x4b   : > { %v602_v8 = vrot.slane %v4549_v52, 2  ;;  %v964_v9 = vsel %vm952_vm2, %v955_v57, %v963_v44  ;;  %v976_v60 = vsel %vm952_vm2, %v963_v44, %v975_v59  ;;  %v837_v14 = vmul.f32 2.0, %v380_v2  ;;  %v3609_v50 = vld [vmem:[%s4376_s18 + $0xf0] sm:$0xff]  ;;  %v3614_v39 = vld [vmem:[%s4376_s18 + $0x118] sm:$0xff] }
  0x4c   : > { %v4566_v7 = vadd.f32 %v955_v57, %v768_v61  ;;  %v4573_v10 = vsel %vm1265_vm3, %v1267_v11, %v1284_v4  ;;  %v4576_v12 = vadd.f32 %v964_v9, %v774_v56  ;;  %v4578_v13 = vadd.f32 %v976_v60, %v780_v34  ;;  %v3611_v57 = vld [vmem:[%s4376_s18 + $0x100] sm:$0xff]  ;;  %317 = vst.msk [vmem:[#allocation2 + $0x48] sm:$0xff] %vm253_vm0, %v3609_v50  ;;  %v3620_v9 = vld [vmem:[%s4376_s18 + $0x148] sm:$0xff]  ;;  %v3621_v60 = vld [vmem:[%s4376_s18 + $0x150] sm:$0xff] }
  0x4d   : > { %1657 = vrot.lane.b32.xlu1 %v1287_v43, %s4258_s20  ;;  %1454 = vrot.lane.b32.xlu0 %v4573_v10, %s4257_s19  ;;  %v591_v16 = vsel %vm573_vm1, %v579_v3, %v590_v6  ;;  %v603_v11 = vsel %vm573_vm1, %v590_v6, %v602_v8  ;;  %v843_v27 = vmul.f32 2.0, %v386_v51  ;;  %v4592_v28 = vmul.f32 2.0, %v4549_v52  ;;  %319 = vst.msk [vmem:[#allocation2 + $0xa8] sm:$0xff] %vm253_vm0, %v3611_v57  ;;  %v3619_v6 = vld [vmem:[%s4376_s18 + $0x140] sm:$0xff] }
  0x4e   : > { %v1272_v15 = vrot.slane %v4566_v7, 7  ;;  %v1273_v20 = vrot.slane %v4576_v12, 7  ;;  %v1288_v21 = vrot.slane %v4578_v13, 7  ;;  %v777_v25 = vadd.f32 %v591_v16, %v380_v2  ;;  %338 = vst.msk [vmem:[#allocation2 + $0x50] sm:$0xff] %vm253_vm0, %v3619_v6  ;;  %339 = vst.msk [vmem:[#allocation2 + $0x80] sm:$0xff] %vm253_vm0, %v3620_v9  ;;  %v4698_v6 = vld [vmem:[#allocation2 + $0x100] sm:$0xff] }
  0x4f   : > { %v783_v26 = vadd.f32 %v603_v11, %v386_v51  ;;  %v958_v37 = vrot.slane %v837_v14, 1  ;;  %v771_v38 = vadd.f32 %v579_v3, %v374_v19  ;;  %v969_v41 = vrot.slane %v843_v27, 1  ;;  %v3610_v51 = vld [vmem:[%s4376_s18 + $0xf8] sm:$0xff]  ;;  %340 = vst.msk [vmem:[#allocation2 + $0xb0] sm:$0xff] %vm253_vm0, %v3621_v60  ;;  %v3613_v19 = vld [vmem:[%s4376_s18 + $0x110] sm:$0xff]  ;;  %322 = vst.msk [vmem:[#allocation2 + $0x138] sm:$0xff] %vm253_vm0, %v3614_v39 }
  0x50   : > { %v4599_v33 = vsel %vm1265_vm3, %v1273_v20, %v1288_v21  ;;  %v4602_v36 = vsel %vm1265_vm3, %v1272_v15, %v1273_v20  ;;  %v981_v42 = vrot.slane %v4592_v28, 1  ;;  %v604_v43 = vrot.slane %v393_v23, 2  ;;  %318 = vst.msk [vmem:[#allocation2 + $0x78] sm:$0xff] %vm253_vm0, %v3610_v51  ;;  %v4642_v11 = vld [vmem:[#allocation2 + $0xf8] sm:$0xff]  ;;  %321 = vst.msk [vmem:[#allocation2 + $0x108] sm:$0xff] %vm253_vm0, %v3613_v19 }
  0x51   : > { %1655 = vrot.lane.b32.xlu0 %v4466_v5, %s4258_s20  ;;  %1677 = vrot.lane.b32.xlu1 %v4599_v33, %s4258_s20  ;;  %v616_v45 = vrot.slane %v4589_v24, 2  ;;  %v4614_v54 = vadd.f32 %v958_v37, %v771_v38  ;;  %v850_v56 = vmul.f32 2.0, %v393_v23  ;;  %v4617_v5 = vmul.f32 2.0, %v4589_v24  ;;  %v3623_v38 = vld [vmem:[%s4376_s18 + $0x160] sm:$0xff] }
  0x52   : > { %v606_v34 = vrot.slane %v4594_v29, 2  ;;  %v970_v44 = vsel %vm952_vm2, %v958_v37, %v969_v41  ;;  %v982_v61 = vsel %vm952_vm2, %v969_v41, %v981_v42  ;;  %v605_v2 = vsel %vm573_vm1, %v592_v0, %v604_v43  ;;  %v3612_v0 = vld [vmem:[%s4376_s18 + $0x108] sm:$0xff]  ;;  %v3622_v37 = vld [vmem:[%s4376_s18 + $0x158] sm:$0xff]  ;;  %342 = vst.msk [vmem:[#allocation2 + $0x110] sm:$0xff] %vm253_vm0, %v3623_v38 }
  0x53   : > { %v617_v3 = vsel %vm573_vm1, %v604_v43, %v616_v45  ;;  %v4637_v14 = vadd.f32 %v970_v44, %v777_v25  ;;  %v4639_v15 = vadd.f32 %v982_v61, %v783_v26  ;;  %v1281_v16 = vrot.slane %v4614_v54, 7  ;;  %320 = vst.msk [vmem:[#allocation2 + $0xd8] sm:$0xff] %vm253_vm0, %v3612_v0  ;;  %341 = vst.msk [vmem:[#allocation2 + $0xe0] sm:$0xff] %vm253_vm0, %v3622_v37  ;;  %v395_v61 = vld [vmem:[#allocation2 + $0xd0] sm:$0xff] }
  0x54   : > { %v784_v20 = vadd.f32 %v605_v2, %v4441_v53  ;;  %v790_v25 = vadd.f32 %v617_v3, %v393_v23  ;;  %v983_v26 = vrot.slane %v850_v56, 1  ;;  %v995_v27 = vrot.slane %v4617_v5, 1  ;;  %v3615_v53 = vld [vmem:[%s4376_s18 + $0x120] sm:$0xff] }
  0x55   : > { %1675 = vrot.lane.b32.xlu0 %v4602_v36, %s4258_s20  ;;  %v1282_v41 = vrot.slane %v4637_v14, 7  ;;  %v1294_v43 = vrot.slane %v4639_v15, 7  ;;  %v607_v51 = vsel %vm573_vm1, %v594_v47, %v606_v34  ;;  %v618_v56 = vrot.slane %v4642_v11, 2  ;;  %323 = vst.msk [vmem:[#allocation2 + $0x168] sm:$0xff] %vm253_vm0, %v3615_v53 }
  0x56   : > { %v984_v23 = vsel %vm952_vm2, %v971_v31, %v983_v26  ;;  %v996_v50 = vsel %vm952_vm2, %v983_v26, %v995_v27  ;;  %v851_v2 = vmul.f32 2.0, %v4594_v29  ;;  %v4696_v3 = vmul.f32 2.0, %v4642_v11 }
  0x57   : > { %v4678_v57 = vsel %vm1265_vm3, %v1282_v41, %v1294_v43  ;;  %v4681_v18 = vsel %vm1265_vm3, %v1281_v16, %v1282_v41  ;;  %v4683_v31 = vadd.f32 %v984_v23, %v784_v20  ;;  %v4685_v44 = vadd.f32 %v996_v50, %v790_v25  ;;  %v3624_v23 = vld [vmem:[%s4376_s18 + $0x168] sm:$0xff]  ;;  %v3625_v50 = vld [vmem:[%s4376_s18 + $0x170] sm:$0xff] }
  0x58   : > { %7755 = vst [vmem:[#allocation3_spill] sm:$0xff] %v4678_v57  ;;  %7756 = vst [vmem:[#allocation4_spill] sm:$0xff] %v4681_v18  ;;  %1554 = vrot.lane.b32.xlu1 %v4678_v57, %s4257_s19  ;;  %v619_v47 = vsel %vm573_vm1, %v606_v34, %v618_v56  ;;  %v785_v16 = vadd.f32 %v607_v51, %v4424_v35  ;;  %v985_v19 = vrot.slane %v851_v2, 1  ;;  %v997_v20 = vrot.slane %v4696_v3, 1 }
  0x59   : > { %1552 = vrot.lane.b32.xlu0 %v4681_v18, %s4257_s19  ;;  %v1296_v9 = vrot.slane %v4683_v31, 7  ;;  %v1308_v60 = vrot.slane %v4685_v44, 7  ;;  %v791_v0 = vadd.f32 %v619_v47, %v4594_v29  ;;  %v608_v25 = vrot.slane %v395_v61, 2  ;;  %v398_v29 = vld [vmem:[#allocation2 + $0xe8] sm:$0xff]  ;;  %343 = vst.msk [vmem:[#allocation2 + $0x140] sm:$0xff] %vm253_vm0, %v3624_v23  ;;  %344 = vst.msk [vmem:[#allocation2 + $0x170] sm:$0xff] %vm253_vm0, %v3625_v50 }
  0x5a   : > { %v620_v35 = vrot.slane %v4698_v6, 2  ;;  %v852_v37 = vmul.f32 2.0, %v395_v61  ;;  %v986_v38 = vsel %vm952_vm2, %v973_v63, %v985_v19  ;;  %v4730_v41 = vmul.f32 2.0, %v4698_v6  ;;  %v3617_v23 = vld [vmem:[%s4376_s18 + $0x130] sm:$0xff] }
  0x5b   : > { %v4708_v34 = vsel %vm1265_vm3, %v1296_v9, %v1308_v60  ;;  %v4713_v26 = vsel %vm1265_vm3, %v1284_v4, %v1296_v9  ;;  %v998_v4 = vsel %vm952_vm2, %v985_v19, %v997_v20  ;;  %v609_v39 = vsel %vm573_vm1, %v596_v32, %v608_v25  ;;  %v405_v19 = vld [vmem:[#allocation2 + $0x120] sm:$0xff]  ;;  %325 = vst.msk [vmem:[#allocation2 + $0x1c8] sm:$0xff] %vm253_vm0, %v3617_v23 }
  0x5c   : > { %1637 = vrot.lane.b32.xlu1 %v4573_v10, %s4258_s20  ;;  %v4732_v53 = vadd.f32 %v986_v38, %v785_v16  ;;  %v4734_v10 = vadd.f32 %v998_v4, %v791_v0  ;;  %v621_v48 = vsel %vm573_vm1, %v608_v25, %v620_v35  ;;  %v786_v63 = vadd.f32 %v609_v39, %v4458_v1  ;;  %v4776_v39 = vld [vmem:[#allocation2 + $0x150] sm:$0xff] }
  0x5d   : > { %1635 = vrot.lane.b32.xlu0 %v4506_v22, %s4258_s20  ;;  %v4740_v22 = vld [vmem:[#allocation2 + $0x118] sm:$0xff]  ;;  %v792_v51 = vadd.f32 %v621_v48, %v395_v61  ;;  %v987_v47 = vrot.slane %v852_v37, 1  ;;  %v999_v32 = vrot.slane %v4730_v41, 1  ;;  %v614_v2 = vrot.slane %v398_v29, 2  ;;  %v3616_v48 = vld [vmem:[%s4376_s18 + $0x128] sm:$0xff] }
  0x5e   : > { %v1298_v9 = vrot.slane %v4732_v53, 7  ;;  %v7653_v16 = vrot.slane %v4734_v10, 7  ;;  %v7660_v0 = vrot.slane %v4740_v22, 2  ;;  %v855_v50 = vmul.f32 2.0, %v398_v29  ;;  %324 = vst.msk [vmem:[#allocation2 + $0x198] sm:$0xff] %vm253_vm0, %v3616_v48 }
  0x5f   : > { %v988_v1 = vsel %vm952_vm2, %v975_v59, %v987_v47  ;;  %v1000_v61 = vsel %vm952_vm2, %v987_v47, %v999_v32  ;;  %v615_v40 = vsel %vm573_vm1, %v602_v8, %v614_v2  ;;  %v4781_v47 = vmul.f32 2.0, %v4740_v22 }
  0x60   : > { %1458 = vrot.lane.b32.xlu1 %v4708_v34, %s4257_s19  ;;  %v1311_v25 = vsel %vm1265_vm3, %v1298_v9, %v7653_v16  ;;  %v1299_v37 = vsel %vm1265_vm3, %v1286_v30, %v1298_v9  ;;  %v4769_v59 = vadd.f32 %v988_v1, %v786_v63  ;;  %v4771_v38 = vadd.f32 %v1000_v61, %v792_v51 }
  0x61   : > { %1456 = vrot.lane.b32.xlu0 %v4713_v26, %s4257_s19  ;;  %v627_v4 = vsel %vm573_vm1, %v614_v2, %v7660_v0  ;;  %v628_v30 = vrot.slane %v405_v19, 2  ;;  %v789_v51 = vadd.f32 %v615_v40, %v4549_v52  ;;  %v993_v9 = vrot.slane %v855_v50, 1  ;;  %v406_v40 = vld [vmem:[#allocation2 + $0x128] sm:$0xff] }
  0x62   : > { %v1300_v8 = vrot.slane %v4769_v59, 7  ;;  %v7654_v63 = vrot.slane %v4771_v38, 7  ;;  %v795_v2 = vadd.f32 %v627_v4, %v398_v29  ;;  %v7656_v1 = vrot.slane %v4781_v47, 1  ;;  %v4806_v4 = vld [vmem:[#allocation2 + $0x158] sm:$0xff] }
  0x63   : > { %v629_v61 = vsel %vm573_vm1, %v616_v45, %v628_v30  ;;  %v7655_v48 = vrot.slane %v4776_v39, 2  ;;  %v862_v29 = vmul.f32 2.0, %v405_v19  ;;  %v994_v45 = vsel %vm952_vm2, %v981_v42, %v993_v9 }
  0x64   : > { %1478 = vrot.lane.b32.xlu1 %v1311_v25, %s4257_s19  ;;  %v4798_v23 = vsel %vm1265_vm3, %v1300_v8, %v7654_v63  ;;  %v4803_v16 = vsel %vm1265_vm3, %v1288_v21, %v1300_v8  ;;  %v796_v52 = vadd.f32 %v629_v61, %v4589_v24  ;;  %v1006_v50 = vsel %vm952_vm2, %v993_v9, %v7656_v1 }
  0x65   : > { %1476 = vrot.lane.b32.xlu0 %v1299_v37, %s4257_s19  ;;  %7757 = vst [vmem:[#allocation5_spill] sm:$0xff] %v4798_v23  ;;  %7758 = vst [vmem:[#allocation6_spill] sm:$0xff] %v4803_v16  ;;  %v641_v63 = vsel %vm573_vm1, %v628_v30, %v7655_v48  ;;  %v4818_v21 = vmul.f32 2.0, %v4776_v39  ;;  %v4822_v24 = vadd.f32 %v994_v45, %v789_v51  ;;  %v1007_v8 = vrot.slane %v862_v29, 1  ;;  %v3626_v29 = vld [vmem:[%s4376_s18 + $0x178] sm:$0xff]  ;;  %v3627_v45 = vld [vmem:[%s4376_s18 + $0x180] sm:$0xff] }
  0x66   : > { %v4824_v28 = vadd.f32 %v1006_v50, %v795_v2  ;;  %v802_v42 = vadd.f32 %v641_v63, %v405_v19  ;;  %v630_v61 = vrot.slane %v406_v40, 2  ;;  %v7659_v30 = vrot.slane %v4806_v4, 2  ;;  %v407_v2 = vld [vmem:[#allocation2 + $0x130] sm:$0xff]  ;;  %345 = vst.msk [vmem:[#allocation2 + $0x1a0] sm:$0xff] %vm253_vm0, %v3626_v29  ;;  %346 = vst.msk [vmem:[#allocation2 + $0x1d0] sm:$0xff] %vm253_vm0, %v3627_v45 }
  0x67   : > { %v7658_v9 = vrot.slane %v4818_v21, 1  ;;  %v863_v48 = vmul.f32 2.0, %v406_v40  ;;  %v1306_v1 = vrot.slane %v4822_v24, 7  ;;  %v4861_v50 = vmul.f32 2.0, %v4806_v4 }
  0x68   : > { %1661 = vrot.lane.b32.xlu1 %v1311_v25, %s4258_s20  ;;  %v7657_v25 = vrot.slane %v4824_v28, 7  ;;  %v631_v19 = vsel %vm573_vm1, %v618_v56, %v630_v61  ;;  %v643_v63 = vsel %vm573_vm1, %v630_v61, %v7659_v30 }
  0x69   : > { %1659 = vrot.lane.b32.xlu0 %v1299_v37, %s4258_s20  ;;  %v1008_v37 = vsel %vm952_vm2, %v995_v27, %v1007_v8  ;;  %v1020_v51 = vsel %vm952_vm2, %v1007_v8, %v7658_v9  ;;  %v4856_v27 = vsel %vm1265_vm3, %v1294_v43, %v1306_v1  ;;  %v4863_v8 = vld [vmem:[#allocation2 + $0x160] sm:$0xff]  ;;  %v803_v9 = vadd.f32 %v643_v63, %v406_v40  ;;  %v4894_v63 = vld [vmem:[#allocation2 + $0x178] sm:$0xff] }
  0x6a   : > { %v4851_v5 = vsel %vm1265_vm3, %v1306_v1, %v7657_v25  ;;  %7760 = vst [vmem:[#allocation8_spill] sm:$0xff] %v4856_v27  ;;  %v4858_v56 = vadd.f32 %v1008_v37, %v796_v52  ;;  %v4867_v61 = vadd.f32 %v1020_v51, %v802_v42  ;;  %v797_v25 = vadd.f32 %v631_v19, %v4642_v11  ;;  %v410_v19 = vld [vmem:[#allocation2 + $0x148] sm:$0xff] }
  0x6b   : > { %7759 = vst [vmem:[#allocation7_spill] sm:$0xff] %v4851_v5  ;;  %v1009_v30 = vrot.slane %v863_v48, 1  ;;  %v7663_v1 = vrot.slane %v4861_v50, 1  ;;  %v632_v52 = vrot.slane %v407_v2, 2  ;;  %v7661_v0 = vrot.slane %v4863_v8, 2 }
  0x6c   : > { %1681 = vrot.lane.b32.xlu1 %v4798_v23, %s4258_s20  ;;  %v1320_v43 = vrot.slane %v4858_v56, 7  ;;  %v864_v40 = vmul.f32 2.0, %v407_v2  ;;  %v7662_v42 = vrot.slane %v4867_v61, 7  ;;  %v4908_v45 = vmul.f32 2.0, %v4863_v8 }
  0x6d   : > { %1679 = vrot.lane.b32.xlu0 %v4803_v16, %s4258_s20  ;;  %v1010_v37 = vsel %vm952_vm2, %v997_v20, %v1009_v30  ;;  %v1022_v11 = vsel %vm952_vm2, %v1009_v30, %v7663_v1  ;;  %v633_v20 = vsel %vm573_vm1, %v620_v35, %v632_v52  ;;  %v645_v51 = vsel %vm573_vm1, %v632_v52, %v7661_v0 }
  0x6e   : > { %v4883_v48 = vadd.f32 %v1010_v37, %v797_v25  ;;  %v4886_v3 = vadd.f32 %v1022_v11, %v803_v9  ;;  %v4897_v30 = vmul.f32 2.0, %v4429_v46  ;;  %v4902_v9 = vsel %vm1265_vm3, %v1308_v60, %v1320_v43 }
  0x6f   : > { %v798_v25 = vadd.f32 %v633_v20, %v4698_v6  ;;  %v1011_v52 = vrot.slane %v864_v40, 1  ;;  %v804_v46 = vadd.f32 %v645_v51, %v407_v2  ;;  %v638_v37 = vrot.slane %v410_v19, 2  ;;  %v3618_v6 = vld [vmem:[%s4376_s18 + $0x138] sm:$0xff] }
  0x70   : > { %1558 = vrot.lane.b32.xlu1 %v4851_v5, %s4257_s19  ;;  %v1322_v35 = vrot.slane %v4883_v48, 7  ;;  %v7664_v29 = vrot.slane %v4886_v3, 7  ;;  %v7665_v60 = vrot.slane %v4894_v63, 2  ;;  %v867_v11 = vmul.f32 2.0, %v410_v19  ;;  %326 = vst.msk [vmem:[#allocation2 + $0x1f8] sm:$0xff] %vm253_vm0, %v3618_v6 }
  0x71   : > { %1556 = vrot.lane.b32.xlu0 %v4856_v27, %s4257_s19  ;;  %v4919_v20 = vsel %vm1265_vm3, %v1320_v43, %v7662_v42  ;;  %v1012_v40 = vsel %vm952_vm2, %v999_v32, %v1011_v52  ;;  %v4926_v0 = vmul.f32 2.0, %v4894_v63  ;;  %v7761_v2 = vrot.slane %v4740_v22, 2  ;;  %v417_v42 = vld [vmem:[#allocation2 + $0x180] sm:$0xff]  ;;  %v4937_v32 = vld [vmem:[#allocation2 + $0x1b0] sm:$0xff] }
  0x72   : > { %v651_v43 = vsel %vm573_vm1, %v638_v37, %v7665_v60  ;;  %v1017_v41 = vrot.slane %v867_v11, 1  ;;  %v1335_v1 = vsel %vm1265_vm3, %v1322_v35, %v7664_v29  ;;  %v7762_v6 = vrot.slane %v4734_v10, 7 }
  0x73   : > { %v639_v51 = vsel %vm573_vm1, %v7761_v2, %v638_v37  ;;  %v7669_v2 = vrot.slane %v4926_v0, 1  ;;  %v807_v29 = vadd.f32 %v651_v43, %v410_v19  ;;  %v652_v60 = vrot.slane %v417_v42, 2 }
  0x74   : > { %1641 = vrot.lane.b32.xlu1 %v4708_v34, %s4258_s20  ;;  %v7666_v34 = vrot.slane %v4908_v45, 1  ;;  %v801_v11 = vadd.f32 %v639_v51, %v4740_v22  ;;  %v4965_v5 = vmul.f32 2.0, %v4435_v49  ;;  %v7764_v22 = vrot.slane %v4776_v39, 2  ;;  %v418_v51 = vld [vmem:[#allocation2 + $0x188] sm:$0xff] }
  0x75   : > { %1639 = vrot.lane.b32.xlu0 %v4713_v26, %s4258_s20  ;;  %v4929_v26 = vadd.f32 %v1012_v40, %v798_v25  ;;  %v1323_v25 = vsel %vm1265_vm3, %v7762_v6, %v1322_v35  ;;  %v7763_v6 = vrot.slane %v4781_v47, 1  ;;  %v1030_v27 = vsel %vm952_vm2, %v1017_v41, %v7669_v2  ;;  %v4971_v47 = vld [vmem:[#allocation2 + $0x1b8] sm:$0xff] }
  0x76   : > { %v1024_v40 = vsel %vm952_vm2, %v1011_v52, %v7666_v34  ;;  %v7672_v34 = vrot.slane %v4937_v32, 2  ;;  %v653_v19 = vsel %vm573_vm1, %v7764_v22, %v652_v60  ;;  %v7766_v43 = vrot.slane %v4771_v38, 7 }
  0x77   : > { %v4953_v37 = vadd.f32 %v1024_v40, %v804_v46  ;;  %v1324_v35 = vrot.slane %v4929_v26, 7  ;;  %v1018_v52 = vsel %vm952_vm2, %v7763_v6, %v1017_v41  ;;  %v3628_v40 = vld [vmem:[%s4376_s18 + $0x188] sm:$0xff]  ;;  %v4975_v6 = vmul.f32 2.0, %v4448_v58 }
  0x78   : > { %1462 = vrot.lane.b32.xlu1 %v4919_v20, %s4257_s19  ;;  %v4980_v41 = vadd.f32 %v1018_v52, %v801_v11  ;;  %v665_v22 = vsel %vm573_vm1, %v652_v60, %v7672_v34  ;;  %347 = vst.msk [vmem:[#allocation2 + $0x200] sm:$0xff] %vm253_vm0, %v3628_v40  ;;  %v4991_v58 = vadd.f32 %v1030_v27, %v807_v29  ;;  %v874_v2 = vmul.f32 2.0, %v417_v42 }
  0x79   : > { %1460 = vrot.lane.b32.xlu0 %v4902_v9, %s4257_s19  ;;  %v4989_v46 = vsel %vm1265_vm3, %v7766_v43, %v1324_v35  ;;  %v4994_v18 = vmul.f32 2.0, %v4937_v32  ;;  %v808_v11 = vadd.f32 %v653_v19, %v4776_v39  ;;  %v654_v52 = vrot.slane %v418_v51, 2  ;;  %v419_v43 = vld [vmem:[#allocation2 + $0x190] sm:$0xff] }
  0x7a   : > { %7765 = vst [vmem:[#allocation9_spill] sm:$0xff] %v4980_v41  ;;  %7767 = vst [vmem:[#allocation10_spill] sm:$0xff] %v4989_v46  ;;  %v875_v57 = vmul.f32 2.0, %v418_v51  ;;  %v814_v60 = vadd.f32 %v665_v22, %v417_v42  ;;  %v1031_v34 = vrot.slane %v874_v2, 1  ;;  %v5000_v16 = vmul.f32 2.0, %v4971_v47 }
  0x7b   : > { %7768 = vst [vmem:[#allocation11_spill] sm:$0xff] %v4991_v58  ;;  %v7676_v40 = vrot.slane %v4994_v18, 1  ;;  %v7769_v27 = vrot.slane %v4953_v37, 7  ;;  %v1330_v39 = vrot.slane %v4980_v41, 7  ;;  %v7771_v19 = vrot.slane %v4806_v4, 2  ;;  %v5023_v41 = vld [vmem:[#allocation2 + $0x1c0] sm:$0xff] }
  0x7c   : > { %1482 = vrot.lane.b32.xlu1 %v1335_v1, %s4257_s19  ;;  %v1033_v2 = vrot.slane %v875_v57, 1  ;;  %v7772_v49 = vrot.slane %v4818_v21, 1  ;;  %v5029_v57 = vmul.f32 2.0, %v4492_v17 }
  0x7d   : > { %1480 = vrot.lane.b32.xlu0 %v1323_v25, %s4257_s19  ;;  %v5007_v29 = vsel %vm1265_vm3, %v1324_v35, %v7769_v27  ;;  %v655_v42 = vsel %vm573_vm1, %v7771_v19, %v654_v52  ;;  %v7773_v35 = vrot.slane %v4971_v47, 2  ;;  %v5026_v19 = vmul.f32 2.0, %v4454_v62 }
  0x7e   : > { %7770 = vst [vmem:[#allocation12_spill] sm:$0xff] %v5007_v29  ;;  %v809_v21 = vadd.f32 %v655_v42, %v4806_v4  ;;  %v876_v4 = vmul.f32 2.0, %v419_v43  ;;  %v7777_v42 = vrot.slane %v4824_v28, 7 }
  0x7f   : > { %v667_v27 = vsel %vm573_vm1, %v654_v52, %v7773_v35  ;;  %v656_v35 = vrot.slane %v419_v43, 2 }
  0x80   : > { %1665 = vrot.lane.b32.xlu1 %v1335_v1, %s4258_s20  ;;  %v1032_v1 = vsel %vm952_vm2, %v7772_v49, %v1031_v34  ;;  %v7677_v49 = vrot.slane %v5000_v16, 1  ;;  %v815_v62 = vadd.f32 %v667_v27, %v418_v51  ;;  %v422_v51 = vld [vmem:[#allocation2 + $0x1a8] sm:$0xff]  ;;  %v1035_v27 = vrot.slane %v876_v4, 1 }
  0x81   : > { %1663 = vrot.lane.b32.xlu0 %v1323_v25, %s4258_s20  ;;  %v1044_v25 = vsel %vm952_vm2, %v1031_v34, %v7676_v40  ;;  %v5033_v22 = vadd.f32 %v1032_v1, %v808_v11  ;;  %v7774_v34 = vrot.slane %v4861_v50, 1  ;;  %v5055_v1 = vsel %vm1265_vm3, %v7777_v42, %v1330_v39 }
  0x82   : > { %v5035_v23 = vadd.f32 %v1044_v25, %v814_v60  ;;  %v7775_v60 = vrot.slane %v4991_v58, 7  ;;  %7778 = vst [vmem:[#allocation14_spill] sm:$0xff] %v5055_v1  ;;  %v1046_v25 = vsel %vm952_vm2, %v1033_v2, %v7677_v49  ;;  %v5063_v11 = vmul.f32 2.0, %v4554_v55 }
  0x83   : > { %v1034_v52 = vsel %vm952_vm2, %v7774_v34, %v1033_v2  ;;  %v1344_v17 = vrot.slane %v5033_v22, 7  ;;  %v7779_v42 = vrot.slane %v4863_v8, 2  ;;  %v5075_v49 = vmul.f32 2.0, %v5023_v41 }
  0x84   : > { %1685 = vrot.lane.b32.xlu1 %v5007_v29, %s4258_s20  ;;  %v5050_v50 = vsel %vm1265_vm3, %v1330_v39, %v7775_v60  ;;  %v5065_v40 = vadd.f32 %v1034_v52, %v809_v21  ;;  %v5067_v60 = vld [vmem:[#allocation2 + $0x1d8] sm:$0xff]  ;;  %v5081_v55 = vadd.f32 %v1046_v25, %v815_v62  ;;  %v7780_v21 = vrot.slane %v5023_v41, 2 }
  0x85   : > { %1683 = vrot.lane.b32.xlu0 %v4989_v46, %s4258_s20  ;;  %7776 = vst [vmem:[#allocation13_spill] sm:$0xff] %v5050_v50  ;;  %v657_v2 = vsel %vm573_vm1, %v7779_v42, %v656_v35  ;;  %v662_v34 = vrot.slane %v422_v51, 2  ;;  %v879_v46 = vmul.f32 2.0, %v422_v51  ;;  %v5089_v29 = vmul.f32 2.0, %v5067_v60 }
  0x86   : > { %v669_v52 = vsel %vm573_vm1, %v656_v35, %v7780_v21  ;;  %v5096_v62 = vmul.f32 2.0, %v4578_v13  ;;  %v5099_v35 = vmul.f32 2.0, %v4566_v7  ;;  %v7784_v4 = vrot.slane %v5035_v23, 7  ;;  %v435_v13 = vld [vmem:[#allocation2 + $0x1e0] sm:$0xff] }
  0x87   : > { %v1346_v21 = vrot.slane %v5065_v40, 7  ;;  %v810_v42 = vadd.f32 %v657_v2, %v4863_v8  ;;  %v816_v39 = vadd.f32 %v669_v52, %v419_v43  ;;  %v7787_v8 = vrot.slane %v5075_v49, 1 }
  0x88   : > { %1562 = vrot.lane.b32.xlu1 %v5050_v50, %s4257_s19  ;;  %7782 = vst [vmem:[#allocation16_spill] sm:$0xff] %v5096_v62  ;;  %7783 = vst [vmem:[#allocation17_spill] sm:$0xff] %v5099_v35  ;;  %v5104_v25 = vsel %vm1265_vm3, %v1344_v17, %v7784_v4  ;;  %v7786_v4 = vrot.slane %v4908_v45, 1  ;;  %v5132_v45 = vmul.f32 2.0, %v4637_v14  ;;  %v5144_v35 = vmul.f32 2.0, %v4639_v15 }
  0x89   : > { %1560 = vrot.lane.b32.xlu0 %v5055_v1, %s4257_s19  ;;  %v5093_v1 = vmul.f32 2.0, %v4576_v12  ;;  %v7785_v12 = vrot.slane %v4867_v61, 7  ;;  %v1048_v43 = vsel %vm952_vm2, %v1035_v27, %v7787_v8  ;;  %v5141_v8 = vmul.f32 2.0, %v4734_v10 }
  0x8a   : > { %v1036_v50 = vsel %vm952_vm2, %v7786_v4, %v1035_v27  ;;  %7790 = vst [vmem:[#allocation18_spill] sm:$0xff] %v5132_v45  ;;  %v5135_v4 = vmul.f32 2.0, %v4614_v54  ;;  %v5138_v27 = vmul.f32 2.0, %v4732_v53  ;;  %7792 = vst [vmem:[#allocation20_spill] sm:$0xff] %v5144_v35  ;;  %v5151_v14 = vadd.f32 %v1048_v43, %v816_v39  ;;  %v502_v35 = vld [vmem:[#allocation2 + $0x218] sm:$0x1] }
  0x8b   : > { %7781 = vst [vmem:[#allocation15_spill] sm:$0xff] %v5093_v1  ;;  %v5115_v7 = vsel %vm1265_vm3, %v7785_v12, %v1344_v17  ;;  %v1041_v17 = vrot.slane %v879_v46, 1  ;;  %v7793_v46 = vrot.slane %v4886_v3, 7  ;;  %v7794_v54 = vrot.slane %v5081_v55, 7 }
  0x8c   : > { %1645 = vrot.lane.b32.xlu1 %v4919_v20, %s4258_s20  ;;  %v7788_v20 = vrot.slane %v4894_v63, 2  ;;  %7791 = vst [vmem:[#allocation19_spill] sm:$0xff] %v5135_v4  ;;  %v676_v12 = vrot.slane %v435_v13, 2  ;;  %v7796_v39 = vrot.slane %v5089_v29, 1  ;;  %v886_v4 = vmul.f32 2.0, %v435_v13 }
  0x8d   : > { %1643 = vrot.lane.b32.xlu0 %v4902_v9, %s4258_s20  ;;  %v7789_v9 = vrot.slane %v5067_v60, 2  ;;  %v1359_v53 = vsel %vm1265_vm3, %v1346_v21, %v7794_v54  ;;  %v5168_v45 = vmul.f32 2.0, %v4683_v31  ;;  %v5184_v31 = vmul.f32 2.0, %v4822_v24  ;;  %v429_v54 = vld [vmem:[#allocation2 + $0x1e0] sm:$0x7f] }
  0x8e   : > { %v663_v2 = vsel %vm573_vm1, %v7788_v20, %v662_v34  ;;  %v501_v20 = vld [vmem:[#allocation2 + $0x210] sm:$0x1]  ;;  %v5197_v24 = vmul.f32 2.0, %v4824_v28  ;;  %v7805_v28 = vrot.slane %v4953_v37, 7 }
  0x8f   : > { %v675_v52 = vsel %vm573_vm1, %v662_v34, %v7789_v9  ;;  %v1347_v34 = vsel %vm1265_vm3, %v7793_v46, %v1346_v21  ;;  %v5149_v9 = vadd.f32 %v1036_v50, %v810_v42  ;;  %v813_v15 = vadd.f32 %v663_v2, %v4894_v63  ;;  %7799 = vst [vmem:[#allocation23_spill] sm:$0xff] %v5184_v31 }
  0x90   : > { %1466 = vrot.lane.b32.xlu1 %v5104_v25, %s4257_s19  ;;  %v819_v10 = vadd.f32 %v675_v52, %v422_v51  ;;  %v7795_v46 = vrot.slane %v4926_v0, 1  ;;  %v1054_v42 = vsel %vm952_vm2, %v1041_v17, %v7796_v39  ;;  %v688_v43 = vrot.slane %v501_v20, 2  ;;  %v436_v0 = vld [vmem:[#allocation2 + $0x1e8] sm:$0xff]  ;;  %7803 = vst [vmem:[#allocation26_spill] sm:$0xff] %v5197_v24 }
  0x91   : > { %1464 = vrot.lane.b32.xlu0 %v5115_v7, %s4257_s19  ;;  %v5171_v21 = vmul.f32 2.0, %v4685_v44  ;;  %v5176_v2 = vmul.f32 2.0, %v4769_v59  ;;  %v5179_v52 = vmul.f32 2.0, %v4771_v38  ;;  %v1348_v13 = vrot.slane %v5149_v9, 7 }
  0x92   : > { %v1042_v50 = vsel %vm952_vm2, %v7795_v46, %v1041_v17  ;;  %v5190_v20 = vadd.f32 %v1054_v42, %v819_v10  ;;  %v7802_v59 = vrot.slane %v4937_v32, 2  ;;  %v689_v46 = vsel %vm573_vm1, %v676_v12, %v688_v43 }
  0x93   : > { %7797 = vst [vmem:[#allocation21_spill] sm:$0xff] %v5176_v2  ;;  %7798 = vst [vmem:[#allocation22_spill] sm:$0xff] %v5179_v52  ;;  %v5188_v44 = vadd.f32 %v1042_v50, %v813_v15  ;;  %v1055_v39 = vrot.slane %v886_v4, 1  ;;  %v678_v63 = vrot.slane %v436_v0, 2  ;;  %v690_v51 = vrot.slane %v502_v35, 2  ;;  %v437_v50 = vld [vmem:[#allocation2 + $0x1f0] sm:$0xff] }
  0x94   : > { %1486 = vrot.lane.b32.xlu1 %v1359_v53, %s4257_s19  ;;  %7801 = vst [vmem:[#allocation25_spill] sm:$0xff] %v5190_v20  ;;  %v677_v38 = vsel %vm573_vm1, %v7802_v59, %v676_v12  ;;  %v5200_v17 = vmul.f32 2.0, %v4858_v56  ;;  %v5203_v15 = vmul.f32 2.0, %v4867_v61  ;;  %v887_v10 = vmul.f32 2.0, %v436_v0  ;;  %v503_v61 = vld [vmem:[#allocation2 + $0x220] sm:$0x1] }
  0x95   : > { %1484 = vrot.lane.b32.xlu0 %v1347_v34, %s4257_s19  ;;  %7800 = vst [vmem:[#allocation24_spill] sm:$0xff] %v5188_v44  ;;  %v5206_v42 = vmul.f32 2.0, %v4883_v48  ;;  %v5209_v59 = vmul.f32 2.0, %v4886_v3  ;;  %v7804_v12 = vrot.slane %v5151_v14, 7  ;;  %v5219_v56 = vsel %vm1265_vm3, %v7805_v28, %v1348_v13  ;;  %v440_v4 = vld [vmem:[#allocation2 + $0x208] sm:$0xff] }
  0x96   : > { %v1354_v48 = vrot.slane %v5188_v44, 7  ;;  %v820_v43 = vadd.f32 %v677_v38, %v4937_v32  ;;  %v826_v0 = vadd.f32 %v689_v46, %v429_v54  ;;  %v7806_v24 = vrot.slane %v4994_v18, 1 }
  0x97   : > { %v5214_v35 = vsel %vm1265_vm3, %v1348_v13, %v7804_v12  ;;  %v506_v12 = vld [vmem:[#allocation2 + $0x238] sm:$0x1]  ;;  %v7807_v13 = vrot.slane %v4971_v47, 2  ;;  %v680_v52 = vrot.slane %v437_v50, 2  ;;  %v1057_v2 = vrot.slane %v887_v10, 1 }
  0x98   : > { %1669 = vrot.lane.b32.xlu1 %v1359_v53, %s4258_s20  ;;  %v1056_v31 = vsel %vm952_vm2, %v7806_v24, %v1055_v39  ;;  %v691_v53 = vsel %vm573_vm1, %v678_v63, %v690_v51  ;;  %v692_v44 = vrot.slane %v503_v61, 2  ;;  %v888_v62 = vmul.f32 2.0, %v437_v50 }
  0x99   : > { %1667 = vrot.lane.b32.xlu0 %v1347_v34, %s4258_s20  ;;  %v679_v28 = vsel %vm573_vm1, %v7807_v13, %v678_v63  ;;  %v430_v34 = vld [vmem:[#allocation2 + $0x1e8] sm:$0x7f]  ;;  %v686_v3 = vrot.slane %v440_v4, 2  ;;  %v5234_v32 = vmul.f32 2.0, %v4929_v26  ;;  %v5237_v38 = vmul.f32 2.0, %v4953_v37 }
  0x9a   : > { %v5240_v18 = vmul.f32 2.0, %v5033_v22  ;;  %v698_v54 = vrot.slane %v506_v12, 2  ;;  %v7811_v63 = vrot.slane %v4991_v58, 7  ;;  %v1187_v26 = vadd.f32 %v1056_v31, %v820_v43  ;;  %v431_v58 = vld [vmem:[#allocation2 + $0x1f0] sm:$0x7f] }
  0x9b   : > { %7808 = vst [vmem:[#allocation27_spill] sm:$0xff] %v5234_v32  ;;  %7809 = vst [vmem:[#allocation28_spill] sm:$0xff] %v5237_v38  ;;  %v1193_v46 = vadd.f32 %v1055_v39, %v826_v0  ;;  %v891_v24 = vmul.f32 2.0, %v440_v4  ;;  %v7813_v37 = vrot.slane %v5190_v20, 7  ;;  %v821_v10 = vadd.f32 %v679_v28, %v4971_v47  ;;  %v434_v4 = vld [vmem:[#allocation2 + $0x208] sm:$0x7f] }
  0x9c   : > { %7810 = vst [vmem:[#allocation29_spill] sm:$0xff] %v5240_v18  ;;  %1689 = vrot.lane.b32.xlu1 %v5214_v35, %s4258_s20  ;;  %v5249_v51 = vsel %vm1265_vm3, %v7811_v63, %v1354_v48  ;;  %v827_v50 = vadd.f32 %v691_v53, %v430_v34  ;;  %v7815_v61 = vrot.slane %v5023_v41, 2  ;;  %v7816_v13 = vrot.slane %v5000_v16, 1  ;;  %v384_v53 = vld [vmem:[#allocation2 + $0x78] sm:$0xff]  ;;  %v444_v34 = vld [vmem:[#allocation2 + $0x48] sm:$0xfe] }
  0x9d   : > { %1687 = vrot.lane.b32.xlu0 %v5219_v56, %s4258_s20  ;;  %7812 = vst [vmem:[#allocation30_spill] sm:$0xff] %v5249_v51  ;;  %v5254_v22 = vsel %vm1265_vm3, %v1354_v48, %v7813_v37  ;;  %v693_v31 = vsel %vm573_vm1, %v680_v52, %v692_v44  ;;  %v1059_v39 = vrot.slane %v888_v62, 1  ;;  %v7817_v43 = vrot.slane %v5067_v60, 2 }
  0x9e   : > { %7814 = vst [vmem:[#allocation31_spill] sm:$0xff] %v5254_v22  ;;  %v681_v12 = vsel %vm573_vm1, %v7815_v61, %v680_v52  ;;  %v1058_v63 = vsel %vm952_vm2, %v7816_v13, %v1057_v2  ;;  %v5268_v47 = vmul.f32 2.0, %v5035_v23  ;;  %v5271_v0 = vmul.f32 2.0, %v5065_v40  ;;  %v378_v40 = vld [vmem:[#allocation2 + $0x48] sm:$0xff] }
  0x9f   : > { %v687_v48 = vsel %vm573_vm1, %v7817_v43, %v686_v3  ;;  %v699_v28 = vsel %vm573_vm1, %v686_v3, %v698_v54  ;;  %v1065_v16 = vrot.slane %v891_v24, 1  ;;  %v5275_v37 = vmul.f32 2.0, %v5081_v55  ;;  %v5282_v61 = vld [vmem:[#allocation2 + $0xa8] sm:$0xff] }
  0xa0   : > { %7818 = vst [vmem:[#allocation32_spill] sm:$0xff] %v5268_v47  ;;  %1566 = vrot.lane.b32.xlu1 %v5254_v22, %s4257_s19  ;;  %v1368_v62 = vrot.slane %v1187_v26, 7  ;;  %v1380_v52 = vrot.slane %v1193_v46, 7  ;;  %v822_v44 = vadd.f32 %v681_v12, %v5023_v41  ;;  %v1188_v3 = vadd.f32 %v1058_v63, %v821_v10 }
  0xa1   : > { %1564 = vrot.lane.b32.xlu0 %v5249_v51, %s4257_s19  ;;  %v1194_v54 = vadd.f32 %v1057_v2, %v827_v50  ;;  %v828_v24 = vadd.f32 %v693_v31, %v431_v58  ;;  %v825_v13 = vadd.f32 %v687_v48, %v5067_v60  ;;  %v7819_v43 = vrot.slane %v5075_v49, 1 }
  0xa2   : > { %v831_v22 = vadd.f32 %v699_v28, %v434_v4  ;;  %v577_v32 = vrot.slane %v444_v34, 2  ;;  %v586_v1 = vrot.slane %v384_v53, 2  ;;  %v7820_v51 = vrot.slane %v5089_v29, 1 }
  0xa3   : > { %v1060_v38 = vsel %vm952_vm2, %v7819_v43, %v1059_v39  ;;  %v7686_v41 = vrot.slane %v5282_v61, 2  ;;  %v835_v12 = vmul.f32 2.0, %v378_v40  ;;  %v841_v18 = vmul.f32 2.0, %v384_v53 }
  0xa4   : > { %v1066_v47 = vsel %vm952_vm2, %v7820_v51, %v1065_v16  ;;  %v5293_v2 = vmul.f32 2.0, %v5149_v9  ;;  %1649 = vrot.lane.b32.xlu1 %v5104_v25, %s4258_s20  ;;  %v5300_v58 = vsel %vm1265_vm3, %v1368_v62, %v1380_v52  ;;  %v7822_v29 = vrot.slane %v5035_v23, 7 }
  0xa5   : > { %1647 = vrot.lane.b32.xlu0 %v5115_v7, %s4258_s20  ;;  %v5308_v60 = vmul.f32 2.0, %v5282_v61  ;;  %v1370_v51 = vrot.slane %v1188_v3, 7  ;;  %v1382_v9 = vrot.slane %v1194_v54, 7  ;;  %v1195_v10 = vadd.f32 %v1059_v39, %v828_v24  ;;  %v385_v24 = vld [vmem:[#allocation2 + $0x80] sm:$0xff] }
  0xa6   : > { %7821 = vst [vmem:[#allocation33_spill] sm:$0xff] %v5293_v2  ;;  %v5305_v49 = vsel %vm1265_vm3, %v7822_v29, %v1368_v62  ;;  %v7823_v50 = vrot.slane %v5029_v57, 7  ;;  %v7824_v25 = vrot.slane %v4965_v5, 7  ;;  %v1189_v63 = vadd.f32 %v1060_v38, %v822_v44  ;;  %v379_v44 = vld [vmem:[#allocation2 + $0x50] sm:$0xff]  ;;  %v396_v2 = vld [vmem:[#allocation2 + $0xd8] sm:$0xff] }
  0xa7   : > { %v5317_v31 = vadd.f32 %v1066_v47, %v825_v13  ;;  %v5319_v23 = vadd.f32 %v1065_v16, %v831_v22  ;;  %v7828_v48 = vrot.slane %v4897_v30, 7  ;;  %v587_v39 = vsel %vm573_vm1, %v577_v32, %v586_v1  ;;  %v372_v30 = vld [vmem:[#allocation2 + $0x18] sm:$0x80]  ;;  %v445_v13 = vld [vmem:[#allocation2 + $0x50] sm:$0xfe] }
  0xa8   : > { %v5315_v7 = vsel %vm1265_vm3, %v7824_v25, %v7823_v50  ;;  %v7827_v4 = vmov %v7824_v25  ;;  %v599_v34 = vsel %vm573_vm1, %v586_v1, %v7686_v41  ;;  %v956_v62 = vrot.slane %v835_v12, 1  ;;  %1470 = vrot.lane.b32.xlu1 %v5300_v58, %s4257_s19  ;;  %v5352_v25 = vld [vmem:[#allocation2 + $0xb0] sm:$0xff] }
  0xa9   : > { %7825 = vst [vmem:[#allocation34_spill] sm:$0xff] %v5317_v31  ;;  %7826 = vst [vmem:[#allocation35_spill] sm:$0xff] %v5319_v23  ;;  %v5326_v28 = vsel %vm1265_vm3, %v7828_v48, %v7827_v4  ;;  %v965_v52 = vrot.slane %v841_v18, 1  ;;  %v5333_v38 = vmul.f32 2.0, %v5151_v14  ;;  %v5335_v22 = vmul.f32 2.0, %v1187_v26  ;;  %1468 = vrot.lane.b32.xlu0 %v5305_v49, %s4257_s19 }
  0xaa   : > { %v5337_v47 = vmul.f32 2.0, %v1193_v46  ;;  %v7687_v5 = vrot.slane %v5308_v60, 1  ;;  %v1383_v1 = vsel %vm1265_vm3, %v1370_v51, %v1382_v9  ;;  %v5345_v16 = vmul.f32 2.0, %v1188_v3 }
  0xab   : > { %7829 = vst [vmem:[#allocation36_spill] sm:$0xff] %v5333_v38  ;;  %7830 = vst [vmem:[#allocation37_spill] sm:$0xff] %v5335_v22  ;;  %v5347_v18 = vmul.f32 2.0, %v1194_v54  ;;  %v7834_v26 = vrot.slane %v5081_v55, 7  ;;  %v1372_v43 = vrot.slane %v1189_v63, 7  ;;  %v1384_v12 = vrot.slane %v1195_v10, 7 }
  0xac   : > { %7831 = vst [vmem:[#allocation38_spill] sm:$0xff] %v5337_v47  ;;  %7832 = vst [vmem:[#allocation39_spill] sm:$0xff] %v5345_v16  ;;  %v775_v29 = vadd.f32 %v587_v39, %v378_v40  ;;  %v781_v50 = vadd.f32 %v599_v34, %v384_v53  ;;  %v1378_v4 = vrot.slane %v5317_v31, 7  ;;  %v1390_v3 = vrot.slane %v5319_v23, 7  ;;  %1490 = vrot.lane.b32.xlu1 %v1383_v1, %s4257_s19 }
  0xad   : > { %7833 = vst [vmem:[#allocation40_spill] sm:$0xff] %v5347_v18  ;;  %v1371_v46 = vsel %vm1265_vm3, %v7834_v26, %v1370_v51  ;;  %v966_v54 = vsel %vm952_vm2, %v956_v62, %v965_v52  ;;  %v769_v9 = vadd.f32 %v577_v32, %v372_v30  ;;  %v978_v55 = vsel %vm952_vm2, %v965_v52, %v7687_v5  ;;  %v5492_v18 = vld [vmem:[#allocation2 + $0x168] sm:$0xff] }
  0xae   : > { %1488 = vrot.lane.b32.xlu0 %v1371_v46, %s4257_s19  ;;  %v578_v51 = vrot.slane %v445_v13, 2  ;;  %v588_v40 = vrot.slane %v385_v24, 2  ;;  %v5362_v53 = vmul.f32 2.0, %v379_v44  ;;  %v842_v48 = vmul.f32 2.0, %v385_v24 }
  0xaf   : > { %v5365_v39 = vmul.f32 2.0, %v5352_v25  ;;  %v7835_v34 = vrot.slane %v5063_v11, 7  ;;  %v7836_v32 = vrot.slane %v5026_v19, 7  ;;  %v7838_v41 = vrot.slane %v4975_v6, 7 }
  0xb0   : > { %v5382_v13 = vsel %vm1265_vm3, %v1372_v43, %v1384_v12  ;;  %v5384_v5 = vmul.f32 2.0, %v1195_v10  ;;  %v7841_v23 = vlaneseq  ;;  %v5396_v6 = vsel %vm1265_vm3, %v1378_v4, %v1390_v3  ;;  %1673 = vrot.lane.b32.xlu1 %v1383_v1, %s4258_s20 }
  0xb1   : > { %v5372_v30 = vsel %vm1265_vm3, %v7836_v32, %v7835_v34  ;;  %v7837_v26 = vmov %v7836_v32  ;;  %7839 = vst [vmem:[#allocation41_spill] sm:$0xff] %v5382_v13  ;;  %v7842_v34 = vrot.slane %v5151_v14, 7  ;;  %7844 = vst [vmem:[#allocation44_spill] sm:$0xff] %v5396_v6  ;;  %v5403_v10 = vadd.f32 %v956_v62, %v769_v9  ;;  %v373_v9 = vld [vmem:[#allocation2 + $0x20] sm:$0x80] }
  0xb2   : > { %v5379_v52 = vsel %vm1265_vm3, %v7838_v41, %v7837_v26  ;;  %7840 = vst [vmem:[#allocation42_spill] sm:$0xff] %v5384_v5  ;;  %v5387_v31 = vand.u32 127, %v7841_v23  ;;  %v7845_v41 = vrot.slane %v5190_v20, 7  ;;  %v5405_v23 = vld [vmem:[#allocation2 + $0x108] sm:$0xff]  ;;  %1671 = vrot.lane.b32.xlu0 %v1371_v46, %s4258_s20  ;;  %v5409_v14 = vmul.f32 2.0, %v1189_v63  ;;  %v397_v62 = vld [vmem:[#allocation2 + $0xe0] sm:$0xff] }
  0xb3   : > { %v5393_v19 = vsel %vm1265_vm3, %v7842_v34, %v1372_v43  ;;  %v5411_v43 = vadd.f32 %v966_v54, %v775_v29  ;;  %v5413_v32 = vadd.f32 %v978_v55, %v781_v50  ;;  %v589_v3 = vsel %vm573_vm1, %v578_v51, %v588_v40  ;;  %v5441_v20 = vld [vmem:[#allocation2 + $0x110] sm:$0xff] }
  0xb4   : > { %7843 = vst [vmem:[#allocation43_spill] sm:$0xff] %v5393_v19  ;;  %v5401_v12 = vsel %vm1265_vm3, %v7845_v41, %v1378_v4  ;;  %7847 = vst [vmem:[#allocation46_spill] sm:$0xff] %v5409_v14  ;;  %v957_v26 = vrot.slane %v5362_v53, 1  ;;  %v967_v4 = vrot.slane %v842_v48, 1  ;;  %v610_v34 = vrot.slane %v396_v2, 2  ;;  %v4181_v41 = vld [vmem:[#allocation2 + $0x68] sm:$0xff]  ;;  %1693 = vrot.lane.b32.xlu1 %v5382_v13, %s4258_s20 }
  0xb5   : > { %7846 = vst [vmem:[#allocation45_spill] sm:$0xff] %v5401_v12  ;;  %v5418_v38 = vmul.f32 4.0, %v4181_v41  ;;  %v7848_v1 = vrot.slane %v5352_v25, 2  ;;  %v853_v29 = vmul.f32 2.0, %v396_v2  ;;  %v1275_v54 = vrot.slane %v5403_v10, 7  ;;  %v4182_v53 = vld [vmem:[#allocation2 + $0x38] sm:$0xff] }
  0xb6   : > { %v5428_v55 = vmul.f32 2.0, %v5403_v10  ;;  %v5430_v48 = vmul.f32 4.0, %v4182_v53  ;;  %v5433_v41 = vmul.f32 2.0, %v5405_v23  ;;  %1691 = vrot.lane.b32.xlu0 %v5393_v19, %s4258_s20  ;;  %v776_v46 = vadd.f32 %v589_v3, %v379_v44 }
  0xb7   : > { %v601_v63 = vsel %vm573_vm1, %v588_v40, %v7848_v1  ;;  %v5424_v50 = vpop.permute.xlu1 %1472  ;;  %v1276_v40 = vrot.slane %v5411_v43, 7  ;;  %v770_v10 = vadd.f32 %v578_v51, %v373_v9  ;;  %v968_v5 = vsel %vm952_vm2, %v957_v26, %v967_v4 }
  0xb8   : > { %7849 = vst [vmem:[#allocation47_spill] sm:$0xff] %v5424_v50  ;;  %7850 = vst [vmem:[#allocation48_spill] sm:$0xff] %v5428_v55  ;;  %v782_v53 = vadd.f32 %v601_v63, %v385_v24  ;;  %v7851_v14 = vrot.slane %v5365_v39, 1  ;;  %v7852_v13 = vrot.slane %v5282_v61, 2  ;;  %v7853_v19 = vrot.slane %v5405_v23, 2  ;;  %1570 = vrot.lane.b32.xlu1 %v5396_v6, %s4257_s19 }
  0xb9   : > { %v989_v1 = vrot.slane %v853_v29, 1  ;;  %v612_v44 = vrot.slane %v397_v62, 2  ;;  %v854_v51 = vmul.f32 2.0, %v397_v62  ;;  %v5454_v3 = vmul.f32 2.0, %v5411_v43  ;;  %v408_v29 = vld [vmem:[#allocation2 + $0x138] sm:$0xff] }
  0xba   : > { %v980_v55 = vsel %vm952_vm2, %v967_v4, %v7851_v14  ;;  %v611_v47 = vsel %vm573_vm1, %v7852_v13, %v610_v34  ;;  %v623_v22 = vsel %vm573_vm1, %v610_v34, %v7853_v19  ;;  %v5459_v14 = vmul.f32 2.0, %v5441_v20  ;;  %1568 = vrot.lane.b32.xlu0 %v5401_v12, %s4257_s19  ;;  %v5465_v13 = vpop.permute.xlu0 %1452 }
  0xbb   : > { %7854 = vst [vmem:[#allocation49_spill] sm:$0xff] %v5454_v3  ;;  %v7855_v19 = vrot.slane %v5413_v32, 7  ;;  %v5473_v4 = vmul.f32 2.0, %v5413_v32  ;;  %vm1755_vm4 = vcmp.lt.s32.totalorder %v5387_v31, 127  ;;  %v5476_v34 = vadd.f32 %v968_v5, %v776_v46  ;;  %v5480_v9 = vpop.permute.xlu1 %1474 }
  0xbc   : > { %v5478_v63 = vadd.f32 %v957_v26, %v770_v10  ;;  %7859 = vst [vmem:[#allocation53_spill] sm:$0xff] %v5480_v9  ;;  %v5482_v24 = vadd.f32 %v980_v55, %v782_v53  ;;  %v787_v12 = vadd.f32 %v611_v47, %v5282_v61  ;;  %v793_v6 = vadd.f32 %v623_v22, %v396_v2 }
  0xbd   : > { %v5470_v43 = vsel %vm1265_vm3, %v1276_v40, %v7855_v19  ;;  %7856 = vst [vmem:[#allocation50_spill] sm:$0xff] %v5473_v4  ;;  %7857 = vst [vmem:[#allocation51_spill] sm:$0xff] %v5476_v34  ;;  %v7861_v19 = vrot.slane %v5141_v8, 7  ;;  %v7862_v3 = vrot.slane %v5138_v27, 7  ;;  %vm1574_vm5 = vcmp.lt.s32.totalorder %v5387_v31, 1  ;;  %1653 = vrot.lane.b32.xlu1 %v5300_v58, %s4258_s20 }
  0xbe   : > { %7858 = vst [vmem:[#allocation52_spill] sm:$0xff] %v5478_v63  ;;  %7860 = vst [vmem:[#allocation54_spill] sm:$0xff] %v5482_v24  ;;  %v7863_v5 = vrot.slane %v5308_v60, 1  ;;  %v7864_v46 = vrot.slane %v5352_v25, 2  ;;  %v991_v2 = vrot.slane %v854_v51, 1  ;;  %v7866_v47 = vrot.slane %v5029_v57, 7  ;;  %1651 = vrot.lane.b32.xlu0 %v5305_v49, %s4258_s20 }
  0xbf   : > { %v5490_v4 = vsel %vm1265_vm3, %v7862_v3, %v7861_v19  ;;  %v7865_v22 = vmov %v7862_v3  ;;  %v7867_v10 = vrot.slane %v5433_v41, 1  ;;  %v7868_v60 = vrot.slane %v5441_v20, 2 }
  0xc0   : > { %v990_v26 = vsel %vm952_vm2, %v7863_v5, %v989_v1  ;;  %v613_v61 = vsel %vm573_vm1, %v7864_v46, %v612_v44  ;;  %v5506_v55 = vsel %vm1265_vm3, %v7866_v47, %v7865_v22  ;;  %v634_v5 = vrot.slane %v408_v29, 2  ;;  %v5524_v46 = vpop.permute.xlu1 %1657 }
  0xc1   : > { %v1002_v53 = vsel %vm952_vm2, %v989_v1, %v7867_v10  ;;  %v625_v3 = vsel %vm573_vm1, %v612_v44, %v7868_v60  ;;  %v865_v27 = vmul.f32 2.0, %v408_v29  ;;  %v5521_v51 = vmul.f32 2.0, %v5492_v18  ;;  %v5530_v10 = vpop.permute.xlu0 %1454  ;;  %1494 = vrot.lane.b32.xlu1 %v4599_v33, %s4257_s19  ;;  %v4183_v33 = vld [vmem:[#allocation2 + $0x60] sm:$0xff] }
  0xc2   : > { %v2038_v1 = vrot.slane %v5168_v45, 7  ;;  %v1277_v44 = vsel %vm1265_vm3, %v1275_v54, %v1276_v40  ;;  %v1279_v22 = vrot.slane %v5476_v34, 7  ;;  %v1278_v47 = vrot.slane %v5478_v63, 7  ;;  %1492 = vrot.lane.b32.xlu0 %v4602_v36, %s4257_s19 }
  0xc3   : > { %v788_v58 = vadd.f32 %v613_v61, %v5352_v25  ;;  %v1154_v49 = vadd.f32 %v990_v26, %v787_v12  ;;  %v5532_v60 = vadd.f32 %v1002_v53, %v793_v6  ;;  %v794_v57 = vadd.f32 %v625_v3, %v397_v62 }
  0xc4   : > { %v7869_v19 = vrot.slane %v5365_v39, 1  ;;  %v7870_v16 = vrot.slane %v5459_v14, 1  ;;  %v7871_v40 = vrot.slane %v5405_v23, 2  ;;  %v1013_v34 = vrot.slane %v865_v27, 1 }
  0xc5   : > { %v7697_v25 = vrot.slane %v5171_v21, 7  ;;  %v1292_v39 = vrot.slane %v5482_v24, 7  ;;  %v7872_v6 = vrot.slane %v5492_v18, 2  ;;  %v7873_v62 = vrot.slane %v5063_v11, 7  ;;  %v5570_v3 = vpop.permute.xlu0 %1655  ;;  %1514 = vrot.lane.b32.xlu1 %v5470_v43, %s4257_s19 }
  0xc6   : > { %v992_v45 = vsel %vm952_vm2, %v7869_v19, %v991_v2  ;;  %v1004_v54 = vsel %vm952_vm2, %v991_v2, %v7870_v16  ;;  %v635_v63 = vsel %vm573_vm1, %v7871_v40, %v634_v5  ;;  %v7698_v16 = vrot.slane %v5521_v51, 1  ;;  %v5572_v19 = vpop.permute.xlu1 %1677  ;;  %1512 = vrot.lane.b32.xlu0 %v1277_v44, %s4257_s19 }
  0xc7   : > { %v647_v12 = vsel %vm573_vm1, %v634_v5, %v7872_v6  ;;  %v5556_v26 = vsel %vm1265_vm3, %v7873_v62, %v2038_v1  ;;  %v5559_v61 = vsel %vm1265_vm3, %v1278_v47, %v1279_v22  ;;  %v5561_v2 = vmul.f32 4.0, %v4183_v33  ;;  %7876 = vst [vmem:[#allocation57_spill] sm:$0xff] %v5572_v19 }
  0xc8   : > { %7874 = vst [vmem:[#allocation55_spill] sm:$0xff] %v5559_v61  ;;  %v5563_v36 = vadd.f32 %v992_v45, %v788_v58  ;;  %v5568_v53 = vsel %vm1265_vm3, %v2038_v1, %v7697_v25  ;;  %v1302_v11 = vrot.slane %v1154_v49, 7  ;;  %v7700_v5 = vrot.slane %v5532_v60, 7 }
  0xc9   : > { %v5575_v27 = vadd.f32 %v1004_v54, %v794_v57  ;;  %v799_v47 = vadd.f32 %v635_v63, %v5405_v23  ;;  %v1616_v58 = vsel %vm1574_vm5, %v5530_v10, %v5480_v9  ;;  %v1787_v1 = vsel %vm1755_vm4, %v5524_v46, %v5572_v19  ;;  %v4184_v57 = vld [vmem:[#allocation2 + $0x30] sm:$0xff]  ;;  %v5633_v19 = vld [vmem:[#allocation2 + $0x198] sm:$0xff]  ;;  %1697 = vrot.lane.b32.xlu1 %v5470_v43, %s4258_s20 }
  0xca   : > { %7875 = vst [vmem:[#allocation56_spill] sm:$0xff] %v5563_v36  ;;  %v805_v45 = vadd.f32 %v647_v12, %v408_v29  ;;  %v7877_v40 = vrot.slane %v5433_v41, 1  ;;  %v1823_v23 = vadd.f32 %v1787_v1, %v1616_v58  ;;  %v5593_v63 = vsel %vm1265_vm3, %v1279_v22, %v1292_v39  ;;  %v5600_v12 = vld [vmem:[#allocation2 + $0x140] sm:$0xff]  ;;  %v5602_v41 = vld [vmem:[#allocation2 + $0x170] sm:$0xff]  ;;  %1695 = vrot.lane.b32.xlu0 %v1277_v44, %s4258_s20 }
  0xcb   : > { %7878 = vst [vmem:[#allocation58_spill] sm:$0xff] %v5593_v63  ;;  %v5595_v54 = vmul.f32 4.0, %v4184_v57  ;;  %v1026_v29 = vsel %vm952_vm2, %v1013_v34, %v7698_v16  ;;  %v1615_v62 = vsel %vm1574_vm5, %v5465_v13, %v5424_v50  ;;  %v5608_v33 = vmul.f32 2.0, %v1154_v49  ;;  %v5656_v57 = vpop.permute.xlu1 %1554 }
  0xcc   : > { %v1014_v6 = vsel %vm952_vm2, %v7877_v40, %v1013_v34  ;;  %v5611_v22 = vmul.f32 2.0, %v5532_v60  ;;  %v1304_v58 = vrot.slane %v5563_v36, 7  ;;  %v2201_v1 = vadd.f32 %v5315_v7, %v1823_v23  ;;  %v5615_v40 = vpop.permute.xlu0 %1675  ;;  %7882 = vst [vmem:[#allocation61_spill] sm:$0xff] %v5656_v57 }
  0xcd   : > { %7880 = vst [vmem:[#allocation60_spill] sm:$0xff] %v5615_v40  ;;  %v5620_v34 = vsel %vm1265_vm3, %v1302_v11, %v7700_v5  ;;  %v5623_v25 = vadd.f32 %v1014_v6, %v799_v47  ;;  %v1786_v49 = vsel %vm1755_vm4, %v5570_v3, %v5615_v40  ;;  %v5629_v16 = vadd.f32 %v1026_v29, %v805_v45 }
  0xce   : > { %7879 = vst [vmem:[#allocation59_spill] sm:$0xff] %v5611_v22  ;;  %v636_v7 = vrot.slane %v5600_v12, 2  ;;  %v2321_v5 = vadd.f32 %v5418_v38, %v2201_v1  ;;  %v1817_v50 = vadd.f32 %v1786_v49, %v1615_v62  ;;  %v866_v47 = vmul.f32 2.0, %v5600_v12  ;;  %v4185_v38 = vld [vmem:[#allocation2 + $0xc8] sm:$0xff]  ;;  %v4186_v1 = vld [vmem:[#allocation2 + $0x98] sm:$0xff]  ;;  %1717 = vrot.lane.b32.xlu1 %v5593_v63, %s4258_s20  ;;  %1715 = vrot.lane.b32.xlu0 %v5559_v61, %s4258_s20 }
  0xcf   : > { %v5641_v6 = vmul.f32 2.0, %v5602_v41  ;;  %v7881_v45 = vrot.slane %v5413_v32, 7  ;;  %v5649_v23 = vsel %vm1265_vm3, %v1292_v39, %v1304_v58  ;;  %v5651_v62 = vmul.f32 4.0, %v4185_v38  ;;  %v5665_v39 = vld [vmem:[#allocation2 + $0x1c8] sm:$0xff] }
  0xd0   : > { %v5653_v43 = vmul.f32 4.0, %v4186_v1  ;;  %v2381_v44 = vmul.f32 0.05, %v2321_v5  ;;  %v2195_v49 = vadd.f32 %v5326_v28, %v1817_v50  ;;  %v5658_v40 = vpop.permute.xlu0 %1552  ;;  %v7884_v32 = vrot.slane %v5575_v27, 7 }
  0xd1   : > { %v5646_v29 = vsel %vm1265_vm3, %v7881_v45, %v1302_v11  ;;  %7883 = vst [vmem:[#allocation62_spill] sm:$0xff] %v5658_v40  ;;  %v658_v45 = vrot.slane %v5633_v19, 2  ;;  %v7885_v5 = vrot.slane %v5441_v20, 2  ;;  %v7886_v50 = vrot.slane %v5602_v41, 2 }
  0xd2   : > { %v5663_v11 = vsel %vm1265_vm3, %v1304_v58, %v7884_v32  ;;  %v2441_v36 = vsub.f32 0.0, %v2381_v44  ;;  %v2315_v58 = vadd.f32 %v5430_v48, %v2195_v49  ;;  %v1015_v32 = vrot.slane %v866_v47, 1  ;;  %v5688_v49 = vpop.permute.xlu1 %1637 }
  0xd3   : > { %v637_v28 = vsel %vm573_vm1, %v7885_v5, %v636_v7  ;;  %v649_v9 = vsel %vm573_vm1, %v636_v7, %v7886_v50  ;;  %v877_v5 = vmul.f32 2.0, %v5633_v19  ;;  %v5685_v24 = vmul.f32 2.0, %v5665_v39  ;;  %7887 = vst [vmem:[#allocation63_spill] sm:$0xff] %v5688_v49 }
  0xd4   : > { %v2064_v7 = vrot.slane %v5206_v42, 7  ;;  %v2508_v44 = vmul.f32 1.442695, %v2441_v36  ;;  %v2375_v48 = vmul.f32 0.05, %v2315_v58  ;;  %v5690_v50 = vpop.permute.xlu0 %1635  ;;  %v7889_v61 = vrot.slane %v5492_v18, 2 }
  0xd5   : > { %7888 = vst [vmem:[#allocation64_spill] sm:$0xff] %v5690_v50  ;;  %v1626_v1 = vsel %vm1574_vm5, %v5656_v57, %v5530_v10  ;;  %v1625_v42 = vsel %vm1574_vm5, %v5658_v40, %v5465_v13  ;;  %v1797_v36 = vsel %vm1755_vm4, %v5688_v49, %v5524_v46  ;;  %v7890_v10 = vld [vmem:[#allocation5_spill] sm:$0xff]  ;;  %v7891_v57 = vld [vmem:[#allocation6_spill] sm:$0xff]  ;;  %v800_v13 = vadd.f32 %v637_v28, %v5441_v20 }
  0xd6   : > { %v659_v47 = vsel %vm573_vm1, %v7889_v61, %v658_v45  ;;  %v1796_v61 = vsel %vm1755_vm4, %v5690_v50, %v5570_v3  ;;  %3941 = vpow2.f32 %v2508_v44  ;;  %v2435_v58 = vsub.f32 0.0, %v2375_v48  ;;  %1498 = vrot.lane.b32.xlu1 %v7890_v10, %s4257_s19  ;;  %1496 = vrot.lane.b32.xlu0 %v7891_v57, %s4257_s19  ;;  %v5725_v48 = vpop.permute.xlu1 %1458 }
  0xd7   : > { %v1822_v38 = vadd.f32 %v1797_v36, %v1626_v1  ;;  %v1816_v63 = vadd.f32 %v1796_v61, %v1625_v42  ;;  %v806_v40 = vadd.f32 %v649_v9, %v5600_v12  ;;  %v1037_v46 = vrot.slane %v877_v5, 1  ;;  %v421_v9 = vld [vmem:[#allocation2 + $0x1a0] sm:$0xff]  ;;  %v5734_v12 = vld [vmem:[#allocation2 + $0x1d0] sm:$0xff] }
  0xd8   : > { %v7892_v49 = vrot.slane %v5209_v59, 7  ;;  %v2496_v3 = vmul.f32 1.442695, %v2435_v58  ;;  %v5727_v42 = vpop.permute.xlu0 %1456  ;;  %v7893_v57 = vrot.slane %v5141_v8, 7  ;;  %v7894_v28 = vrot.slane %v5459_v14, 1 }
  0xd9   : > { %v2200_v1 = vadd.f32 %v5372_v30, %v1822_v38  ;;  %v2194_v44 = vadd.f32 %v5379_v52, %v1816_v63  ;;  %v7895_v30 = vrot.slane %v5641_v6, 1  ;;  %v7896_v63 = vrot.slane %v5665_v39, 2 }
  0xda   : > { %v5721_v22 = vsel %vm1265_vm3, %v2064_v7, %v7892_v49  ;;  %v5732_v20 = vsel %vm1265_vm3, %v7893_v57, %v2064_v7  ;;  %v1016_v5 = vsel %vm952_vm2, %v7894_v28, %v1015_v32  ;;  %v811_v8 = vadd.f32 %v659_v47, %v5492_v18  ;;  %1518 = vrot.lane.b32.xlu1 %v5620_v34, %s4257_s19  ;;  %v5759_v58 = vpop.permute.xlu1 %1478 }
  0xdb   : > { %v1028_v52 = vsel %vm952_vm2, %v1015_v32, %v7895_v30  ;;  %v671_v38 = vsel %vm573_vm1, %v658_v45, %v7896_v63  ;;  %3943 = vpow2.f32 %v2496_v3  ;;  %v2320_v7 = vadd.f32 %v5561_v2, %v2200_v1  ;;  %1516 = vrot.lane.b32.xlu0 %v5646_v29, %s4257_s19  ;;  %v4187_v32 = vld [vmem:[#allocation2 + $0xc0] sm:$0xff]  ;;  %7898 = vst [vmem:[#allocation5_spill] sm:$0xff] %v5759_v58 }
  0xdc   : > { %v2314_v49 = vadd.f32 %v5595_v54, %v2194_v44  ;;  %v7713_v14 = vrot.slane %v5685_v24, 1  ;;  %v5753_v36 = vmul.f32 4.0, %v4187_v32  ;;  %v7897_v45 = vrot.slane %v5521_v51, 1  ;;  %v5761_v10 = vpop.permute.xlu0 %1476 }
  0xdd   : > { %v660_v47 = vrot.slane %v421_v9, 2  ;;  %v7712_v2 = vrot.slane %v5734_v12, 2  ;;  %v2380_v61 = vmul.f32 0.05, %v2320_v7  ;;  %7899 = vst [vmem:[#allocation6_spill] sm:$0xff] %v5761_v10  ;;  %v878_v3 = vmul.f32 2.0, %v421_v9 }
  0xde   : > { %v1038_v18 = vsel %vm952_vm2, %v7897_v45, %v1037_v46  ;;  %v2374_v54 = vmul.f32 0.05, %v2314_v49  ;;  %v5764_v1 = vmul.f32 2.0, %v5734_v12  ;;  %v7900_v44 = vrot.slane %v5629_v16, 7  ;;  %1701 = vrot.lane.b32.xlu1 %v5620_v34, %s4258_s20 }
  0xdf   : > { %v7901_v57 = vrot.slane %v5623_v25, 7  ;;  %v5773_v28 = vadd.f32 %v1016_v5, %v800_v13  ;;  %v5775_v30 = vadd.f32 %v1028_v52, %v806_v40  ;;  %v817_v63 = vadd.f32 %v671_v38, %v5633_v19  ;;  %1699 = vrot.lane.b32.xlu0 %v5646_v29, %s4258_s20 }
  0xe0   : > { %v2440_v7 = vsub.f32 0.0, %v2380_v61  ;;  %v2434_v49 = vsub.f32 0.0, %v2374_v54  ;;  %v1050_v32 = vsel %vm952_vm2, %v1037_v46, %v7713_v14  ;;  %v5785_v45 = vadd.f32 %v1038_v18, %v811_v8  ;;  %v3942_v38 = vpop.eup %3941  ;;  %v5792_v54 = vpop.permute.xlu1 %1661  ;;  %v7909_v14 = vld [vmem:[#allocation12_spill] sm:$0xff] }
  0xe1   : > { %v5771_v51 = vsel %vm1265_vm3, %v7901_v57, %v7900_v44  ;;  %v7902_v13 = vrot.slane %v5602_v41, 2  ;;  %v1039_v5 = vrot.slane %v878_v3, 1  ;;  %v2062_v19 = vrot.slane %v5200_v17, 7  ;;  %v5794_v29 = vpop.permute.xlu0 %1659 }
  0xe2   : > { %v7711_v52 = vrot.slane %v5203_v15, 7  ;;  %v2506_v34 = vmul.f32 1.442695, %v2440_v7  ;;  %v2494_v61 = vmul.f32 1.442695, %v2434_v49  ;;  %v673_v46 = vsel %vm573_vm1, %v660_v47, %v7712_v2  ;;  %1721 = vrot.lane.b32.xlu1 %v5663_v11, %s4258_s20 }
  0xe3   : > { %v661_v40 = vsel %vm573_vm1, %v7902_v13, %v660_v47  ;;  %v7714_v8 = vrot.slane %v5764_v1, 1  ;;  %v7903_v18 = vmov %v7901_v57  ;;  %v7904_v3 = vrot.slane %v5532_v60, 7  ;;  %1719 = vrot.lane.b32.xlu0 %v5649_v23, %s4258_s20 }
  0xe4   : > { %v1328_v44 = vrot.slane %v5773_v28, 7  ;;  %v2621_v57 = vadd.f32 1.0, %v3942_v38  ;;  %v5811_v7 = vsel %vm1265_vm3, %v2062_v19, %v7711_v52  ;;  %3945 = vpow2.f32 %v2506_v34 }
  0xe5   : > { %v5805_v17 = vsel %vm1265_vm3, %v7904_v3, %v7903_v18  ;;  %v5817_v47 = vadd.f32 %v1050_v32, %v817_v63  ;;  %v812_v60 = vadd.f32 %v661_v40, %v5602_v41  ;;  %v7905_v49 = vrot.slane %v5171_v21, 7  ;;  %v3944_v52 = vpop.eup %3943  ;;  %v5837_v41 = vpop.permute.xlu1 %1681  ;;  %v438_v40 = vld [vmem:[#allocation2 + $0x1f8] sm:$0xff] }
  0xe6   : > { %3947 = vpow2.f32 %v2494_v61  ;;  %v818_v18 = vadd.f32 %v673_v46, %v421_v9  ;;  %v7906_v34 = vrot.slane %v5641_v6, 1  ;;  %v1618_v63 = vsel %vm1574_vm5, %v5725_v48, %v5759_v58  ;;  %7907 = vst [vmem:[#allocation65_spill] sm:$0xff] %v5837_v41  ;;  %v5839_v32 = vpop.permute.xlu0 %1679  ;;  %1502 = vrot.lane.b32.xlu1 %v7909_v14, %s4257_s19 }
  0xe7   : > { %v5823_v13 = vsel %vm1265_vm3, %v7905_v49, %v2062_v19  ;;  %v1617_v21 = vsel %vm1574_vm5, %v5727_v42, %v5761_v10  ;;  %7908 = vst [vmem:[#allocation66_spill] sm:$0xff] %v5839_v32  ;;  %v1052_v6 = vsel %vm952_vm2, %v1039_v5, %v7714_v8  ;;  %v1789_v19 = vsel %vm1755_vm4, %v5792_v54, %v5837_v41  ;;  %v504_v49 = vld [vmem:[#allocation2 + $0x228] sm:$0x1] }
  0xe8   : > { %v1040_v3 = vsel %vm952_vm2, %v7906_v34, %v1039_v5  ;;  %v1788_v61 = vsel %vm1755_vm4, %v5794_v29, %v5839_v32  ;;  %v2615_v46 = vadd.f32 1.0, %v3944_v52  ;;  %3949 = vrcp.f32 %v2621_v57  ;;  %v7910_v5 = vld [vmem:[#allocation10_spill] sm:$0xff] }
  0xe9   : > { %v1835_v34 = vadd.f32 %v1789_v19, %v1618_v63  ;;  %v1829_v2 = vadd.f32 %v1788_v61, %v1617_v21  ;;  %1500 = vrot.lane.b32.xlu0 %v7910_v5, %s4257_s19  ;;  %v7717_v8 = vrot.slane %v5817_v47, 7  ;;  %v5858_v9 = vadd.f32 %v1040_v3, %v812_v60  ;;  %v5866_v63 = vpop.permute.xlu1 %1558  ;;  %v4188_v21 = vld [vmem:[#allocation2 + $0x90] sm:$0xff] }
  0xea   : > { %3951 = vrcp.f32 %v2615_v46  ;;  %v5860_v38 = vadd.f32 %v1052_v6, %v818_v18  ;;  %v682_v50 = vrot.slane %v438_v40, 2  ;;  %v5862_v32 = vmul.f32 2.0, %v438_v40  ;;  %7912 = vst [vmem:[#allocation10_spill] sm:$0xff] %v5866_v63  ;;  %v5868_v14 = vpop.permute.xlu0 %1556  ;;  %1522 = vrot.lane.b32.xlu1 %v5771_v51, %s4257_s19 }
  0xeb   : > { %7911 = vst [vmem:[#allocation12_spill] sm:$0xff] %v5858_v9  ;;  %v2213_v52 = vadd.f32 %v5490_v4, %v1835_v34  ;;  %v2207_v57 = vadd.f32 %v5506_v55, %v1829_v2  ;;  %7913 = vst [vmem:[#allocation67_spill] sm:$0xff] %v5868_v14  ;;  %v2266_v19 = vmul.f32 4.0, %v4188_v21  ;;  %v694_v61 = vrot.slane %v504_v49, 2  ;;  %v4189_v55 = vld [vmem:[#allocation2 + $0x128] sm:$0xff]  ;;  %v4190_v49 = vld [vmem:[#allocation2 + $0xf8] sm:$0xff] }
  0xec   : > { %v5871_v60 = vmul.f32 2.0, %v5623_v25  ;;  %v7914_v18 = vrot.slane %v5775_v30, 7  ;;  %v7915_v6 = vrot.slane %v5575_v27, 7  ;;  %v5883_v2 = vmul.f32 4.0, %v4189_v55 }
  0xed   : > { %v2333_v40 = vadd.f32 %v5651_v62, %v2213_v52  ;;  %v2327_v46 = vadd.f32 %v5653_v43, %v2207_v57  ;;  %1520 = vrot.lane.b32.xlu0 %v5805_v17, %s4257_s19  ;;  %v7916_v25 = vrot.slane %v5785_v45, 7  ;;  %v5898_v34 = vmul.f32 4.0, %v4190_v49 }
  0xee   : > { %v5876_v3 = vsel %vm1265_vm3, %v1328_v44, %v7914_v18  ;;  %v5881_v4 = vsel %vm1265_vm3, %v7915_v6, %v1328_v44  ;;  %v7917_v5 = vrot.slane %v5665_v39, 2  ;;  %v1061_v57 = vrot.slane %v5862_v32, 1  ;;  %v3946_v21 = vpop.eup %3945  ;;  %v5912_v49 = vpop.permute.xlu0 %1639  ;;  %1705 = vrot.lane.b32.xlu1 %v5771_v51, %s4258_s20 }
  0xef   : > { %v5896_v44 = vsel %vm1265_vm3, %v7916_v25, %v7717_v8  ;;  %v2393_v18 = vmul.f32 0.05, %v2333_v40  ;;  %v2387_v6 = vmul.f32 0.05, %v2327_v46  ;;  %v1628_v55 = vsel %vm1574_vm5, %v5866_v63, %v5725_v48  ;;  %v5910_v25 = vpop.permute.xlu1 %1641  ;;  %7919 = vst [vmem:[#allocation69_spill] sm:$0xff] %v5912_v49 }
  0xf0   : > { %v683_v52 = vsel %vm573_vm1, %v7917_v5, %v682_v50  ;;  %7918 = vst [vmem:[#allocation68_spill] sm:$0xff] %v5910_v25  ;;  %v695_v8 = vsel %vm573_vm1, %v682_v50, %v694_v61  ;;  %v3948_v62 = vpop.eup %3947  ;;  %v1627_v32 = vsel %vm1574_vm5, %v5868_v14, %v5727_v42  ;;  %v1799_v40 = vsel %vm1755_vm4, %v5910_v25, %v5792_v54  ;;  %v432_v42 = vld [vmem:[#allocation2 + $0x1f8] sm:$0x7f]  ;;  %v439_v14 = vld [vmem:[#allocation2 + $0x200] sm:$0xff] }
  0xf1   : > { %v1798_v48 = vsel %vm1755_vm4, %v5912_v49, %v5794_v29  ;;  %v2620_v46 = vadd.f32 1.0, %v3946_v21  ;;  %v2453_v5 = vsub.f32 0.0, %v2393_v18  ;;  %v2447_v43 = vsub.f32 0.0, %v2387_v6  ;;  %1703 = vrot.lane.b32.xlu0 %v5805_v17, %s4258_s20  ;;  %v505_v17 = vld [vmem:[#allocation2 + $0x230] sm:$0x1] }
  0xf2   : > { %v1834_v50 = vadd.f32 %v1799_v40, %v1628_v55  ;;  %v1828_v61 = vadd.f32 %v1798_v48, %v1627_v32  ;;  %v3950_v63 = vpop.eup %3949  ;;  %v2614_v54 = vadd.f32 1.0, %v3948_v62  ;;  %v823_v25 = vadd.f32 %v683_v52, %v5665_v39  ;;  %v5937_v51 = vpop.permute.xlu0 %1460  ;;  %1725 = vrot.lane.b32.xlu1 %v5876_v3, %s4258_s20 }
  0xf3   : > { %3953 = vrcp.f32 %v2620_v46  ;;  %v2088_v29 = vrot.slane %v5271_v0, 7  ;;  %v2532_v21 = vmul.f32 1.442695, %v2453_v5  ;;  %v2520_v18 = vmul.f32 1.442695, %v2447_v43  ;;  %v5935_v32 = vpop.permute.xlu1 %1462 }
  0xf4   : > { %v2212_v6 = vadd.f32 %v5568_v53, %v1834_v50  ;;  %v2206_v55 = vadd.f32 %v5556_v26, %v1828_v61  ;;  %v3952_v40 = vpop.eup %3951  ;;  %3955 = vrcp.f32 %v2614_v54  ;;  %v829_v48 = vadd.f32 %v695_v8, %v432_v42 }
  0xf5   : > { %v7920_v62 = vrot.slane %v5685_v24, 1  ;;  %v684_v52 = vrot.slane %v439_v14, 2  ;;  %3957 = vpow2.f32 %v2532_v21  ;;  %1723 = vrot.lane.b32.xlu0 %v5881_v4, %s4258_s20  ;;  %v3656_v26 = vpack.c.bf16 %v3950_v63, %v3952_v40 }
  0xf6   : > { %v2332_v0 = vadd.f32 %v5753_v36, %v2212_v6  ;;  %v2326_v43 = vadd.f32 %v2266_v19, %v2206_v55  ;;  %3959 = vpow2.f32 %v2520_v18  ;;  %v7921_v53 = vrot.slane %v5785_v45, 7  ;;  %v5957_v61 = vpop.permute.xlu0 %1480  ;;  %v4191_v6 = vld [vmem:[#allocation2 + $0x120] sm:$0xff]  ;;  %1506 = vrot.lane.b32.xlu1 %v5214_v35, %s4257_s19 }
  0xf7   : > { %v1062_v39 = vsel %vm952_vm2, %v7920_v62, %v1061_v57  ;;  %v7922_v8 = vrot.slane %v5629_v16, 7  ;;  %v696_v46 = vrot.slane %v505_v17, 2  ;;  %v2100_v5 = vrot.slane %v5275_v37, 7  ;;  %v5955_v50 = vpop.permute.xlu1 %1482  ;;  %3657 = vmatprep.subr.bf16.mxu0 %v3656_v26  ;;  %v4192_v17 = vld [vmem:[#allocation2 + $0xf0] sm:$0xff]  ;;  %v433_v26 = vld [vmem:[#allocation2 + $0x200] sm:$0x7f] }
  0xf8   : > { %v2392_v36 = vmul.f32 0.05, %v2332_v0  ;;  %v2386_v19 = vmul.f32 0.05, %v2326_v43  ;;  %v5959_v42 = vadd.f32 %v1062_v39, %v823_v25  ;;  %v7923_v63 = vrot.slane %v5209_v59, 7 }
  0xf9   : > { %v5952_v24 = vsel %vm1265_vm3, %v7922_v8, %v7921_v53  ;;  %v7924_v21 = vrot.slane %v5860_v38, 7  ;;  %v7925_v18 = vrot.slane %v5858_v9, 7  ;;  %v5973_v55 = vmul.f32 4.0, %v4191_v6  ;;  %1504 = vrot.lane.b32.xlu0 %v5219_v56, %s4257_s19 }
  0xfa   : > { %v5964_v54 = vsel %vm1265_vm3, %v7923_v63, %v2088_v29  ;;  %v5975_v40 = vmul.f32 4.0, %v4192_v17  ;;  %v5977_v25 = vadd.f32 %v1061_v57, %v829_v48  ;;  %v2452_v62 = vsub.f32 0.0, %v2392_v36  ;;  %v7927_v48 = vld [vmem:[#allocation29_spill] sm:$0xff]  ;;  %v7928_v36 = vld [vmem:[#allocation32_spill] sm:$0xff]  ;;  %v5994_v56 = vpop.permute.xlu0 %1663  ;;  %1526 = vrot.lane.b32.xlu1 %v5896_v44, %s4257_s19 }
  0xfb   : > { %v5971_v37 = vsel %vm1265_vm3, %v7925_v18, %v7924_v21  ;;  %v2446_v59 = vsub.f32 0.0, %v2386_v19  ;;  %v7926_v39 = vrot.slane %v5734_v12, 2  ;;  %v5987_v43 = vsel %vm1265_vm3, %v2088_v29, %v2100_v5  ;;  %v5992_v21 = vpop.permute.xlu1 %1665 }
  0xfc   : > { %v697_v53 = vsel %vm573_vm1, %v684_v52, %v696_v46  ;;  %v890_v57 = vmul.f32 2.0, %v439_v14  ;;  %v2086_v8 = vrot.slane %v7927_v48, 7  ;;  %v2098_v19 = vrot.slane %v7928_v36, 7 }
  0xfd   : > { %v685_v0 = vsel %vm573_vm1, %v7926_v39, %v684_v52  ;;  %v2530_v63 = vmul.f32 1.442695, %v2452_v62  ;;  %v2518_v35 = vmul.f32 1.442695, %v2446_v59  ;;  %v7929_v6 = vrot.slane %v5775_v30, 7  ;;  %v3954_v14 = vpop.eup %3953  ;;  %v7931_v39 = vld [vmem:[#allocation39_spill] sm:$0xff]  ;;  %1524 = vrot.lane.b32.xlu0 %v5952_v24, %s4257_s19 }
  0xfe   : > { %v1374_v52 = vrot.slane %v5959_v42, 7  ;;  %v1386_v46 = vrot.slane %v5977_v25, 7  ;;  %v6006_v17 = vsel %vm1265_vm3, %v2086_v8, %v2098_v19  ;;  %v7930_v62 = vrot.slane %v5203_v15, 7  ;;  %v3956_v41 = vpop.eup %3955  ;;  %v6029_v58 = vpop.permute.xlu0 %1683  ;;  %1709 = vrot.lane.b32.xlu1 %v5896_v44, %s4258_s20 }
  0xff   : > { %v6001_v29 = vsel %vm1265_vm3, %v7929_v6, %v7925_v18  ;;  %v2112_v48 = vrot.slane %v7931_v39, 7  ;;  %3961 = vpow2.f32 %v2530_v63  ;;  %v824_v36 = vadd.f32 %v685_v0, %v5734_v12  ;;  %v7932_v6 = vld [vmem:[#allocation40_spill] sm:$0xff]  ;;  %v6027_v39 = vpop.permute.xlu1 %1685  ;;  %7933 = vst [vmem:[#allocation29_spill] sm:$0xff] %v6029_v58  ;;  %v7934_v0 = vld [vmem:[#allocation37_spill] sm:$0xff] }
 0x100   : > { %v6011_v59 = vsel %vm1265_vm3, %v7930_v62, %v2086_v8  ;;  %v830_v18 = vadd.f32 %v697_v53, %v433_v26  ;;  %v2124_v49 = vrot.slane %v7932_v6, 7  ;;  %3963 = vpow2.f32 %v2518_v35  ;;  %v3958_v62 = vpop.eup %3957  ;;  %v7935_v53 = vld [vmem:[#allocation38_spill] sm:$0xff] }
 0x101   : > { %v1620_v15 = vsel %vm1574_vm5, %v5935_v32, %v5955_v50  ;;  %v1063_v8 = vrot.slane %v890_v57, 1  ;;  %v6025_v63 = vsel %vm1265_vm3, %v2100_v5, %v2112_v48  ;;  %v3658_v10 = vpack.c.bf16 %v3954_v14, %v3956_v41  ;;  %v3960_v6 = vpop.eup %3959  ;;  %1707 = vrot.lane.b32.xlu0 %v5952_v24, %s4258_s20 }
 0x102   : > { %v6032_v12 = vsel %vm1265_vm3, %v2112_v48, %v2124_v49  ;;  %v2110_v26 = vrot.slane %v7934_v0, 7  ;;  %v2122_v35 = vrot.slane %v7935_v53, 7  ;;  %v2633_v9 = vadd.f32 1.0, %v3958_v62  ;;  %1729 = vrot.lane.b32.xlu1 %v5971_v37, %s4258_s20 }
 0x103   : > { %v1619_v5 = vsel %vm1574_vm5, %v5937_v51, %v5957_v61  ;;  %v1791_v41 = vsel %vm1755_vm4, %v5992_v21, %v6027_v39  ;;  %v1790_v49 = vsel %vm1755_vm4, %v5994_v56, %v6029_v58  ;;  %v2627_v57 = vadd.f32 1.0, %v3960_v6  ;;  %3659 = vmatpush1.bf16.msra.mxu0 %v3658_v10 }
 0x104   : > { %v1847_v14 = vadd.f32 %v1791_v41, %v1620_v15  ;;  %v1841_v48 = vadd.f32 %v1790_v49, %v1619_v5  ;;  %v6051_v62 = vsel %vm1265_vm3, %v2110_v26, %v2122_v35  ;;  %3965 = vrcp.f32 %v2633_v9  ;;  %v7937_v15 = vld [vmem:[#allocation15_spill] sm:$0xff]  ;;  %v6064_v35 = vpop.permute.xlu1 %1562  ;;  %v6066_v9 = vpop.permute.xlu0 %1560  ;;  %v7940_v5 = vld [vmem:[#allocation16_spill] sm:$0xff]  ;;  %v7943_v49 = vld [vmem:[#allocation17_spill] sm:$0xff] }
 0x105   : > { %v7936_v0 = vrot.slane %v5764_v1, 1  ;;  %v6059_v58 = vsel %vm1265_vm3, %v2098_v19, %v2110_v26  ;;  %v2015_v10 = vrot.slane %v7937_v15, 7  ;;  %3967 = vrcp.f32 %v2627_v57  ;;  %7938 = vst [vmem:[#allocation32_spill] sm:$0xff] %v6064_v35  ;;  %7939 = vst [vmem:[#allocation39_spill] sm:$0xff] %v6066_v9  ;;  %1727 = vrot.lane.b32.xlu0 %v6001_v29, %s4258_s20 }
 0x106   : > { %v2225_v6 = vadd.f32 %v5721_v22, %v1847_v14  ;;  %v2219_v44 = vadd.f32 %v5732_v20, %v1841_v48  ;;  %v2030_v24 = vrot.slane %v7940_v5, 7  ;;  %v6070_v1 = vsel %vm1265_vm3, %v1374_v52, %v1386_v46 }
 0x107   : > { %v1064_v53 = vsel %vm952_vm2, %v7936_v0, %v1063_v8  ;;  %v7941_v41 = vrot.slane %v5817_v47, 7  ;;  %v6077_v26 = vadd.f32 %v1063_v8, %v830_v18  ;;  %v2014_v22 = vrot.slane %v7943_v49, 7  ;;  %v7946_v8 = vld [vmem:[#allocation50_spill] sm:$0xff] }
 0x108   : > { %v2345_v20 = vadd.f32 %v5883_v2, %v2225_v6  ;;  %v2339_v57 = vadd.f32 %v5898_v34, %v2219_v44  ;;  %v6084_v14 = vadd.f32 %v1064_v53, %v824_v36  ;;  %v6087_v46 = vsel %vm1265_vm3, %v2015_v10, %v2030_v24  ;;  %v7945_v34 = vld [vmem:[#allocation49_spill] sm:$0xff]  ;;  %v6104_v6 = vpop.permute.xlu1 %1645  ;;  %v7949_v44 = vld [vmem:[#allocation48_spill] sm:$0xff] }
 0x109   : > { %v6075_v19 = vsel %vm1265_vm3, %v7941_v41, %v1374_v52  ;;  %7942 = vst [vmem:[#allocation40_spill] sm:$0xff] %v6077_v26  ;;  %v1630_v52 = vsel %vm1574_vm5, %v6064_v35, %v5935_v32  ;;  %v6096_v2 = vsel %vm1265_vm3, %v2014_v22, %v2015_v10  ;;  %v2018_v18 = vrot.slane %v7945_v34, 7  ;;  %v3962_v36 = vpop.eup %3961  ;;  %7947 = vst [vmem:[#allocation38_spill] sm:$0xff] %v6104_v6  ;;  %v6106_v32 = vpop.permute.xlu0 %1643 }
 0x10a   : > { %7944 = vst [vmem:[#allocation37_spill] sm:$0xff] %v6084_v14  ;;  %v2032_v48 = vrot.slane %v7946_v8, 7  ;;  %v2405_v0 = vmul.f32 0.05, %v2345_v20  ;;  %v2399_v53 = vmul.f32 0.05, %v2339_v57  ;;  %v1629_v15 = vsel %vm1574_vm5, %v6066_v9, %v5937_v51  ;;  %v3964_v10 = vpop.eup %3963 }
 0x10b   : > { %7948 = vst [vmem:[#allocation15_spill] sm:$0xff] %v6106_v32  ;;  %v2017_v5 = vrot.slane %v7949_v44, 7  ;;  %v2632_v41 = vadd.f32 1.0, %v3962_v36  ;;  %v1801_v49 = vsel %vm1755_vm4, %v6104_v6, %v5992_v21  ;;  %v1800_v22 = vsel %vm1755_vm4, %v6106_v32, %v5994_v56  ;;  %v7950_v44 = vld [vmem:[#allocation41_spill] sm:$0xff]  ;;  %v7951_v9 = vld [vmem:[#allocation43_spill] sm:$0xff] }
 0x10c   : > { %v6118_v51 = vsel %vm1265_vm3, %v2018_v18, %v2032_v48  ;;  %v2626_v20 = vadd.f32 1.0, %v3964_v10  ;;  %v2465_v57 = vsub.f32 0.0, %v2405_v0  ;;  %v2459_v34 = vsub.f32 0.0, %v2399_v53  ;;  %1510 = vrot.lane.b32.xlu1 %v7950_v44, %s4257_s19  ;;  %1508 = vrot.lane.b32.xlu0 %v7951_v9, %s4257_s19  ;;  %v7952_v6 = vld [vmem:[#allocation21_spill] sm:$0xff]  ;;  %v6129_v53 = vpop.permute.xlu1 %1466  ;;  %v7953_v9 = vld [vmem:[#allocation22_spill] sm:$0xff] }
 0x10d   : > { %v1846_v8 = vadd.f32 %v1801_v49, %v1630_v52  ;;  %3969 = vrcp.f32 %v2632_v41  ;;  %v1840_v36 = vadd.f32 %v1800_v22, %v1629_v15  ;;  %v6125_v21 = vsel %vm1265_vm3, %v2017_v5, %v2018_v18  ;;  %v6131_v52 = vpop.permute.xlu0 %1464 }
 0x10e   : > { %v2042_v56 = vrot.slane %v7952_v6, 7  ;;  %3971 = vrcp.f32 %v2626_v20  ;;  %v2556_v32 = vmul.f32 1.442695, %v2465_v57  ;;  %v2544_v35 = vmul.f32 1.442695, %v2459_v34  ;;  %v3966_v10 = vpop.eup %3965 }
 0x10f   : > { %v2224_v0 = vadd.f32 %v5811_v7, %v1846_v8  ;;  %v2218_v15 = vadd.f32 %v5823_v13, %v1840_v36  ;;  %v1388_v41 = vrot.slane %v6077_v26, 7  ;;  %v2054_v49 = vrot.slane %v7953_v9, 7  ;;  %v3968_v6 = vpop.eup %3967  ;;  %v7956_v8 = vld [vmem:[#allocation59_spill] sm:$0xff]  ;;  %v7959_v9 = vld [vmem:[#allocation28_spill] sm:$0xff] }
 0x110   : > { %v6137_v18 = vsel %vm1265_vm3, %v2030_v24, %v2042_v56  ;;  %3973 = vpow2.f32 %v2556_v32  ;;  %1530 = vrot.lane.b32.xlu1 %v6070_v1, %s4257_s19  ;;  %v1376_v7 = vrot.slane %v6084_v14, 7  ;;  %v2044_v22 = vrot.slane %v5608_v33, 7  ;;  %1528 = vrot.lane.b32.xlu0 %v6075_v19, %s4257_s19  ;;  %v6153_v57 = vpop.permute.xlu1 %1486 }
 0x111   : > { %v2344_v5 = vadd.f32 %v5973_v55, %v2224_v0  ;;  %3975 = vpow2.f32 %v2544_v35  ;;  %v2338_v13 = vadd.f32 %v5975_v40, %v2218_v15  ;;  %v3660_v20 = vpack.c.bf16 %v3966_v10, %v3968_v6  ;;  %7954 = vst [vmem:[#allocation16_spill] sm:$0xff] %v6153_v57  ;;  %v6155_v34 = vpop.permute.xlu0 %1484  ;;  %v7957_v40 = vld [vmem:[#allocation51_spill] sm:$0xff] }
 0x112   : > { %v6148_v24 = vsel %vm1265_vm3, %v2042_v56, %v2054_v49  ;;  %v6151_v32 = vmul.f32 2.0, %v5629_v16  ;;  %7955 = vst [vmem:[#allocation17_spill] sm:$0xff] %v6155_v34  ;;  %v2056_v33 = vrot.slane %v7956_v8, 7  ;;  %v6159_v35 = vsel %vm1265_vm3, %v2032_v48, %v2044_v22  ;;  %v7958_v15 = vld [vmem:[#allocation27_spill] sm:$0xff] }
 0x113   : > { %v2404_v55 = vmul.f32 0.05, %v2344_v5  ;;  %v6162_v44 = vmul.f32 2.0, %v7957_v40  ;;  %v1921_v36 = vmul.f32 2.0, %v5785_v45  ;;  %v6166_v56 = vmul.f32 2.0, %v5817_v47  ;;  %3661 = vmatprep.subr.bf16.mxu0 %v3660_v20 }
 0x114   : > { %v2398_v16 = vmul.f32 0.05, %v2338_v13  ;;  %1713 = vrot.lane.b32.xlu1 %v6070_v1, %s4258_s20  ;;  %v6171_v10 = vsel %vm1265_vm3, %v2044_v22, %v2056_v33  ;;  %v2066_v48 = vrot.slane %v7958_v15, 7  ;;  %v2078_v6 = vrot.slane %v7959_v9, 7  ;;  %1711 = vrot.lane.b32.xlu0 %v6075_v19, %s4258_s20  ;;  %v6186_v20 = vpop.permute.xlu1 %1669  ;;  %v4193_v15 = vld [vmem:[#allocation2 + $0x188] sm:$0xff] }
 0x115   : > { %v2464_v0 = vsub.f32 0.0, %v2404_v55  ;;  %v6178_v45 = vsel %vm1265_vm3, %v1376_v7, %v1388_v41  ;;  %v7960_v47 = vrot.slane %v5860_v38, 7  ;;  %v2068_v1 = vrot.slane %v5871_v60, 7  ;;  %v6188_v55 = vpop.permute.xlu0 %1667 }
 0x116   : > { %v2458_v5 = vsub.f32 0.0, %v2398_v16  ;;  %v6191_v8 = vsel %vm1265_vm3, %v2066_v48, %v2078_v6  ;;  %v6194_v19 = vsel %vm1265_vm3, %v2054_v49, %v2066_v48  ;;  %v2080_v41 = vrot.slane %v6151_v32, 7  ;;  %v7963_v48 = vld [vmem:[#allocation33_spill] sm:$0xff] }
 0x117   : > { %v6183_v13 = vsel %vm1265_vm3, %v7960_v47, %v1376_v7  ;;  %v2554_v22 = vmul.f32 1.442695, %v2464_v0  ;;  %v3970_v40 = vpop.eup %3969  ;;  %v6198_v7 = vmul.f32 2.0, %v5959_v42  ;;  %v2297_v60 = vmul.f32 4.0, %v4193_v15  ;;  %v7964_v47 = vld [vmem:[#allocation36_spill] sm:$0xff] }
 0x118   : > { %v2542_v16 = vmul.f32 1.442695, %v2458_v5  ;;  %v6201_v0 = vsel %vm1265_vm3, %v2056_v33, %v2068_v1  ;;  %v3972_v9 = vpop.eup %3971  ;;  %1733 = vrot.lane.b32.xlu1 %v6178_v45, %s4258_s20  ;;  %v6206_v49 = vsel %vm1265_vm3, %v2068_v1, %v2080_v41  ;;  %v2090_v32 = vrot.slane %v7963_v48, 7  ;;  %1731 = vrot.lane.b32.xlu0 %v6183_v13, %s4258_s20  ;;  %v6216_v14 = vpop.permute.xlu1 %1689 }
 0x119   : > { %7961 = vst [vmem:[#allocation49_spill] sm:$0xff] %v6201_v0  ;;  %3977 = vpow2.f32 %v2554_v22  ;;  %7962 = vst [vmem:[#allocation50_spill] sm:$0xff] %v6206_v49  ;;  %v2102_v5 = vrot.slane %v7964_v47, 7  ;;  %v1622_v42 = vsel %vm1574_vm5, %v6129_v53, %v6153_v57  ;;  %v3662_v33 = vpack.c.bf16 %v3970_v40, %v3972_v9  ;;  %v4194_v22 = vld [vmem:[#allocation2 + $0x158] sm:$0xff]  ;;  %v6218_v1 = vpop.permute.xlu0 %1687 }
 0x11a   : > { %3979 = vpow2.f32 %v2542_v16  ;;  %v2291_v15 = vmul.f32 4.0, %v4194_v22  ;;  %v3974_v26 = vpop.eup %3973  ;;  %7965 = vst [vmem:[#allocation48_spill] sm:$0xff] %v6218_v1  ;;  %v6224_v16 = vsel %vm1265_vm3, %v2078_v6, %v2090_v32  ;;  %v2092_v47 = vrot.slane %v1921_v36, 7 }
 0x11b   : > { %v6221_v48 = vsel %vm1265_vm3, %v2090_v32, %v2102_v5  ;;  %7967 = vst [vmem:[#allocation43_spill] sm:$0xff] %v6224_v16  ;;  %v2104_v57 = vrot.slane %v6166_v56, 7  ;;  %v3976_v0 = vpop.eup %3975  ;;  %v2645_v49 = vadd.f32 1.0, %v3974_v26  ;;  %v1621_v40 = vsel %vm1574_vm5, %v6131_v52, %v6155_v34  ;;  %3663 = vmatpush1.bf16.msra.mxu0 %v3662_v33  ;;  %v7968_v26 = vld [vmem:[#allocation58_spill] sm:$0xff] }
 0x11c   : > { %7966 = vst [vmem:[#allocation41_spill] sm:$0xff] %v6221_v48  ;;  %v1793_v9 = vsel %vm1755_vm4, %v6186_v20, %v6216_v14  ;;  %v1792_v36 = vsel %vm1755_vm4, %v6188_v55, %v6218_v1  ;;  %v2639_v6 = vadd.f32 1.0, %v3976_v0  ;;  %1534 = vrot.lane.b32.xlu1 %v7968_v26, %s4257_s19  ;;  %v1939_v16 = vmul.f32 2.0, %v5977_v25  ;;  %v7970_v48 = vld [vmem:[#allocation55_spill] sm:$0xff]  ;;  %v7971_v34 = vld [vmem:[#allocation46_spill] sm:$0xff] }
 0x11d   : > { %v1859_v56 = vadd.f32 %v1793_v9, %v1622_v42  ;;  %v1853_v32 = vadd.f32 %v1792_v36, %v1621_v40  ;;  %v6242_v22 = vsel %vm1265_vm3, %v2092_v47, %v2104_v57  ;;  %3981 = vrcp.f32 %v2645_v49  ;;  %1532 = vrot.lane.b32.xlu0 %v7970_v48, %s4257_s19  ;;  %v6253_v40 = vpop.permute.xlu1 %1566  ;;  %v6255_v9 = vpop.permute.xlu0 %1564  ;;  %v7974_v49 = vld [vmem:[#allocation42_spill] sm:$0xff]  ;;  %v7976_v48 = vld [vmem:[#allocation52_spill] sm:$0xff] }
 0x11e   : > { %7969 = vst [vmem:[#allocation21_spill] sm:$0xff] %v6242_v22  ;;  %v6248_v33 = vsel %vm1265_vm3, %v2080_v41, %v2092_v47  ;;  %v2114_v1 = vrot.slane %v7971_v34, 7  ;;  %3983 = vrcp.f32 %v2639_v6  ;;  %7972 = vst [vmem:[#allocation22_spill] sm:$0xff] %v6253_v40  ;;  %v2126_v36 = vrot.slane %v7974_v49, 7  ;;  %v7975_v25 = vld [vmem:[#allocation54_spill] sm:$0xff]  ;;  %v4195_v41 = vld [vmem:[#allocation2 + $0x180] sm:$0xff] }
 0x11f   : > { %v2237_v0 = vadd.f32 %v5987_v43, %v1859_v56  ;;  %v2231_v42 = vadd.f32 %v5964_v54, %v1853_v32  ;;  %7973 = vst [vmem:[#allocation59_spill] sm:$0xff] %v6255_v9  ;;  %v6259_v26 = vmul.f32 2.0, %v7975_v25  ;;  %v6262_v22 = vmul.f32 2.0, %v7976_v48  ;;  %v7978_v54 = vld [vmem:[#allocation3_spill] sm:$0xff]  ;;  %v4196_v56 = vld [vmem:[#allocation2 + $0x150] sm:$0xff] }
 0x120   : > { %v2296_v47 = vmul.f32 4.0, %v4195_v41  ;;  %v6265_v34 = vsel %vm1265_vm3, %v2102_v5, %v2114_v1  ;;  %1737 = vrot.lane.b32.xlu1 %v7978_v54, %s4258_s20  ;;  %v2290_v32 = vmul.f32 4.0, %v4196_v56  ;;  %v6270_v49 = vsel %vm1265_vm3, %v2114_v1, %v2126_v36  ;;  %v7982_v54 = vld [vmem:[#allocation18_spill] sm:$0xff] }
 0x121   : > { %7977 = vst [vmem:[#allocation51_spill] sm:$0xff] %v6265_v34  ;;  %v2357_v43 = vadd.f32 %v2297_v60, %v2237_v0  ;;  %v2351_v6 = vadd.f32 %v2291_v15, %v2231_v42  ;;  %v1632_v25 = vsel %vm1574_vm5, %v6253_v40, %v6129_v53  ;;  %v1631_v5 = vsel %vm1574_vm5, %v6255_v9, %v6131_v52  ;;  %v7979_v60 = vld [vmem:[#allocation4_spill] sm:$0xff]  ;;  %v6283_v36 = vpop.permute.xlu1 %1649  ;;  %v6285_v41 = vpop.permute.xlu0 %1647 }
 0x122   : > { %1735 = vrot.lane.b32.xlu0 %v7979_v60, %s4258_s20  ;;  %v2116_v15 = vrot.slane %v6198_v7, 7  ;;  %v2128_v0 = vrot.slane %v1939_v16, 7  ;;  %7980 = vst [vmem:[#allocation27_spill] sm:$0xff] %v6283_v36  ;;  %7981 = vst [vmem:[#allocation28_spill] sm:$0xff] %v6285_v41  ;;  %v2021_v53 = vrot.slane %v6162_v44, 7  ;;  %v2024_v56 = vrot.slane %v7982_v54, 7 }
 0x123   : > { %v3978_v42 = vpop.eup %3977  ;;  %v2417_v48 = vmul.f32 0.05, %v2357_v43  ;;  %v2411_v1 = vmul.f32 0.05, %v2351_v6  ;;  %v1803_v52 = vsel %vm1755_vm4, %v6283_v36, %v6186_v20  ;;  %v1802_v7 = vsel %vm1755_vm4, %v6285_v41, %v6188_v55 }
 0x124   : > { %v3980_v40 = vpop.eup %3979  ;;  %v2644_v34 = vadd.f32 1.0, %v3978_v42  ;;  %v6298_v16 = vsel %vm1265_vm3, %v2116_v15, %v2128_v0  ;;  %v1858_v60 = vadd.f32 %v1803_v52, %v1632_v25  ;;  %1538 = vrot.lane.b32.xlu1 %v5663_v11, %s4257_s19  ;;  %v1852_v42 = vadd.f32 %v1802_v7, %v1631_v5 }
 0x125   : > { %v2638_v43 = vadd.f32 1.0, %v3980_v40  ;;  %v2477_v6 = vsub.f32 0.0, %v2417_v48  ;;  %v2471_v44 = vsub.f32 0.0, %v2411_v1  ;;  %v6305_v20 = vsel %vm1265_vm3, %v2104_v57, %v2116_v15  ;;  %v6309_v48 = vpop.permute.xlu1 %1470  ;;  %v6311_v25 = vpop.permute.xlu0 %1468  ;;  %v7984_v57 = vld [vmem:[#allocation20_spill] sm:$0xff] }
 0x126   : > { %3985 = vrcp.f32 %v2644_v34  ;;  %1536 = vrot.lane.b32.xlu0 %v5649_v23, %s4257_s19  ;;  %v2034_v55 = vrot.slane %v6259_v26, 7  ;;  %v2236_v40 = vadd.f32 %v6006_v17, %v1858_v60  ;;  %v7983_v34 = vld [vmem:[#allocation56_spill] sm:$0xff]  ;;  %v2230_v1 = vadd.f32 %v6011_v59, %v1852_v42  ;;  %v7985_v17 = vld [vmem:[#allocation7_spill] sm:$0xff] }
 0x127   : > { %3987 = vrcp.f32 %v2638_v43  ;;  %v2580_v0 = vmul.f32 1.442695, %v2477_v6  ;;  %v2568_v54 = vmul.f32 1.442695, %v2471_v44  ;;  %v3982_v11 = vpop.eup %3981  ;;  %v1898_v5 = vmul.f32 2.0, %v7983_v34  ;;  %v7986_v44 = vld [vmem:[#allocation8_spill] sm:$0xff] }
 0x128   : > { %v6316_v23 = vsel %vm1265_vm3, %v2021_v53, %v2034_v55  ;;  %v2036_v15 = vrot.slane %v7984_v57, 7  ;;  %v3984_v26 = vpop.eup %3983  ;;  %v1904_v52 = vmul.f32 2.0, %v5575_v27  ;;  %v2356_v7 = vadd.f32 %v2296_v47, %v2236_v40  ;;  %1741 = vrot.lane.b32.xlu1 %v7985_v17, %s4258_s20  ;;  %v7990_v17 = vld [vmem:[#allocation23_spill] sm:$0xff] }
 0x129   : > { %3989 = vpow2.f32 %v2580_v0  ;;  %v2020_v43 = vrot.slane %v6262_v22, 7  ;;  %v2350_v6 = vadd.f32 %v2290_v32, %v2230_v1  ;;  %v3664_v59 = vpack.c.bf16 %v3982_v11, %v3984_v26  ;;  %v6328_v34 = vpop.permute.xlu1 %1490  ;;  %v6330_v27 = vpop.permute.xlu0 %1488  ;;  %v7987_v0 = vld [vmem:[#allocation19_spill] sm:$0xff]  ;;  %v7988_v22 = vld [vmem:[#allocation9_spill] sm:$0xff] }
 0x12a   : > { %3991 = vpow2.f32 %v2568_v54  ;;  %1739 = vrot.lane.b32.xlu0 %v7986_v44, %s4258_s20  ;;  %v6326_v60 = vsel %vm1265_vm3, %v2024_v56, %v2036_v15  ;;  %v2416_v42 = vmul.f32 0.05, %v2356_v7  ;;  %v2023_v40 = vrot.slane %v7987_v0, 7  ;;  %v7989_v32 = vld [vmem:[#allocation11_spill] sm:$0xff] }
 0x12b   : > { %v6333_v47 = vsel %vm1265_vm3, %v2020_v43, %v2021_v53  ;;  %v1911_v54 = vmul.f32 2.0, %v7988_v22  ;;  %v6338_v1 = vmul.f32 2.0, %v7989_v32  ;;  %v1910_v11 = vmul.f32 2.0, %v5773_v28  ;;  %3665 = vmatprep.subr.bf16.mxu0 %v3664_v59  ;;  %v4197_v32 = vld [vmem:[#allocation2 + $0x1e8] sm:$0xff] }
 0x12c   : > { %v2410_v57 = vmul.f32 0.05, %v2350_v6  ;;  %v2476_v26 = vsub.f32 0.0, %v2416_v42  ;;  %1542 = vrot.lane.b32.xlu1 %v5876_v3, %s4257_s19  ;;  %v6344_v7 = vsel %vm1265_vm3, %v2023_v40, %v2024_v56  ;;  %v2046_v53 = vrot.slane %v1898_v5, 7  ;;  %v7991_v6 = vld [vmem:[#allocation26_spill] sm:$0xff] }
 0x12d   : > { %v2048_v43 = vrot.slane %v7990_v17, 7  ;;  %v6348_v44 = vmul.f32 2.0, %v5775_v30  ;;  %v2058_v28 = vrot.slane %v1904_v52, 7  ;;  %v2060_v59 = vrot.slane %v7991_v6, 7  ;;  %v6353_v22 = vpop.permute.xlu1 %1673  ;;  %v6355_v3 = vpop.permute.xlu0 %1671  ;;  %v7992_v17 = vld [vmem:[#allocation13_spill] sm:$0xff] }
 0x12e   : > { %v2470_v0 = vsub.f32 0.0, %v2410_v57  ;;  %1540 = vrot.lane.b32.xlu0 %v5881_v4, %s4257_s19  ;;  %v2578_v42 = vmul.f32 1.442695, %v2476_v26  ;;  %v6358_v56 = vsel %vm1265_vm3, %v2034_v55, %v2046_v53  ;;  %v2309_v57 = vmul.f32 4.0, %v4197_v32  ;;  %v4198_v55 = vld [vmem:[#allocation2 + $0x1b8] sm:$0xff] }
 0x12f   : > { %v6361_v5 = vsel %vm1265_vm3, %v2036_v15, %v2048_v43  ;;  %v6364_v4 = vsel %vm1265_vm3, %v2046_v53, %v2058_v28  ;;  %v6367_v52 = vsel %vm1265_vm3, %v2048_v43, %v2060_v59  ;;  %v2303_v6 = vmul.f32 4.0, %v4198_v55 }
 0x130   : > { %v3986_v30 = vpop.eup %3985  ;;  %v2566_v40 = vmul.f32 1.442695, %v2470_v0  ;;  %3993 = vpow2.f32 %v2578_v42  ;;  %1745 = vrot.lane.b32.xlu1 %v7992_v17, %s4258_s20  ;;  %v2070_v41 = vrot.slane %v1910_v11, 7  ;;  %v2072_v15 = vrot.slane %v1911_v54, 7  ;;  %v7993_v0 = vld [vmem:[#allocation14_spill] sm:$0xff] }
 0x131   : > { %v3988_v26 = vpop.eup %3987  ;;  %v7740_v53 = vrot.slane %v6348_v44, 7  ;;  %v1624_v42 = vsel %vm1574_vm5, %v6309_v48, %v6328_v34  ;;  %v1623_v54 = vsel %vm1574_vm5, %v6311_v25, %v6330_v27  ;;  %v6383_v11 = vpop.permute.xlu1 %1693 }
 0x132   : > { %3995 = vpow2.f32 %v2566_v40  ;;  %1743 = vrot.lane.b32.xlu0 %v7993_v0, %s4258_s20  ;;  %v3666_v32 = vpack.c.bf16 %v3986_v30, %v3988_v26  ;;  %v6385_v40 = vpop.permute.xlu0 %1691  ;;  %v6388_v30 = vsel %vm1265_vm3, %v2058_v28, %v2070_v41  ;;  %v6391_v26 = vsel %vm1265_vm3, %v2060_v59, %v2072_v15 }
 0x133   : > { %v3990_v43 = vpop.eup %3989  ;;  %7994 = vst [vmem:[#allocation33_spill] sm:$0xff] %v6388_v30  ;;  %7995 = vst [vmem:[#allocation36_spill] sm:$0xff] %v6391_v26  ;;  %v1795_v0 = vsel %vm1755_vm4, %v6353_v22, %v6383_v11  ;;  %v1794_v36 = vsel %vm1755_vm4, %v6355_v3, %v6385_v40  ;;  %v6404_v28 = vsel %vm1265_vm3, %v2070_v41, %v7740_v53 }
 0x134   : > { %v3992_v17 = vpop.eup %3991  ;;  %v2657_v55 = vadd.f32 1.0, %v3990_v43  ;;  %3667 = vmatpush1.bf16.msra.mxu0 %v3666_v32  ;;  %7996 = vst [vmem:[#allocation58_spill] sm:$0xff] %v6404_v28  ;;  %v1871_v9 = vadd.f32 %v1795_v0, %v1624_v42  ;;  %v1865_v26 = vadd.f32 %v1794_v36, %v1623_v54  ;;  %1546 = vrot.lane.b32.xlu1 %v5971_v37, %s4257_s19  ;;  %v7997_v43 = vrot.slane %v6338_v1, 7  ;;  %v8001_v42 = vld [vmem:[#allocation24_spill] sm:$0xff] }
 0x135   : > { %v2651_v59 = vadd.f32 1.0, %v3992_v17  ;;  %v6417_v17 = vpop.permute.xlu1 %1570  ;;  %v6422_v37 = vmul.f32 2.0, %v8001_v42  ;;  %v4223_v28 = vld [vmem:[#allocation2 + $0x88] sm:$0xff] }
 0x136   : > { %v6411_v32 = vsel %vm1265_vm3, %v2072_v15, %v7997_v43  ;;  %3997 = vrcp.f32 %v2657_v55  ;;  %1544 = vrot.lane.b32.xlu0 %v6001_v29, %s4257_s19  ;;  %v2249_v30 = vadd.f32 %v6032_v12, %v1871_v9  ;;  %v2243_v41 = vadd.f32 %v6025_v63, %v1865_v26  ;;  %7999 = vst [vmem:[#allocation46_spill] sm:$0xff] %v6417_v17  ;;  %v6419_v36 = vpop.permute.xlu0 %1568  ;;  %v8002_v15 = vld [vmem:[#allocation31_spill] sm:$0xff]  ;;  %v8003_v55 = vld [vmem:[#allocation25_spill] sm:$0xff]  ;;  %v8004_v29 = vld [vmem:[#allocation12_spill] sm:$0xff] }
 0x137   : > { %7998 = vst [vmem:[#allocation55_spill] sm:$0xff] %v6411_v32  ;;  %3999 = vrcp.f32 %v2651_v59  ;;  %8000 = vst [vmem:[#allocation42_spill] sm:$0xff] %v6419_v36  ;;  %v6427_v43 = vmul.f32 2.0, %v8003_v55  ;;  %v1922_v59 = vmul.f32 2.0, %v8004_v29  ;;  %v6431_v12 = vmul.f32 2.0, %v5860_v38  ;;  %v8005_v63 = vld [vmem:[#allocation30_spill] sm:$0xff] }
 0x138   : > { %v2369_v54 = vadd.f32 %v2309_v57, %v2249_v30  ;;  %v2363_v0 = vadd.f32 %v2303_v6, %v2243_v41  ;;  %1749 = vrot.lane.b32.xlu1 %v8002_v15, %s4258_s20  ;;  %v4199_v9 = vld [vmem:[#allocation2 + $0x1e0] sm:$0xff]  ;;  %v1634_v6 = vsel %vm1574_vm5, %v6417_v17, %v6309_v48  ;;  %v4200_v41 = vld [vmem:[#allocation2 + $0x1b0] sm:$0xff] }
 0x139   : > { %v2308_v26 = vmul.f32 4.0, %v4199_v9  ;;  %v6439_v30 = vpop.permute.xlu1 %1653  ;;  %v2302_v15 = vmul.f32 4.0, %v4200_v41  ;;  %v4222_v32 = vld [vmem:[#allocation2 + $0x80] sm:$0xff] }
 0x13a   : > { %1747 = vrot.lane.b32.xlu0 %v8005_v63, %s4258_s20  ;;  %v3994_v42 = vpop.eup %3993  ;;  %v2429_v53 = vmul.f32 0.05, %v2369_v54  ;;  %v2423_v57 = vmul.f32 0.05, %v2363_v0  ;;  %8006 = vst [vmem:[#allocation54_spill] sm:$0xff] %v6439_v30  ;;  %v6441_v55 = vpop.permute.xlu0 %1651  ;;  %v1633_v63 = vsel %vm1574_vm5, %v6419_v36, %v6311_v25  ;;  %v1805_v54 = vsel %vm1755_vm4, %v6439_v30, %v6353_v22 }
 0x13b   : > { %8007 = vst [vmem:[#allocation52_spill] sm:$0xff] %v6441_v55  ;;  %v2656_v29 = vadd.f32 1.0, %v3994_v42  ;;  %v1804_v48 = vsel %vm1755_vm4, %v6441_v55, %v6355_v3  ;;  %v1870_v17 = vadd.f32 %v1805_v54, %v1634_v6  ;;  %v2094_v25 = vrot.slane %v1922_v59, 7  ;;  %v8008_v6 = vld [vmem:[#allocation34_spill] sm:$0xff] }
 0x13c   : > { %v3996_v38 = vpop.eup %3995  ;;  %v2489_v9 = vsub.f32 0.0, %v2429_v53  ;;  %v2483_v41 = vsub.f32 0.0, %v2423_v57  ;;  %1550 = vrot.lane.b32.xlu1 %v6178_v45, %s4257_s19  ;;  %v1864_v42 = vadd.f32 %v1804_v48, %v1633_v63  ;;  %v2096_v22 = vrot.slane %v6422_v37, 7  ;;  %v8009_v48 = vld [vmem:[#allocation35_spill] sm:$0xff]  ;;  %v8010_v37 = vld [vmem:[#allocation44_spill] sm:$0xff] }
 0x13d   : > { %v2650_v0 = vadd.f32 1.0, %v3996_v38  ;;  %4001 = vrcp.f32 %v2656_v29  ;;  %v2248_v3 = vadd.f32 %v6051_v62, %v1870_v17  ;;  %v1495_v38 = vpop.permute.xlu1 %1494  ;;  %v1935_v54 = vmul.f32 2.0, %v8008_v6  ;;  %v8011_v17 = vld [vmem:[#allocation45_spill] sm:$0xff] }
 0x13e   : > { %1548 = vrot.lane.b32.xlu0 %v6183_v13, %s4257_s19  ;;  %v2604_v30 = vmul.f32 1.442695, %v2489_v9  ;;  %v2592_v36 = vmul.f32 1.442695, %v2483_v41  ;;  %v1493_v53 = vpop.permute.xlu0 %1492  ;;  %v2242_v45 = vadd.f32 %v6059_v58, %v1864_v42  ;;  %v7744_v29 = vrot.slane %v6431_v12, 7 }
 0x13f   : > { %4003 = vrcp.f32 %v2650_v0  ;;  %v1941_v13 = vmul.f32 2.0, %v8009_v48  ;;  %v2368_v59 = vadd.f32 %v2308_v26, %v2248_v3  ;;  %v2108_v0 = vrot.slane %v6427_v43, 7 }
 0x140   : > { %v3998_v57 = vpop.eup %3997  ;;  %4005 = vpow2.f32 %v2604_v30  ;;  %1753 = vrot.lane.b32.xlu1 %v8010_v37, %s4258_s20  ;;  %v2362_v62 = vadd.f32 %v2302_v15, %v2242_v45  ;;  %v6473_v58 = vsel %vm1265_vm3, %v2094_v25, %v7744_v29  ;;  %v8016_v3 = vrot.slane %v6338_v1, 7  ;;  %v8018_v37 = vld [vmem:[#allocation53_spill] sm:$0xff] }
 0x141   : > { %v4000_v63 = vpop.eup %3999  ;;  %4007 = vpow2.f32 %v2592_v36  ;;  %8012 = vst [vmem:[#allocation3_spill] sm:$0xff] %v6473_v58  ;;  %v2428_v41 = vmul.f32 0.05, %v2368_v59  ;;  %v6475_v42 = vpop.permute.xlu1 %1514  ;;  %v6480_v30 = vsel %vm1265_vm3, %v2096_v22, %v2108_v0  ;;  %v8014_v36 = vrot.slane %v6348_v44, 7  ;;  %v4201_v44 = vld [vmem:[#allocation2 + $0x70] sm:$0xff] }
 0x142   : > { %1751 = vrot.lane.b32.xlu0 %v8011_v17, %s4258_s20  ;;  %v3668_v9 = vpack.c.bf16 %v3998_v57, %v4000_v63  ;;  %v6477_v26 = vpop.permute.xlu0 %1512  ;;  %8013 = vst [vmem:[#allocation4_spill] sm:$0xff] %v6480_v30  ;;  %v2422_v15 = vmul.f32 0.05, %v2362_v62  ;;  %v6490_v57 = vsel %vm1265_vm3, %v8016_v3, %v2096_v22  ;;  %v2120_v63 = vrot.slane %v1935_v54, 7 }
 0x143   : > { %v6485_v43 = vsel %vm1265_vm3, %v8014_v36, %v2094_v25  ;;  %8017 = vst [vmem:[#allocation56_spill] sm:$0xff] %v6490_v57  ;;  %v2488_v6 = vsub.f32 0.0, %v2428_v41  ;;  %v2132_v48 = vrot.slane %v1941_v13, 7  ;;  %v1606_v17 = vsel %vm1574_vm5, %v8018_v37, %v1495_v38  ;;  %v4202_v36 = vld [vmem:[#allocation2 + $0x40] sm:$0xff]  ;;  %v8020_v41 = vld [vmem:[#allocation57_spill] sm:$0xff]  ;;  %v8021_v13 = vld [vmem:[#allocation60_spill] sm:$0xff] }
 0x144   : > { %8015 = vst [vmem:[#allocation18_spill] sm:$0xff] %v6485_v43  ;;  %3669 = vmatprep.subr.bf16.mxu0 %v3668_v9  ;;  %v2482_v45 = vsub.f32 0.0, %v2422_v15  ;;  %v2262_v29 = vmul.f32 4.0, %v4201_v44  ;;  %v2256_v62 = vmul.f32 4.0, %v4202_v36  ;;  %v8019_v43 = vld [vmem:[#allocation47_spill] sm:$0xff] }
 0x145   : > { %v2602_v59 = vmul.f32 1.442695, %v2488_v6  ;;  %v1698_v25 = vpop.permute.xlu1 %1697  ;;  %v1605_v22 = vsel %vm1574_vm5, %v8019_v43, %v1493_v53  ;;  %v6505_v44 = vsel %vm1265_vm3, %v2120_v63, %v2132_v48 }
 0x146   : > { %v1696_v9 = vpop.permute.xlu0 %1695  ;;  %v2590_v1 = vmul.f32 1.442695, %v2482_v45  ;;  %v1777_v54 = vsel %vm1755_vm4, %v8020_v41, %v1698_v25  ;;  %8022 = vst [vmem:[#allocation20_spill] sm:$0xff] %v6505_v44  ;;  %v4203_v45 = vld [vmem:[#allocation2 + $0x78] sm:$0xff]  ;;  %v1596_v41 = vsel %vm1574_vm5, %v1495_v38, %v6475_v42 }
 0x147   : > { %v4002_v55 = vpop.eup %4001  ;;  %v1776_v15 = vsel %vm1755_vm4, %v8021_v13, %v1696_v9  ;;  %4009 = vpow2.f32 %v2602_v59  ;;  %v1824_v6 = vadd.f32 %v1777_v54, %v1606_v17  ;;  %v2263_v36 = vmul.f32 4.0, %v4203_v45 }
 0x148   : > { %v1818_v37 = vadd.f32 %v1776_v15, %v1605_v22  ;;  %4011 = vpow2.f32 %v2590_v1  ;;  %v1595_v13 = vsel %vm1574_vm5, %v1493_v53, %v6477_v26  ;;  %v6526_v53 = vsel %vm1265_vm3, %v2108_v0, %v2120_v63 }
 0x149   : > { %v4004_v3 = vpop.eup %4003  ;;  %v2202_v59 = vadd.f32 %v6087_v46, %v1824_v6  ;;  %v6515_v22 = vpop.permute.xlu1 %1717  ;;  %8023 = vst [vmem:[#allocation7_spill] sm:$0xff] %v6526_v53  ;;  %v4204_v6 = vld [vmem:[#allocation2 + $0x48] sm:$0xff] }
 0x14a   : > { %v3670_v57 = vpack.c.bf16 %v4002_v55, %v4004_v3  ;;  %v4006_v43 = vpop.eup %4005  ;;  %v2196_v17 = vadd.f32 %v6096_v2, %v1818_v37  ;;  %v6517_v48 = vpop.permute.xlu0 %1715  ;;  %v1767_v55 = vsel %vm1755_vm4, %v1698_v25, %v6515_v22  ;;  %v2257_v37 = vmul.f32 4.0, %v4204_v6 }
 0x14b   : > { %v4008_v1 = vpop.eup %4007  ;;  %v2669_v54 = vadd.f32 1.0, %v4006_v43  ;;  %v1766_v38 = vsel %vm1755_vm4, %v1696_v9, %v6517_v48  ;;  %v2322_v2 = vadd.f32 %v2262_v29, %v2202_v59  ;;  %v1825_v3 = vadd.f32 %v1767_v55, %v1596_v41 }
 0x14c   : > { %3671 = vmatpush1.bf16.msra.mxu0 %v3670_v57  ;;  %v2663_v46 = vadd.f32 1.0, %v4008_v1  ;;  %v2316_v15 = vadd.f32 %v2256_v62, %v2196_v17  ;;  %v1819_v45 = vadd.f32 %v1766_v38, %v1595_v13 }
 0x14d   : > { %4013 = vrcp.f32 %v2669_v54  ;;  %v2382_v43 = vmul.f32 0.05, %v2322_v2  ;;  %v2203_v57 = vadd.f32 %v6118_v51, %v1825_v3  ;;  %v1499_v25 = vpop.permute.xlu1 %1498  ;;  %v4205_v2 = vld [vmem:[#allocation2 + $0xd0] sm:$0xff]  ;;  %v8025_v3 = vld [vmem:[#allocation6_spill] sm:$0xff] }
 0x14e   : > { %4015 = vrcp.f32 %v2663_v46  ;;  %v2376_v44 = vmul.f32 0.05, %v2316_v15  ;;  %v1497_v30 = vpop.permute.xlu0 %1496  ;;  %v2197_v9 = vadd.f32 %v6125_v21, %v1819_v45  ;;  %v8024_v15 = vld [vmem:[#allocation5_spill] sm:$0xff] }
 0x14f   : > { %v2442_v58 = vsub.f32 0.0, %v2382_v43  ;;  %v2323_v63 = vadd.f32 %v2263_v36, %v2203_v57  ;;  %v1607_v6 = vsel %vm1574_vm5, %v8025_v3, %v1497_v30 }
 0x150   : > { %v2436_v0 = vsub.f32 0.0, %v2376_v44  ;;  %v2317_v1 = vadd.f32 %v2257_v37, %v2197_v9  ;;  %v2274_v44 = vmul.f32 4.0, %v4205_v2  ;;  %v8026_v9 = vld [vmem:[#allocation65_spill] sm:$0xff] }
 0x151   : > { %v4010_v29 = vpop.eup %4009  ;;  %v2510_v62 = vmul.f32 1.442695, %v2442_v58  ;;  %v2383_v41 = vmul.f32 0.05, %v2323_v63  ;;  %v6530_v59 = vpop.permute.xlu1 %1518  ;;  %v1608_v58 = vsel %vm1574_vm5, %v8024_v15, %v1499_v25  ;;  %v8027_v63 = vld [vmem:[#allocation66_spill] sm:$0xff]  ;;  %v4208_v15 = vld [vmem:[#allocation2 + $0xa8] sm:$0xff] }
 0x152   : > { %v6532_v17 = vpop.permute.xlu0 %1516  ;;  %v4012_v13 = vpop.eup %4011  ;;  %v2668_v54 = vadd.f32 1.0, %v4010_v29  ;;  %v2498_v55 = vmul.f32 1.442695, %v2436_v0  ;;  %v2377_v38 = vmul.f32 0.05, %v2317_v1  ;;  %v2269_v3 = vmul.f32 4.0, %v4208_v15 }
 0x153   : > { %v2662_v51 = vadd.f32 1.0, %v4012_v13  ;;  %4017 = vpow2.f32 %v2510_v62  ;;  %v2443_v46 = vsub.f32 0.0, %v2383_v41  ;;  %v4206_v41 = vld [vmem:[#allocation2 + $0xa0] sm:$0xff] }
 0x154   : > { %4019 = vrcp.f32 %v2668_v54  ;;  %v2437_v21 = vsub.f32 0.0, %v2377_v38  ;;  %v2268_v13 = vmul.f32 4.0, %v4206_v41 }
 0x155   : > { %4021 = vrcp.f32 %v2662_v51  ;;  %v2512_v36 = vmul.f32 1.442695, %v2443_v46  ;;  %v1702_v37 = vpop.permute.xlu1 %1701  ;;  %v4207_v46 = vld [vmem:[#allocation2 + $0xd8] sm:$0xff] }
 0x156   : > { %v1700_v45 = vpop.permute.xlu0 %1699  ;;  %4023 = vpow2.f32 %v2498_v55  ;;  %v2500_v57 = vmul.f32 1.442695, %v2437_v21  ;;  %v1779_v0 = vsel %vm1755_vm4, %v8026_v9, %v1702_v37  ;;  %v2275_v21 = vmul.f32 4.0, %v4207_v46 }
 0x157   : > { %v4014_v43 = vpop.eup %4013  ;;  %v1778_v1 = vsel %vm1755_vm4, %v8027_v63, %v1700_v45  ;;  %4025 = vpow2.f32 %v2512_v36  ;;  %v1836_v62 = vadd.f32 %v1779_v0, %v1608_v58  ;;  %v1598_v36 = vsel %vm1574_vm5, %v1499_v25, %v6530_v59 }
 0x158   : > { %v4016_v29 = vpop.eup %4015  ;;  %v1830_v54 = vadd.f32 %v1778_v1, %v1607_v6  ;;  %4027 = vpow2.f32 %v2500_v57  ;;  %v1597_v58 = vsel %vm1574_vm5, %v1497_v30, %v6532_v17 }
 0x159   : > { %v3672_v38 = vpack.c.bf16 %v4014_v43, %v4016_v29  ;;  %v2214_v51 = vadd.f32 %v6148_v24, %v1836_v62  ;;  %v6548_v2 = vpop.permute.xlu1 %1721 }
 0x15a   : > { %v2208_v55 = vadd.f32 %v6137_v18, %v1830_v54  ;;  %v6550_v9 = vpop.permute.xlu0 %1719  ;;  %v1769_v18 = vsel %vm1755_vm4, %v1702_v37, %v6548_v2 }
 0x15b   : > { %3673 = vmatprep.subr.bf16.mxu0 %v3672_v38  ;;  %v1768_v24 = vsel %vm1755_vm4, %v1700_v45, %v6550_v9  ;;  %v2334_v6 = vadd.f32 %v2274_v44, %v2214_v51  ;;  %v1837_v57 = vadd.f32 %v1769_v18, %v1598_v36 }
 0x15c   : > { %v2328_v43 = vadd.f32 %v2268_v13, %v2208_v55  ;;  %v1831_v0 = vadd.f32 %v1768_v24, %v1597_v58 }
 0x15d   : > { %v4018_v63 = vpop.eup %4017  ;;  %v2394_v1 = vmul.f32 0.05, %v2334_v6  ;;  %v2215_v29 = vadd.f32 %v6171_v10, %v1837_v57  ;;  %v1503_v62 = vpop.permute.xlu1 %1502 }
 0x15e   : > { %v2388_v25 = vmul.f32 0.05, %v2328_v43  ;;  %v2209_v30 = vadd.f32 %v6159_v35, %v1831_v0  ;;  %v1501_v41 = vpop.permute.xlu0 %1500  ;;  %v4020_v54 = vpop.eup %4019  ;;  %v2622_v37 = vadd.f32 1.0, %v4018_v63  ;;  %v1610_v63 = vsel %vm1574_vm5, %v5955_v50, %v1503_v62  ;;  %v2735_v50 = vld [vmem:[%s7650_s1 + $0x8] sm:$0xff] }
 0x15f   : > { %v4022_v38 = vpop.eup %4021  ;;  %v2454_v46 = vsub.f32 0.0, %v2394_v1  ;;  %v2335_v53 = vadd.f32 %v2275_v21, %v2215_v29  ;;  %v2734_v21 = vld [vmem:[%s7650_s1] sm:$0xff]  ;;  %v4209_v1 = vld [vmem:[#allocation2 + $0x130] sm:$0xff] }
 0x160   : > { %v2448_v15 = vsub.f32 0.0, %v2388_v25  ;;  %v2329_v45 = vadd.f32 %v2269_v3, %v2209_v30  ;;  %v4024_v44 = vpop.eup %4023  ;;  %v3674_v13 = vpack.c.bf16 %v4020_v54, %v4022_v38  ;;  %4029 = vrcp.f32 %v2622_v37  ;;  %v6580_v38 = vld [vmem:[#allocation2 + $0x8] sm:$0xff] }
 0x161   : > { %v4026_v51 = vpop.eup %4025  ;;  %v2616_v55 = vadd.f32 1.0, %v4024_v44  ;;  %v2534_v36 = vmul.f32 1.442695, %v2454_v46  ;;  %v6566_v58 = vpop.permute.xlu1 %1522  ;;  %v2395_v24 = vmul.f32 0.05, %v2335_v53  ;;  %v2286_v25 = vmul.f32 4.0, %v4209_v1 }
 0x162   : > { %8028 = vst [vmem:[#allocation8_spill] sm:$0xff] %v6566_v58  ;;  %v6568_v10 = vpop.permute.xlu0 %1520  ;;  %v4028_v35 = vpop.eup %4027  ;;  %v2623_v18 = vadd.f32 1.0, %v4026_v51  ;;  %v2389_v6 = vmul.f32 0.05, %v2329_v45  ;;  %3675 = vmatpush1.bf16.msra.mxu0 %v3674_v13  ;;  %v2522_v43 = vmul.f32 1.442695, %v2448_v15  ;;  %v1609_v46 = vsel %vm1574_vm5, %v5957_v61, %v1501_v41 }
 0x163   : > { %8029 = vst [vmem:[#allocation19_spill] sm:$0xff] %v6568_v10  ;;  %4031 = vrcp.f32 %v2616_v55  ;;  %v2617_v3 = vadd.f32 1.0, %v4028_v35  ;;  %v2455_v57 = vsub.f32 0.0, %v2395_v24  ;;  %v8030_v45 = vld [vmem:[#allocation29_spill] sm:$0xff]  ;;  %v1600_v55 = vsel %vm1574_vm5, %v1503_v62, %v6566_v58  ;;  %v4212_v35 = vld [vmem:[#allocation2 + $0x138] sm:$0xff] }
 0x164   : > { %4033 = vrcp.f32 %v2623_v18  ;;  %v2449_v0 = vsub.f32 0.0, %v2389_v6  ;;  %v2287_v18 = vmul.f32 4.0, %v4212_v35  ;;  %v1599_v6 = vsel %vm1574_vm5, %v1501_v41, %v6568_v10  ;;  %v4213_v41 = vld [vmem:[#allocation2 + $0x108] sm:$0xff]  ;;  %v4234_v10 = vld [vmem:[#allocation2 + $0x1a0] sm:$0xff] }
 0x165   : > { %4035 = vrcp.f32 %v2617_v3  ;;  %v1706_v53 = vpop.permute.xlu1 %1705  ;;  %3639 = vmatmul.mubr.msk.f32.vlgmr.msra.gmra.mrb[0].mxu0 %vm253_vm0, %v2734_v21  ;;  %v2536_v30 = vmul.f32 1.442695, %v2455_v57  ;;  %v2736_v3 = vld [vmem:[%s7650_s1 + $0x10] sm:$0xff] }
 0x166   : > { %v1704_v29 = vpop.permute.xlu0 %1703  ;;  %4037 = vpow2.f32 %v2534_v36  ;;  %v2524_v54 = vmul.f32 1.442695, %v2449_v0  ;;  %v1781_v37 = vsel %vm1755_vm4, %v6027_v39, %v1706_v53  ;;  %2824 = vmatprep.mubr.f32.mxu0 %v6580_v38  ;;  %v4211_v39 = vld [vmem:[#allocation2 + $0x100] sm:$0xff] }
 0x167   : > { %4039 = vpow2.f32 %v2522_v43  ;;  %v1848_v15 = vadd.f32 %v1781_v37, %v1610_v63  ;;  %v1780_v44 = vsel %vm1755_vm4, %v8030_v45, %v1704_v29  ;;  %v2280_v13 = vmul.f32 4.0, %v4211_v39  ;;  %v4214_v39 = vld [vmem:[#allocation2 + $0x190] sm:$0xff] }
 0x168   : > { %4041 = vpow2.f32 %v2536_v30  ;;  %v1842_v51 = vadd.f32 %v1780_v44, %v1609_v46  ;;  %v2281_v63 = vmul.f32 4.0, %v4213_v41  ;;  %v4217_v41 = vld [vmem:[#allocation2 + $0x168] sm:$0xff] }
 0x169   : > { %4043 = vpow2.f32 %v2524_v54  ;;  %v2226_v36 = vadd.f32 %v6191_v8, %v1848_v15  ;;  %v6596_v24 = vpop.permute.xlu1 %1725  ;;  %3640 = vmatmul.mubr.msk.f32.gmra.mrb[2].mxu0 %vm253_vm0, %v2735_v50  ;;  %v8034_v50 = vld [vmem:[#allocation49_spill] sm:$0xff] }
 0x16a   : > { %8031 = vst [vmem:[#allocation9_spill] sm:$0xff] %v6596_v24  ;;  %v6598_v61 = vpop.permute.xlu0 %1723  ;;  %v2220_v21 = vadd.f32 %v6194_v19, %v1842_v51  ;;  %v1771_v62 = vsel %vm1755_vm4, %v1706_v53, %v6596_v24  ;;  %2830 = vmatprep.mubr.f32.mxu0 %v6580_v38  ;;  %v4030_v43 = vpop.eup %4029  ;;  %v8033_v53 = vld [vmem:[#allocation50_spill] sm:$0xff]  ;;  %v6622_v51 = vmul.f32 4.0, %v4214_v39  ;;  %v6653_v24 = vmul.f32 4.0, %v4223_v28  ;;  %v8038_v28 = vld [vmem:[#allocation17_spill] sm:$0xff] }
 0x16b   : > { %8032 = vst [vmem:[#allocation11_spill] sm:$0xff] %v6598_v61  ;;  %v1770_v8 = vsel %vm1755_vm4, %v1704_v29, %v6598_v61  ;;  %v2346_v57 = vadd.f32 %v2286_v25, %v2226_v36  ;;  %v1849_v0 = vadd.f32 %v1771_v62, %v1600_v55  ;;  %v6651_v61 = vmul.f32 4.0, %v4222_v32 }
 0x16c   : > { %v1843_v19 = vadd.f32 %v1770_v8, %v1599_v6  ;;  %v2340_v1 = vadd.f32 %v2280_v13, %v2220_v21  ;;  %v2737_v13 = vld [vmem:[%s7650_s1 + $0x18] sm:$0xff]  ;;  %v4215_v21 = vld [vmem:[#allocation2 + $0x160] sm:$0xff] }
 0x16d   : > { %v4032_v30 = vpop.eup %4031  ;;  %v2406_v54 = vmul.f32 0.05, %v2346_v57  ;;  %v2227_v37 = vadd.f32 %v8033_v53, %v1849_v0  ;;  %v6617_v29 = vpop.permute.xlu1 %1506  ;;  %3641 = vmatmul.mubr.msk.f32.gmra.mrb[4].mxu0 %vm253_vm0, %v2736_v3  ;;  %v6628_v62 = vmul.f32 4.0, %v4215_v21 }
 0x16e   : > { %v2221_v46 = vadd.f32 %v8034_v50, %v1843_v19  ;;  %v6619_v15 = vpop.permute.xlu0 %1504  ;;  %v4034_v45 = vpop.eup %4033  ;;  %v2400_v44 = vmul.f32 0.05, %v2340_v1  ;;  %v3678_v25 = vpack.c.bf16 %v4030_v43, %v4032_v30  ;;  %2836 = vmatprep.mubr.f32.mxu0 %v6580_v38  ;;  %v4216_v43 = vld [vmem:[#allocation2 + $0x198] sm:$0xff]  ;;  %v6632_v19 = vmul.f32 4.0, %v4217_v41 }
 0x16f   : > { %v4036_v55 = vpop.eup %4035  ;;  %v2466_v36 = vsub.f32 0.0, %v2406_v54  ;;  %v2347_v35 = vadd.f32 %v2287_v18, %v2227_v37  ;;  %v6630_v0 = vmul.f32 4.0, %v4216_v43  ;;  %v4218_v18 = vld [vmem:[#allocation2 + $0x1f0] sm:$0xff]  ;;  %v4219_v37 = vld [vmem:[#allocation2 + $0x1c0] sm:$0xff]  ;;  %v1611_v32 = vsel %vm1574_vm5, %v8038_v28, %v6619_v15 }
 0x170   : > { %v2341_v6 = vadd.f32 %v2281_v63, %v2221_v46  ;;  %v4038_v8 = vpop.eup %4037  ;;  %v2460_v3 = vsub.f32 0.0, %v2400_v44  ;;  %v3676_v57 = vpack.c.bf16 %v4034_v45, %v4036_v55  ;;  %v6638_v63 = vmul.f32 4.0, %v4218_v18  ;;  %v4220_v55 = vld [vmem:[#allocation2 + $0x1f8] sm:$0xff]  ;;  %v2738_v43 = vld [vmem:[%s7650_s1 + $0x20] sm:$0xff] }
 0x171   : > { %v4040_v1 = vpop.eup %4039  ;;  %v2634_v30 = vadd.f32 1.0, %v4038_v8  ;;  %v2407_v53 = vmul.f32 0.05, %v2347_v35  ;;  %v6634_v50 = vpop.permute.xlu1 %1526  ;;  %v6640_v46 = vmul.f32 4.0, %v4219_v37  ;;  %3642 = vmatmul.mubr.msk.f32.gmra.mrb[6].mxu0 %vm253_vm0, %v2737_v13  ;;  %v6643_v21 = vmul.f32 4.0, %v4220_v55  ;;  %v4221_v35 = vld [vmem:[#allocation2 + $0x1c8] sm:$0xff] }
 0x172   : > { %8035 = vst [vmem:[#allocation23_spill] sm:$0xff] %v6634_v50  ;;  %v6636_v54 = vpop.permute.xlu0 %1524  ;;  %v4042_v45 = vpop.eup %4041  ;;  %v2628_v44 = vadd.f32 1.0, %v4040_v1  ;;  %v2401_v39 = vmul.f32 0.05, %v2341_v6  ;;  %3677 = vmatprep.subr.bf16.mxu0 %v3676_v57  ;;  %v6645_v8 = vmul.f32 4.0, %v4221_v35  ;;  %2842 = vmatprep.mubr.f32.mxu0 %v6580_v38  ;;  %v8042_v28 = vld [vmem:[#allocation43_spill] sm:$0xff] }
 0x173   : > { %8036 = vst [vmem:[#allocation26_spill] sm:$0xff] %v6636_v54  ;;  %v4044_v41 = vpop.eup %4043  ;;  %4045 = vrcp.f32 %v2634_v30  ;;  %v2635_v18 = vadd.f32 1.0, %v4042_v45  ;;  %v2558_v13 = vmul.f32 1.442695, %v2466_v36  ;;  %v2467_v37 = vsub.f32 0.0, %v2407_v53  ;;  %3679 = vmatpush1.bf16.msra.mxu0 %v3678_v25  ;;  %v8037_v36 = vld [vmem:[#allocation16_spill] sm:$0xff] }
 0x174   : > { %4047 = vrcp.f32 %v2628_v44  ;;  %v2629_v6 = vadd.f32 1.0, %v4044_v41  ;;  %v2546_v57 = vmul.f32 1.442695, %v2460_v3  ;;  %v2461_v1 = vsub.f32 0.0, %v2401_v39  ;;  %v8039_v44 = vld [vmem:[#allocation48_spill] sm:$0xff]  ;;  %v4224_v41 = vld [vmem:[#allocation2 + $0x50] sm:$0xff] }
 0x175   : > { %4049 = vrcp.f32 %v2635_v18  ;;  %v2560_v55 = vmul.f32 1.442695, %v2467_v37  ;;  %v1710_v35 = vpop.permute.xlu1 %1709  ;;  %3643 = vmatmul.mubr.msk.f32.gmra.mrb[8].mxu0 %vm253_vm0, %v2738_v43  ;;  %v1612_v25 = vsel %vm1574_vm5, %v8037_v36, %v6617_v29  ;;  %v6671_v18 = vmul.f32 4.0, %v4224_v41 }
 0x176   : > { %4051 = vrcp.f32 %v2629_v6  ;;  %v2548_v30 = vmul.f32 1.442695, %v2461_v1  ;;  %v1783_v3 = vsel %vm1755_vm4, %v6216_v14, %v1710_v35  ;;  %v1708_v53 = vpop.permute.xlu0 %1707  ;;  %2913 = vmatprep.mubr.f32.mxu0 %v6580_v38  ;;  %v4225_v14 = vld [vmem:[#allocation2 + $0x58] sm:$0xff]  ;;  %v8040_v38 = vld [vmem:[#allocation41_spill] sm:$0xff]  ;;  %v4226_v1 = vld [vmem:[#allocation2 + $0xe0] sm:$0xff] }
 0x177   : > { %4053 = vpow2.f32 %v2558_v13  ;;  %v1860_v45 = vadd.f32 %v1783_v3, %v1612_v25  ;;  %v1782_v39 = vsel %vm1755_vm4, %v8039_v44, %v1708_v53  ;;  %v6673_v37 = vmul.f32 4.0, %v4225_v14  ;;  %v4227_v25 = vld [vmem:[#allocation2 + $0xe8] sm:$0xff]  ;;  %v4228_v14 = vld [vmem:[#allocation2 + $0xb0] sm:$0xff] }
 0x178   : > { %4055 = vpow2.f32 %v2546_v57  ;;  %v1854_v43 = vadd.f32 %v1782_v39, %v1611_v32  ;;  %v6678_v36 = vmul.f32 4.0, %v4226_v1  ;;  %v6680_v3 = vmul.f32 4.0, %v4227_v25 }
 0x179   : > { %4057 = vpow2.f32 %v2560_v55  ;;  %v2238_v13 = vadd.f32 %v8040_v38, %v1860_v45  ;;  %v6676_v6 = vpop.permute.xlu1 %1729  ;;  %v1602_v57 = vsel %vm1574_vm5, %v6617_v29, %v6634_v50  ;;  %v1601_v44 = vsel %vm1574_vm5, %v6619_v15, %v6636_v54  ;;  %v8050_v50 = vld [vmem:[#allocation40_spill] sm:$0xff] }
 0x17a   : > { %8041 = vst [vmem:[#allocation13_spill] sm:$0xff] %v6676_v6  ;;  %4059 = vpow2.f32 %v2548_v30  ;;  %v2232_v32 = vadd.f32 %v8042_v28, %v1854_v43  ;;  %v1773_v55 = vsel %vm1755_vm4, %v1710_v35, %v6676_v6  ;;  %v6690_v45 = vpop.permute.xlu0 %1727  ;;  %v6701_v38 = vmul.f32 4.0, %v4228_v14  ;;  %v4229_v35 = vld [vmem:[#allocation2 + $0xb8] sm:$0xff]  ;;  %v8045_v6 = vld [vmem:[#allocation21_spill] sm:$0xff] }
 0x17b   : > { %8043 = vst [vmem:[#allocation14_spill] sm:$0xff] %v6690_v45  ;;  %v2358_v30 = vadd.f32 %v6622_v51, %v2238_v13  ;;  %v1861_v39 = vadd.f32 %v1773_v55, %v1602_v57  ;;  %v1772_v29 = vsel %vm1755_vm4, %v1708_v53, %v6690_v45  ;;  %v6703_v1 = vmul.f32 4.0, %v4229_v35  ;;  %v4230_v51 = vld [vmem:[#allocation2 + $0x140] sm:$0xff]  ;;  %v4231_v57 = vld [vmem:[#allocation2 + $0x148] sm:$0xff] }
 0x17c   : > { %v2352_v43 = vadd.f32 %v6628_v62, %v2232_v32  ;;  %v1855_v41 = vadd.f32 %v1772_v29, %v1601_v44  ;;  %v6708_v13 = vmul.f32 4.0, %v4230_v51  ;;  %v6710_v53 = vmul.f32 4.0, %v4231_v57  ;;  %v4232_v29 = vld [vmem:[#allocation2 + $0x110] sm:$0xff] }
 0x17d   : > { %8044 = vst [vmem:[#allocation24_spill] sm:$0xff] %v6703_v1  ;;  %v4046_v25 = vpop.eup %4045  ;;  %v2418_v28 = vmul.f32 0.05, %v2358_v30  ;;  %v2239_v15 = vadd.f32 %v8045_v6, %v1861_v39  ;;  %v6715_v14 = vmul.f32 4.0, %v4232_v29  ;;  %v8049_v30 = vld [vmem:[#allocation37_spill] sm:$0xff]  ;;  %v1940_v57 = vmul.f32 2.0, %v8050_v50 }
 0x17e   : > { %v6706_v54 = vpop.permute.xlu1 %1510  ;;  %8046 = vst [vmem:[#allocation31_spill] sm:$0xff] %v6708_v13  ;;  %8047 = vst [vmem:[#allocation25_spill] sm:$0xff] %v6710_v53  ;;  %v4048_v62 = vpop.eup %4047  ;;  %v2412_v32 = vmul.f32 0.05, %v2352_v43  ;;  %v2233_v55 = vadd.f32 %v6248_v33, %v1855_v41  ;;  %v6718_v35 = vmul.f32 2.0, %v8049_v30  ;;  %v4233_v33 = vld [vmem:[#allocation2 + $0x118] sm:$0xff] }
 0x17f   : > { %v6713_v44 = vpop.permute.xlu0 %1508  ;;  %8048 = vst [vmem:[#allocation12_spill] sm:$0xff] %v6715_v14  ;;  %v4050_v6 = vpop.eup %4049  ;;  %v2478_v39 = vsub.f32 0.0, %v2418_v28  ;;  %v2359_v51 = vadd.f32 %v6630_v0, %v2239_v15  ;;  %v3682_v45 = vpack.c.bf16 %v4046_v25, %v4048_v62  ;;  %v6723_v41 = vmul.f32 4.0, %v4233_v33  ;;  %v4235_v0 = vld [vmem:[#allocation2 + $0x1a8] sm:$0xff] }
 0x180   : > { %v4052_v53 = vpop.eup %4051  ;;  %v2472_v13 = vsub.f32 0.0, %v2412_v32  ;;  %v2353_v43 = vadd.f32 %v6632_v19, %v2233_v55  ;;  %v6725_v29 = vmul.f32 4.0, %v4234_v10  ;;  %v6729_v25 = vmul.f32 4.0, %v4235_v0  ;;  %v4236_v19 = vld [vmem:[#allocation2 + $0x170] sm:$0xff] }
 0x181   : > { %8051 = vst [vmem:[#allocation30_spill] sm:$0xff] %v6723_v41  ;;  %v4054_v14 = vpop.eup %4053  ;;  %v2582_v30 = vmul.f32 1.442695, %v2478_v39  ;;  %v2419_v58 = vmul.f32 0.05, %v2359_v51  ;;  %v3680_v28 = vpack.c.bf16 %v4050_v6, %v4052_v53  ;;  %v6733_v55 = vmul.f32 4.0, %v4236_v19 }
 0x182   : > { %8052 = vst [vmem:[#allocation34_spill] sm:$0xff] %v6725_v29  ;;  %v6727_v1 = vpop.permute.xlu1 %1530  ;;  %8053 = vst [vmem:[#allocation35_spill] sm:$0xff] %v6729_v25  ;;  %v4056_v50 = vpop.eup %4055  ;;  %v2646_v15 = vadd.f32 1.0, %v4054_v14  ;;  %v2413_v62 = vmul.f32 0.05, %v2353_v43  ;;  %v2118_v10 = vrot.slane %v6718_v35, 7 }
 0x183   : > { %v6731_v32 = vpop.permute.xlu0 %1528  ;;  %8054 = vst [vmem:[#allocation44_spill] sm:$0xff] %v6733_v55  ;;  %v4058_v33 = vpop.eup %4057  ;;  %v2640_v29 = vadd.f32 1.0, %v4056_v50  ;;  %4061 = vpow2.f32 %v2582_v30  ;;  %v2479_v39 = vsub.f32 0.0, %v2419_v58  ;;  %3681 = vmatprep.subr.bf16.mxu0 %v3680_v28  ;;  %v2130_v51 = vrot.slane %v1940_v57, 7  ;;  %v4237_v19 = vld [vmem:[#allocation2 + $0x178] sm:$0xff] }
 0x184   : > { %v4060_v53 = vpop.eup %4059  ;;  %4063 = vrcp.f32 %v2646_v15  ;;  %v2647_v6 = vadd.f32 1.0, %v4058_v33  ;;  %v2570_v0 = vmul.f32 1.442695, %v2472_v13  ;;  %v2473_v25 = vsub.f32 0.0, %v2413_v62  ;;  %3683 = vmatpush1.bf16.msra.mxu0 %v3682_v45  ;;  %v4239_v62 = vld [vmem:[#allocation2 + $0x208] sm:$0xff] }
 0x185   : > { %4065 = vrcp.f32 %v2640_v29  ;;  %v2641_v14 = vadd.f32 1.0, %v4060_v53  ;;  %v2584_v43 = vmul.f32 1.442695, %v2479_v39  ;;  %v6736_v55 = vmul.f32 4.0, %v4237_v19  ;;  %v3103_v53 = vld [vmem:[%s7651_s2 + $0x200] sm:$0xff] }
 0x186   : > { %v1714_v41 = vpop.permute.xlu1 %1713  ;;  %4067 = vrcp.f32 %v2647_v6  ;;  %v2572_v35 = vmul.f32 1.442695, %v2473_v25  ;;  %v1614_v58 = vsel %vm1574_vm5, %v6328_v34, %v6706_v54  ;;  %v1613_v45 = vsel %vm1574_vm5, %v6330_v27, %v6713_v44  ;;  %v4238_v25 = vld [vmem:[#allocation2 + $0x200] sm:$0xff] }
 0x187   : > { %v1785_v13 = vsel %vm1755_vm4, %v6383_v11, %v1714_v41  ;;  %v1712_v57 = vpop.permute.xlu0 %1711  ;;  %4069 = vrcp.f32 %v2641_v14  ;;  %v6753_v34 = vsel %vm1265_vm3, %v2118_v10, %v2130_v51  ;;  %v6755_v50 = vmul.f32 4.0, %v4238_v25  ;;  %v3104_v11 = vld [vmem:[%s7651_s2 + $0x208] sm:$0xff]  ;;  %v3106_v51 = vld [vmem:[%s7651_s2 + $0x218] sm:$0xff] }
 0x188   : > { %v1872_v29 = vadd.f32 %v1785_v13, %v1614_v58  ;;  %v1784_v30 = vsel %vm1755_vm4, %v6385_v40, %v1712_v57  ;;  %4071 = vpow2.f32 %v2570_v0  ;;  %v6763_v33 = vmul.f32 4.0, %v4239_v62  ;;  %v4240_v62 = vld [vmem:[#allocation2 + $0x1d0] sm:$0xff] }
 0x189   : > { %v1866_v28 = vadd.f32 %v1784_v30, %v1613_v45  ;;  %4073 = vpow2.f32 %v2584_v43  ;;  %v8055_v40 = vrot.slane %v6431_v12, 7  ;;  %v1604_v12 = vsel %vm1574_vm5, %v6706_v54, %v6727_v1 }
 0x18a   : > { %v2250_v27 = vadd.f32 %v6270_v49, %v1872_v29  ;;  %v6761_v15 = vpop.permute.xlu1 %1733  ;;  %v3105_v49 = vld [vmem:[%s7651_s2 + $0x210] sm:$0xff]  ;;  %4075 = vpow2.f32 %v2572_v35  ;;  %v1603_v43 = vsel %vm1574_vm5, %v6713_v44, %v6731_v32  ;;  %v3780_v45 = vpack.c.bf16 %v3106_v51, %v3104_v11  ;;  %v4241_v44 = vld [vmem:[#allocation2 + $0x1d8] sm:$0xff] }
 0x18b   : > { %v6768_v39 = vsel %vm1265_vm3, %v8055_v40, %v2118_v10  ;;  %v8056_v10 = vld [vmem:[#allocation51_spill] sm:$0xff]  ;;  %v1775_v0 = vsel %vm1755_vm4, %v1714_v41, %v6761_v15  ;;  %v6787_v14 = vpop.permute.xlu0 %1731  ;;  %v3782_v29 = vpack.c.bf16 %v3105_v49, %v3103_v53  ;;  %v6799_v40 = vmul.f32 4.0, %v4240_v62  ;;  %v3110_v53 = vld [vmem:[%s7651_s2 + $0x238] sm:$0xff] }
 0x18c   : > { %v2244_v6 = vadd.f32 %v8056_v10, %v1866_v28  ;;  %v2370_v19 = vadd.f32 %v6638_v63, %v2250_v27  ;;  %v1873_v35 = vadd.f32 %v1775_v0, %v1604_v12  ;;  %v1774_v54 = vsel %vm1755_vm4, %v1712_v57, %v6787_v14  ;;  %v8057_v10 = vld [vmem:[#allocation61_spill] sm:$0xff]  ;;  %3781 = vmatprep.subr.bf16.mxu1 %v3780_v45 }
 0x18d   : > { %v1867_v13 = vadd.f32 %v1774_v54, %v1603_v43  ;;  %v4062_v41 = vpop.eup %4061  ;;  %v6801_v63 = vmul.f32 4.0, %v4241_v44  ;;  %v8058_v43 = vld [vmem:[#allocation62_spill] sm:$0xff]  ;;  %3783 = vmatpush1.bf16.msra.mxu1 %v3782_v29 }
 0x18e   : > { %v2364_v58 = vadd.f32 %v6640_v46, %v2244_v6  ;;  %v2430_v30 = vmul.f32 0.05, %v2370_v19  ;;  %v2251_v28 = vadd.f32 %v6298_v16, %v1873_v35  ;;  %v1535_v25 = vpop.permute.xlu1 %1534  ;;  %v6803_v27 = vpop.eup %4063  ;;  %v2658_v12 = vadd.f32 1.0, %v4062_v41  ;;  %v3108_v16 = vld [vmem:[%s7651_s2 + $0x228] sm:$0xff] }
 0x18f   : > { %v2245_v46 = vadd.f32 %v6305_v20, %v1867_v13  ;;  %v1576_v11 = vsel %vm1574_vm5, %v1535_v25, %v8057_v10  ;;  %v1533_v51 = vpop.permute.xlu0 %1532  ;;  %v4066_v49 = vpop.eup %4065  ;;  %v1586_v20 = vsel %vm1574_vm5, %v6475_v42, %v1535_v25 }
 0x190   : > { %v2424_v57 = vmul.f32 0.05, %v2364_v58  ;;  %v2490_v6 = vsub.f32 0.0, %v2430_v30  ;;  %v2371_v0 = vadd.f32 %v6643_v21, %v2251_v28  ;;  %v1575_v19 = vsel %vm1574_vm5, %v1533_v51, %v8058_v43  ;;  %v4068_v35 = vpop.eup %4067 }
 0x191   : > { %4077 = vrcp.f32 %v2658_v12  ;;  %v2365_v58 = vadd.f32 %v6645_v8, %v2245_v46  ;;  %v1585_v13 = vsel %vm1574_vm5, %v6477_v26, %v1533_v51  ;;  %v4070_v45 = vpop.eup %4069  ;;  %v3686_v42 = vpack.c.bf16 %v6803_v27, %v4066_v49  ;;  %v8059_v12 = vld [vmem:[#allocation63_spill] sm:$0xff] }
 0x192   : > { %v2484_v54 = vsub.f32 0.0, %v2424_v57  ;;  %v2606_v21 = vmul.f32 1.442695, %v2490_v6  ;;  %v2431_v41 = vmul.f32 0.05, %v2371_v0  ;;  %v1738_v30 = vpop.permute.xlu1 %1737  ;;  %v3784_v28 = vpack.c.bf16 %v3110_v53, %v3108_v16  ;;  %v4072_v25 = vpop.eup %4071 }
 0x193   : > { %v2425_v44 = vmul.f32 0.05, %v2365_v58  ;;  %v1757_v29 = vsel %vm1755_vm4, %v6515_v22, %v1738_v30  ;;  %v1807_v8 = vsel %vm1755_vm4, %v1738_v30, %v8059_v12  ;;  %v4074_v26 = vpop.eup %4073  ;;  %v2652_v46 = vadd.f32 1.0, %v4072_v25 }
 0x194   : > { %v2594_v62 = vmul.f32 1.442695, %v2484_v54  ;;  %v1736_v57 = vpop.permute.xlu0 %1735  ;;  %4079 = vpow2.f32 %v2606_v21  ;;  %v2491_v10 = vsub.f32 0.0, %v2431_v41  ;;  %v1826_v51 = vadd.f32 %v1757_v29, %v1586_v20  ;;  %3785 = vmatprep.subr.bf16.mxu1 %v3784_v28  ;;  %v4076_v27 = vpop.eup %4075 }
 0x195   : > { %v2659_v16 = vadd.f32 1.0, %v4074_v26  ;;  %v2485_v53 = vsub.f32 0.0, %v2425_v44  ;;  %v1827_v49 = vadd.f32 %v1807_v8, %v1576_v11  ;;  %v2653_v6 = vadd.f32 1.0, %v4076_v27  ;;  %v8060_v11 = vld [vmem:[#allocation64_spill] sm:$0xff] }
 0x196   : > { %4081 = vpow2.f32 %v2594_v62  ;;  %v2608_v0 = vmul.f32 1.442695, %v2491_v10  ;;  %v2204_v22 = vadd.f32 %v6316_v23, %v1826_v51  ;;  %v1539_v43 = vpop.permute.xlu1 %1538  ;;  %v3684_v30 = vpack.c.bf16 %v4068_v35, %v4070_v45  ;;  %v8061_v35 = vld [vmem:[#allocation10_spill] sm:$0xff]  ;;  %v8063_v26 = vld [vmem:[#allocation68_spill] sm:$0xff] }
 0x197   : > { %4083 = vrcp.f32 %v2652_v46  ;;  %v2596_v54 = vmul.f32 1.442695, %v2485_v53  ;;  %v2205_v58 = vadd.f32 %v6326_v60, %v1827_v49  ;;  %v1756_v41 = vsel %vm1755_vm4, %v6517_v48, %v1736_v57  ;;  %v8064_v49 = vld [vmem:[#allocation69_spill] sm:$0xff] }
 0x198   : > { %4085 = vrcp.f32 %v2659_v16  ;;  %v1537_v21 = vpop.permute.xlu0 %1536  ;;  %v2324_v20 = vadd.f32 %v6651_v61, %v2204_v22  ;;  %v1806_v28 = vsel %vm1755_vm4, %v1736_v57, %v8060_v11  ;;  %3685 = vmatprep.subr.bf16.mxu0 %v3684_v30  ;;  %v1820_v25 = vadd.f32 %v1756_v41, %v1585_v13 }
 0x199   : > { %4087 = vrcp.f32 %v2653_v6  ;;  %v2325_v23 = vadd.f32 %v6653_v24, %v2205_v58  ;;  %v1821_v62 = vadd.f32 %v1806_v28, %v1575_v19  ;;  %3687 = vmatpush1.bf16.msra.mxu0 %v3686_v42  ;;  %v1578_v61 = vsel %vm1574_vm5, %v1539_v43, %v8061_v35  ;;  %v8062_v19 = vld [vmem:[#allocation67_spill] sm:$0xff] }
 0x19a   : > { %4089 = vpow2.f32 %v2608_v0  ;;  %v2384_v60 = vmul.f32 0.05, %v2324_v20  ;;  %v1588_v48 = vsel %vm1574_vm5, %v6530_v59, %v1539_v43  ;;  %v1742_v45 = vpop.permute.xlu1 %1741  ;;  %v2198_v24 = vadd.f32 %v6333_v47, %v1820_v25 }
 0x19b   : > { %4091 = vpow2.f32 %v2596_v54  ;;  %v6849_v44 = vpop.eup %4077  ;;  %v2385_v29 = vmul.f32 0.05, %v2325_v23  ;;  %v2199_v13 = vadd.f32 %v6344_v7, %v1821_v62  ;;  %v1577_v42 = vsel %vm1574_vm5, %v1537_v21, %v8062_v19 }
 0x19c   : > { %v1740_v12 = vpop.permute.xlu0 %1739  ;;  %v2444_v8 = vsub.f32 0.0, %v2384_v60  ;;  %v1587_v57 = vsel %vm1574_vm5, %v6532_v17, %v1537_v21  ;;  %v1759_v59 = vsel %vm1755_vm4, %v6548_v2, %v1742_v45  ;;  %v1809_v47 = vsel %vm1755_vm4, %v1742_v45, %v8063_v26 }
 0x19d   : > { %v2445_v46 = vsub.f32 0.0, %v2385_v29  ;;  %v2318_v7 = vadd.f32 %v6671_v18, %v2198_v24  ;;  %v2319_v10 = vadd.f32 %v6673_v37, %v2199_v13  ;;  %v1838_v51 = vadd.f32 %v1759_v59, %v1588_v48  ;;  %v8066_v59 = vld [vmem:[#allocation32_spill] sm:$0xff] }
 0x19e   : > { %v4080_v27 = vpop.eup %4079  ;;  %v2514_v16 = vmul.f32 1.442695, %v2444_v8  ;;  %v1839_v53 = vadd.f32 %v1809_v47, %v1578_v61  ;;  %v1758_v17 = vsel %vm1755_vm4, %v6550_v9, %v1740_v12  ;;  %v1808_v2 = vsel %vm1755_vm4, %v1740_v12, %v8064_v49  ;;  %v1543_v6 = vpop.permute.xlu1 %1542  ;;  %v8070_v49 = vld [vmem:[#allocation9_spill] sm:$0xff] }
 0x19f   : > { %v2670_v22 = vadd.f32 1.0, %v4080_v27  ;;  %v2516_v43 = vmul.f32 1.442695, %v2445_v46  ;;  %v2378_v54 = vmul.f32 0.05, %v2318_v7  ;;  %v2216_v18 = vadd.f32 %v6364_v4, %v1838_v51  ;;  %v8067_v7 = vld [vmem:[#allocation8_spill] sm:$0xff] }
 0x1a0   : > { %v4082_v0 = vpop.eup %4081  ;;  %4093 = vpow2.f32 %v2514_v16  ;;  %v2379_v30 = vmul.f32 0.05, %v2319_v10  ;;  %v2217_v21 = vadd.f32 %v6367_v52, %v1839_v53  ;;  %v1541_v20 = vpop.permute.xlu0 %1540  ;;  %v1832_v28 = vadd.f32 %v1758_v17, %v1587_v57  ;;  %v8069_v53 = vld [vmem:[#allocation19_spill] sm:$0xff] }
 0x1a1   : > { %v6874_v37 = vpop.eup %4083  ;;  %v2664_v58 = vadd.f32 1.0, %v4082_v0  ;;  %4095 = vrcp.f32 %v2670_v22  ;;  %v2438_v41 = vsub.f32 0.0, %v2378_v54  ;;  %v2336_v11 = vadd.f32 %v6678_v36, %v2216_v18 }
 0x1a2   : > { %v4086_v9 = vpop.eup %4085  ;;  %v2439_v25 = vsub.f32 0.0, %v2379_v30  ;;  %v2337_v62 = vadd.f32 %v6680_v3, %v2217_v21  ;;  %v1833_v4 = vadd.f32 %v1808_v2, %v1577_v42  ;;  %v2210_v48 = vadd.f32 %v6358_v56, %v1832_v28  ;;  %v1746_v52 = vpop.permute.xlu1 %1745  ;;  %v8065_v42 = vld [vmem:[#allocation24_spill] sm:$0xff] }
 0x1a3   : > { %v4088_v23 = vpop.eup %4087  ;;  %4097 = vrcp.f32 %v2664_v58  ;;  %v2502_v35 = vmul.f32 1.442695, %v2438_v41  ;;  %v2396_v61 = vmul.f32 0.05, %v2336_v11  ;;  %v1580_v56 = vsel %vm1574_vm5, %v1543_v6, %v8066_v59  ;;  %v8079_v59 = vld [vmem:[#allocation36_spill] sm:$0xff] }
 0x1a4   : > { %v4090_v60 = vpop.eup %4089  ;;  %4099 = vpow2.f32 %v2516_v43  ;;  %v2504_v24 = vmul.f32 1.442695, %v2439_v25  ;;  %v2397_v13 = vmul.f32 0.05, %v2337_v62  ;;  %v2211_v36 = vadd.f32 %v6361_v5, %v1833_v4  ;;  %v1744_v26 = vpop.permute.xlu0 %1743  ;;  %v8071_v43 = vld [vmem:[#allocation38_spill] sm:$0xff]  ;;  %v8073_v4 = vld [vmem:[#allocation11_spill] sm:$0xff] }
 0x1a5   : > { %v4092_v45 = vpop.eup %4091  ;;  %v2671_v29 = vadd.f32 1.0, %v4090_v60  ;;  %4101 = vpow2.f32 %v2502_v35  ;;  %v2456_v12 = vsub.f32 0.0, %v2396_v61  ;;  %v2330_v8 = vadd.f32 %v6701_v38, %v2210_v48  ;;  %v8068_v38 = vld [vmem:[#allocation39_spill] sm:$0xff]  ;;  %v8072_v25 = vld [vmem:[#allocation58_spill] sm:$0xff] }
 0x1a6   : > { %v2665_v19 = vadd.f32 1.0, %v4092_v45  ;;  %v2457_v3 = vsub.f32 0.0, %v2397_v13  ;;  %v2331_v57 = vadd.f32 %v8065_v42, %v2211_v36  ;;  %v1590_v5 = vsel %vm1574_vm5, %v8067_v7, %v1543_v6  ;;  %v1547_v0 = vpop.permute.xlu1 %1546  ;;  %v8074_v35 = vld [vmem:[#allocation15_spill] sm:$0xff]  ;;  %v8078_v42 = vld [vmem:[#allocation33_spill] sm:$0xff] }
 0x1a7   : > { %4103 = vrcp.f32 %v2671_v29  ;;  %v2538_v47 = vmul.f32 1.442695, %v2456_v12  ;;  %v2390_v46 = vmul.f32 0.05, %v2330_v8  ;;  %v1579_v27 = vsel %vm1574_vm5, %v1541_v20, %v8068_v38  ;;  %v8075_v45 = vld [vmem:[#allocation55_spill] sm:$0xff]  ;;  %v8077_v8 = vld [vmem:[#allocation25_spill] sm:$0xff] }
 0x1a8   : > { %4105 = vrcp.f32 %v2665_v19  ;;  %v2540_v10 = vmul.f32 1.442695, %v2457_v3  ;;  %v2391_v51 = vmul.f32 0.05, %v2331_v57  ;;  %v1589_v17 = vsel %vm1574_vm5, %v8069_v53, %v1541_v20  ;;  %v1545_v48 = vpop.permute.xlu0 %1544  ;;  %v8076_v13 = vld [vmem:[#allocation31_spill] sm:$0xff] }
 0x1a9   : > { %4107 = vpow2.f32 %v2504_v24  ;;  %v2450_v16 = vsub.f32 0.0, %v2390_v46  ;;  %v1761_v2 = vsel %vm1755_vm4, %v8070_v49, %v1746_v52  ;;  %v1811_v54 = vsel %vm1755_vm4, %v1746_v52, %v8071_v43  ;;  %v8083_v53 = vld [vmem:[#allocation23_spill] sm:$0xff]  ;;  %v8085_v43 = vld [vmem:[#allocation26_spill] sm:$0xff] }
 0x1aa   : > { %4109 = vpow2.f32 %v2538_v47  ;;  %v4094_v22 = vpop.eup %4093  ;;  %v2451_v6 = vsub.f32 0.0, %v2391_v51  ;;  %v1850_v18 = vadd.f32 %v1761_v2, %v1590_v5  ;;  %v1851_v41 = vadd.f32 %v1811_v54, %v1580_v56  ;;  %v8080_v5 = vld [vmem:[#allocation22_spill] sm:$0xff]  ;;  %v8081_v51 = vld [vmem:[#allocation12_spill] sm:$0xff] }
 0x1ab   : > { %4111 = vpow2.f32 %v2540_v10  ;;  %v6901_v58 = vpop.eup %4095  ;;  %v2624_v30 = vadd.f32 1.0, %v4094_v22  ;;  %v2526_v21 = vmul.f32 1.442695, %v2450_v16  ;;  %v3688_v11 = vpack.c.bf16 %v4086_v9, %v4088_v23  ;;  %v8084_v22 = vld [vmem:[#allocation59_spill] sm:$0xff] }
 0x1ac   : > { %v2528_v28 = vmul.f32 1.442695, %v2451_v6  ;;  %v2228_v62 = vadd.f32 %v8072_v25, %v1850_v18  ;;  %v1760_v60 = vsel %vm1755_vm4, %v8073_v4, %v1744_v26  ;;  %v1810_v61 = vsel %vm1755_vm4, %v1744_v26, %v8074_v35  ;;  %v1750_v26 = vpop.permute.xlu1 %1749  ;;  %v1748_v18 = vpop.permute.xlu0 %1747  ;;  %v8086_v4 = vld [vmem:[#allocation13_spill] sm:$0xff]  ;;  %v8087_v35 = vld [vmem:[#allocation27_spill] sm:$0xff] }
 0x1ad   : > { %v6903_v20 = vpop.eup %4097  ;;  %4113 = vrcp.f32 %v2624_v30  ;;  %v2229_v29 = vadd.f32 %v8075_v45, %v1851_v41  ;;  %3689 = vmatprep.subr.bf16.mxu0 %v3688_v11  ;;  %v1844_v9 = vadd.f32 %v1760_v60, %v1589_v17  ;;  %v1845_v23 = vadd.f32 %v1810_v61, %v1579_v27  ;;  %v8082_v27 = vld [vmem:[#allocation30_spill] sm:$0xff] }
 0x1ae   : > { %v4100_v52 = vpop.eup %4099  ;;  %4115 = vpow2.f32 %v2526_v21  ;;  %v2348_v36 = vadd.f32 %v8076_v13, %v2228_v62  ;;  %v3690_v19 = vpack.c.bf16 %v6849_v44, %v6874_v37  ;;  %v1582_v10 = vsel %vm1574_vm5, %v1547_v0, %v8080_v5 }
 0x1af   : > { %v2625_v24 = vadd.f32 1.0, %v4100_v52  ;;  %v4102_v12 = vpop.eup %4101  ;;  %4117 = vpow2.f32 %v2528_v28  ;;  %v2349_v3 = vadd.f32 %v8077_v8, %v2229_v29  ;;  %v2222_v57 = vadd.f32 %v8078_v42, %v1844_v9  ;;  %v8089_v8 = vld [vmem:[#allocation28_spill] sm:$0xff] }
 0x1b0   : > { %v2223_v56 = vadd.f32 %v8079_v59, %v1845_v23  ;;  %v2618_v46 = vadd.f32 1.0, %v4102_v12  ;;  %v2408_v7 = vmul.f32 0.05, %v2348_v36  ;;  %3691 = vmatpush1.bf16.msra.mxu0 %v3690_v19  ;;  %v1592_v17 = vsel %vm1574_vm5, %v8083_v53, %v1547_v0  ;;  %v1551_v29 = vpop.permute.xlu1 %1550  ;;  %v8088_v19 = vld [vmem:[#allocation14_spill] sm:$0xff]  ;;  %v8090_v59 = vld [vmem:[#allocation3_spill] sm:$0xff] }
 0x1b1   : > { %v6919_v47 = vpop.eup %4103  ;;  %4119 = vrcp.f32 %v2625_v24  ;;  %v2409_v37 = vmul.f32 0.05, %v2349_v3  ;;  %v2342_v38 = vadd.f32 %v8081_v51, %v2222_v57  ;;  %v1581_v6 = vsel %vm1574_vm5, %v1545_v48, %v8084_v22 }
 0x1b2   : > { %v6924_v44 = vpop.eup %4105  ;;  %v2343_v16 = vadd.f32 %v8082_v27, %v2223_v56  ;;  %4121 = vrcp.f32 %v2618_v46  ;;  %v2468_v2 = vsub.f32 0.0, %v2408_v7  ;;  %v1591_v54 = vsel %vm1574_vm5, %v8085_v43, %v1545_v48  ;;  %v1549_v7 = vpop.permute.xlu0 %1548  ;;  %v8095_v43 = vld [vmem:[#allocation56_spill] sm:$0xff] }
 0x1b3   : > { %v4108_v49 = vpop.eup %4107  ;;  %v2469_v41 = vsub.f32 0.0, %v2409_v37  ;;  %v2402_v11 = vmul.f32 0.05, %v2342_v38  ;;  %v1763_v60 = vsel %vm1755_vm4, %v8086_v4, %v1750_v26  ;;  %v1813_v61 = vsel %vm1755_vm4, %v1750_v26, %v8087_v35  ;;  %v8091_v26 = vld [vmem:[#allocation4_spill] sm:$0xff]  ;;  %v8098_v4 = vld [vmem:[#allocation42_spill] sm:$0xff] }
 0x1b4   : > { %v4110_v30 = vpop.eup %4109  ;;  %v2619_v21 = vadd.f32 1.0, %v4108_v49  ;;  %v2403_v28 = vmul.f32 0.05, %v2343_v16  ;;  %v2562_v0 = vmul.f32 1.442695, %v2468_v2  ;;  %v1862_v23 = vadd.f32 %v1763_v60, %v1592_v17  ;;  %v8092_v16 = vld [vmem:[#allocation34_spill] sm:$0xff] }
 0x1b5   : > { %v4112_v25 = vpop.eup %4111  ;;  %v2636_v62 = vadd.f32 1.0, %v4110_v30  ;;  %v2564_v48 = vmul.f32 1.442695, %v2469_v41  ;;  %v2462_v45 = vsub.f32 0.0, %v2402_v11  ;;  %v1863_v24 = vadd.f32 %v1813_v61, %v1582_v10  ;;  %v8093_v17 = vld [vmem:[#allocation35_spill] sm:$0xff]  ;;  %v8094_v2 = vld [vmem:[#allocation18_spill] sm:$0xff]  ;;  %v1754_v41 = vpop.permute.xlu1 %1753 }
 0x1b6   : > { %4123 = vrcp.f32 %v2619_v21  ;;  %v2637_v52 = vadd.f32 1.0, %v4112_v25  ;;  %v2463_v9 = vsub.f32 0.0, %v2403_v28  ;;  %v1762_v12 = vsel %vm1755_vm4, %v8088_v19, %v1748_v18  ;;  %v8096_v30 = vld [vmem:[#allocation46_spill] sm:$0xff]  ;;  %v8097_v25 = vld [vmem:[#allocation44_spill] sm:$0xff] }
 0x1b7   : > { %4125 = vrcp.f32 %v2636_v62  ;;  %v6943_v13 = vpop.eup %4113  ;;  %v2550_v36 = vmul.f32 1.442695, %v2462_v45  ;;  %v1812_v3 = vsel %vm1755_vm4, %v1748_v18, %v8089_v8  ;;  %v2240_v56 = vadd.f32 %v8090_v59, %v1862_v23  ;;  %v8099_v23 = vld [vmem:[#allocation54_spill] sm:$0xff] }
 0x1b8   : > { %4127 = vrcp.f32 %v2637_v52  ;;  %v4116_v42 = vpop.eup %4115  ;;  %v2552_v57 = vmul.f32 1.442695, %v2463_v9  ;;  %v2241_v46 = vadd.f32 %v8091_v26, %v1863_v24  ;;  %v1856_v37 = vadd.f32 %v1762_v12, %v1591_v54  ;;  %v8100_v26 = vld [vmem:[#allocation20_spill] sm:$0xff] }
 0x1b9   : > { %4129 = vpow2.f32 %v2562_v0  ;;  %v4118_v5 = vpop.eup %4117  ;;  %v2630_v10 = vadd.f32 1.0, %v4116_v42  ;;  %v1857_v51 = vadd.f32 %v1812_v3, %v1581_v6  ;;  %v2360_v53 = vadd.f32 %v8092_v16, %v2240_v56 }
 0x1ba   : > { %4131 = vpow2.f32 %v2564_v48  ;;  %v2631_v27 = vadd.f32 1.0, %v4118_v5  ;;  %v2361_v49 = vadd.f32 %v8093_v17, %v2241_v46  ;;  %v2234_v22 = vadd.f32 %v8094_v2, %v1856_v37 }
 0x1bb   : > { %v6953_v38 = vpop.eup %4119  ;;  %4133 = vpow2.f32 %v2550_v36  ;;  %v2235_v18 = vadd.f32 %v8095_v43, %v1857_v51  ;;  %v1584_v21 = vsel %vm1574_vm5, %v1551_v29, %v8096_v30  ;;  %v2420_v6 = vmul.f32 0.05, %v2360_v53  ;;  %v8102_v30 = vld [vmem:[#allocation7_spill] sm:$0xff] }
 0x1bc   : > { %4135 = vrcp.f32 %v2630_v10  ;;  %v6962_v54 = vpop.eup %4121  ;;  %v2421_v11 = vmul.f32 0.05, %v2361_v49  ;;  %v1594_v28 = vsel %vm1574_vm5, %v6727_v1, %v1551_v29  ;;  %v2354_v62 = vadd.f32 %v8097_v25, %v2234_v22  ;;  %v1752_v1 = vpop.permute.xlu0 %1751 }
 0x1bd   : > { %4137 = vrcp.f32 %v2631_v27  ;;  %v2355_v0 = vadd.f32 %v6736_v55, %v2235_v18  ;;  %v1583_v60 = vsel %vm1574_vm5, %v1549_v7, %v8098_v4  ;;  %v2480_v35 = vsub.f32 0.0, %v2420_v6  ;;  %v7024_v4 = vld [vmem:[%s7650_s1] sm:$0xff] }
 0x1be   : > { %4139 = vpow2.f32 %v2552_v57  ;;  %v2481_v61 = vsub.f32 0.0, %v2421_v11  ;;  %v1593_v52 = vsel %vm1574_vm5, %v6731_v32, %v1549_v7  ;;  %v1765_v48 = vsel %vm1755_vm4, %v6761_v15, %v1754_v41  ;;  %v8101_v7 = vld [vmem:[#allocation52_spill] sm:$0xff] }
 0x1bf   : > { %v2414_v29 = vmul.f32 0.05, %v2354_v62  ;;  %v2415_v9 = vmul.f32 0.05, %v2355_v0  ;;  %v1815_v55 = vsel %vm1755_vm4, %v1754_v41, %v8099_v23  ;;  %v1874_v24 = vadd.f32 %v1765_v48, %v1594_v28  ;;  %v3109_v28 = vld [vmem:[%s7651_s2 + $0x230] sm:$0xff]  ;;  %v7036_v48 = vld [vmem:[#allocation2 + $0x8] sm:$0xff] }
 0x1c0   : > { %v4124_v45 = vpop.eup %4123  ;;  %v2586_v19 = vmul.f32 1.442695, %v2480_v35  ;;  %v2588_v12 = vmul.f32 1.442695, %v2481_v61  ;;  %v1875_v8 = vadd.f32 %v1815_v55, %v1584_v21  ;;  %v3692_v32 = vpack.c.bf16 %v6919_v47, %v6924_v44  ;;  %v3113_v35 = vld [vmem:[%s7651_s2 + $0x250] sm:$0xff] }
 0x1c1   : > { %v6981_v36 = vpop.eup %4125  ;;  %v2474_v15 = vsub.f32 0.0, %v2414_v29  ;;  %v2475_v42 = vsub.f32 0.0, %v2415_v9  ;;  %v2252_v57 = vadd.f32 %v6753_v34, %v1874_v24  ;;  %v1764_v59 = vsel %vm1755_vm4, %v6787_v14, %v1752_v1  ;;  %v3118_v29 = vld [vmem:[%s7651_s2 + $0x278] sm:$0xff] }
 0x1c2   : > { %v6985_v3 = vpop.eup %4127  ;;  %4141 = vpow2.f32 %v2586_v19  ;;  %v2253_v46 = vadd.f32 %v8100_v26, %v1875_v8  ;;  %3693 = vmatprep.subr.bf16.mxu0 %v3692_v32  ;;  %v1814_v5 = vsel %vm1755_vm4, %v1752_v1, %v8101_v7  ;;  %v1868_v47 = vadd.f32 %v1764_v59, %v1593_v52  ;;  %v3115_v32 = vld [vmem:[%s7651_s2 + $0x260] sm:$0xff]  ;;  %v3120_v59 = vld [vmem:[%s7651_s2 + $0x288] sm:$0xff] }
 0x1c3   : > { %v4130_v56 = vpop.eup %4129  ;;  %4143 = vpow2.f32 %v2588_v12  ;;  %v2574_v37 = vmul.f32 1.442695, %v2474_v15  ;;  %v2576_v51 = vmul.f32 1.442695, %v2475_v42  ;;  %v2372_v16 = vadd.f32 %v6755_v50, %v2252_v57  ;;  %v7048_v12 = vld [vmem:[%s7650_s1 + $0x8] sm:$0xff] }
 0x1c4   : > { %v4132_v44 = vpop.eup %4131  ;;  %v2648_v10 = vadd.f32 1.0, %v4130_v56  ;;  %v2373_v14 = vadd.f32 %v6763_v33, %v2253_v46  ;;  %v1869_v53 = vadd.f32 %v1814_v5, %v1583_v60  ;;  %v2246_v31 = vadd.f32 %v6768_v39, %v1868_v47  ;;  %v3111_v60 = vld [vmem:[%s7651_s2 + $0x240] sm:$0xff]  ;;  %v3122_v56 = vld [vmem:[%s7651_s2 + $0x298] sm:$0xff] }
 0x1c5   : > { %v4134_v34 = vpop.eup %4133  ;;  %v2649_v27 = vadd.f32 1.0, %v4132_v44  ;;  %v3694_v2 = vpack.c.bf16 %v6901_v58, %v6903_v20  ;;  %v2432_v43 = vmul.f32 0.05, %v2372_v16  ;;  %v3696_v33 = vpack.c.bf16 %v6953_v38, %v4124_v45  ;;  %v3107_v20 = vld [vmem:[%s7651_s2 + $0x220] sm:$0xff]  ;;  %v3116_v45 = vld [vmem:[%s7651_s2 + $0x268] sm:$0xff] }
 0x1c6   : > { %v6997_v17 = vpop.eup %4135  ;;  %4145 = vrcp.f32 %v2648_v10  ;;  %v2642_v49 = vadd.f32 1.0, %v4134_v34  ;;  %v2433_v18 = vmul.f32 0.05, %v2373_v14  ;;  %v2247_v21 = vadd.f32 %v8102_v30, %v1869_v53  ;;  %v7068_v10 = vld [vmem:[%s7650_s1 + $0x10] sm:$0xff]  ;;  %v3124_v14 = vld [vmem:[%s7651_s2 + $0x2a8] sm:$0xff]  ;;  %v3126_v53 = vld [vmem:[%s7651_s2 + $0x2b8] sm:$0xff] }
 0x1c7   : > { %v4138_v22 = vpop.eup %4137  ;;  %4147 = vrcp.f32 %v2649_v27  ;;  %v2366_v50 = vadd.f32 %v6799_v40, %v2246_v31  ;;  %3695 = vmatpush1.bf16.msra.mxu0 %v3694_v2  ;;  %v3698_v6 = vpack.c.bf16 %v6943_v13, %v6962_v54  ;;  %v2492_v11 = vsub.f32 0.0, %v2432_v43  ;;  %v3112_v13 = vld [vmem:[%s7651_s2 + $0x248] sm:$0xff]  ;;  %v3114_v54 = vld [vmem:[%s7651_s2 + $0x258] sm:$0xff]  ;;  %v3121_v34 = vld [vmem:[%s7651_s2 + $0x290] sm:$0xff] }
 0x1c8   : > { %v4140_v41 = vpop.eup %4139  ;;  %4149 = vrcp.f32 %v2642_v49  ;;  %v2493_v58 = vsub.f32 0.0, %v2433_v18  ;;  %v2367_v40 = vadd.f32 %v6801_v63, %v2247_v21  ;;  %3697 = vmatprep.subr.bf16.mxu0 %v3696_v33  ;;  %v3700_v38 = vpack.c.bf16 %v6985_v3, %v4138_v22  ;;  %v3117_v3 = vld [vmem:[%s7651_s2 + $0x270] sm:$0xff]  ;;  %v7088_v43 = vld [vmem:[%s7650_s1 + $0x18] sm:$0xff]  ;;  %v3123_v30 = vld [vmem:[%s7651_s2 + $0x2a0] sm:$0xff] }
 0x1c9   : > { %v2643_v39 = vadd.f32 1.0, %v4140_v41  ;;  %4151 = vpow2.f32 %v2574_v37  ;;  %v2426_v25 = vmul.f32 0.05, %v2366_v50  ;;  %v2610_v62 = vmul.f32 1.442695, %v2492_v11  ;;  %v3125_v21 = vld [vmem:[%s7651_s2 + $0x2b0] sm:$0xff] }
 0x1ca   : > { %4153 = vpow2.f32 %v2576_v51  ;;  %v2612_v0 = vmul.f32 1.442695, %v2493_v58  ;;  %3644 = vmatmul.mubr.msk.f32.vlgmr.msra.gmra.mrb[10].mxu0 %vm253_vm0, %v7024_v4  ;;  %v3702_v63 = vpack.c.bf16 %v6981_v36, %v6997_v17  ;;  %v2427_v61 = vmul.f32 0.05, %v2367_v40  ;;  %v3119_v51 = vld [vmem:[%s7651_s2 + $0x280] sm:$0xff]  ;;  %v3128_v50 = vld [vmem:[%s7651_s2 + $0x2c8] sm:$0xff] }
 0x1cb   : > { %4155 = vrcp.f32 %v2643_v39  ;;  %v2486_v52 = vsub.f32 0.0, %v2426_v25  ;;  %3699 = vmatpush1.bf16.msra.mxu0 %v3698_v6  ;;  %2919 = vmatprep.mubr.f32.mxu0 %v7036_v48  ;;  %v3786_v1 = vpack.c.bf16 %v3109_v28, %v3107_v20  ;;  %v3788_v23 = vpack.c.bf16 %v3114_v54, %v3112_v13  ;;  %v3130_v33 = vld [vmem:[%s7651_s2 + $0x2d8] sm:$0xff]  ;;  %v7108_v58 = vld [vmem:[%s7650_s1 + $0x20] sm:$0xff]  ;;  %v3129_v40 = vld [vmem:[%s7651_s2 + $0x2d0] sm:$0xff] }
 0x1cc   : > { %v4142_v9 = vpop.eup %4141  ;;  %4157 = vpow2.f32 %v2610_v62  ;;  %3701 = vmatprep.subr.bf16.mxu0 %v3700_v38  ;;  %v2487_v24 = vsub.f32 0.0, %v2427_v61  ;;  %v3790_v19 = vpack.c.bf16 %v3113_v35, %v3111_v60  ;;  %v3792_v8 = vpack.c.bf16 %v3118_v29, %v3116_v45  ;;  %v3127_v28 = vld [vmem:[%s7651_s2 + $0x2c0] sm:$0xff]  ;;  %v3132_v38 = vld [vmem:[%s7651_s2 + $0x2e8] sm:$0xff]  ;;  %v3134_v13 = vld [vmem:[%s7651_s2 + $0x2f8] sm:$0xff] }
 0x1cd   : > { %v4144_v55 = vpop.eup %4143  ;;  %4159 = vpow2.f32 %v2612_v0  ;;  %v2598_v36 = vmul.f32 1.442695, %v2486_v52  ;;  %3787 = vmatpush1.bf16.msra.mxu1 %v3786_v1  ;;  %v2660_v42 = vadd.f32 1.0, %v4142_v9  ;;  %v3794_v5 = vpack.c.bf16 %v3117_v3, %v3115_v32  ;;  %v3131_v52 = vld [vmem:[%s7651_s2 + $0x2e0] sm:$0xff]  ;;  %v3133_v1 = vld [vmem:[%s7651_s2 + $0x2f0] sm:$0xff]  ;;  %v3136_v29 = vld [vmem:[%s7651_s2 + $0x308] sm:$0xff] }
 0x1ce   : > { %3645 = vmatmul.mubr.msk.f32.gmra.mrb[12].mxu0 %vm253_vm0, %v7048_v12  ;;  %3789 = vmatprep.subr.bf16.mxu1 %v3788_v23  ;;  %v2600_v57 = vmul.f32 1.442695, %v2487_v24  ;;  %v2661_v46 = vadd.f32 1.0, %v4144_v55  ;;  %v3796_v37 = vpack.c.bf16 %v3122_v56, %v3120_v59  ;;  %v3798_v2 = vpack.c.bf16 %v3121_v34, %v3119_v51  ;;  %v3138_v9 = vld [vmem:[%s7651_s2 + $0x318] sm:$0xff]  ;;  %v3137_v32 = vld [vmem:[%s7651_s2 + $0x310] sm:$0xff]  ;;  %v3140_v3 = vld [vmem:[%s7651_s2 + $0x328] sm:$0xff] }
 0x1cf   : > { %3703 = vmatpush1.bf16.msra.mxu0 %v3702_v63  ;;  %2925 = vmatprep.mubr.f32.mxu0 %v7036_v48  ;;  %4161 = vpow2.f32 %v2598_v36  ;;  %v3800_v18 = vpack.c.bf16 %v3126_v53, %v3124_v14  ;;  %v3802_v11 = vpack.c.bf16 %v3125_v21, %v3123_v30  ;;  %v3804_v20 = vpack.c.bf16 %v3130_v33, %v3128_v50  ;;  %v3040_v59 = vld [vmem:[%s7651_s2 + $0x8] sm:$0xff]  ;;  %v3039_v53 = vld [vmem:[%s7651_s2] sm:$0xff]  ;;  %v3150_v21 = vld [vmem:[%s7651_s2 + $0x378] sm:$0xff] }
 0x1d0   : > { %v4146_v15 = vpop.eup %4145  ;;  %4163 = vpow2.f32 %v2600_v57  ;;  %v3806_v60 = vpack.c.bf16 %v3129_v40, %v3127_v28  ;;  %v3808_v61 = vpack.c.bf16 %v3134_v13, %v3132_v38  ;;  %v3810_v36 = vpack.c.bf16 %v3133_v1, %v3131_v52  ;;  %v3148_v30 = vld [vmem:[%s7651_s2 + $0x368] sm:$0xff]  ;;  %v3043_v33 = vld [vmem:[%s7651_s2 + $0x20] sm:$0xff]  ;;  %v3154_v13 = vld [vmem:[%s7651_s2 + $0x398] sm:$0xff] }
 0x1d1   : > { %v4148_v26 = vpop.eup %4147  ;;  %3791 = vmatpush1.bf16.msra.mxu1 %v3790_v19  ;;  %4165 = vrcp.f32 %v2660_v42  ;;  %v3812_v19 = vpack.c.bf16 %v3138_v9, %v3136_v29  ;;  %v3824_v28 = vpack.c.bf16 %v3150_v21, %v3148_v30  ;;  %v3147_v40 = vld [vmem:[%s7651_s2 + $0x360] sm:$0xff]  ;;  %v3152_v38 = vld [vmem:[%s7651_s2 + $0x388] sm:$0xff]  ;;  %v3153_v1 = vld [vmem:[%s7651_s2 + $0x390] sm:$0xff] }
 0x1d2   : > { %v4150_v7 = vpop.eup %4149  ;;  %3646 = vmatmul.mubr.msk.f32.gmra.mrb[14].mxu0 %vm253_vm0, %v7068_v10  ;;  %3793 = vmatprep.subr.bf16.mxu1 %v3792_v8  ;;  %4167 = vrcp.f32 %v2661_v46  ;;  %v3135_v8 = vld [vmem:[%s7651_s2 + $0x300] sm:$0xff]  ;;  %v3141_v46 = vld [vmem:[%s7651_s2 + $0x330] sm:$0xff]  ;;  %v3158_v29 = vld [vmem:[%s7651_s2 + $0x3b8] sm:$0xff] }
 0x1d3   : > { %v4152_v47 = vpop.eup %4151  ;;  %v3706_v44 = vpack.c.bf16 %v4146_v15, %v4150_v7  ;;  %2931 = vmatprep.mubr.f32.mxu0 %v7036_v48  ;;  %v3142_v15 = vld [vmem:[%s7651_s2 + $0x338] sm:$0xff]  ;;  %v3814_v42 = vpack.c.bf16 %v3137_v32, %v3135_v8  ;;  %v3151_v52 = vld [vmem:[%s7651_s2 + $0x380] sm:$0xff]  ;;  %v3065_v30 = vld [vmem:[%s7651_s2 + $0xd0] sm:$0xff] }
 0x1d4   : > { %v4154_v27 = vpop.eup %4153  ;;  %v2654_v16 = vadd.f32 1.0, %v4152_v47  ;;  %v3816_v56 = vpack.c.bf16 %v3142_v15, %v3140_v3  ;;  %v3144_v47 = vld [vmem:[%s7651_s2 + $0x348] sm:$0xff]  ;;  %v3155_v32 = vld [vmem:[%s7651_s2 + $0x3a0] sm:$0xff]  ;;  %v3157_v3 = vld [vmem:[%s7651_s2 + $0x3b0] sm:$0xff] }
 0x1d5   : > { %v4156_v17 = vpop.eup %4155  ;;  %v2655_v49 = vadd.f32 1.0, %v4154_v27  ;;  %3795 = vmatpush1.bf16.msra.mxu1 %v3794_v5  ;;  %v3042_v5 = vld [vmem:[%s7651_s2 + $0x18] sm:$0xff]  ;;  %v3160_v15 = vld [vmem:[%s7651_s2 + $0x3c8] sm:$0xff] }
 0x1d6   : > { %4169 = vrcp.f32 %v2654_v16  ;;  %v3704_v31 = vpack.c.bf16 %v4148_v26, %v4156_v17  ;;  %v4158_v22 = vpop.eup %4157  ;;  %3647 = vmatmul.mubr.msk.f32.gmra.mrb[16].mxu0 %vm253_vm0, %v7088_v43  ;;  %3797 = vmatprep.subr.bf16.mxu1 %v3796_v37  ;;  %v3139_v26 = vld [vmem:[%s7651_s2 + $0x320] sm:$0xff]  ;;  %v3716_v14 = vpack.c.bf16 %v3042_v5, %v3040_v59  ;;  %v3041_v17 = vld [vmem:[%s7651_s2 + $0x10] sm:$0xff] }
 0x1d7   : > { %4171 = vrcp.f32 %v2655_v49  ;;  %v4160_v41 = vpop.eup %4159  ;;  %2937 = vmatprep.mubr.f32.mxu0 %v7036_v48  ;;  %v2672_v6 = vadd.f32 1.0, %v4158_v22  ;;  %v3818_v27 = vpack.c.bf16 %v3141_v46, %v3139_v26  ;;  %v3044_v49 = vld [vmem:[%s7651_s2 + $0x28] sm:$0xff]  ;;  %v3143_v22 = vld [vmem:[%s7651_s2 + $0x340] sm:$0xff]  ;;  %v3834_v46 = vpack.c.bf16 %v3157_v3, %v3155_v32 }
 0x1d8   : > { %3705 = vmatprep.subr.bf16.mxu0 %v3704_v31  ;;  %v2673_v39 = vadd.f32 1.0, %v4160_v41  ;;  %v3718_v41 = vpack.c.bf16 %v3041_v17, %v3039_v53  ;;  %v3060_v26 = vld [vmem:[%s7651_s2 + $0xa8] sm:$0xff]  ;;  %v3087_v3 = vld [vmem:[%s7651_s2 + $0x180] sm:$0xff] }
 0x1d9   : > { %3707 = vmatpush1.bf16.msra.mxu0 %v3706_v44  ;;  %3799 = vmatpush1.bf16.msra.mxu1 %v3798_v2  ;;  %v4162_v25 = vpop.eup %4161  ;;  %4173 = vrcp.f32 %v2672_v6  ;;  %v3146_v44 = vld [vmem:[%s7651_s2 + $0x358] sm:$0xff]  ;;  %v3045_v6 = vld [vmem:[%s7651_s2 + $0x30] sm:$0xff] }
 0x1da   : > { %3648 = vmatmul.mubr.msk.f32.gmra.mrb[18].mxu0 %vm253_vm0, %v7108_v58  ;;  %3801 = vmatprep.subr.bf16.mxu1 %v3800_v18  ;;  %v4164_v54 = vpop.eup %4163  ;;  %v2666_v62 = vadd.f32 1.0, %v4162_v25  ;;  %4175 = vrcp.f32 %v2673_v39  ;;  %v3820_v31 = vpack.c.bf16 %v3146_v44, %v3144_v47  ;;  %v3046_v2 = vld [vmem:[%s7651_s2 + $0x38] sm:$0xff]  ;;  %v3145_v18 = vld [vmem:[%s7651_s2 + $0x350] sm:$0xff]  ;;  %v3048_v39 = vld [vmem:[%s7651_s2 + $0x48] sm:$0xff] }
 0x1db   : > { %3008 = vmatprep.mubr.f32.mxu0 %v7036_v48  ;;  %v4166_v0 = vpop.eup %4165  ;;  %v2667_v63 = vadd.f32 1.0, %v4164_v54  ;;  %v3720_v50 = vpack.c.bf16 %v3046_v2, %v3044_v49  ;;  %v3149_v25 = vld [vmem:[%s7651_s2 + $0x370] sm:$0xff]  ;;  %v3722_v54 = vpack.c.bf16 %v3045_v6, %v3043_v33  ;;  %v3159_v47 = vld [vmem:[%s7651_s2 + $0x3c0] sm:$0xff] }
 0x1dc   : > { %v4168_v35 = vpop.eup %4167  ;;  %4177 = vrcp.f32 %v2666_v62  ;;  %v3161_v44 = vld [vmem:[%s7651_s2 + $0x3d0] sm:$0xff]  ;;  %v3163_v49 = vld [vmem:[%s7651_s2 + $0x3e0] sm:$0xff] }
 0x1dd   : > { %3803 = vmatpush1.bf16.msra.mxu1 %v3802_v11  ;;  %4179 = vrcp.f32 %v2667_v63  ;;  %v3822_v11 = vpack.c.bf16 %v3145_v18, %v3143_v22  ;;  %v3052_v63 = vld [vmem:[%s7651_s2 + $0x68] sm:$0xff]  ;;  %v3838_v53 = vpack.c.bf16 %v3161_v44, %v3159_v47  ;;  %v3063_v18 = vld [vmem:[%s7651_s2 + $0xc0] sm:$0xff]  ;;  %v3170_v47 = vld [vmem:[%s7651_s2 + $0x418] sm:$0xff] }
 0x1de   : > { %3805 = vmatprep.subr.bf16.mxu1 %v3804_v20  ;;  %v3050_v20 = vld [vmem:[%s7651_s2 + $0x58] sm:$0xff]  ;;  %v3067_v6 = vld [vmem:[%s7651_s2 + $0xe0] sm:$0xff] }
 0x1df   : > { %v3724_v62 = vpack.c.bf16 %v3050_v20, %v3048_v39  ;;  %v3069_v39 = vld [vmem:[%s7651_s2 + $0xf0] sm:$0xff]  ;;  %v3074_v20 = vld [vmem:[%s7651_s2 + $0x118] sm:$0xff] }
 0x1e0   : > { %v4170_v45 = vpop.eup %4169 }
 0x1e1   : > { %v4172_v23 = vpop.eup %4171  ;;  %v3710_v55 = vpack.c.bf16 %v4166_v0, %v4170_v45  ;;  %3807 = vmatpush1.bf16.msra.mxu1 %v3806_v60  ;;  %v3047_v0 = vld [vmem:[%s7651_s2 + $0x40] sm:$0xff]  ;;  %v3826_v60 = vpack.c.bf16 %v3149_v25, %v3147_v40  ;;  %v3156_v45 = vld [vmem:[%s7651_s2 + $0x3a8] sm:$0xff] }
 0x1e2   : > { %v3708_v24 = vpack.c.bf16 %v4168_v35, %v4172_v23  ;;  %3809 = vmatprep.subr.bf16.mxu1 %v3808_v61  ;;  %v3054_v35 = vld [vmem:[%s7651_s2 + $0x78] sm:$0xff]  ;;  %v3828_v61 = vpack.c.bf16 %v3154_v13, %v3152_v38  ;;  %v3832_v8 = vpack.c.bf16 %v3158_v29, %v3156_v45  ;;  %v3071_v25 = vld [vmem:[%s7651_s2 + $0x100] sm:$0xff]  ;;  %v3073_v38 = vld [vmem:[%s7651_s2 + $0x110] sm:$0xff] }
 0x1e3   : > { %v4174_v57 = vpop.eup %4173  ;;  %v3728_v23 = vpack.c.bf16 %v3054_v35, %v3052_v63  ;;  %v3076_v13 = vld [vmem:[%s7651_s2 + $0x128] sm:$0xff]  ;;  %v3077_v63 = vld [vmem:[%s7651_s2 + $0x130] sm:$0xff]  ;;  %v3082_v35 = vld [vmem:[%s7651_s2 + $0x158] sm:$0xff] }
 0x1e4   : > { %3709 = vmatprep.subr.bf16.mxu0 %v3708_v24  ;;  %v4176_v7 = vpop.eup %4175  ;;  %v3056_v24 = vld [vmem:[%s7651_s2 + $0x88] sm:$0xff]  ;;  %v3081_v45 = vld [vmem:[%s7651_s2 + $0x150] sm:$0xff] }
 0x1e5   : > { %3711 = vmatpush1.bf16.msra.mxu0 %v3710_v55  ;;  %3811 = vmatpush1.bf16.msra.mxu1 %v3810_v36  ;;  %v3051_v55 = vld [vmem:[%s7651_s2 + $0x60] sm:$0xff]  ;;  %v3830_v36 = vpack.c.bf16 %v3153_v1, %v3151_v52  ;;  %v3084_v29 = vld [vmem:[%s7651_s2 + $0x168] sm:$0xff] }
 0x1e6   : > { %3813 = vmatprep.subr.bf16.mxu1 %v3812_v19  ;;  %v4178_v37 = vpop.eup %4177  ;;  %v3058_v19 = vld [vmem:[%s7651_s2 + $0x98] sm:$0xff]  ;;  %v3079_v1 = vld [vmem:[%s7651_s2 + $0x140] sm:$0xff] }
 0x1e7   : > { %v4180_v51 = vpop.eup %4179  ;;  %v3714_v34 = vpack.c.bf16 %v4174_v57, %v4178_v37  ;;  %v3732_v59 = vpack.c.bf16 %v3058_v19, %v3056_v24  ;;  %v3164_v37 = vld [vmem:[%s7651_s2 + $0x3e8] sm:$0xff]  ;;  %v3085_v24 = vld [vmem:[%s7651_s2 + $0x170] sm:$0xff]  ;;  %v3090_v19 = vld [vmem:[%s7651_s2 + $0x198] sm:$0xff] }
 0x1e8   : > { %v3712_v16 = vpack.c.bf16 %v4176_v7, %v4180_v51  ;;  %v3062_v7 = vld [vmem:[%s7651_s2 + $0xb8] sm:$0xff] }
 0x1e9   : > { %3815 = vmatpush1.bf16.msra.mxu1 %v3814_v42  ;;  %v3162_v42 = vld [vmem:[%s7651_s2 + $0x3d8] sm:$0xff] }
 0x1ea   : > { %3817 = vmatprep.subr.bf16.mxu1 %v3816_v56  ;;  %3713 = vmatprep.subr.bf16.mxu0 %v3712_v16  ;;  %v3055_v56 = vld [vmem:[%s7651_s2 + $0x80] sm:$0xff]  ;;  %v3836_v5 = vpack.c.bf16 %v3162_v42, %v3160_v15  ;;  %v3166_v51 = vld [vmem:[%s7651_s2 + $0x3f8] sm:$0xff]  ;;  %v3089_v15 = vld [vmem:[%s7651_s2 + $0x190] sm:$0xff] }
 0x1eb   : > { %3715 = vmatpush1.bf16.msra.mxu0 %v3714_v34  ;;  %v3059_v16 = vld [vmem:[%s7651_s2 + $0xa0] sm:$0xff]  ;;  %v3840_v17 = vpack.c.bf16 %v3166_v51, %v3164_v37  ;;  %v3092_v42 = vld [vmem:[%s7651_s2 + $0x1a8] sm:$0xff] }
 0x1ec   : > { %3717 = vmatprep.subr.bf16.mxu0 %v3716_v14  ;;  %v3064_v14 = vld [vmem:[%s7651_s2 + $0xc8] sm:$0xff] }
 0x1ed   : > { %3819 = vmatpush1.bf16.msra.mxu1 %v3818_v27  ;;  %v3736_v27 = vpack.c.bf16 %v3062_v7, %v3060_v26  ;;  %v3093_v26 = vld [vmem:[%s7651_s2 + $0x1b0] sm:$0xff]  ;;  %v3098_v7 = vld [vmem:[%s7651_s2 + $0x1d8] sm:$0xff] }
 0x1ee   : > { %3821 = vmatprep.subr.bf16.mxu1 %v3820_v31  ;;  %3649 = vmatmul.mubr.msk.f32.vlgmr.msra.gmra.mrb[20].mxu0 %vm253_vm0, %v7024_v4  ;;  %v3049_v4 = vld [vmem:[%s7651_s2 + $0x50] sm:$0xff] }
 0x1ef   : > { %3014 = vmatprep.mubr.f32.mxu0 %v7036_v48  ;;  %3719 = vmatpush1.bf16.msra.mxu0 %v3718_v41  ;;  %v3726_v9 = vpack.c.bf16 %v3049_v4, %v3047_v0  ;;  %v3165_v31 = vld [vmem:[%s7651_s2 + $0x3f0] sm:$0xff]  ;;  %v3068_v41 = vld [vmem:[%s7651_s2 + $0xe8] sm:$0xff]  ;;  %v3075_v4 = vld [vmem:[%s7651_s2 + $0x120] sm:$0xff] }
 0x1f0   : > { %3721 = vmatprep.subr.bf16.mxu0 %v3720_v50  ;;  %v3842_v21 = vpack.c.bf16 %v3165_v31, %v3163_v49  ;;  %v3742_v50 = vpack.c.bf16 %v3065_v30, %v3063_v18 }
 0x1f1   : > { %3823 = vmatpush1.bf16.msra.mxu1 %v3822_v11  ;;  %v3072_v11 = vld [vmem:[%s7651_s2 + $0x108] sm:$0xff] }
 0x1f2   : > { %3825 = vmatprep.subr.bf16.mxu1 %v3824_v28  ;;  %3650 = vmatmul.mubr.msk.f32.gmra.mrb[22].mxu0 %vm253_vm0, %v7048_v12  ;;  %v3053_v12 = vld [vmem:[%s7651_s2 + $0x70] sm:$0xff]  ;;  %v3746_v28 = vpack.c.bf16 %v3069_v39, %v3067_v6  ;;  %v3748_v40 = vpack.c.bf16 %v3074_v20, %v3072_v11  ;;  %v3167_v6 = vld [vmem:[%s7651_s2 + $0x400] sm:$0xff]  ;;  %v3172_v11 = vld [vmem:[%s7651_s2 + $0x428] sm:$0xff] }
 0x1f3   : > { %3020 = vmatprep.mubr.f32.mxu0 %v7036_v48  ;;  %3723 = vmatpush1.bf16.msra.mxu0 %v3722_v54  ;;  %v3730_v57 = vpack.c.bf16 %v3053_v12, %v3051_v55  ;;  %v3078_v54 = vld [vmem:[%s7651_s2 + $0x138] sm:$0xff]  ;;  %v3083_v12 = vld [vmem:[%s7651_s2 + $0x160] sm:$0xff]  ;;  %v3169_v39 = vld [vmem:[%s7651_s2 + $0x410] sm:$0xff] }
 0x1f4   : > { %3725 = vmatprep.subr.bf16.mxu0 %v3724_v62  ;;  %v3750_v62 = vpack.c.bf16 %v3073_v38, %v3071_v25  ;;  %v3752_v0 = vpack.c.bf16 %v3078_v54, %v3076_v13  ;;  %v3174_v20 = vld [vmem:[%s7651_s2 + $0x438] sm:$0xff]  ;;  %v3171_v13 = vld [vmem:[%s7651_s2 + $0x420] sm:$0xff]  ;;  %v3173_v54 = vld [vmem:[%s7651_s2 + $0x430] sm:$0xff] }
 0x1f5   : > { %3827 = vmatpush1.bf16.msra.mxu1 %v3826_v60  ;;  %v3080_v60 = vld [vmem:[%s7651_s2 + $0x148] sm:$0xff]  ;;  %v3848_v38 = vpack.c.bf16 %v3174_v20, %v3172_v11  ;;  %v3210_v20 = vld [vmem:[%s7651_s2 + $0x558] sm:$0xff] }
 0x1f6   : > { %3829 = vmatprep.subr.bf16.mxu1 %v3828_v61  ;;  %3651 = vmatmul.mubr.msk.f32.gmra.mrb[24].mxu0 %vm253_vm0, %v7068_v10  ;;  %v3057_v10 = vld [vmem:[%s7651_s2 + $0x90] sm:$0xff]  ;;  %v3754_v61 = vpack.c.bf16 %v3077_v63, %v3075_v4  ;;  %v3756_v52 = vpack.c.bf16 %v3082_v35, %v3080_v60  ;;  %v3850_v4 = vpack.c.bf16 %v3173_v54, %v3171_v13  ;;  %v3175_v35 = vld [vmem:[%s7651_s2 + $0x440] sm:$0xff]  ;;  %v3208_v11 = vld [vmem:[%s7651_s2 + $0x548] sm:$0xff] }
 0x1f7   : > { %3026 = vmatprep.mubr.f32.mxu0 %v7036_v48  ;;  %3727 = vmatpush1.bf16.msra.mxu0 %v3726_v9  ;;  %v3734_v34 = vpack.c.bf16 %v3057_v10, %v3055_v56  ;;  %v3086_v9 = vld [vmem:[%s7651_s2 + $0x178] sm:$0xff]  ;;  %v3091_v10 = vld [vmem:[%s7651_s2 + $0x1a0] sm:$0xff]  ;;  %v3212_v13 = vld [vmem:[%s7651_s2 + $0x568] sm:$0xff] }
 0x1f8   : > { %3729 = vmatprep.subr.bf16.mxu0 %v3728_v23  ;;  %v3758_v23 = vpack.c.bf16 %v3081_v45, %v3079_v1  ;;  %v3760_v55 = vpack.c.bf16 %v3086_v9, %v3084_v29  ;;  %v3770_v37 = vpack.c.bf16 %v3093_v26, %v3091_v10  ;;  %v3180_v1 = vld [vmem:[%s7651_s2 + $0x468] sm:$0xff]  ;;  %v3182_v45 = vld [vmem:[%s7651_s2 + $0x478] sm:$0xff] }
 0x1f9   : > { %3831 = vmatpush1.bf16.msra.mxu1 %v3830_v36  ;;  %v3088_v36 = vld [vmem:[%s7651_s2 + $0x188] sm:$0xff]  ;;  %v3214_v54 = vld [vmem:[%s7651_s2 + $0x578] sm:$0xff] }
 0x1fa   : > { %3833 = vmatprep.subr.bf16.mxu1 %v3832_v8  ;;  %3652 = vmatmul.mubr.msk.f32.gmra.mrb[26].mxu0 %vm253_vm0, %v7088_v43  ;;  %v3061_v43 = vld [vmem:[%s7651_s2 + $0xb0] sm:$0xff]  ;;  %v3762_v8 = vpack.c.bf16 %v3085_v24, %v3083_v12  ;;  %v3764_v32 = vpack.c.bf16 %v3090_v19, %v3088_v36  ;;  %v3184_v36 = vld [vmem:[%s7651_s2 + $0x488] sm:$0xff]  ;;  %v3186_v19 = vld [vmem:[%s7651_s2 + $0x498] sm:$0xff] }
 0x1fb   : > { %3032 = vmatprep.mubr.f32.mxu0 %v7036_v48  ;;  %3731 = vmatpush1.bf16.msra.mxu0 %v3730_v57  ;;  %v3066_v48 = vld [vmem:[%s7651_s2 + $0xd8] sm:$0xff]  ;;  %v3738_v2 = vpack.c.bf16 %v3061_v43, %v3059_v16  ;;  %v3100_v16 = vld [vmem:[%s7651_s2 + $0x1e8] sm:$0xff]  ;;  %v3181_v12 = vld [vmem:[%s7651_s2 + $0x470] sm:$0xff] }
 0x1fc   : > { %3733 = vmatprep.subr.bf16.mxu0 %v3732_v59  ;;  %v3740_v22 = vpack.c.bf16 %v3066_v48, %v3064_v14  ;;  %v3094_v57 = vld [vmem:[%s7651_s2 + $0x1b8] sm:$0xff]  ;;  %v3766_v59 = vpack.c.bf16 %v3089_v15, %v3087_v3  ;;  %v3099_v48 = vld [vmem:[%s7651_s2 + $0x1e0] sm:$0xff]  ;;  %v3860_v3 = vpack.c.bf16 %v3186_v19, %v3184_v36 }
 0x1fd   : > { %3835 = vmatpush1.bf16.msra.mxu1 %v3834_v46  ;;  %v3768_v56 = vpack.c.bf16 %v3094_v57, %v3092_v42  ;;  %v3096_v46 = vld [vmem:[%s7651_s2 + $0x1c8] sm:$0xff]  ;;  %v3102_v43 = vld [vmem:[%s7651_s2 + $0x1f8] sm:$0xff]  ;;  %v3183_v15 = vld [vmem:[%s7651_s2 + $0x480] sm:$0xff] }
 0x1fe   : > { %3837 = vmatprep.subr.bf16.mxu1 %v3836_v5  ;;  %3653 = vmatmul.mubr.msk.f32.gmra.mrb[28].mxu0 %vm253_vm0, %v7108_v58  ;;  %v3070_v58 = vld [vmem:[%s7651_s2 + $0xf8] sm:$0xff]  ;;  %v3168_v5 = vld [vmem:[%s7651_s2 + $0x408] sm:$0xff]  ;;  %v3772_v51 = vpack.c.bf16 %v3098_v7, %v3096_v46  ;;  %v3185_v42 = vld [vmem:[%s7651_s2 + $0x490] sm:$0xff] }
 0x1ff   : > { %3735 = vmatpush1.bf16.msra.mxu0 %v3734_v34  ;;  %v3744_v33 = vpack.c.bf16 %v3070_v58, %v3068_v41  ;;  %v3844_v44 = vpack.c.bf16 %v3170_v47, %v3168_v5  ;;  %v3095_v34 = vld [vmem:[%s7651_s2 + $0x1c0] sm:$0xff]  ;;  %v3862_v10 = vpack.c.bf16 %v3185_v42, %v3183_v15  ;;  %v3189_v5 = vld [vmem:[%s7651_s2 + $0x4b0] sm:$0xff]  ;;  %v3224_v42 = vld [vmem:[%s7651_s2 + $0x5c8] sm:$0xff] }
 0x200   : > { %3737 = vmatprep.subr.bf16.mxu0 %v3736_v27  ;;  %v3097_v27 = vld [vmem:[%s7651_s2 + $0x1d0] sm:$0xff]  ;;  %v3187_v7 = vld [vmem:[%s7651_s2 + $0x4a0] sm:$0xff] }
 0x201   : > { %3839 = vmatpush1.bf16.msra.mxu1 %v3838_v53  ;;  %v3774_v14 = vpack.c.bf16 %v3097_v27, %v3095_v34  ;;  %v3776_v53 = vpack.c.bf16 %v3102_v43, %v3100_v16  ;;  %v3191_v27 = vld [vmem:[%s7651_s2 + $0x4c0] sm:$0xff]  ;;  %v3193_v16 = vld [vmem:[%s7651_s2 + $0x4d0] sm:$0xff]  ;;  %v3196_v43 = vld [vmem:[%s7651_s2 + $0x4e8] sm:$0xff] }
 0x202   : > { %3841 = vmatprep.subr.bf16.mxu1 %v3840_v17  ;;  %v3101_v17 = vld [vmem:[%s7651_s2 + $0x1f0] sm:$0xff] }
 0x203   : > { %3739 = vmatpush1.bf16.msra.mxu0 %v3738_v2  ;;  %v3778_v49 = vpack.c.bf16 %v3101_v17, %v3099_v48  ;;  %v3195_v17 = vld [vmem:[%s7651_s2 + $0x4e0] sm:$0xff]  ;;  %v3221_v15 = vld [vmem:[%s7651_s2 + $0x5b0] sm:$0xff] }
 0x204   : > { %3741 = vmatprep.subr.bf16.mxu0 %v3740_v22 }
 0x205   : > { %3843 = vmatpush1.bf16.msra.mxu1 %v3842_v21 }
 0x206   : > { %3845 = vmatprep.subr.bf16.mxu1 %v3844_v44  ;;  %v3192_v44 = vld [vmem:[%s7651_s2 + $0x4c8] sm:$0xff] }
 0x207   : > { %3743 = vmatpush1.bf16.msra.mxu0 %v3742_v50 }
 0x208   : > { %3745 = vmatprep.subr.bf16.mxu0 %v3744_v33 }
 0x20b   : > { %3747 = vmatpush1.bf16.msra.mxu0 %v3746_v28 }
 0x20c   : > { %3749 = vmatprep.subr.bf16.mxu0 %v3748_v40  ;;  %v3846_v40 = vpack.c.bf16 %v3169_v39, %v3167_v6  ;;  %v3203_v6 = vld [vmem:[%s7651_s2 + $0x520] sm:$0xff]  ;;  %v3205_v39 = vld [vmem:[%s7651_s2 + $0x530] sm:$0xff] }
 0x20f   : > { %3751 = vmatpush1.bf16.msra.mxu0 %v3750_v62  ;;  %v3176_v62 = vld [vmem:[%s7651_s2 + $0x448] sm:$0xff] }
 0x210   : > { %3753 = vmatprep.subr.bf16.mxu0 %v3752_v0  ;;  %v3178_v0 = vld [vmem:[%s7651_s2 + $0x458] sm:$0xff] }
 0x211   : > { %v3852_v60 = vpack.c.bf16 %v3178_v0, %v3176_v62 }
 0x213   : > { %3755 = vmatpush1.bf16.msra.mxu0 %v3754_v61  ;;  %v3177_v61 = vld [vmem:[%s7651_s2 + $0x450] sm:$0xff] }
 0x214   : > { %3757 = vmatprep.subr.bf16.mxu0 %v3756_v52  ;;  %v3854_v29 = vpack.c.bf16 %v3177_v61, %v3175_v35  ;;  %v3213_v35 = vld [vmem:[%s7651_s2 + $0x570] sm:$0xff]  ;;  %v3216_v61 = vld [vmem:[%s7651_s2 + $0x588] sm:$0xff] }
 0x217   : > { %3759 = vmatpush1.bf16.msra.mxu0 %v3758_v23  ;;  %v3856_v23 = vpack.c.bf16 %v3182_v45, %v3180_v1 }
 0x218   : > { %3761 = vmatprep.subr.bf16.mxu0 %v3760_v55  ;;  %v3179_v55 = vld [vmem:[%s7651_s2 + $0x460] sm:$0xff] }
 0x21b   : > { %3763 = vmatpush1.bf16.msra.mxu0 %v3762_v8  ;;  %v3858_v8 = vpack.c.bf16 %v3181_v12, %v3179_v55  ;;  %v3217_v55 = vld [vmem:[%s7651_s2 + $0x590] sm:$0xff]  ;;  %v3220_v12 = vld [vmem:[%s7651_s2 + $0x5a8] sm:$0xff] }
 0x21c   : > { %3765 = vmatprep.subr.bf16.mxu0 %v3764_v32 }
 0x21f   : > { %3767 = vmatpush1.bf16.msra.mxu0 %v3766_v59  ;;  %v3188_v59 = vld [vmem:[%s7651_s2 + $0x4a8] sm:$0xff] }
 0x220   : > { %3769 = vmatprep.subr.bf16.mxu0 %v3768_v56  ;;  %v3190_v56 = vld [vmem:[%s7651_s2 + $0x4b8] sm:$0xff] }
 0x221   : > { %v3864_v46 = vpack.c.bf16 %v3190_v56, %v3188_v59 }
 0x223   : > { %3771 = vmatpush1.bf16.msra.mxu0 %v3770_v37  ;;  %v3194_v37 = vld [vmem:[%s7651_s2 + $0x4d8] sm:$0xff] }
 0x224   : > { %3773 = vmatprep.subr.bf16.mxu0 %v3772_v51  ;;  %v3866_v51 = vpack.c.bf16 %v3189_v5, %v3187_v7  ;;  %v3868_v34 = vpack.c.bf16 %v3194_v37, %v3192_v44  ;;  %v3225_v7 = vld [vmem:[%s7651_s2 + $0x5d0] sm:$0xff]  ;;  %v3228_v5 = vld [vmem:[%s7651_s2 + $0x5e8] sm:$0xff] }
 0x227   : > { %3775 = vmatpush1.bf16.msra.mxu0 %v3774_v14  ;;  %v3198_v14 = vld [vmem:[%s7651_s2 + $0x4f8] sm:$0xff] }
 0x228   : > { %3777 = vmatprep.subr.bf16.mxu0 %v3776_v53  ;;  %v3870_v53 = vpack.c.bf16 %v3193_v16, %v3191_v27  ;;  %v3872_v48 = vpack.c.bf16 %v3198_v14, %v3196_v43  ;;  %v3227_v27 = vld [vmem:[%s7651_s2 + $0x5e0] sm:$0xff]  ;;  %v3229_v16 = vld [vmem:[%s7651_s2 + $0x5f0] sm:$0xff] }
 0x229   : > { %v3906_v43 = vpack.c.bf16 %v3229_v16, %v3227_v27 }
 0x22b   : > { %3779 = vmatpush1.bf16.msra.mxu0 %v3778_v49  ;;  %v3197_v49 = vld [vmem:[%s7651_s2 + $0x4f0] sm:$0xff] }
 0x238   : > { %v2820_v31 = vpop.f32.mrb[0].mxu0 }
 0x239   : > { %v2822_v2 = vpop.f32.mrb[1].mxu0 }
 0x23a   : > { %3295 = vmatprep.mubr.f32.mxu0 %v2822_v2  ;;  %v3202_v2 = vld [vmem:[%s7651_s2 + $0x518] sm:$0xff] }
 0x23b   : > { %3296 = vmatmul.mubr.f32.vlgmr.msra.gmra.mrb[30].mxu0 %v2820_v31  ;;  %v3200_v31 = vld [vmem:[%s7651_s2 + $0x508] sm:$0xff] }
 0x23c   : > { %v2826_v22 = vpop.f32.mrb[2].mxu0 }
 0x23d   : > { %v2828_v18 = vpop.f32.mrb[3].mxu0 }
 0x23e   : > { %3301 = vmatprep.mubr.f32.mxu0 %v2828_v18  ;;  %v3876_v18 = vpack.c.bf16 %v3202_v2, %v3200_v31 }
 0x23f   : > { %3302 = vmatmul.mubr.f32.gmra.mrb[32].mxu0 %v2826_v22  ;;  %v3874_v22 = vpack.c.bf16 %v3197_v49, %v3195_v17 }
 0x240   : > { %v2832_v30 = vpop.f32.mrb[4].mxu0 }
 0x241   : > { %v2834_v21 = vpop.f32.mrb[5].mxu0 }
 0x242   : > { %3307 = vmatprep.mubr.f32.mxu0 %v2834_v21  ;;  %v3201_v21 = vld [vmem:[%s7651_s2 + $0x510] sm:$0xff] }
 0x243   : > { %3308 = vmatmul.mubr.f32.gmra.mrb[34].mxu0 %v2832_v30  ;;  %v3199_v30 = vld [vmem:[%s7651_s2 + $0x500] sm:$0xff] }
 0x244   : > { %v2838_v41 = vpop.f32.mrb[6].mxu0 }
 0x245   : > { %v2840_v58 = vpop.f32.mrb[7].mxu0 }
 0x246   : > { %3313 = vmatprep.mubr.f32.mxu0 %v2840_v58  ;;  %v3206_v58 = vld [vmem:[%s7651_s2 + $0x538] sm:$0xff] }
 0x247   : > { %3314 = vmatmul.mubr.f32.gmra.mrb[36].mxu0 %v2838_v41  ;;  %v3204_v41 = vld [vmem:[%s7651_s2 + $0x528] sm:$0xff] }
 0x248   : > { %v2844_v50 = vpop.f32.mrb[8].mxu0 }
 0x249   : > { %v2846_v33 = vpop.f32.mrb[9].mxu0 }
 0x24a   : > { %3319 = vmatprep.mubr.f32.mxu0 %v2846_v33  ;;  %v3880_v33 = vpack.c.bf16 %v3206_v58, %v3204_v41 }
 0x24b   : > { %3320 = vmatmul.mubr.f32.gmra.mrb[38].mxu0 %v2844_v50  ;;  %v3878_v50 = vpack.c.bf16 %v3201_v21, %v3199_v30 }
 0x29d   : > { %v2915_v28 = vpop.f32.mrb[10].mxu0 }
 0x29e   : > { %v2917_v25 = vpop.f32.mrb[11].mxu0 }
 0x29f   : > { %3390 = vmatprep.mubr.f32.mxu1 %v2917_v25  ;;  %v3207_v25 = vld [vmem:[%s7651_s2 + $0x540] sm:$0xff] }
 0x2a0   : > { %3391 = vmatmul.mubr.f32.vlgmr.msra.gmra.mrb[0].mxu1 %v2915_v28  ;;  %v3882_v28 = vpack.c.bf16 %v3205_v39, %v3203_v6 }
 0x2a1   : > { %3847 = vmatpush1.bf16.msra.mxu1 %v3846_v40  ;;  %v2921_v63 = vpop.f32.mrb[12].mxu0  ;;  %v3884_v40 = vpack.c.bf16 %v3210_v20, %v3208_v11 }
 0x2a2   : > { %3849 = vmatprep.subr.bf16.mxu1 %v3848_v38  ;;  %v2923_v52 = vpop.f32.mrb[13].mxu0  ;;  %v3209_v38 = vld [vmem:[%s7651_s2 + $0x550] sm:$0xff] }
 0x2a3   : > { %3396 = vmatprep.mubr.f32.mxu1 %v2923_v52  ;;  %v3218_v52 = vld [vmem:[%s7651_s2 + $0x598] sm:$0xff] }
 0x2a4   : > { %3397 = vmatmul.mubr.f32.gmra.mrb[2].mxu1 %v2921_v63  ;;  %v3888_v63 = vpack.c.bf16 %v3214_v54, %v3212_v13 }
 0x2a5   : > { %3851 = vmatpush1.bf16.msra.mxu1 %v3850_v4  ;;  %v2927_v9 = vpop.f32.mrb[14].mxu0  ;;  %v3886_v4 = vpack.c.bf16 %v3209_v38, %v3207_v25 }
 0x2a6   : > { %3853 = vmatprep.subr.bf16.mxu1 %v3852_v60  ;;  %v2929_v24 = vpop.f32.mrb[15].mxu0  ;;  %v3211_v60 = vld [vmem:[%s7651_s2 + $0x560] sm:$0xff] }
 0x2a7   : > { %3402 = vmatprep.mubr.f32.mxu1 %v2929_v24  ;;  %v3222_v24 = vld [vmem:[%s7651_s2 + $0x5b8] sm:$0xff] }
 0x2a8   : > { %3403 = vmatmul.mubr.f32.gmra.mrb[4].mxu1 %v2927_v9  ;;  %v3892_v9 = vpack.c.bf16 %v3218_v52, %v3216_v61 }
 0x2a9   : > { %3855 = vmatpush1.bf16.msra.mxu1 %v3854_v29  ;;  %v2933_v32 = vpop.f32.mrb[16].mxu0  ;;  %v3890_v29 = vpack.c.bf16 %v3213_v35, %v3211_v60 }
 0x2aa   : > { %3857 = vmatprep.subr.bf16.mxu1 %v3856_v23  ;;  %v2935_v57 = vpop.f32.mrb[17].mxu0  ;;  %v3215_v23 = vld [vmem:[%s7651_s2 + $0x580] sm:$0xff] }
 0x2ab   : > { %3408 = vmatprep.mubr.f32.mxu1 %v2935_v57  ;;  %v3226_v57 = vld [vmem:[%s7651_s2 + $0x5d8] sm:$0xff] }
 0x2ac   : > { %3409 = vmatmul.mubr.f32.gmra.mrb[6].mxu1 %v2933_v32  ;;  %v3896_v32 = vpack.c.bf16 %v3222_v24, %v3220_v12 }
 0x2ad   : > { %3859 = vmatpush1.bf16.msra.mxu1 %v3858_v8  ;;  %v2939_v26 = vpop.f32.mrb[18].mxu0  ;;  %v3894_v8 = vpack.c.bf16 %v3217_v55, %v3215_v23 }
 0x2ae   : > { %3861 = vmatprep.subr.bf16.mxu1 %v3860_v3  ;;  %v2941_v47 = vpop.f32.mrb[19].mxu0  ;;  %v3219_v3 = vld [vmem:[%s7651_s2 + $0x5a0] sm:$0xff] }
 0x2af   : > { %3414 = vmatprep.mubr.f32.mxu1 %v2941_v47  ;;  %v3230_v47 = vld [vmem:[%s7651_s2 + $0x5f8] sm:$0xff] }
 0x2b0   : > { %3415 = vmatmul.mubr.f32.gmra.mrb[8].mxu1 %v2939_v26  ;;  %v3900_v26 = vpack.c.bf16 %v3226_v57, %v3224_v42 }
 0x2b1   : > { %3863 = vmatpush1.bf16.msra.mxu1 %v3862_v10  ;;  %v3898_v10 = vpack.c.bf16 %v3221_v15, %v3219_v3 }
 0x2b2   : > { %3865 = vmatprep.subr.bf16.mxu1 %v3864_v46  ;;  %v3223_v46 = vld [vmem:[%s7651_s2 + $0x5c0] sm:$0xff] }
 0x2b5   : > { %3867 = vmatpush1.bf16.msra.mxu1 %v3866_v51  ;;  %v3902_v51 = vpack.c.bf16 %v3225_v7, %v3223_v46 }
 0x2b6   : > { %3869 = vmatprep.subr.bf16.mxu1 %v3868_v34  ;;  %v3904_v34 = vpack.c.bf16 %v3230_v47, %v3228_v5 }
 0x2b9   : > { %3871 = vmatpush1.bf16.msra.mxu1 %v3870_v53 }
 0x2ba   : > { %3873 = vmatprep.subr.bf16.mxu1 %v3872_v48 }
 0x2bd   : > { %3875 = vmatpush1.bf16.msra.mxu1 %v3874_v22 }
 0x2be   : > { %3877 = vmatprep.subr.bf16.mxu1 %v3876_v18 }
 0x2c1   : > { %3879 = vmatpush1.bf16.msra.mxu1 %v3878_v50  ;;  %v3010_v62 = vpop.f32.mrb[20].mxu0 }
 0x2c2   : > { %3881 = vmatprep.subr.bf16.mxu1 %v3880_v33  ;;  %v3012_v0 = vpop.f32.mrb[21].mxu0 }
 0x2c3   : > { %3485 = vmatprep.mubr.f32.mxu1 %v3012_v0 }
 0x2c5   : > { %3883 = vmatpush1.bf16.msra.mxu1 %v3882_v28  ;;  %v3016_v1 = vpop.f32.mrb[22].mxu0 }
 0x2c6   : > { %3885 = vmatprep.subr.bf16.mxu1 %v3884_v40  ;;  %v3018_v45 = vpop.f32.mrb[23].mxu0 }
 0x2c9   : > { %3887 = vmatpush1.bf16.msra.mxu1 %v3886_v4  ;;  %v3022_v36 = vpop.f32.mrb[24].mxu0 }
 0x2ca   : > { %3889 = vmatprep.subr.bf16.mxu1 %v3888_v63  ;;  %v3024_v19 = vpop.f32.mrb[25].mxu0 }
 0x2cd   : > { %3891 = vmatpush1.bf16.msra.mxu1 %v3890_v29  ;;  %v3028_v59 = vpop.f32.mrb[26].mxu0 }
 0x2ce   : > { %3893 = vmatprep.subr.bf16.mxu1 %v3892_v9  ;;  %v3030_v56 = vpop.f32.mrb[27].mxu0 }
 0x2d1   : > { %3895 = vmatpush1.bf16.msra.mxu1 %v3894_v8  ;;  %v3034_v44 = vpop.f32.mrb[28].mxu0 }
 0x2d2   : > { %3897 = vmatprep.subr.bf16.mxu1 %v3896_v32  ;;  %v3036_v37 = vpop.f32.mrb[29].mxu0 }
 0x2d5   : > { %3899 = vmatpush1.bf16.msra.mxu1 %v3898_v10 }
 0x2d6   : > { %3901 = vmatprep.subr.bf16.mxu1 %v3900_v26 }
 0x2d9   : > { %3903 = vmatpush1.bf16.msra.mxu1 %v3902_v51 }
 0x2da   : > { %3905 = vmatprep.subr.bf16.mxu1 %v3904_v34 }
 0x2dd   : > { %3907 = vmatpush1.bf16.msra.mxu1 %v3906_v43 }
 0x2e0   : > { %3486 = vmatmul.mubr.f32.vlgmr.msra.gmra.mrb[0].mxu1 %v3010_v62 }
 0x2e1   : > { %3491 = vmatprep.mubr.f32.mxu1 %v3018_v45 }
 0x2e4   : > { %3492 = vmatmul.mubr.f32.gmra.mrb[2].mxu1 %v3016_v1 }
 0x2e5   : > { %3497 = vmatprep.mubr.f32.mxu1 %v3024_v19 }
 0x2e8   : > { %3498 = vmatmul.mubr.f32.gmra.mrb[4].mxu1 %v3022_v36 }
 0x2e9   : > { %3503 = vmatprep.mubr.f32.mxu1 %v3030_v56 }
 0x2ec   : > { %3504 = vmatmul.mubr.f32.gmra.mrb[6].mxu1 %v3028_v59 }
 0x2ed   : > { %3509 = vmatprep.mubr.f32.mxu1 %v3036_v37 }
 0x2f0   : > { %3510 = vmatmul.mubr.f32.gmra.mrb[8].mxu1 %v3034_v44 }
 0x30e   : > { %v3297_v14 = vpop.f32.mrb[30].mxu0 }
 0x30f   : > { %v3299_v53 = vpop.f32.mrb[31].mxu0 }
 0x312   : > { %v3303_v48 = vpop.f32.mrb[32].mxu0 }
 0x313   : > { %v3305_v17 = vpop.f32.mrb[33].mxu0 }
 0x316   : > { %v3309_v49 = vpop.f32.mrb[34].mxu0 }
 0x317   : > { %v3311_v31 = vpop.f32.mrb[35].mxu0 }
 0x31a   : > { %v3315_v2 = vpop.f32.mrb[36].mxu0 }
 0x31b   : > { %v3317_v22 = vpop.f32.mrb[37].mxu0 }
 0x31e   : > { %v3321_v18 = vpop.f32.mrb[38].mxu0 }
 0x31f   : > { %v3323_v30 = vpop.f32.mrb[39].mxu0 }
 0x3b3   : > { %v3487_v21 = vpop.f32.mrb[0].mxu1 }
 0x3b4   : > { %v3908_v41 = vadd.f32 %v3487_v21, %v3297_v14  ;;  %v3489_v58 = vpop.f32.mrb[1].mxu1 }
 0x3b5   : > { %v3909_v50 = vadd.f32 %v3489_v58, %v3299_v53 }
 0x3b6   : > { %3516 = vst [vmem:[%s7629_s28] sm:$0xff] %v3908_v41 }
 0x3b7   : > { %3518 = vst.msk [vmem:[%s7629_s28 + $0x8] sm:$0xff] %vm3517_vm6, %v3909_v50  ;;  %v3493_v33 = vpop.f32.mrb[2].mxu1 }
 0x3b8   : > { %v3910_v6 = vadd.f32 %v3493_v33, %v3303_v48  ;;  %v3495_v39 = vpop.f32.mrb[3].mxu1 }
 0x3b9   : > { %v3911_v11 = vadd.f32 %v3495_v39, %v3305_v17 }
 0x3ba   : > { %3519 = vst [vmem:[%s7629_s28 + $0x10] sm:$0xff] %v3910_v6 }
 0x3bb   : > { %3520 = vst.msk [vmem:[%s7629_s28 + $0x18] sm:$0xff] %vm3517_vm6, %v3911_v11  ;;  %v3499_v20 = vpop.f32.mrb[4].mxu1 }
 0x3bc   : > { %v3912_v28 = vadd.f32 %v3499_v20, %v3309_v49  ;;  %v3501_v40 = vpop.f32.mrb[5].mxu1 }
 0x3bd   : > { %v3913_v25 = vadd.f32 %v3501_v40, %v3311_v31 }
 0x3be   : > { %3521 = vst [vmem:[%s7629_s28 + $0x20] sm:$0xff] %v3912_v28 }
 0x3bf   : > { %3522 = vst.msk [vmem:[%s7629_s28 + $0x28] sm:$0xff] %vm3517_vm6, %v3913_v25  ;;  %v3505_v38 = vpop.f32.mrb[6].mxu1 }
 0x3c0   : > { %v3914_v13 = vadd.f32 %v3505_v38, %v3315_v2  ;;  %v3507_v54 = vpop.f32.mrb[7].mxu1 }
 0x3c1   : > { %v3915_v62 = vadd.f32 %v3507_v54, %v3317_v22 }
 0x3c2   : > { %3523 = vst [vmem:[%s7629_s28 + $0x30] sm:$0xff] %v3914_v13 }
 0x3c3   : > { %3524 = vst.msk [vmem:[%s7629_s28 + $0x38] sm:$0xff] %vm3517_vm6, %v3915_v62  ;;  %v3511_v0 = vpop.f32.mrb[8].mxu1 }
 0x3c4   : > { %v3916_v4 = vadd.f32 %v3511_v0, %v3321_v18  ;;  %v3513_v63 = vpop.f32.mrb[9].mxu1 }
 0x3c5   : > { %v3917_v60 = vadd.f32 %v3513_v63, %v3323_v30 }
 0x3c6   : > { %3525 = vst [vmem:[%s7629_s28 + $0x40] sm:$0xff] %v3916_v4 }
 0x3c7   : > { %3526 = vst.msk [vmem:[%s7629_s28 + $0x48] sm:$0xff] %vm3517_vm6, %v3917_v60 }
 0x3c8 PF: > { %s13_s12 = sadd.s32 1, %s4254_s12  }
 0x3c9   : > { %p10_p4 = scmp.ge.s32.totalorder %s13_s12, 4  }
 0x3cb   :  { %12 = sbr.rel (!%p10_p4) target bundleno = 1 (0x1), region = 67 }

// kernel: risk_assessment_forward.3
= control target key start
LH: loop header
LB: loop body
LE: loop exit
PB: predicated region body
PF: predicated region fallthrough
CT: control target
= control target key end

     0   :  { %v9063_v21 = vmov 1983009808   ;;  %v65_v23 = vlaneseq  ;;  %vm9065_vm0 = vmmov 0   ;;  %vm6879_vm1 = vcmask 1041408   ;;  %s11070_s1 = inlined_call_operand.vmem [shape: bf16[9600,50], index: 1, kind: input, shape index: {}]   ;;  %s11071_s0 = inlined_call_operand.vmem [shape: f32[2,9600], index: 0, kind: input, shape index: {}]   ;;  %s11072_s2 = inlined_call_operand.vmem [shape: f32[1,50], index: 2, kind: input, shape index: {}]   ;;  %s11073_s3 = inlined_call_operand.vmem [shape: f32[50,1], index: 3, kind: input, shape index: {}]   ;;  %s11074_s4 = inlined_call_operand.<no memory space> [shape: f32[1,1], index: 4, kind: input, shape index: {}]   ;;  %s11075_s5 = inlined_call_operand.vmem [shape: f32[2,1], index: 5, kind: output, shape index: {}]  }
   0x1   :  { %v8444_v0 = vld [vmem:[%s11070_s1 + $0x40] sm:$0xff]   ;;  %v8448_v4 = vld [vmem:[%s11070_s1 + $0x48] sm:$0xff]   ;;  %v8452_v8 = vld [vmem:[%s11070_s1 + $0x50] sm:$0xff]   ;;  %v63_v22 = vunpack.c.l.s4 %v9063_v21  ;;  %vm6875_vm2 = vcmask 408576   ;;  %vm6953_vm3 = vcmask 1024  }
   0x2   :  { %v8445_v1 = vld [vmem:[%s11070_s1] sm:$0xff]   ;;  %7563 = vmatprep.subr.bf16.mxu0 %v8444_v0  ;;  %v8449_v5 = vld [vmem:[%s11070_s1 + $0x8] sm:$0xff]   ;;  %v8453_v9 = vld [vmem:[%s11070_s1 + $0x10] sm:$0xff]   ;;  %v66_v29 = vshrl.u32 %v65_v23, 7 }
   0x3   :  { %v8446_v2 = vld [vmem:[%s11070_s1 + $0xc0] sm:$0xff]   ;;  %7564 = vmatpush3.bf16.msra.mxu0 %v8445_v1  ;;  %v8450_v6 = vld [vmem:[%s11070_s1 + $0xc8] sm:$0xff]   ;;  %v8454_v10 = vld [vmem:[%s11070_s1 + $0xd0] sm:$0xff]   ;;  %v64_v28 = vunpack.c.0.s8 %v63_v22 }
   0x4   :  { %v8447_v3 = vld [vmem:[%s11070_s1 + $0x80] sm:$0xff]   ;;  %7585 = vmatprep.subr.bf16.mxu1 %v8446_v2  ;;  %7565 = vmatprep.subr.bf16.mxu0 %v8448_v4  ;;  %v8451_v7 = vld [vmem:[%s11070_s1 + $0x88] sm:$0xff]   ;;  %v8455_v11 = vld [vmem:[%s11070_s1 + $0x90] sm:$0xff]  }
   0x5   :  { %7586 = vmatpush3.bf16.msra.mxu1 %v8447_v3  ;;  %v8456_v12 = vld [vmem:[%s11070_s1 + $0x58] sm:$0xff]   ;;  %v8460_v16 = vld [vmem:[%s11070_s1 + $0x60] sm:$0xff]   ;;  %v8464_v20 = vld [vmem:[%s11070_s1 + $0x68] sm:$0xff]   ;;  %v9184_v34 = vsub.s32 %v64_v28, %v66_v29 }
   0x6   :  { %7587 = vmatprep.subr.bf16.mxu1 %v8450_v6  ;;  %v8457_v13 = vld [vmem:[%s11070_s1 + $0x18] sm:$0xff]   ;;  %v8461_v17 = vld [vmem:[%s11070_s1 + $0x20] sm:$0xff]   ;;  %v8465_v24 = vld [vmem:[%s11070_s1 + $0x28] sm:$0xff]  }
   0x7   :  { %7566 = vmatpush3.bf16.msra.mxu0 %v8449_v5  ;;  %v8458_v14 = vld [vmem:[%s11070_s1 + $0xd8] sm:$0xff]   ;;  %v8462_v18 = vld [vmem:[%s11070_s1 + $0xe0] sm:$0xff]   ;;  %v8466_v25 = vld [vmem:[%s11070_s1 + $0xe8] sm:$0xff]  }
   0x8   :  { %7567 = vmatprep.subr.bf16.mxu0 %v8452_v8  ;;  %v8459_v15 = vld [vmem:[%s11070_s1 + $0x98] sm:$0xff]   ;;  %v8463_v19 = vld [vmem:[%s11070_s1 + $0xa0] sm:$0xff]   ;;  %v8467_v26 = vld [vmem:[%s11070_s1 + $0xa8] sm:$0xff]  }
   0x9   :  { %7588 = vmatpush3.bf16.msra.mxu1 %v8451_v7  ;;  %v8468_v27 = vld [vmem:[%s11070_s1 + $0x70] sm:$0xff]   ;;  %v8472_v33 = vld [vmem:[%s11070_s1 + $0x78] sm:$0xff]   ;;  %v23_v37 = vld [vmem:[%s11071_s0] sm:$0xff] }
   0xa   :  { %7589 = vmatprep.subr.bf16.mxu1 %v8454_v10  ;;  %v8469_v30 = vld [vmem:[%s11070_s1 + $0x30] sm:$0xff]   ;;  %v8473_v35 = vld [vmem:[%s11070_s1 + $0x38] sm:$0xff]   ;;  %v68_v38 = vrot.slane %v23_v37, %v9184_v34  ;;  %v61_v40 = vcombine.high %v23_v37, %v23_v37  ;;  %v8476_v41 = vld [vmem:[%s11070_s1 + $0x140] sm:$0xff]  }
   0xb   :  { %7568 = vmatpush3.bf16.msra.mxu0 %v8453_v9  ;;  %v8470_v31 = vld [vmem:[%s11070_s1 + $0xf0] sm:$0xff]   ;;  %v8474_v36 = vld [vmem:[%s11070_s1 + $0xf8] sm:$0xff]   ;;  %v8478_v44 = vld [vmem:[%s11070_s1 + $0x100] sm:$0xff]  }
   0xc   :  { %7569 = vmatprep.subr.bf16.mxu0 %v8456_v12  ;;  %v8471_v32 = vld [vmem:[%s11070_s1 + $0xb0] sm:$0xff]   ;;  %v8475_v39 = vld [vmem:[%s11070_s1 + $0xb8] sm:$0xff]   ;;  %v76_v42 = vcombine.high %v68_v38, %v68_v38  ;;  %v75_v43 = vrot.slane %v61_v40, %v9184_v34  ;;  %v458_v45 = vpack.c.bf16 %v68_v38, %v68_v38  ;;  %v8479_v46 = vld [vmem:[%s11070_s1 + $0x1c0] sm:$0xff]  }
   0xd   :  { %7590 = vmatpush3.bf16.msra.mxu1 %v8455_v11  ;;  %v8480_v49 = vld [vmem:[%s11070_s1 + $0x180] sm:$0xff]   ;;  %v8481_v51 = vld [vmem:[%s11070_s1 + $0x148] sm:$0xff]   ;;  %v8485_v56 = vld [vmem:[%s11070_s1 + $0x150] sm:$0xff]  }
   0xe   :  { %7591 = vmatprep.subr.bf16.mxu1 %v8458_v14  ;;  %v459_v47 = vpack.c.bf16 %v76_v42, %v76_v42  ;;  %v77_v48 = vcombine.high %v75_v43, %v75_v43  ;;  %v460_v50 = vpack.c.bf16 %v75_v43, %v75_v43  ;;  %v8482_v53 = vld [vmem:[%s11070_s1 + $0x108] sm:$0xff]   ;;  %v8486_v57 = vld [vmem:[%s11070_s1 + $0x110] sm:$0xff]   ;;  %v8489_v60 = vld [vmem:[%s11070_s1 + $0x158] sm:$0xff]  }
   0xf   :  { %7570 = vmatpush3.bf16.msra.mxu0 %v8457_v13  ;;  %v8483_v54 = vld [vmem:[%s11070_s1 + $0x1c8] sm:$0xff]   ;;  %v8487_v58 = vld [vmem:[%s11070_s1 + $0x1d0] sm:$0xff]   ;;  %v8490_v61 = vld [vmem:[%s11070_s1 + $0x118] sm:$0xff]  }
  0x10   :  { %7571 = vmatprep.subr.bf16.mxu0 %v8460_v16  ;;  %5372 = vmatprep.mubr.bf16.mxu0 %v459_v47  ;;  %v461_v52 = vpack.c.bf16 %v77_v48, %v77_v48  ;;  %v8484_v55 = vld [vmem:[%s11070_s1 + $0x188] sm:$0xff]   ;;  %v8488_v59 = vld [vmem:[%s11070_s1 + $0x190] sm:$0xff]   ;;  %v8491_v62 = vld [vmem:[%s11070_s1 + $0x1d8] sm:$0xff]  }
  0x11   :  { %7592 = vmatpush3.bf16.msra.mxu1 %v8459_v15  ;;  %v8492_v63 = vld [vmem:[%s11070_s1 + $0x198] sm:$0xff]   ;;  %v8493_v0 = vld [vmem:[%s11070_s1 + $0x160] sm:$0xff]   ;;  %v8497_v4 = vld [vmem:[%s11070_s1 + $0x168] sm:$0xff]  }
  0x12   :  { %7593 = vmatprep.subr.bf16.mxu1 %v8462_v18  ;;  %5412 = vmatprep.mubr.bf16.mxu1 %v461_v52  ;;  %v8494_v1 = vld [vmem:[%s11070_s1 + $0x120] sm:$0xff]   ;;  %v8498_v5 = vld [vmem:[%s11070_s1 + $0x128] sm:$0xff]   ;;  %v8501_v8 = vld [vmem:[%s11070_s1 + $0x170] sm:$0xff]  }
  0x13   :  { %7572 = vmatpush3.bf16.msra.mxu0 %v8461_v17  ;;  %v8495_v2 = vld [vmem:[%s11070_s1 + $0x1e0] sm:$0xff]   ;;  %v8499_v6 = vld [vmem:[%s11070_s1 + $0x1e8] sm:$0xff]   ;;  %v8502_v9 = vld [vmem:[%s11070_s1 + $0x130] sm:$0xff]  }
  0x14   :  { %7573 = vmatprep.subr.bf16.mxu0 %v8464_v20  ;;  %v8496_v3 = vld [vmem:[%s11070_s1 + $0x1a0] sm:$0xff]   ;;  %v8500_v7 = vld [vmem:[%s11070_s1 + $0x1a8] sm:$0xff]   ;;  %v8503_v10 = vld [vmem:[%s11070_s1 + $0x1f0] sm:$0xff]  }
  0x15   :  { %7594 = vmatpush3.bf16.msra.mxu1 %v8463_v19  ;;  %v8504_v11 = vld [vmem:[%s11070_s1 + $0x1b0] sm:$0xff]   ;;  %v8505_v12 = vld [vmem:[%s11070_s1 + $0x178] sm:$0xff]   ;;  %v24_v15 = vld [vmem:[%s11071_s0 + $0x8] sm:$0xff] }
  0x16   :  { %7595 = vmatprep.subr.bf16.mxu1 %v8466_v25  ;;  %v8506_v13 = vld [vmem:[%s11070_s1 + $0x138] sm:$0xff]   ;;  %v85_v16 = vrot.slane %v24_v15, %v9184_v34  ;;  %v78_v18 = vcombine.high %v24_v15, %v24_v15  ;;  %v8509_v19 = vld [vmem:[%s11070_s1 + $0x240] sm:$0xff]   ;;  %v8514_v29 = vld [vmem:[%s11070_s1 + $0x248] sm:$0xff]  }
  0x17   :  { %7574 = vmatpush3.bf16.msra.mxu0 %v8465_v24  ;;  %v8507_v14 = vld [vmem:[%s11070_s1 + $0x1f8] sm:$0xff]   ;;  %v8511_v22 = vld [vmem:[%s11070_s1 + $0x200] sm:$0xff]   ;;  %v8520_v37 = vld [vmem:[%s11070_s1 + $0x2d0] sm:$0xff]  }
  0x18   :  { %7575 = vmatprep.subr.bf16.mxu0 %v8468_v27  ;;  %v8508_v17 = vld [vmem:[%s11070_s1 + $0x1b8] sm:$0xff]   ;;  %v93_v20 = vcombine.high %v85_v16, %v85_v16  ;;  %v92_v21 = vrot.slane %v78_v18, %v9184_v34  ;;  %v462_v23 = vpack.c.bf16 %v85_v16, %v85_v16  ;;  %v8512_v24 = vld [vmem:[%s11070_s1 + $0x2c0] sm:$0xff]   ;;  %v8521_v38 = vld [vmem:[%s11070_s1 + $0x290] sm:$0xff]  }
  0x19   :  { %7596 = vmatpush3.bf16.msra.mxu1 %v8467_v26  ;;  %v8513_v27 = vld [vmem:[%s11070_s1 + $0x280] sm:$0xff]   ;;  %v8523_v40 = vld [vmem:[%s11070_s1 + $0x218] sm:$0xff]   ;;  %v8530_v47 = vld [vmem:[%s11070_s1 + $0x268] sm:$0xff]  }
  0x1a   :  { %7597 = vmatprep.subr.bf16.mxu1 %v8470_v31  ;;  %v463_v25 = vpack.c.bf16 %v93_v20, %v93_v20  ;;  %v94_v26 = vcombine.high %v92_v21, %v92_v21  ;;  %v464_v28 = vpack.c.bf16 %v92_v21, %v92_v21  ;;  %v8515_v31 = vld [vmem:[%s11070_s1 + $0x208] sm:$0xff]   ;;  %v8525_v42 = vld [vmem:[%s11070_s1 + $0x298] sm:$0xff]   ;;  %v8526_v43 = vld [vmem:[%s11070_s1 + $0x260] sm:$0xff]  }
  0x1b   :  { %7576 = vmatpush3.bf16.msra.mxu0 %v8469_v30  ;;  %v8531_v48 = vld [vmem:[%s11070_s1 + $0x228] sm:$0xff]   ;;  %v8535_v52 = vld [vmem:[%s11070_s1 + $0x230] sm:$0xff]   ;;  %v8556_v18 = vld [vmem:[%s11070_s1 + $0x318] sm:$0xff]  }
  0x1c   :  { %7577 = vmatprep.subr.bf16.mxu0 %v8472_v33  ;;  %v465_v30 = vpack.c.bf16 %v94_v26, %v94_v26  ;;  %v8517_v33 = vld [vmem:[%s11070_s1 + $0x288] sm:$0xff]   ;;  %v8553_v15 = vld [vmem:[%s11070_s1 + $0x3d0] sm:$0xff]   ;;  %v8558_v20 = vld [vmem:[%s11070_s1 + $0x398] sm:$0xff]  }
  0x1d   :  { %7598 = vmatpush3.bf16.msra.mxu1 %v8471_v32  ;;  %v8516_v32 = vld [vmem:[%s11070_s1 + $0x2c8] sm:$0xff]   ;;  %v8554_v16 = vld [vmem:[%s11070_s1 + $0x390] sm:$0xff]   ;;  %v8559_v21 = vld [vmem:[%s11070_s1 + $0x360] sm:$0xff]  }
  0x1e   :  { %7599 = vmatprep.subr.bf16.mxu1 %v8474_v36  ;;  %v8519_v36 = vld [vmem:[%s11070_s1 + $0x210] sm:$0xff]   ;;  %v8564_v26 = vld [vmem:[%s11070_s1 + $0x328] sm:$0xff]  }
  0x1f   :  { %7578 = vmatpush3.bf16.msra.mxu0 %v8473_v35  ;;  %v8518_v35 = vld [vmem:[%s11070_s1 + $0x250] sm:$0xff]  }
  0x20   :  { %7607 = vmatprep.subr.bf16.mxu0 %v8476_v41  ;;  %v8524_v41 = vld [vmem:[%s11070_s1 + $0x2d8] sm:$0xff]  }
  0x21   :  { %7600 = vmatpush3.bf16.msra.mxu1 %v8475_v39  ;;  %v8522_v39 = vld [vmem:[%s11070_s1 + $0x258] sm:$0xff]  }
  0x22   :  { %7629 = vmatprep.subr.bf16.mxu1 %v8479_v46  ;;  %5373 = vmatmul.mubr.bf16.vlgmr.msra.gmra.mrb[0].mxu0 %v458_v45  ;;  %v8528_v45 = vld [vmem:[%s11070_s1 + $0x2e0] sm:$0xff]  }
  0x23   :  { %7608 = vmatpush3.bf16.msra.mxu0 %v8478_v44  ;;  %5452 = vmatprep.mubr.bf16.mxu0 %v463_v25  ;;  %v8527_v44 = vld [vmem:[%s11070_s1 + $0x220] sm:$0xff]   ;;  %v8563_v25 = vld [vmem:[%s11070_s1 + $0x368] sm:$0xff]  }
  0x24   :  { %5413 = vmatmul.mubr.bf16.vlgmr.msra.gmra.mrb[0].mxu1 %v460_v50  ;;  %7609 = vmatprep.subr.bf16.mxu0 %v8481_v51  ;;  %v8529_v46 = vld [vmem:[%s11070_s1 + $0x2a0] sm:$0xff]   ;;  %v8533_v50 = vld [vmem:[%s11070_s1 + $0x2a8] sm:$0xff]   ;;  %v8534_v51 = vld [vmem:[%s11070_s1 + $0x270] sm:$0xff]  }
  0x25   :  { %7630 = vmatpush3.bf16.msra.mxu1 %v8480_v49  ;;  %5492 = vmatprep.mubr.bf16.mxu1 %v465_v30  ;;  %v8532_v49 = vld [vmem:[%s11070_s1 + $0x2e8] sm:$0xff]   ;;  %v8568_v30 = vld [vmem:[%s11070_s1 + $0x330] sm:$0xff]  }
  0x26   :  { %7631 = vmatprep.subr.bf16.mxu1 %v8483_v54  ;;  %v8537_v54 = vld [vmem:[%s11070_s1 + $0x2b0] sm:$0xff]  }
  0x27   :  { %7610 = vmatpush3.bf16.msra.mxu0 %v8482_v53  ;;  %v8536_v53 = vld [vmem:[%s11070_s1 + $0x2f0] sm:$0xff]  }
  0x28   :  { %7611 = vmatprep.subr.bf16.mxu0 %v8485_v56  ;;  %v8539_v56 = vld [vmem:[%s11070_s1 + $0x238] sm:$0xff]  }
  0x29   :  { %7632 = vmatpush3.bf16.msra.mxu1 %v8484_v55  ;;  %v8538_v55 = vld [vmem:[%s11070_s1 + $0x278] sm:$0xff]  }
  0x2a   :  { %7633 = vmatprep.subr.bf16.mxu1 %v8487_v58  ;;  %v25_v58 = vld [vmem:[%s11071_s0 + $0x10] sm:$0xff] }
  0x2b   :  { %7612 = vmatpush3.bf16.msra.mxu0 %v8486_v57  ;;  %v8540_v57 = vld [vmem:[%s11070_s1 + $0x2f8] sm:$0xff]  }
  0x2c   :  { %7613 = vmatprep.subr.bf16.mxu0 %v8489_v60  ;;  %v8541_v60 = vld [vmem:[%s11070_s1 + $0x2b8] sm:$0xff]  }
  0x2d   :  { %7634 = vmatpush3.bf16.msra.mxu1 %v8488_v59  ;;  %v102_v59 = vrot.slane %v25_v58, %v9184_v34 }
  0x2e   :  { %7635 = vmatprep.subr.bf16.mxu1 %v8491_v62  ;;  %v8542_v62 = vld [vmem:[%s11070_s1 + $0x340] sm:$0xff]  }
  0x2f   :  { %7614 = vmatpush3.bf16.msra.mxu0 %v8490_v61  ;;  %v95_v61 = vcombine.high %v25_v58, %v25_v58  ;;  %v8586_v58 = vld [vmem:[%s11070_s1 + $0x4d0] sm:$0xff]  }
  0x30   :  { %7615 = vmatprep.subr.bf16.mxu0 %v8493_v0 }
  0x31   :  { %7636 = vmatpush3.bf16.msra.mxu1 %v8492_v63  ;;  %v110_v63 = vcombine.high %v102_v59, %v102_v59  ;;  %v109_v0 = vrot.slane %v95_v61, %v9184_v34  ;;  %v8589_v61 = vld [vmem:[%s11070_s1 + $0x418] sm:$0xff]  }
  0x32   :  { %7637 = vmatprep.subr.bf16.mxu1 %v8495_v2  ;;  %v466_v2 = vpack.c.bf16 %v102_v59, %v102_v59  ;;  %v8587_v59 = vld [vmem:[%s11070_s1 + $0x490] sm:$0xff]  }
  0x33   :  { %7616 = vmatpush3.bf16.msra.mxu0 %v8494_v1  ;;  %v8544_v1 = vld [vmem:[%s11070_s1 + $0x300] sm:$0xff]  }
  0x34   :  { %7617 = vmatprep.subr.bf16.mxu0 %v8497_v4  ;;  %v467_v4 = vpack.c.bf16 %v110_v63, %v110_v63  ;;  %v8591_v63 = vld [vmem:[%s11070_s1 + $0x498] sm:$0xff]  }
  0x35   :  { %7638 = vmatpush3.bf16.msra.mxu1 %v8496_v3  ;;  %v8545_v3 = vld [vmem:[%s11070_s1 + $0x3c0] sm:$0xff]  }
  0x36   :  { %7639 = vmatprep.subr.bf16.mxu1 %v8499_v6  ;;  %v8546_v6 = vld [vmem:[%s11070_s1 + $0x380] sm:$0xff]  }
  0x37   :  { %7618 = vmatpush3.bf16.msra.mxu0 %v8498_v5  ;;  %v111_v5 = vcombine.high %v109_v0, %v109_v0 }
  0x38   :  { %7619 = vmatprep.subr.bf16.mxu0 %v8501_v8  ;;  %v8547_v8 = vld [vmem:[%s11070_s1 + $0x348] sm:$0xff]  }
  0x39   :  { %7640 = vmatpush3.bf16.msra.mxu1 %v8500_v7  ;;  %v468_v7 = vpack.c.bf16 %v109_v0, %v109_v0  ;;  %v8592_v0 = vld [vmem:[%s11070_s1 + $0x460] sm:$0xff]  }
  0x3a   :  { %7641 = vmatprep.subr.bf16.mxu1 %v8503_v10  ;;  %v8548_v10 = vld [vmem:[%s11070_s1 + $0x308] sm:$0xff]  }
  0x3b   :  { %7620 = vmatpush3.bf16.msra.mxu0 %v8502_v9  ;;  %v469_v9 = vpack.c.bf16 %v111_v5, %v111_v5  ;;  %v8597_v5 = vld [vmem:[%s11070_s1 + $0x428] sm:$0xff]  }
  0x3c   :  { %7621 = vmatprep.subr.bf16.mxu0 %v8505_v12  ;;  %v8550_v12 = vld [vmem:[%s11070_s1 + $0x388] sm:$0xff]  }
  0x3d   :  { %7642 = vmatpush3.bf16.msra.mxu1 %v8504_v11  ;;  %v8549_v11 = vld [vmem:[%s11070_s1 + $0x3c8] sm:$0xff]  }
  0x3e   :  { %7643 = vmatprep.subr.bf16.mxu1 %v8507_v14  ;;  %v8552_v14 = vld [vmem:[%s11070_s1 + $0x310] sm:$0xff]  }
  0x3f   :  { %7622 = vmatpush3.bf16.msra.mxu0 %v8506_v13  ;;  %v8551_v13 = vld [vmem:[%s11070_s1 + $0x350] sm:$0xff]  }
  0x40   :  { %7651 = vmatprep.subr.bf16.mxu0 %v8509_v19  ;;  %v8557_v19 = vld [vmem:[%s11070_s1 + $0x3d8] sm:$0xff]  }
  0x41   :  { %7644 = vmatpush3.bf16.msra.mxu1 %v8508_v17  ;;  %v8555_v17 = vld [vmem:[%s11070_s1 + $0x358] sm:$0xff]  }
  0x42   :  { %5453 = vmatmul.mubr.bf16.vlgmr.msra.gmra.mrb[4].mxu0 %v462_v23  ;;  %7673 = vmatprep.subr.bf16.mxu1 %v8512_v24  ;;  %v8561_v23 = vld [vmem:[%s11070_s1 + $0x3e0] sm:$0xff]  }
  0x43   :  { %7652 = vmatpush3.bf16.msra.mxu0 %v8511_v22  ;;  %5532 = vmatprep.mubr.bf16.mxu0 %v467_v4  ;;  %v8560_v22 = vld [vmem:[%s11070_s1 + $0x320] sm:$0xff]   ;;  %v8596_v4 = vld [vmem:[%s11070_s1 + $0x468] sm:$0xff]  }
  0x44   :  { %5493 = vmatmul.mubr.bf16.vlgmr.msra.gmra.mrb[4].mxu1 %v464_v28  ;;  %7653 = vmatprep.subr.bf16.mxu0 %v8514_v29  ;;  %v8562_v24 = vld [vmem:[%s11070_s1 + $0x3a0] sm:$0xff]   ;;  %v8566_v28 = vld [vmem:[%s11070_s1 + $0x3a8] sm:$0xff]   ;;  %v8567_v29 = vld [vmem:[%s11070_s1 + $0x370] sm:$0xff]  }
  0x45   :  { %7674 = vmatpush3.bf16.msra.mxu1 %v8513_v27  ;;  %5572 = vmatprep.mubr.bf16.mxu1 %v469_v9  ;;  %v8565_v27 = vld [vmem:[%s11070_s1 + $0x3e8] sm:$0xff]   ;;  %v8601_v9 = vld [vmem:[%s11070_s1 + $0x430] sm:$0xff]  }
  0x46   :  { %7675 = vmatprep.subr.bf16.mxu1 %v8516_v32  ;;  %v8570_v32 = vld [vmem:[%s11070_s1 + $0x3b0] sm:$0xff]  }
  0x47   :  { %7654 = vmatpush3.bf16.msra.mxu0 %v8515_v31  ;;  %v8569_v31 = vld [vmem:[%s11070_s1 + $0x3f0] sm:$0xff]  }
  0x48   :  { %7655 = vmatprep.subr.bf16.mxu0 %v8518_v35  ;;  %v8572_v35 = vld [vmem:[%s11070_s1 + $0x338] sm:$0xff]  }
  0x49   :  { %7676 = vmatpush3.bf16.msra.mxu1 %v8517_v33  ;;  %v8571_v33 = vld [vmem:[%s11070_s1 + $0x378] sm:$0xff]  }
  0x4a   :  { %7677 = vmatprep.subr.bf16.mxu1 %v8520_v37  ;;  %v26_v37 = vld [vmem:[%s11071_s0 + $0x18] sm:$0xff] }
  0x4b   :  { %7656 = vmatpush3.bf16.msra.mxu0 %v8519_v36  ;;  %v8573_v36 = vld [vmem:[%s11070_s1 + $0x3f8] sm:$0xff]  }
  0x4c   :  { %7657 = vmatprep.subr.bf16.mxu0 %v8522_v39  ;;  %v8574_v39 = vld [vmem:[%s11070_s1 + $0x3b8] sm:$0xff]  }
  0x4d   :  { %7678 = vmatpush3.bf16.msra.mxu1 %v8521_v38  ;;  %v119_v38 = vrot.slane %v26_v37, %v9184_v34 }
  0x4e   :  { %7679 = vmatprep.subr.bf16.mxu1 %v8524_v41  ;;  %v8575_v41 = vld [vmem:[%s11070_s1 + $0x440] sm:$0xff]  }
  0x4f   :  { %7658 = vmatpush3.bf16.msra.mxu0 %v8523_v40  ;;  %v112_v40 = vcombine.high %v26_v37, %v26_v37  ;;  %v8619_v37 = vld [vmem:[%s11070_s1 + $0x5d0] sm:$0xff]  }
  0x50   :  { %7659 = vmatprep.subr.bf16.mxu0 %v8526_v43 }
  0x51   :  { %7680 = vmatpush3.bf16.msra.mxu1 %v8525_v42  ;;  %v127_v42 = vcombine.high %v119_v38, %v119_v38  ;;  %v126_v43 = vrot.slane %v112_v40, %v9184_v34  ;;  %v8622_v40 = vld [vmem:[%s11070_s1 + $0x518] sm:$0xff]  }
  0x52   :  { %7681 = vmatprep.subr.bf16.mxu1 %v8528_v45  ;;  %v470_v45 = vpack.c.bf16 %v119_v38, %v119_v38  ;;  %v8620_v38 = vld [vmem:[%s11070_s1 + $0x590] sm:$0xff]  }
  0x53   :  { %7660 = vmatpush3.bf16.msra.mxu0 %v8527_v44  ;;  %v8577_v44 = vld [vmem:[%s11070_s1 + $0x400] sm:$0xff]  }
  0x54   :  { %7661 = vmatprep.subr.bf16.mxu0 %v8530_v47  ;;  %v471_v47 = vpack.c.bf16 %v127_v42, %v127_v42  ;;  %v8624_v42 = vld [vmem:[%s11070_s1 + $0x598] sm:$0xff]  }
  0x55   :  { %7682 = vmatpush3.bf16.msra.mxu1 %v8529_v46  ;;  %v8578_v46 = vld [vmem:[%s11070_s1 + $0x4c0] sm:$0xff]  }
  0x56   :  { %7683 = vmatprep.subr.bf16.mxu1 %v8532_v49  ;;  %v8579_v49 = vld [vmem:[%s11070_s1 + $0x480] sm:$0xff]  }
  0x57   :  { %7662 = vmatpush3.bf16.msra.mxu0 %v8531_v48  ;;  %v128_v48 = vcombine.high %v126_v43, %v126_v43 }
  0x58   :  { %7663 = vmatprep.subr.bf16.mxu0 %v8534_v51  ;;  %v8580_v51 = vld [vmem:[%s11070_s1 + $0x448] sm:$0xff]  }
  0x59   :  { %7684 = vmatpush3.bf16.msra.mxu1 %v8533_v50  ;;  %v472_v50 = vpack.c.bf16 %v126_v43, %v126_v43  ;;  %v8625_v43 = vld [vmem:[%s11070_s1 + $0x560] sm:$0xff]  }
  0x5a   :  { %7685 = vmatprep.subr.bf16.mxu1 %v8536_v53  ;;  %v8581_v53 = vld [vmem:[%s11070_s1 + $0x408] sm:$0xff]  }
  0x5b   :  { %7664 = vmatpush3.bf16.msra.mxu0 %v8535_v52  ;;  %v473_v52 = vpack.c.bf16 %v128_v48, %v128_v48  ;;  %v8630_v48 = vld [vmem:[%s11070_s1 + $0x528] sm:$0xff]  }
  0x5c   :  { %7665 = vmatprep.subr.bf16.mxu0 %v8538_v55  ;;  %v8583_v55 = vld [vmem:[%s11070_s1 + $0x488] sm:$0xff]  }
  0x5d   :  { %7686 = vmatpush3.bf16.msra.mxu1 %v8537_v54  ;;  %v8582_v54 = vld [vmem:[%s11070_s1 + $0x4c8] sm:$0xff]  }
  0x5e   :  { %7687 = vmatprep.subr.bf16.mxu1 %v8540_v57  ;;  %v8585_v57 = vld [vmem:[%s11070_s1 + $0x410] sm:$0xff]  }
  0x5f   :  { %7666 = vmatpush3.bf16.msra.mxu0 %v8539_v56  ;;  %v8584_v56 = vld [vmem:[%s11070_s1 + $0x450] sm:$0xff]  }
  0x60   :  { %7695 = vmatprep.subr.bf16.mxu0 %v8542_v62  ;;  %v8590_v62 = vld [vmem:[%s11070_s1 + $0x4d8] sm:$0xff]  }
  0x61   :  { %7688 = vmatpush3.bf16.msra.mxu1 %v8541_v60  ;;  %v8588_v60 = vld [vmem:[%s11070_s1 + $0x458] sm:$0xff]  }
  0x62   :  { %5533 = vmatmul.mubr.bf16.vlgmr.msra.gmra.mrb[8].mxu0 %v466_v2  ;;  %7717 = vmatprep.subr.bf16.mxu1 %v8545_v3  ;;  %v8594_v2 = vld [vmem:[%s11070_s1 + $0x4e0] sm:$0xff]  }
  0x63   :  { %7696 = vmatpush3.bf16.msra.mxu0 %v8544_v1  ;;  %5612 = vmatprep.mubr.bf16.mxu0 %v471_v47  ;;  %v8593_v1 = vld [vmem:[%s11070_s1 + $0x420] sm:$0xff]   ;;  %v8629_v47 = vld [vmem:[%s11070_s1 + $0x568] sm:$0xff]  }
  0x64   :  { %5573 = vmatmul.mubr.bf16.vlgmr.msra.gmra.mrb[8].mxu1 %v468_v7  ;;  %7697 = vmatprep.subr.bf16.mxu0 %v8547_v8  ;;  %v8595_v3 = vld [vmem:[%s11070_s1 + $0x4a0] sm:$0xff]   ;;  %v8599_v7 = vld [vmem:[%s11070_s1 + $0x4a8] sm:$0xff]   ;;  %v8600_v8 = vld [vmem:[%s11070_s1 + $0x470] sm:$0xff]  }
  0x65   :  { %7718 = vmatpush3.bf16.msra.mxu1 %v8546_v6  ;;  %5652 = vmatprep.mubr.bf16.mxu1 %v473_v52  ;;  %v8598_v6 = vld [vmem:[%s11070_s1 + $0x4e8] sm:$0xff]   ;;  %v8634_v52 = vld [vmem:[%s11070_s1 + $0x530] sm:$0xff]  }
  0x66   :  { %7719 = vmatprep.subr.bf16.mxu1 %v8549_v11  ;;  %v8603_v11 = vld [vmem:[%s11070_s1 + $0x4b0] sm:$0xff]  }
  0x67   :  { %7698 = vmatpush3.bf16.msra.mxu0 %v8548_v10  ;;  %v8602_v10 = vld [vmem:[%s11070_s1 + $0x4f0] sm:$0xff]  }
  0x68   :  { %7699 = vmatprep.subr.bf16.mxu0 %v8551_v13  ;;  %v8605_v13 = vld [vmem:[%s11070_s1 + $0x438] sm:$0xff]  }
  0x69   :  { %7720 = vmatpush3.bf16.msra.mxu1 %v8550_v12  ;;  %v8604_v12 = vld [vmem:[%s11070_s1 + $0x478] sm:$0xff]  }
  0x6a   :  { %7721 = vmatprep.subr.bf16.mxu1 %v8553_v15  ;;  %v27_v15 = vld [vmem:[%s11071_s0 + $0x20] sm:$0xff] }
  0x6b   :  { %7700 = vmatpush3.bf16.msra.mxu0 %v8552_v14  ;;  %v8606_v14 = vld [vmem:[%s11070_s1 + $0x4f8] sm:$0xff]  }
  0x6c   :  { %7701 = vmatprep.subr.bf16.mxu0 %v8555_v17  ;;  %v8607_v17 = vld [vmem:[%s11070_s1 + $0x4b8] sm:$0xff]  }
  0x6d   :  { %7722 = vmatpush3.bf16.msra.mxu1 %v8554_v16  ;;  %v136_v16 = vrot.slane %v27_v15, %v9184_v34 }
  0x6e   :  { %7723 = vmatprep.subr.bf16.mxu1 %v8557_v19  ;;  %v8608_v19 = vld [vmem:[%s11070_s1 + $0x540] sm:$0xff]  }
  0x6f   :  { %7702 = vmatpush3.bf16.msra.mxu0 %v8556_v18  ;;  %v129_v18 = vcombine.high %v27_v15, %v27_v15  ;;  %v8652_v15 = vld [vmem:[%s11070_s1 + $0x6d0] sm:$0xff]  }
  0x70   :  { %7703 = vmatprep.subr.bf16.mxu0 %v8559_v21 }
  0x71   :  { %7724 = vmatpush3.bf16.msra.mxu1 %v8558_v20  ;;  %v144_v20 = vcombine.high %v136_v16, %v136_v16  ;;  %v143_v21 = vrot.slane %v129_v18, %v9184_v34  ;;  %v8655_v18 = vld [vmem:[%s11070_s1 + $0x618] sm:$0xff]  }
  0x72   :  { %7725 = vmatprep.subr.bf16.mxu1 %v8561_v23  ;;  %v474_v23 = vpack.c.bf16 %v136_v16, %v136_v16  ;;  %v8653_v16 = vld [vmem:[%s11070_s1 + $0x690] sm:$0xff]  }
  0x73   :  { %7704 = vmatpush3.bf16.msra.mxu0 %v8560_v22  ;;  %v8610_v22 = vld [vmem:[%s11070_s1 + $0x500] sm:$0xff]  }
  0x74   :  { %7705 = vmatprep.subr.bf16.mxu0 %v8563_v25  ;;  %v475_v25 = vpack.c.bf16 %v144_v20, %v144_v20  ;;  %v8657_v20 = vld [vmem:[%s11070_s1 + $0x698] sm:$0xff]  }
  0x75   :  { %7726 = vmatpush3.bf16.msra.mxu1 %v8562_v24  ;;  %v8611_v24 = vld [vmem:[%s11070_s1 + $0x5c0] sm:$0xff]  }
  0x76   :  { %7727 = vmatprep.subr.bf16.mxu1 %v8565_v27  ;;  %v8612_v27 = vld [vmem:[%s11070_s1 + $0x580] sm:$0xff]  }
  0x77   :  { %7706 = vmatpush3.bf16.msra.mxu0 %v8564_v26  ;;  %v145_v26 = vcombine.high %v143_v21, %v143_v21 }
  0x78   :  { %7707 = vmatprep.subr.bf16.mxu0 %v8567_v29  ;;  %v8613_v29 = vld [vmem:[%s11070_s1 + $0x548] sm:$0xff]  }
  0x79   :  { %7728 = vmatpush3.bf16.msra.mxu1 %v8566_v28  ;;  %v476_v28 = vpack.c.bf16 %v143_v21, %v143_v21  ;;  %v8658_v21 = vld [vmem:[%s11070_s1 + $0x660] sm:$0xff]  }
  0x7a   :  { %7729 = vmatprep.subr.bf16.mxu1 %v8569_v31  ;;  %v8614_v31 = vld [vmem:[%s11070_s1 + $0x508] sm:$0xff]  }
  0x7b   :  { %7708 = vmatpush3.bf16.msra.mxu0 %v8568_v30  ;;  %v477_v30 = vpack.c.bf16 %v145_v26, %v145_v26  ;;  %v8663_v26 = vld [vmem:[%s11070_s1 + $0x628] sm:$0xff]  }
  0x7c   :  { %7709 = vmatprep.subr.bf16.mxu0 %v8571_v33  ;;  %v8616_v33 = vld [vmem:[%s11070_s1 + $0x588] sm:$0xff]  }
  0x7d   :  { %7730 = vmatpush3.bf16.msra.mxu1 %v8570_v32  ;;  %v8615_v32 = vld [vmem:[%s11070_s1 + $0x5c8] sm:$0xff]  }
  0x7e   :  { %7731 = vmatprep.subr.bf16.mxu1 %v8573_v36  ;;  %v8618_v36 = vld [vmem:[%s11070_s1 + $0x510] sm:$0xff]  }
  0x7f   :  { %7710 = vmatpush3.bf16.msra.mxu0 %v8572_v35  ;;  %v8617_v35 = vld [vmem:[%s11070_s1 + $0x550] sm:$0xff]  }
  0x80   :  { %7739 = vmatprep.subr.bf16.mxu0 %v8575_v41  ;;  %v8623_v41 = vld [vmem:[%s11070_s1 + $0x5d8] sm:$0xff]  }
  0x81   :  { %7732 = vmatpush3.bf16.msra.mxu1 %v8574_v39  ;;  %v8621_v39 = vld [vmem:[%s11070_s1 + $0x558] sm:$0xff]  }
  0x82   :  { %7761 = vmatprep.subr.bf16.mxu1 %v8578_v46  ;;  %5613 = vmatmul.mubr.bf16.vlgmr.msra.gmra.mrb[12].mxu0 %v470_v45  ;;  %v8627_v45 = vld [vmem:[%s11070_s1 + $0x5e0] sm:$0xff]  }
  0x83   :  { %7740 = vmatpush3.bf16.msra.mxu0 %v8577_v44  ;;  %5692 = vmatprep.mubr.bf16.mxu0 %v475_v25  ;;  %v8626_v44 = vld [vmem:[%s11070_s1 + $0x520] sm:$0xff]   ;;  %v8662_v25 = vld [vmem:[%s11070_s1 + $0x668] sm:$0xff]  }
  0x84   :  { %5653 = vmatmul.mubr.bf16.vlgmr.msra.gmra.mrb[12].mxu1 %v472_v50  ;;  %7741 = vmatprep.subr.bf16.mxu0 %v8580_v51  ;;  %v8628_v46 = vld [vmem:[%s11070_s1 + $0x5a0] sm:$0xff]   ;;  %v8632_v50 = vld [vmem:[%s11070_s1 + $0x5a8] sm:$0xff]   ;;  %v8633_v51 = vld [vmem:[%s11070_s1 + $0x570] sm:$0xff]  }
  0x85   :  { %7762 = vmatpush3.bf16.msra.mxu1 %v8579_v49  ;;  %5732 = vmatprep.mubr.bf16.mxu1 %v477_v30  ;;  %v8631_v49 = vld [vmem:[%s11070_s1 + $0x5e8] sm:$0xff]   ;;  %v8667_v30 = vld [vmem:[%s11070_s1 + $0x630] sm:$0xff]  }
  0x86   :  { %7763 = vmatprep.subr.bf16.mxu1 %v8582_v54  ;;  %v8636_v54 = vld [vmem:[%s11070_s1 + $0x5b0] sm:$0xff]  }
  0x87   :  { %7742 = vmatpush3.bf16.msra.mxu0 %v8581_v53  ;;  %v8635_v53 = vld [vmem:[%s11070_s1 + $0x5f0] sm:$0xff]  }
  0x88   :  { %7743 = vmatprep.subr.bf16.mxu0 %v8584_v56  ;;  %v8638_v56 = vld [vmem:[%s11070_s1 + $0x538] sm:$0xff]  }
  0x89   :  { %7764 = vmatpush3.bf16.msra.mxu1 %v8583_v55  ;;  %v8637_v55 = vld [vmem:[%s11070_s1 + $0x578] sm:$0xff]  }
  0x8a   :  { %7765 = vmatprep.subr.bf16.mxu1 %v8586_v58  ;;  %v28_v58 = vld [vmem:[%s11071_s0 + $0x28] sm:$0xff] }
  0x8b   :  { %7744 = vmatpush3.bf16.msra.mxu0 %v8585_v57  ;;  %v8639_v57 = vld [vmem:[%s11070_s1 + $0x5f8] sm:$0xff]  }
  0x8c   :  { %7745 = vmatprep.subr.bf16.mxu0 %v8588_v60  ;;  %v8640_v60 = vld [vmem:[%s11070_s1 + $0x5b8] sm:$0xff]  }
  0x8d   :  { %7766 = vmatpush3.bf16.msra.mxu1 %v8587_v59  ;;  %v153_v59 = vrot.slane %v28_v58, %v9184_v34 }
  0x8e   :  { %7767 = vmatprep.subr.bf16.mxu1 %v8590_v62  ;;  %v8641_v62 = vld [vmem:[%s11070_s1 + $0x640] sm:$0xff]  }
  0x8f   :  { %7746 = vmatpush3.bf16.msra.mxu0 %v8589_v61  ;;  %v146_v61 = vcombine.high %v28_v58, %v28_v58  ;;  %v8684_v58 = vld [vmem:[%s11070_s1 + $0x710] sm:$0xff]  }
  0x90   :  { %7747 = vmatprep.subr.bf16.mxu0 %v8592_v0 }
  0x91   :  { %7768 = vmatpush3.bf16.msra.mxu1 %v8591_v63  ;;  %v161_v63 = vcombine.high %v153_v59, %v153_v59  ;;  %v160_v0 = vrot.slane %v146_v61, %v9184_v34  ;;  %v8689_v61 = vld [vmem:[%s11070_s1 + $0x7d8] sm:$0xff]  }
  0x92   :  { %7769 = vmatprep.subr.bf16.mxu1 %v8594_v2  ;;  %v478_v2 = vpack.c.bf16 %v153_v59, %v153_v59  ;;  %v8687_v59 = vld [vmem:[%s11070_s1 + $0x758] sm:$0xff]  }
  0x93   :  { %7748 = vmatpush3.bf16.msra.mxu0 %v8593_v1  ;;  %v8643_v1 = vld [vmem:[%s11070_s1 + $0x600] sm:$0xff]  }
  0x94   :  { %7749 = vmatprep.subr.bf16.mxu0 %v8596_v4  ;;  %v479_v4 = vpack.c.bf16 %v161_v63, %v161_v63  ;;  %v8691_v63 = vld [vmem:[%s11070_s1 + $0x760] sm:$0xff]  }
  0x95   :  { %7770 = vmatpush3.bf16.msra.mxu1 %v8595_v3  ;;  %v8644_v3 = vld [vmem:[%s11070_s1 + $0x6c0] sm:$0xff]  }
  0x96   :  { %7771 = vmatprep.subr.bf16.mxu1 %v8598_v6  ;;  %v8645_v6 = vld [vmem:[%s11070_s1 + $0x680] sm:$0xff]  }
  0x97   :  { %7750 = vmatpush3.bf16.msra.mxu0 %v8597_v5  ;;  %v162_v5 = vcombine.high %v160_v0, %v160_v0 }
  0x98   :  { %7751 = vmatprep.subr.bf16.mxu0 %v8600_v8  ;;  %v8646_v8 = vld [vmem:[%s11070_s1 + $0x648] sm:$0xff]  }
  0x99   :  { %7772 = vmatpush3.bf16.msra.mxu1 %v8599_v7  ;;  %v480_v7 = vpack.c.bf16 %v160_v0, %v160_v0  ;;  %v8690_v0 = vld [vmem:[%s11070_s1 + $0x798] sm:$0xff]  }
  0x9a   :  { %7773 = vmatprep.subr.bf16.mxu1 %v8602_v10  ;;  %v8647_v10 = vld [vmem:[%s11070_s1 + $0x608] sm:$0xff]  }
  0x9b   :  { %7752 = vmatpush3.bf16.msra.mxu0 %v8601_v9  ;;  %v481_v9 = vpack.c.bf16 %v162_v5, %v162_v5  ;;  %v8696_v5 = vld [vmem:[%s11070_s1 + $0x728] sm:$0xff]  }
  0x9c   :  { %7753 = vmatprep.subr.bf16.mxu0 %v8604_v12  ;;  %v8649_v12 = vld [vmem:[%s11070_s1 + $0x688] sm:$0xff]  }
  0x9d   :  { %7774 = vmatpush3.bf16.msra.mxu1 %v8603_v11  ;;  %v8648_v11 = vld [vmem:[%s11070_s1 + $0x6c8] sm:$0xff]  }
  0x9e   :  { %7775 = vmatprep.subr.bf16.mxu1 %v8606_v14  ;;  %v8651_v14 = vld [vmem:[%s11070_s1 + $0x610] sm:$0xff]  }
  0x9f   :  { %7754 = vmatpush3.bf16.msra.mxu0 %v8605_v13  ;;  %v8650_v13 = vld [vmem:[%s11070_s1 + $0x650] sm:$0xff]  }
  0xa0   :  { %7783 = vmatprep.subr.bf16.mxu0 %v8608_v19  ;;  %v8656_v19 = vld [vmem:[%s11070_s1 + $0x6d8] sm:$0xff]  }
  0xa1   :  { %7776 = vmatpush3.bf16.msra.mxu1 %v8607_v17  ;;  %v8654_v17 = vld [vmem:[%s11070_s1 + $0x658] sm:$0xff]  }
  0xa2   :  { %5693 = vmatmul.mubr.bf16.vlgmr.msra.gmra.mrb[16].mxu0 %v474_v23  ;;  %7805 = vmatprep.subr.bf16.mxu1 %v8611_v24  ;;  %v8660_v23 = vld [vmem:[%s11070_s1 + $0x6e0] sm:$0xff]  }
  0xa3   :  { %7784 = vmatpush3.bf16.msra.mxu0 %v8610_v22  ;;  %5772 = vmatprep.mubr.bf16.mxu0 %v479_v4  ;;  %v8659_v22 = vld [vmem:[%s11070_s1 + $0x620] sm:$0xff]   ;;  %v8695_v4 = vld [vmem:[%s11070_s1 + $0x768] sm:$0xff]  }
  0xa4   :  { %5733 = vmatmul.mubr.bf16.vlgmr.msra.gmra.mrb[16].mxu1 %v476_v28  ;;  %7785 = vmatprep.subr.bf16.mxu0 %v8613_v29  ;;  %v8661_v24 = vld [vmem:[%s11070_s1 + $0x6a0] sm:$0xff]   ;;  %v8665_v28 = vld [vmem:[%s11070_s1 + $0x6a8] sm:$0xff]   ;;  %v8666_v29 = vld [vmem:[%s11070_s1 + $0x670] sm:$0xff]  }
  0xa5   :  { %7806 = vmatpush3.bf16.msra.mxu1 %v8612_v27  ;;  %5812 = vmatprep.mubr.bf16.mxu1 %v481_v9  ;;  %v8664_v27 = vld [vmem:[%s11070_s1 + $0x6e8] sm:$0xff]  }
  0xa6   :  { %7807 = vmatprep.subr.bf16.mxu1 %v8615_v32  ;;  %v8669_v32 = vld [vmem:[%s11070_s1 + $0x6b0] sm:$0xff]   ;;  %v8698_v9 = vld [vmem:[%s11070_s1 + $0x7a8] sm:$0xff]  }
  0xa7   :  { %7786 = vmatpush3.bf16.msra.mxu0 %v8614_v31  ;;  %v8668_v31 = vld [vmem:[%s11070_s1 + $0x6f0] sm:$0xff]  }
  0xa8   :  { %7787 = vmatprep.subr.bf16.mxu0 %v8617_v35  ;;  %v8671_v35 = vld [vmem:[%s11070_s1 + $0x638] sm:$0xff]  }
  0xa9   :  { %7808 = vmatpush3.bf16.msra.mxu1 %v8616_v33  ;;  %v8670_v33 = vld [vmem:[%s11070_s1 + $0x678] sm:$0xff]  }
  0xaa   :  { %7809 = vmatprep.subr.bf16.mxu1 %v8619_v37  ;;  %v29_v37 = vld [vmem:[%s11071_s0 + $0x30] sm:$0xff] }
  0xab   :  { %7788 = vmatpush3.bf16.msra.mxu0 %v8618_v36  ;;  %v8672_v36 = vld [vmem:[%s11070_s1 + $0x6f8] sm:$0xff]  }
  0xac   :  { %7789 = vmatprep.subr.bf16.mxu0 %v8621_v39  ;;  %v8673_v39 = vld [vmem:[%s11070_s1 + $0x6b8] sm:$0xff]  }
  0xad   :  { %7810 = vmatpush3.bf16.msra.mxu1 %v8620_v38  ;;  %v170_v38 = vrot.slane %v29_v37, %v9184_v34 }
  0xae   :  { %7811 = vmatprep.subr.bf16.mxu1 %v8623_v41  ;;  %v8674_v41 = vld [vmem:[%s11070_s1 + $0x740] sm:$0xff]  }
  0xaf   :  { %7790 = vmatpush3.bf16.msra.mxu0 %v8622_v40  ;;  %v163_v40 = vcombine.high %v29_v37, %v29_v37  ;;  %v8710_v37 = vld [vmem:[%s11070_s1 + $0x8c0] sm:$0xff]  }
  0xb0   :  { %7791 = vmatprep.subr.bf16.mxu0 %v8625_v43 }
  0xb1   :  { %7812 = vmatpush3.bf16.msra.mxu1 %v8624_v42  ;;  %v178_v42 = vcombine.high %v170_v38, %v170_v38  ;;  %v177_v43 = vrot.slane %v163_v40, %v9184_v34  ;;  %v8709_v40 = vld [vmem:[%s11070_s1 + $0x800] sm:$0xff]  }
  0xb2   :  { %7813 = vmatprep.subr.bf16.mxu1 %v8627_v45  ;;  %v8677_v45 = vld [vmem:[%s11070_s1 + $0x7c0] sm:$0xff]  }
  0xb3   :  { %7792 = vmatpush3.bf16.msra.mxu0 %v8626_v44  ;;  %v482_v44 = vpack.c.bf16 %v170_v38, %v170_v38 }
  0xb4   :  { %7793 = vmatprep.subr.bf16.mxu0 %v8629_v47  ;;  %v179_v47 = vcombine.high %v177_v43, %v177_v43 }
  0xb5   :  { %7814 = vmatpush3.bf16.msra.mxu1 %v8628_v46  ;;  %v483_v46 = vpack.c.bf16 %v178_v42, %v178_v42  ;;  %v8712_v42 = vld [vmem:[%s11070_s1 + $0x848] sm:$0xff]  }
  0xb6   :  { %7815 = vmatprep.subr.bf16.mxu1 %v8631_v49  ;;  %v484_v49 = vpack.c.bf16 %v177_v43, %v177_v43 }
  0xb7   :  { %7794 = vmatpush3.bf16.msra.mxu0 %v8630_v48  ;;  %v8676_v48 = vld [vmem:[%s11070_s1 + $0x700] sm:$0xff]  }
  0xb8   :  { %7795 = vmatprep.subr.bf16.mxu0 %v8633_v51  ;;  %v485_v51 = vpack.c.bf16 %v179_v47, %v179_v47  ;;  %v8716_v47 = vld [vmem:[%s11070_s1 + $0x850] sm:$0xff]  }
  0xb9   :  { %7816 = vmatpush3.bf16.msra.mxu1 %v8632_v50  ;;  %v8679_v50 = vld [vmem:[%s11070_s1 + $0x748] sm:$0xff]  }
  0xba   :  { %7817 = vmatprep.subr.bf16.mxu1 %v8635_v53  ;;  %v8681_v53 = vld [vmem:[%s11070_s1 + $0x7c8] sm:$0xff]  }
  0xbb   :  { %7796 = vmatpush3.bf16.msra.mxu0 %v8634_v52  ;;  %v8678_v52 = vld [vmem:[%s11070_s1 + $0x780] sm:$0xff]  }
  0xbc   :  { %7797 = vmatprep.subr.bf16.mxu0 %v8637_v55  ;;  %v8683_v55 = vld [vmem:[%s11070_s1 + $0x750] sm:$0xff]  }
  0xbd   :  { %7818 = vmatpush3.bf16.msra.mxu1 %v8636_v54  ;;  %v8680_v54 = vld [vmem:[%s11070_s1 + $0x708] sm:$0xff]  }
  0xbe   :  { %7819 = vmatprep.subr.bf16.mxu1 %v8639_v57  ;;  %v8685_v57 = vld [vmem:[%s11070_s1 + $0x7d0] sm:$0xff]  }
  0xbf   :  { %7798 = vmatpush3.bf16.msra.mxu0 %v8638_v56  ;;  %v8682_v56 = vld [vmem:[%s11070_s1 + $0x788] sm:$0xff]  }
  0xc0   :  { %7827 = vmatprep.subr.bf16.mxu0 %v8641_v62  ;;  %v8688_v62 = vld [vmem:[%s11070_s1 + $0x718] sm:$0xff]  }
  0xc1   :  { %7820 = vmatpush3.bf16.msra.mxu1 %v8640_v60  ;;  %v8686_v60 = vld [vmem:[%s11070_s1 + $0x790] sm:$0xff]  }
  0xc2   :  { %5773 = vmatmul.mubr.bf16.vlgmr.msra.gmra.mrb[20].mxu0 %v478_v2  ;;  %7849 = vmatprep.subr.bf16.mxu1 %v8644_v3  ;;  %v8692_v2 = vld [vmem:[%s11070_s1 + $0x720] sm:$0xff]  }
  0xc3   :  { %7828 = vmatpush3.bf16.msra.mxu0 %v8643_v1  ;;  %5852 = vmatprep.mubr.bf16.mxu0 %v483_v46  ;;  %v8693_v1 = vld [vmem:[%s11070_s1 + $0x7e0] sm:$0xff]   ;;  %v8713_v46 = vld [vmem:[%s11070_s1 + $0x808] sm:$0xff]  }
  0xc4   :  { %5813 = vmatmul.mubr.bf16.vlgmr.msra.gmra.mrb[20].mxu1 %v480_v7  ;;  %7829 = vmatprep.subr.bf16.mxu0 %v8646_v8  ;;  %v8694_v3 = vld [vmem:[%s11070_s1 + $0x7a0] sm:$0xff]   ;;  %v8697_v7 = vld [vmem:[%s11070_s1 + $0x7e8] sm:$0xff]  }
  0xc5   :  { %7850 = vmatpush3.bf16.msra.mxu1 %v8645_v6  ;;  %5892 = vmatprep.mubr.bf16.mxu1 %v485_v51  ;;  %v6959_v6 = vld [vmem:[%s11072_s2] ss:$0 sm:$0xff]  ;;  %v8720_v51 = vld [vmem:[%s11070_s1 + $0x858] sm:$0xff]  }
  0xc6   :  { %7851 = vmatprep.subr.bf16.mxu1 %v8648_v11  ;;  %v8699_v11 = vld [vmem:[%s11070_s1 + $0x770] sm:$0xff]  }
  0xc7   :  { %7830 = vmatpush3.bf16.msra.mxu0 %v8647_v10 }
  0xc8   :  { %7831 = vmatprep.subr.bf16.mxu0 %v8650_v13 }
  0xc9   :  { %7852 = vmatpush3.bf16.msra.mxu1 %v8649_v12 }
  0xca   :  { %7853 = vmatprep.subr.bf16.mxu1 %v8652_v15  ;;  %v8700_v15 = vld [vmem:[%s11070_s1 + $0x730] sm:$0xff]  }
  0xcb   :  { %7832 = vmatpush3.bf16.msra.mxu0 %v8651_v14 }
  0xcc   :  { %7833 = vmatprep.subr.bf16.mxu0 %v8654_v17 }
  0xcd   :  { %7854 = vmatpush3.bf16.msra.mxu1 %v8653_v16  ;;  %v8701_v16 = vld [vmem:[%s11070_s1 + $0x7f0] sm:$0xff]  }
  0xce   :  { %7855 = vmatprep.subr.bf16.mxu1 %v8656_v19 }
  0xcf   :  { %7834 = vmatpush3.bf16.msra.mxu0 %v8655_v18 }
  0xd0   :  { %7835 = vmatprep.subr.bf16.mxu0 %v8658_v21 }
  0xd1   :  { %7856 = vmatpush3.bf16.msra.mxu1 %v8657_v20 }
  0xd2   :  { %7857 = vmatprep.subr.bf16.mxu1 %v8660_v23 }
  0xd3   :  { %7836 = vmatpush3.bf16.msra.mxu0 %v8659_v22  ;;  %v8702_v22 = vld [vmem:[%s11070_s1 + $0x7b0] sm:$0xff]  }
  0xd4   :  { %7837 = vmatprep.subr.bf16.mxu0 %v8662_v25 }
  0xd5   :  { %7858 = vmatpush3.bf16.msra.mxu1 %v8661_v24  ;;  %v8703_v24 = vld [vmem:[%s11070_s1 + $0x778] sm:$0xff]  }
  0xd6   :  { %7859 = vmatprep.subr.bf16.mxu1 %v8664_v27  ;;  %v8705_v27 = vld [vmem:[%s11070_s1 + $0x7f8] sm:$0xff]  }
  0xd7   :  { %7838 = vmatpush3.bf16.msra.mxu0 %v8663_v26  ;;  %v8704_v26 = vld [vmem:[%s11070_s1 + $0x738] sm:$0xff]  }
  0xd8   :  { %7839 = vmatprep.subr.bf16.mxu0 %v8666_v29 }
  0xd9   :  { %7860 = vmatpush3.bf16.msra.mxu1 %v8665_v28  ;;  %v30_v28 = vld [vmem:[%s11071_s0 + $0x38] sm:$0xff] }
  0xda   :  { %7861 = vmatprep.subr.bf16.mxu1 %v8668_v31  ;;  %v187_v29 = vrot.slane %v30_v28, %v9184_v34  ;;  %v180_v31 = vcombine.high %v30_v28, %v30_v28  ;;  %v8743_v28 = vld [vmem:[%s11070_s1 + $0x9c0] sm:$0xff]  }
  0xdb   :  { %7840 = vmatpush3.bf16.msra.mxu0 %v8667_v30  ;;  %v8706_v30 = vld [vmem:[%s11070_s1 + $0x7b8] sm:$0xff]  }
  0xdc   :  { %7841 = vmatprep.subr.bf16.mxu0 %v8670_v33  ;;  %v195_v33 = vcombine.high %v187_v29, %v187_v29 }
  0xdd   :  { %7862 = vmatpush3.bf16.msra.mxu1 %v8669_v32  ;;  %v8707_v32 = vld [vmem:[%s11070_s1 + $0x840] sm:$0xff]  }
  0xde   :  { %7863 = vmatprep.subr.bf16.mxu1 %v8672_v36  ;;  %v486_v36 = vpack.c.bf16 %v187_v29, %v187_v29  ;;  %v487_v38 = vpack.c.bf16 %v195_v33, %v195_v33  ;;  %v8745_v33 = vld [vmem:[%s11070_s1 + $0x948] sm:$0xff]  }
  0xdf   :  { %7842 = vmatpush3.bf16.msra.mxu0 %v8671_v35  ;;  %v194_v35 = vrot.slane %v180_v31, %v9184_v34  ;;  %v8744_v31 = vld [vmem:[%s11070_s1 + $0x980] sm:$0xff]  }
  0xe0   :  { %7871 = vmatprep.subr.bf16.mxu0 %v8674_v41 }
  0xe1   :  { %7864 = vmatpush3.bf16.msra.mxu1 %v8673_v39  ;;  %v196_v39 = vcombine.high %v194_v35, %v194_v35  ;;  %v488_v41 = vpack.c.bf16 %v194_v35, %v194_v35 }
  0xe2   :  { %7893 = vmatprep.subr.bf16.mxu1 %v8677_v45  ;;  %5853 = vmatmul.mubr.bf16.vlgmr.msra.gmra.mrb[24].mxu0 %v482_v44  ;;  %v8711_v44 = vld [vmem:[%s11070_s1 + $0x880] sm:$0xff]   ;;  %v8714_v45 = vld [vmem:[%s11070_s1 + $0x8c8] sm:$0xff]  }
  0xe3   :  { %7872 = vmatpush3.bf16.msra.mxu0 %v8676_v48  ;;  %5932 = vmatprep.mubr.bf16.mxu0 %v487_v38  ;;  %v489_v43 = vpack.c.bf16 %v196_v39, %v196_v39  ;;  %v8715_v48 = vld [vmem:[%s11070_s1 + $0x888] sm:$0xff]   ;;  %v8749_v39 = vld [vmem:[%s11070_s1 + $0x950] sm:$0xff]  }
  0xe4   :  { %5893 = vmatmul.mubr.bf16.vlgmr.msra.gmra.mrb[24].mxu1 %v484_v49  ;;  %7873 = vmatprep.subr.bf16.mxu0 %v8679_v50  ;;  %v8718_v49 = vld [vmem:[%s11070_s1 + $0x8d0] sm:$0xff]   ;;  %v8748_v38 = vld [vmem:[%s11070_s1 + $0x988] sm:$0xff]  }
  0xe5   :  { %7894 = vmatpush3.bf16.msra.mxu1 %v8678_v52  ;;  %5972 = vmatprep.mubr.bf16.mxu1 %v489_v43  ;;  %v8717_v50 = vld [vmem:[%s11070_s1 + $0x810] sm:$0xff]   ;;  %v8753_v43 = vld [vmem:[%s11070_s1 + $0x958] sm:$0xff]  }
  0xe6   :  { %7895 = vmatprep.subr.bf16.mxu1 %v8681_v53  ;;  %v8719_v52 = vld [vmem:[%s11070_s1 + $0x890] sm:$0xff]   ;;  %v8722_v53 = vld [vmem:[%s11070_s1 + $0x8d8] sm:$0xff]  }
  0xe7   :  { %7874 = vmatpush3.bf16.msra.mxu0 %v8680_v54  ;;  %v8721_v54 = vld [vmem:[%s11070_s1 + $0x818] sm:$0xff]  }
  0xe8   :  { %7875 = vmatprep.subr.bf16.mxu0 %v8683_v55  ;;  %v8724_v55 = vld [vmem:[%s11070_s1 + $0x860] sm:$0xff]  }
  0xe9   :  { %7896 = vmatpush3.bf16.msra.mxu1 %v8682_v56  ;;  %v8723_v56 = vld [vmem:[%s11070_s1 + $0x898] sm:$0xff]  }
  0xea   :  { %7897 = vmatprep.subr.bf16.mxu1 %v8685_v57  ;;  %v8726_v57 = vld [vmem:[%s11070_s1 + $0x8e0] sm:$0xff]  }
  0xeb   :  { %7876 = vmatpush3.bf16.msra.mxu0 %v8684_v58  ;;  %v8725_v58 = vld [vmem:[%s11070_s1 + $0x820] sm:$0xff]  }
  0xec   :  { %7877 = vmatprep.subr.bf16.mxu0 %v8687_v59  ;;  %v8728_v59 = vld [vmem:[%s11070_s1 + $0x868] sm:$0xff]  }
  0xed   :  { %7898 = vmatpush3.bf16.msra.mxu1 %v8686_v60  ;;  %v8727_v60 = vld [vmem:[%s11070_s1 + $0x8a0] sm:$0xff]  }
  0xee   :  { %7899 = vmatprep.subr.bf16.mxu1 %v8689_v61 }
  0xef   :  { %7878 = vmatpush3.bf16.msra.mxu0 %v8688_v62  ;;  %v8730_v62 = vld [vmem:[%s11070_s1 + $0x8e8] sm:$0xff]  }
  0xf0   :  { %7879 = vmatprep.subr.bf16.mxu0 %v8691_v63 }
  0xf1   :  { %7900 = vmatpush3.bf16.msra.mxu1 %v8690_v0  ;;  %v8729_v0 = vld [vmem:[%s11070_s1 + $0x828] sm:$0xff]  }
  0xf2   :  { %7901 = vmatprep.subr.bf16.mxu1 %v8693_v1 }
  0xf3   :  { %7880 = vmatpush3.bf16.msra.mxu0 %v8692_v2 }
  0xf4   :  { %7881 = vmatprep.subr.bf16.mxu0 %v8695_v4  ;;  %v8731_v4 = vld [vmem:[%s11070_s1 + $0x8a8] sm:$0xff]  }
  0xf5   :  { %v7579_v8 = vpop.f32.mrb[0].mxu0  ;;  %7902 = vmatpush3.bf16.msra.mxu1 %v8694_v3 }
  0xf6   :  { %v7580_v10 = vpop.f32.mrb[1].mxu0  ;;  %7903 = vmatprep.subr.bf16.mxu1 %v8697_v7 }
  0xf7   :  { %v7581_v12 = vadd.f32 %v7580_v10, %v7579_v8  ;;  %v7582_v13 = vpop.f32.mrb[2].mxu0  ;;  %v7601_v14 = vpop.f32.mrb[0].mxu1  ;;  %7882 = vmatpush3.bf16.msra.mxu0 %v8696_v5  ;;  %v8732_v5 = vld [vmem:[%s11070_s1 + $0x870] sm:$0xff]  }
  0xf8   :  { %v7583_v17 = vpop.f32.mrb[3].mxu0  ;;  %v7602_v18 = vpop.f32.mrb[1].mxu1  ;;  %7883 = vmatprep.subr.bf16.mxu0 %v8699_v11  ;;  %v8733_v8 = vld [vmem:[%s11070_s1 + $0x830] sm:$0xff]  }
  0xf9   :  { %v5375_v19 = vadd.f32 %v7581_v12, %v6959_v6  ;;  %v7603_v20 = vadd.f32 %v7602_v18, %v7601_v14  ;;  %v7604_v21 = vpop.f32.mrb[2].mxu1  ;;  %7904 = vmatpush3.bf16.msra.mxu1 %v8698_v9  ;;  %v8734_v12 = vld [vmem:[%s11070_s1 + $0x8f0] sm:$0xff]   ;;  %v8737_v17 = vld [vmem:[%s11070_s1 + $0x838] sm:$0xff]  }
  0xfa   :  { %v7605_v23 = vpop.f32.mrb[3].mxu1  ;;  %7905 = vmatprep.subr.bf16.mxu1 %v8701_v16  ;;  %v8735_v14 = vld [vmem:[%s11070_s1 + $0x8b0] sm:$0xff]   ;;  %v8736_v16 = vld [vmem:[%s11070_s1 + $0x878] sm:$0xff]  }
  0xfb   :  { %v9896_v25 = vadd.f32 %v7603_v20, %v5375_v19  ;;  %7884 = vmatpush3.bf16.msra.mxu0 %v8700_v15  ;;  %v8738_v18 = vld [vmem:[%s11070_s1 + $0x8f8] sm:$0xff]   ;;  %v31_v19 = vld [vmem:[%s11071_s0 + $0x40] sm:$0xff] }
  0xfc   :  { %7885 = vmatprep.subr.bf16.mxu0 %v8703_v24  ;;  %v204_v20 = vrot.slane %v31_v19, %v9184_v34  ;;  %v8739_v21 = vld [vmem:[%s11070_s1 + $0x8b8] sm:$0xff]   ;;  %v8740_v23 = vld [vmem:[%s11070_s1 + $0x940] sm:$0xff]  }
  0xfd   :  { %7906 = vmatpush3.bf16.msra.mxu1 %v8702_v22  ;;  %v197_v22 = vcombine.high %v31_v19, %v31_v19 }
  0xfe   :  { %7907 = vmatprep.subr.bf16.mxu1 %v8705_v27  ;;  %v212_v24 = vcombine.high %v204_v20, %v204_v20  ;;  %v490_v27 = vpack.c.bf16 %v204_v20, %v204_v20 }
  0xff   :  { %7886 = vmatpush3.bf16.msra.mxu0 %v8704_v26  ;;  %v8742_v26 = vld [vmem:[%s11070_s1 + $0x900] sm:$0xff]  }
 0x100   :  { %7915 = vmatprep.subr.bf16.mxu0 %v8707_v32  ;;  %v491_v29 = vpack.c.bf16 %v212_v24, %v212_v24 }
 0x101   :  { %7908 = vmatpush3.bf16.msra.mxu1 %v8706_v30 }
 0x102   :  { %7937 = vmatprep.subr.bf16.mxu1 %v8710_v37  ;;  %5933 = vmatmul.mubr.bf16.vlgmr.msra.gmra.mrb[28].mxu0 %v486_v36  ;;  %v8746_v36 = vld [vmem:[%s11070_s1 + $0x908] sm:$0xff]  }
 0x103   :  { %7916 = vmatpush3.bf16.msra.mxu0 %v8709_v40  ;;  %6012 = vmatprep.mubr.bf16.mxu0 %v491_v29  ;;  %v8747_v37 = vld [vmem:[%s11070_s1 + $0x9c8] sm:$0xff]   ;;  %v8750_v40 = vld [vmem:[%s11070_s1 + $0x910] sm:$0xff]  }
 0x104   :  { %5973 = vmatmul.mubr.bf16.vlgmr.msra.gmra.mrb[28].mxu1 %v488_v41  ;;  %7917 = vmatprep.subr.bf16.mxu0 %v8712_v42  ;;  %v8751_v41 = vld [vmem:[%s11070_s1 + $0x9d0] sm:$0xff]   ;;  %v8781_v29 = vld [vmem:[%s11070_s1 + $0xa88] sm:$0xff]  }
 0x105   :  { %7938 = vmatpush3.bf16.msra.mxu1 %v8711_v44  ;;  %v8752_v42 = vld [vmem:[%s11070_s1 + $0x990] sm:$0xff]   ;;  %v8754_v44 = vld [vmem:[%s11070_s1 + $0x918] sm:$0xff]  }
 0x106   :  { %7939 = vmatprep.subr.bf16.mxu1 %v8714_v45  ;;  %v8755_v45 = vld [vmem:[%s11070_s1 + $0x9d8] sm:$0xff]  }
 0x107   :  { %7918 = vmatpush3.bf16.msra.mxu0 %v8713_v46  ;;  %v8756_v46 = vld [vmem:[%s11070_s1 + $0x998] sm:$0xff]  }
 0x108   :  { %7919 = vmatprep.subr.bf16.mxu0 %v8716_v47  ;;  %v8757_v47 = vld [vmem:[%s11070_s1 + $0x960] sm:$0xff]  }
 0x109   :  { %7940 = vmatpush3.bf16.msra.mxu1 %v8715_v48  ;;  %v8758_v48 = vld [vmem:[%s11070_s1 + $0x920] sm:$0xff]  }
 0x10a   :  { %7941 = vmatprep.subr.bf16.mxu1 %v8718_v49  ;;  %v8759_v49 = vld [vmem:[%s11070_s1 + $0x9e0] sm:$0xff]  }
 0x10b   :  { %7920 = vmatpush3.bf16.msra.mxu0 %v8717_v50  ;;  %v8760_v50 = vld [vmem:[%s11070_s1 + $0x9a0] sm:$0xff]  }
 0x10c   :  { %7921 = vmatprep.subr.bf16.mxu0 %v8720_v51  ;;  %v8761_v51 = vld [vmem:[%s11070_s1 + $0x968] sm:$0xff]  }
 0x10d   :  { %7942 = vmatpush3.bf16.msra.mxu1 %v8719_v52  ;;  %v8762_v52 = vld [vmem:[%s11070_s1 + $0x928] sm:$0xff]  }
 0x10e   :  { %7943 = vmatprep.subr.bf16.mxu1 %v8722_v53 }
 0x10f   :  { %7922 = vmatpush3.bf16.msra.mxu0 %v8721_v54  ;;  %v8763_v54 = vld [vmem:[%s11070_s1 + $0x9e8] sm:$0xff]  }
 0x110   :  { %7923 = vmatprep.subr.bf16.mxu0 %v8724_v55 }
 0x111   :  { %7944 = vmatpush3.bf16.msra.mxu1 %v8723_v56  ;;  %v8764_v56 = vld [vmem:[%s11070_s1 + $0x9a8] sm:$0xff]  }
 0x112   :  { %7945 = vmatprep.subr.bf16.mxu1 %v8726_v57 }
 0x113   :  { %7924 = vmatpush3.bf16.msra.mxu0 %v8725_v58 }
 0x114   :  { %7925 = vmatprep.subr.bf16.mxu0 %v8728_v59 }
 0x115   :  { %v7623_v61 = vpop.f32.mrb[4].mxu0  ;;  %7946 = vmatpush3.bf16.msra.mxu1 %v8727_v60 }
 0x116   :  { %v7624_v63 = vpop.f32.mrb[5].mxu0  ;;  %7947 = vmatprep.subr.bf16.mxu1 %v8730_v62  ;;  %v8765_v62 = vld [vmem:[%s11070_s1 + $0x970] sm:$0xff]  }
 0x117   :  { %v7625_v1 = vadd.f32 %v7624_v63, %v7623_v61  ;;  %v7626_v2 = vpop.f32.mrb[6].mxu0  ;;  %v7645_v3 = vpop.f32.mrb[4].mxu1  ;;  %7926 = vmatpush3.bf16.msra.mxu0 %v8729_v0  ;;  %v8766_v63 = vld [vmem:[%s11070_s1 + $0x930] sm:$0xff]  }
 0x118   :  { %v7627_v6 = vpop.f32.mrb[7].mxu0  ;;  %v7646_v7 = vpop.f32.mrb[5].mxu1  ;;  %7927 = vmatprep.subr.bf16.mxu0 %v8732_v5  ;;  %v8768_v5 = vld [vmem:[%s11070_s1 + $0x9b0] sm:$0xff]  }
 0x119   :  { %v5455_v9 = vadd.f32 %v7625_v1, %v9896_v25  ;;  %v7647_v10 = vadd.f32 %v7646_v7, %v7645_v3  ;;  %v7648_v11 = vpop.f32.mrb[6].mxu1  ;;  %7948 = vmatpush3.bf16.msra.mxu1 %v8731_v4  ;;  %v211_v25 = vrot.slane %v197_v22, %v9184_v34  ;;  %v8767_v3 = vld [vmem:[%s11070_s1 + $0x9f0] sm:$0xff]   ;;  %v8769_v7 = vld [vmem:[%s11070_s1 + $0x978] sm:$0xff]  }
 0x11a   :  { %v7649_v13 = vpop.f32.mrb[7].mxu1  ;;  %7949 = vmatprep.subr.bf16.mxu1 %v8734_v12  ;;  %v8772_v12 = vld [vmem:[%s11070_s1 + $0x9b8] sm:$0xff]  }
 0x11b   :  { %v9997_v15 = vadd.f32 %v7647_v10, %v5455_v9  ;;  %7928 = vmatpush3.bf16.msra.mxu0 %v8733_v8  ;;  %v213_v30 = vcombine.high %v211_v25, %v211_v25  ;;  %v492_v32 = vpack.c.bf16 %v211_v25, %v211_v25  ;;  %v8770_v8 = vld [vmem:[%s11070_s1 + $0x938] sm:$0xff]   ;;  %v32_v10 = vld [vmem:[%s11071_s0 + $0x48] sm:$0xff]  ;;  %v8777_v25 = vld [vmem:[%s11070_s1 + $0xa80] sm:$0xff]  }
 0x11c   :  { %7929 = vmatprep.subr.bf16.mxu0 %v8736_v16  ;;  %v8771_v9 = vld [vmem:[%s11070_s1 + $0x9f8] sm:$0xff]   ;;  %v221_v11 = vrot.slane %v32_v10, %v9184_v34  ;;  %v214_v13 = vcombine.high %v32_v10, %v32_v10  ;;  %v8809_v10 = vld [vmem:[%s11070_s1 + $0xbc0] sm:$0xff]  }
 0x11d   :  { %7950 = vmatpush3.bf16.msra.mxu1 %v8735_v14  ;;  %v493_v35 = vpack.c.bf16 %v213_v30, %v213_v30  ;;  %v8773_v14 = vld [vmem:[%s11070_s1 + $0xa40] sm:$0xff]   ;;  %v8784_v30 = vld [vmem:[%s11070_s1 + $0xad0] sm:$0xff]  }
 0x11e   :  { %7951 = vmatprep.subr.bf16.mxu1 %v8738_v18  ;;  %v228_v16 = vrot.slane %v214_v13, %v9184_v34  ;;  %v8776_v18 = vld [vmem:[%s11070_s1 + $0xac0] sm:$0xff]  }
 0x11f   :  { %7930 = vmatpush3.bf16.msra.mxu0 %v8737_v17  ;;  %6052 = vmatprep.mubr.bf16.mxu1 %v493_v35  ;;  %v494_v17 = vpack.c.bf16 %v221_v11, %v221_v11  ;;  %v8788_v35 = vld [vmem:[%s11070_s1 + $0xad8] sm:$0xff]   ;;  %v8810_v13 = vld [vmem:[%s11070_s1 + $0xb80] sm:$0xff]  }
 0x120   :  { %7959 = vmatprep.subr.bf16.mxu0 %v8740_v23  ;;  %v230_v20 = vcombine.high %v228_v16, %v228_v16  ;;  %v496_v22 = vpack.c.bf16 %v228_v16, %v228_v16  ;;  %v8778_v23 = vld [vmem:[%s11070_s1 + $0xa48] sm:$0xff]  }
 0x121   :  { %7952 = vmatpush3.bf16.msra.mxu1 %v8739_v21  ;;  %v8775_v21 = vld [vmem:[%s11070_s1 + $0xa00] sm:$0xff]  }
 0x122   :  { %6013 = vmatmul.mubr.bf16.vlgmr.msra.gmra.mrb[32].mxu0 %v490_v27  ;;  %7981 = vmatprep.subr.bf16.mxu1 %v8743_v28  ;;  %v497_v24 = vpack.c.bf16 %v230_v20, %v230_v20  ;;  %v8779_v27 = vld [vmem:[%s11070_s1 + $0xa08] sm:$0xff]   ;;  %v8782_v28 = vld [vmem:[%s11070_s1 + $0xa50] sm:$0xff]  }
 0x123   :  { %7960 = vmatpush3.bf16.msra.mxu0 %v8742_v26  ;;  %v8780_v26 = vld [vmem:[%s11070_s1 + $0xac8] sm:$0xff]   ;;  %v8815_v20 = vld [vmem:[%s11070_s1 + $0xb50] sm:$0xff]  }
 0x124   :  { %6053 = vmatmul.mubr.bf16.vlgmr.msra.gmra.mrb[32].mxu1 %v492_v32  ;;  %7961 = vmatprep.subr.bf16.mxu0 %v8745_v33  ;;  %v8786_v32 = vld [vmem:[%s11070_s1 + $0xa58] sm:$0xff]   ;;  %v8785_v33 = vld [vmem:[%s11070_s1 + $0xa90] sm:$0xff]  }
 0x125   :  { %7982 = vmatpush3.bf16.msra.mxu1 %v8744_v31  ;;  %6132 = vmatprep.mubr.bf16.mxu1 %v497_v24  ;;  %v8783_v31 = vld [vmem:[%s11070_s1 + $0xa10] sm:$0xff]   ;;  %v8819_v24 = vld [vmem:[%s11070_s1 + $0xb58] sm:$0xff]  }
 0x126   :  { %7983 = vmatprep.subr.bf16.mxu1 %v8747_v37  ;;  %v8790_v37 = vld [vmem:[%s11070_s1 + $0xa60] sm:$0xff]  }
 0x127   :  { %7962 = vmatpush3.bf16.msra.mxu0 %v8746_v36  ;;  %v8787_v36 = vld [vmem:[%s11070_s1 + $0xa18] sm:$0xff]  }
 0x128   :  { %7963 = vmatprep.subr.bf16.mxu0 %v8749_v39  ;;  %v8792_v39 = vld [vmem:[%s11070_s1 + $0xae0] sm:$0xff]  }
 0x129   :  { %7984 = vmatpush3.bf16.msra.mxu1 %v8748_v38  ;;  %v8789_v38 = vld [vmem:[%s11070_s1 + $0xa98] sm:$0xff]  }
 0x12a   :  { %7985 = vmatprep.subr.bf16.mxu1 %v8751_v41  ;;  %v8794_v41 = vld [vmem:[%s11070_s1 + $0xa68] sm:$0xff]  }
 0x12b   :  { %7964 = vmatpush3.bf16.msra.mxu0 %v8750_v40  ;;  %v8791_v40 = vld [vmem:[%s11070_s1 + $0xa20] sm:$0xff]  }
 0x12c   :  { %7965 = vmatprep.subr.bf16.mxu0 %v8753_v43 }
 0x12d   :  { %7986 = vmatpush3.bf16.msra.mxu1 %v8752_v42  ;;  %v8793_v42 = vld [vmem:[%s11070_s1 + $0xaa0] sm:$0xff]  }
 0x12e   :  { %7987 = vmatprep.subr.bf16.mxu1 %v8755_v45 }
 0x12f   :  { %7966 = vmatpush3.bf16.msra.mxu0 %v8754_v44  ;;  %v8796_v44 = vld [vmem:[%s11070_s1 + $0xae8] sm:$0xff]  }
 0x130   :  { %7967 = vmatprep.subr.bf16.mxu0 %v8757_v47 }
 0x131   :  { %7988 = vmatpush3.bf16.msra.mxu1 %v8756_v46  ;;  %v8795_v46 = vld [vmem:[%s11070_s1 + $0xa28] sm:$0xff]  }
 0x132   :  { %7989 = vmatprep.subr.bf16.mxu1 %v8759_v49 }
 0x133   :  { %7968 = vmatpush3.bf16.msra.mxu0 %v8758_v48 }
 0x134   :  { %7969 = vmatprep.subr.bf16.mxu0 %v8761_v51  ;;  %v8798_v51 = vld [vmem:[%s11070_s1 + $0xa70] sm:$0xff]  }
 0x135   :  { %v7667_v53 = vpop.f32.mrb[8].mxu0  ;;  %7990 = vmatpush3.bf16.msra.mxu1 %v8760_v50  ;;  %v8797_v50 = vld [vmem:[%s11070_s1 + $0xaa8] sm:$0xff]  }
 0x136   :  { %v7668_v55 = vpop.f32.mrb[9].mxu0  ;;  %7991 = vmatprep.subr.bf16.mxu1 %v8763_v54  ;;  %v8799_v54 = vld [vmem:[%s11070_s1 + $0xa30] sm:$0xff]  }
 0x137   :  { %v7669_v57 = vadd.f32 %v7668_v55, %v7667_v53  ;;  %v7670_v58 = vpop.f32.mrb[10].mxu0  ;;  %v7689_v59 = vpop.f32.mrb[8].mxu1  ;;  %7970 = vmatpush3.bf16.msra.mxu0 %v8762_v52 }
 0x138   :  { %v7671_v60 = vpop.f32.mrb[11].mxu0  ;;  %v7690_v61 = vpop.f32.mrb[9].mxu1  ;;  %7971 = vmatprep.subr.bf16.mxu0 %v8765_v62  ;;  %v8800_v58 = vld [vmem:[%s11070_s1 + $0xaf0] sm:$0xff]   ;;  %v8802_v62 = vld [vmem:[%s11070_s1 + $0xa78] sm:$0xff]  }
 0x139   :  { %v5535_v0 = vadd.f32 %v7669_v57, %v9997_v15  ;;  %v7691_v1 = vadd.f32 %v7690_v61, %v7689_v59  ;;  %v7692_v2 = vpop.f32.mrb[10].mxu1  ;;  %7992 = vmatpush3.bf16.msra.mxu1 %v8764_v56  ;;  %v229_v15 = vcombine.high %v221_v11, %v221_v11  ;;  %v8801_v60 = vld [vmem:[%s11070_s1 + $0xab0] sm:$0xff]  }
 0x13a   :  { %v7693_v4 = vpop.f32.mrb[11].mxu1  ;;  %7993 = vmatprep.subr.bf16.mxu1 %v8767_v3  ;;  %v8805_v3 = vld [vmem:[%s11070_s1 + $0xab8] sm:$0xff]  }
 0x13b   :  { %v10101_v6 = vadd.f32 %v7691_v1, %v5535_v0  ;;  %7972 = vmatpush3.bf16.msra.mxu0 %v8766_v63  ;;  %v495_v19 = vpack.c.bf16 %v229_v15, %v229_v15  ;;  %v8803_v63 = vld [vmem:[%s11070_s1 + $0xa38] sm:$0xff]   ;;  %v33_v1 = vld [vmem:[%s11071_s0 + $0x50] sm:$0xff]  ;;  %v8811_v15 = vld [vmem:[%s11070_s1 + $0xb48] sm:$0xff]  }
 0x13c   :  { %7973 = vmatprep.subr.bf16.mxu0 %v8769_v7  ;;  %v8804_v0 = vld [vmem:[%s11070_s1 + $0xaf8] sm:$0xff]   ;;  %v238_v2 = vrot.slane %v33_v1, %v9184_v34  ;;  %v231_v4 = vcombine.high %v33_v1, %v33_v1  ;;  %v8842_v1 = vld [vmem:[%s11070_s1 + $0xcc0] sm:$0xff]  }
 0x13d   :  { %7994 = vmatpush3.bf16.msra.mxu1 %v8768_v5  ;;  %6092 = vmatprep.mubr.bf16.mxu0 %v495_v19  ;;  %v8806_v5 = vld [vmem:[%s11070_s1 + $0xb40] sm:$0xff]   ;;  %v8814_v19 = vld [vmem:[%s11070_s1 + $0xb88] sm:$0xff]  }
 0x13e   :  { %7995 = vmatprep.subr.bf16.mxu1 %v8771_v9  ;;  %v245_v7 = vrot.slane %v231_v4, %v9184_v34  ;;  %v498_v9 = vpack.c.bf16 %v238_v2, %v238_v2  ;;  %v8843_v4 = vld [vmem:[%s11070_s1 + $0xc80] sm:$0xff]  }
 0x13f   :  { %7974 = vmatpush3.bf16.msra.mxu0 %v8770_v8  ;;  %v8808_v8 = vld [vmem:[%s11070_s1 + $0xb00] sm:$0xff]  }
 0x140   :  { %8003 = vmatprep.subr.bf16.mxu0 %v8773_v14  ;;  %v500_v14 = vpack.c.bf16 %v245_v7, %v245_v7 }
 0x141   :  { %7996 = vmatpush3.bf16.msra.mxu1 %v8772_v12  ;;  %v247_v12 = vcombine.high %v245_v7, %v245_v7 }
 0x142   :  { %8025 = vmatprep.subr.bf16.mxu1 %v8776_v18  ;;  %6093 = vmatmul.mubr.bf16.vlgmr.msra.gmra.mrb[36].mxu0 %v494_v17  ;;  %v8812_v17 = vld [vmem:[%s11070_s1 + $0xb08] sm:$0xff]  }
 0x143   :  { %8004 = vmatpush3.bf16.msra.mxu0 %v8775_v21  ;;  %v501_v16 = vpack.c.bf16 %v247_v12, %v247_v12  ;;  %v8813_v18 = vld [vmem:[%s11070_s1 + $0xbc8] sm:$0xff]   ;;  %v8816_v21 = vld [vmem:[%s11070_s1 + $0xb10] sm:$0xff]  }
 0x144   :  { %6133 = vmatmul.mubr.bf16.vlgmr.msra.gmra.mrb[36].mxu1 %v496_v22  ;;  %8005 = vmatprep.subr.bf16.mxu0 %v8778_v23  ;;  %v8817_v22 = vld [vmem:[%s11070_s1 + $0xbd0] sm:$0xff]  }
 0x145   :  { %8026 = vmatpush3.bf16.msra.mxu1 %v8777_v25  ;;  %6212 = vmatprep.mubr.bf16.mxu1 %v501_v16  ;;  %v8818_v23 = vld [vmem:[%s11070_s1 + $0xb90] sm:$0xff]   ;;  %v8820_v25 = vld [vmem:[%s11070_s1 + $0xb18] sm:$0xff]  }
 0x146   :  { %8027 = vmatprep.subr.bf16.mxu1 %v8780_v26  ;;  %v8821_v26 = vld [vmem:[%s11070_s1 + $0xbd8] sm:$0xff]   ;;  %v8849_v12 = vld [vmem:[%s11070_s1 + $0xc10] sm:$0xff]  }
 0x147   :  { %8006 = vmatpush3.bf16.msra.mxu0 %v8779_v27  ;;  %v8822_v27 = vld [vmem:[%s11070_s1 + $0xb98] sm:$0xff]  }
 0x148   :  { %8007 = vmatprep.subr.bf16.mxu0 %v8782_v28  ;;  %v8823_v28 = vld [vmem:[%s11070_s1 + $0xb60] sm:$0xff]   ;;  %v8853_v16 = vld [vmem:[%s11070_s1 + $0xc18] sm:$0xff]  }
 0x149   :  { %8028 = vmatpush3.bf16.msra.mxu1 %v8781_v29  ;;  %v8824_v29 = vld [vmem:[%s11070_s1 + $0xb20] sm:$0xff]  }
 0x14a   :  { %8029 = vmatprep.subr.bf16.mxu1 %v8784_v30  ;;  %v8825_v30 = vld [vmem:[%s11070_s1 + $0xbe0] sm:$0xff]  }
 0x14b   :  { %8008 = vmatpush3.bf16.msra.mxu0 %v8783_v31  ;;  %v8826_v31 = vld [vmem:[%s11070_s1 + $0xba0] sm:$0xff]  }
 0x14c   :  { %8009 = vmatprep.subr.bf16.mxu0 %v8786_v32  ;;  %v8827_v32 = vld [vmem:[%s11070_s1 + $0xb68] sm:$0xff]  }
 0x14d   :  { %8030 = vmatpush3.bf16.msra.mxu1 %v8785_v33 }
 0x14e   :  { %8031 = vmatprep.subr.bf16.mxu1 %v8788_v35  ;;  %v8828_v35 = vld [vmem:[%s11070_s1 + $0xb28] sm:$0xff]  }
 0x14f   :  { %8010 = vmatpush3.bf16.msra.mxu0 %v8787_v36 }
 0x150   :  { %8011 = vmatprep.subr.bf16.mxu0 %v8790_v37  ;;  %v8829_v37 = vld [vmem:[%s11070_s1 + $0xbe8] sm:$0xff]  }
 0x151   :  { %8032 = vmatpush3.bf16.msra.mxu1 %v8789_v38 }
 0x152   :  { %8033 = vmatprep.subr.bf16.mxu1 %v8792_v39 }
 0x153   :  { %8012 = vmatpush3.bf16.msra.mxu0 %v8791_v40 }
 0x154   :  { %8013 = vmatprep.subr.bf16.mxu0 %v8794_v41  ;;  %v8830_v41 = vld [vmem:[%s11070_s1 + $0xba8] sm:$0xff]  }
 0x155   :  { %v7711_v43 = vpop.f32.mrb[12].mxu0  ;;  %8034 = vmatpush3.bf16.msra.mxu1 %v8793_v42  ;;  %v8831_v42 = vld [vmem:[%s11070_s1 + $0xb70] sm:$0xff]  }
 0x156   :  { %v7712_v45 = vpop.f32.mrb[13].mxu0  ;;  %8035 = vmatprep.subr.bf16.mxu1 %v8796_v44 }
 0x157   :  { %v7713_v47 = vadd.f32 %v7712_v45, %v7711_v43  ;;  %v7714_v48 = vpop.f32.mrb[14].mxu0  ;;  %v7733_v49 = vpop.f32.mrb[12].mxu1  ;;  %8014 = vmatpush3.bf16.msra.mxu0 %v8795_v46 }
 0x158   :  { %v7715_v52 = vpop.f32.mrb[15].mxu0  ;;  %v7734_v53 = vpop.f32.mrb[13].mxu1  ;;  %8015 = vmatprep.subr.bf16.mxu0 %v8798_v51  ;;  %v8832_v48 = vld [vmem:[%s11070_s1 + $0xb30] sm:$0xff]  }
 0x159   :  { %v5615_v55 = vadd.f32 %v7713_v47, %v10101_v6  ;;  %v7735_v56 = vadd.f32 %v7734_v53, %v7733_v49  ;;  %v7736_v57 = vpop.f32.mrb[14].mxu1  ;;  %8036 = vmatpush3.bf16.msra.mxu1 %v8797_v50  ;;  %v246_v6 = vcombine.high %v238_v2, %v238_v2  ;;  %v8833_v50 = vld [vmem:[%s11070_s1 + $0xbf0] sm:$0xff]   ;;  %v8835_v53 = vld [vmem:[%s11070_s1 + $0xb78] sm:$0xff]  }
 0x15a   :  { %v7737_v59 = vpop.f32.mrb[15].mxu1  ;;  %8037 = vmatprep.subr.bf16.mxu1 %v8800_v58  ;;  %v8834_v52 = vld [vmem:[%s11070_s1 + $0xbb0] sm:$0xff]   ;;  %v8838_v58 = vld [vmem:[%s11070_s1 + $0xbb8] sm:$0xff]  }
 0x15b   :  { %v10205_v61 = vadd.f32 %v7735_v56, %v5615_v55  ;;  %8016 = vmatpush3.bf16.msra.mxu0 %v8799_v54  ;;  %v499_v11 = vpack.c.bf16 %v246_v6, %v246_v6  ;;  %v8836_v54 = vld [vmem:[%s11070_s1 + $0xb38] sm:$0xff]   ;;  %v8844_v6 = vld [vmem:[%s11070_s1 + $0xc48] sm:$0xff]  }
 0x15c   :  { %8017 = vmatprep.subr.bf16.mxu0 %v8802_v62  ;;  %v8837_v55 = vld [vmem:[%s11070_s1 + $0xbf8] sm:$0xff]  }
 0x15d   :  { %8038 = vmatpush3.bf16.msra.mxu1 %v8801_v60  ;;  %6172 = vmatprep.mubr.bf16.mxu0 %v499_v11  ;;  %v34_v56 = vld [vmem:[%s11071_s0 + $0x58] sm:$0xff]  ;;  %v8839_v60 = vld [vmem:[%s11070_s1 + $0xc40] sm:$0xff]   ;;  %v8848_v11 = vld [vmem:[%s11070_s1 + $0xc50] sm:$0xff]  }
 0x15e   :  { %8039 = vmatprep.subr.bf16.mxu1 %v8804_v0  ;;  %v255_v57 = vrot.slane %v34_v56, %v9184_v34  ;;  %v248_v59 = vcombine.high %v34_v56, %v34_v56  ;;  %v8875_v56 = vld [vmem:[%s11070_s1 + $0xdc0] sm:$0xff]  }
 0x15f   :  { %8018 = vmatpush3.bf16.msra.mxu0 %v8803_v63  ;;  %v8841_v63 = vld [vmem:[%s11070_s1 + $0xc00] sm:$0xff]  }
 0x160   :  { %8047 = vmatprep.subr.bf16.mxu0 %v8806_v5  ;;  %v262_v62 = vrot.slane %v248_v59, %v9184_v34  ;;  %v502_v0 = vpack.c.bf16 %v255_v57, %v255_v57  ;;  %v8876_v59 = vld [vmem:[%s11070_s1 + $0xd80] sm:$0xff]  }
 0x161   :  { %8040 = vmatpush3.bf16.msra.mxu1 %v8805_v3 }
 0x162   :  { %8069 = vmatprep.subr.bf16.mxu1 %v8809_v10  ;;  %6173 = vmatmul.mubr.bf16.vlgmr.msra.gmra.mrb[40].mxu0 %v498_v9  ;;  %v264_v3 = vcombine.high %v262_v62, %v262_v62  ;;  %v504_v5 = vpack.c.bf16 %v262_v62, %v262_v62  ;;  %v8846_v9 = vld [vmem:[%s11070_s1 + $0xcc8] sm:$0xff]  }
 0x163   :  { %8048 = vmatpush3.bf16.msra.mxu0 %v8808_v8  ;;  %v8845_v8 = vld [vmem:[%s11070_s1 + $0xc08] sm:$0xff]  }
 0x164   :  { %6213 = vmatmul.mubr.bf16.vlgmr.msra.gmra.mrb[40].mxu1 %v500_v14  ;;  %8049 = vmatprep.subr.bf16.mxu0 %v8811_v15  ;;  %v505_v7 = vpack.c.bf16 %v264_v3, %v264_v3  ;;  %v8847_v10 = vld [vmem:[%s11070_s1 + $0xc88] sm:$0xff]   ;;  %v8851_v14 = vld [vmem:[%s11070_s1 + $0xc90] sm:$0xff]   ;;  %v8852_v15 = vld [vmem:[%s11070_s1 + $0xc58] sm:$0xff]  }
 0x165   :  { %8070 = vmatpush3.bf16.msra.mxu1 %v8810_v13  ;;  %v8850_v13 = vld [vmem:[%s11070_s1 + $0xcd0] sm:$0xff]  }
 0x166   :  { %8071 = vmatprep.subr.bf16.mxu1 %v8813_v18  ;;  %6292 = vmatprep.mubr.bf16.mxu1 %v505_v7  ;;  %v8855_v18 = vld [vmem:[%s11070_s1 + $0xc98] sm:$0xff]   ;;  %v8882_v3 = vld [vmem:[%s11070_s1 + $0xd10] sm:$0xff]  }
 0x167   :  { %8050 = vmatpush3.bf16.msra.mxu0 %v8812_v17  ;;  %v8854_v17 = vld [vmem:[%s11070_s1 + $0xcd8] sm:$0xff]  }
 0x168   :  { %8051 = vmatprep.subr.bf16.mxu0 %v8815_v20  ;;  %v8857_v20 = vld [vmem:[%s11070_s1 + $0xc20] sm:$0xff]   ;;  %v8886_v7 = vld [vmem:[%s11070_s1 + $0xd18] sm:$0xff]  }
 0x169   :  { %8072 = vmatpush3.bf16.msra.mxu1 %v8814_v19  ;;  %v8856_v19 = vld [vmem:[%s11070_s1 + $0xc60] sm:$0xff]  }
 0x16a   :  { %8073 = vmatprep.subr.bf16.mxu1 %v8817_v22  ;;  %v8859_v22 = vld [vmem:[%s11070_s1 + $0xca0] sm:$0xff]  }
 0x16b   :  { %8052 = vmatpush3.bf16.msra.mxu0 %v8816_v21  ;;  %v8858_v21 = vld [vmem:[%s11070_s1 + $0xce0] sm:$0xff]  }
 0x16c   :  { %8053 = vmatprep.subr.bf16.mxu0 %v8819_v24 }
 0x16d   :  { %8074 = vmatpush3.bf16.msra.mxu1 %v8818_v23  ;;  %v8860_v23 = vld [vmem:[%s11070_s1 + $0xc68] sm:$0xff]  }
 0x16e   :  { %8075 = vmatprep.subr.bf16.mxu1 %v8821_v26 }
 0x16f   :  { %8054 = vmatpush3.bf16.msra.mxu0 %v8820_v25  ;;  %v8861_v25 = vld [vmem:[%s11070_s1 + $0xc28] sm:$0xff]  }
 0x170   :  { %8055 = vmatprep.subr.bf16.mxu0 %v8823_v28 }
 0x171   :  { %8076 = vmatpush3.bf16.msra.mxu1 %v8822_v27  ;;  %v8862_v27 = vld [vmem:[%s11070_s1 + $0xce8] sm:$0xff]  }
 0x172   :  { %8077 = vmatprep.subr.bf16.mxu1 %v8825_v30 }
 0x173   :  { %8056 = vmatpush3.bf16.msra.mxu0 %v8824_v29 }
 0x174   :  { %8057 = vmatprep.subr.bf16.mxu0 %v8827_v32 }
 0x175   :  { %v7755_v33 = vpop.f32.mrb[16].mxu0  ;;  %8078 = vmatpush3.bf16.msra.mxu1 %v8826_v31 }
 0x176   :  { %v7756_v36 = vpop.f32.mrb[17].mxu0  ;;  %8079 = vmatprep.subr.bf16.mxu1 %v8829_v37 }
 0x177   :  { %v7757_v38 = vadd.f32 %v7756_v36, %v7755_v33  ;;  %v7758_v39 = vpop.f32.mrb[18].mxu0  ;;  %v7777_v40 = vpop.f32.mrb[16].mxu1  ;;  %8058 = vmatpush3.bf16.msra.mxu0 %v8828_v35  ;;  %v8863_v33 = vld [vmem:[%s11070_s1 + $0xca8] sm:$0xff]   ;;  %v8864_v35 = vld [vmem:[%s11070_s1 + $0xc70] sm:$0xff]  }
 0x178   :  { %v7759_v43 = vpop.f32.mrb[19].mxu0  ;;  %v7778_v44 = vpop.f32.mrb[17].mxu1  ;;  %8059 = vmatprep.subr.bf16.mxu0 %v8831_v42  ;;  %v8865_v39 = vld [vmem:[%s11070_s1 + $0xc30] sm:$0xff]  }
 0x179   :  { %v5695_v45 = vadd.f32 %v7757_v38, %v10205_v61  ;;  %v7779_v46 = vadd.f32 %v7778_v44, %v7777_v40  ;;  %v7780_v47 = vpop.f32.mrb[18].mxu1  ;;  %8080 = vmatpush3.bf16.msra.mxu1 %v8830_v41  ;;  %v263_v61 = vcombine.high %v255_v57, %v255_v57  ;;  %v8866_v41 = vld [vmem:[%s11070_s1 + $0xcf0] sm:$0xff]   ;;  %v8868_v44 = vld [vmem:[%s11070_s1 + $0xc78] sm:$0xff]  }
 0x17a   :  { %v7781_v49 = vpop.f32.mrb[19].mxu1  ;;  %8081 = vmatprep.subr.bf16.mxu1 %v8833_v50  ;;  %v8867_v43 = vld [vmem:[%s11070_s1 + $0xcb0] sm:$0xff]   ;;  %v35_v47 = vld [vmem:[%s11071_s0 + $0x60] sm:$0xff] }
 0x17b   :  { %v10306_v51 = vadd.f32 %v7779_v46, %v5695_v45  ;;  %8060 = vmatpush3.bf16.msra.mxu0 %v8832_v48  ;;  %v503_v2 = vpack.c.bf16 %v263_v61, %v263_v61  ;;  %v8869_v45 = vld [vmem:[%s11070_s1 + $0xc38] sm:$0xff]   ;;  %v272_v48 = vrot.slane %v35_v47, %v9184_v34  ;;  %v265_v50 = vcombine.high %v35_v47, %v35_v47  ;;  %v8877_v61 = vld [vmem:[%s11070_s1 + $0xd48] sm:$0xff]   ;;  %v8908_v47 = vld [vmem:[%s11070_s1 + $0xec0] sm:$0xff]  }
 0x17c   :  { %8061 = vmatprep.subr.bf16.mxu0 %v8835_v53  ;;  %v8870_v46 = vld [vmem:[%s11070_s1 + $0xcf8] sm:$0xff]  }
 0x17d   :  { %8082 = vmatpush3.bf16.msra.mxu1 %v8834_v52  ;;  %6252 = vmatprep.mubr.bf16.mxu0 %v503_v2  ;;  %v8871_v49 = vld [vmem:[%s11070_s1 + $0xcb8] sm:$0xff]   ;;  %v280_v52 = vcombine.high %v272_v48, %v272_v48  ;;  %v279_v53 = vrot.slane %v265_v50, %v9184_v34  ;;  %v8881_v2 = vld [vmem:[%s11070_s1 + $0xd50] sm:$0xff]   ;;  %v8909_v50 = vld [vmem:[%s11070_s1 + $0xe80] sm:$0xff]  }
 0x17e   :  { %8083 = vmatprep.subr.bf16.mxu1 %v8837_v55  ;;  %v506_v55 = vpack.c.bf16 %v272_v48, %v272_v48 }
 0x17f   :  { %8062 = vmatpush3.bf16.msra.mxu0 %v8836_v54  ;;  %v8874_v54 = vld [vmem:[%s11070_s1 + $0xd00] sm:$0xff]   ;;  %v507_v57 = vpack.c.bf16 %v280_v52, %v280_v52  ;;  %v8910_v52 = vld [vmem:[%s11070_s1 + $0xe48] sm:$0xff]  }
 0x180   :  { %8091 = vmatprep.subr.bf16.mxu0 %v8839_v60  ;;  %v508_v60 = vpack.c.bf16 %v279_v53, %v279_v53 }
 0x181   :  { %8084 = vmatpush3.bf16.msra.mxu1 %v8838_v58  ;;  %v281_v58 = vcombine.high %v279_v53, %v279_v53 }
 0x182   :  { %6253 = vmatmul.mubr.bf16.vlgmr.msra.gmra.mrb[44].mxu0 %v502_v0  ;;  %8113 = vmatprep.subr.bf16.mxu1 %v8842_v1  ;;  %v8879_v0 = vld [vmem:[%s11070_s1 + $0xdc8] sm:$0xff]  }
 0x183   :  { %8092 = vmatpush3.bf16.msra.mxu0 %v8841_v63  ;;  %6332 = vmatprep.mubr.bf16.mxu0 %v507_v57  ;;  %v509_v62 = vpack.c.bf16 %v281_v58, %v281_v58  ;;  %v8878_v63 = vld [vmem:[%s11070_s1 + $0xd08] sm:$0xff]   ;;  %v8914_v57 = vld [vmem:[%s11070_s1 + $0xe50] sm:$0xff]  }
 0x184   :  { %6293 = vmatmul.mubr.bf16.vlgmr.msra.gmra.mrb[44].mxu1 %v504_v5  ;;  %8093 = vmatprep.subr.bf16.mxu0 %v8844_v6  ;;  %v8880_v1 = vld [vmem:[%s11070_s1 + $0xd88] sm:$0xff]   ;;  %v8884_v5 = vld [vmem:[%s11070_s1 + $0xd90] sm:$0xff]   ;;  %v8885_v6 = vld [vmem:[%s11070_s1 + $0xd58] sm:$0xff]  }
 0x185   :  { %8114 = vmatpush3.bf16.msra.mxu1 %v8843_v4  ;;  %6372 = vmatprep.mubr.bf16.mxu1 %v509_v62  ;;  %v8883_v4 = vld [vmem:[%s11070_s1 + $0xdd0] sm:$0xff]   ;;  %v8919_v62 = vld [vmem:[%s11070_s1 + $0xe18] sm:$0xff]  }
 0x186   :  { %8115 = vmatprep.subr.bf16.mxu1 %v8846_v9  ;;  %v8888_v9 = vld [vmem:[%s11070_s1 + $0xd98] sm:$0xff]   ;;  %v8915_v58 = vld [vmem:[%s11070_s1 + $0xe10] sm:$0xff]  }
 0x187   :  { %8094 = vmatpush3.bf16.msra.mxu0 %v8845_v8  ;;  %v8887_v8 = vld [vmem:[%s11070_s1 + $0xdd8] sm:$0xff]  }
 0x188   :  { %8095 = vmatprep.subr.bf16.mxu0 %v8848_v11  ;;  %v8890_v11 = vld [vmem:[%s11070_s1 + $0xd20] sm:$0xff]  }
 0x189   :  { %8116 = vmatpush3.bf16.msra.mxu1 %v8847_v10  ;;  %v8889_v10 = vld [vmem:[%s11070_s1 + $0xd60] sm:$0xff]  }
 0x18a   :  { %8117 = vmatprep.subr.bf16.mxu1 %v8850_v13  ;;  %v8892_v13 = vld [vmem:[%s11070_s1 + $0xda0] sm:$0xff]  }
 0x18b   :  { %8096 = vmatpush3.bf16.msra.mxu0 %v8849_v12  ;;  %v8891_v12 = vld [vmem:[%s11070_s1 + $0xde0] sm:$0xff]  }
 0x18c   :  { %8097 = vmatprep.subr.bf16.mxu0 %v8852_v15 }
 0x18d   :  { %8118 = vmatpush3.bf16.msra.mxu1 %v8851_v14  ;;  %v8893_v14 = vld [vmem:[%s11070_s1 + $0xd68] sm:$0xff]  }
 0x18e   :  { %8119 = vmatprep.subr.bf16.mxu1 %v8854_v17 }
 0x18f   :  { %8098 = vmatpush3.bf16.msra.mxu0 %v8853_v16  ;;  %v8894_v16 = vld [vmem:[%s11070_s1 + $0xd28] sm:$0xff]  }
 0x190   :  { %8099 = vmatprep.subr.bf16.mxu0 %v8856_v19 }
 0x191   :  { %8120 = vmatpush3.bf16.msra.mxu1 %v8855_v18  ;;  %v8895_v18 = vld [vmem:[%s11070_s1 + $0xde8] sm:$0xff]  }
 0x192   :  { %8121 = vmatprep.subr.bf16.mxu1 %v8858_v21 }
 0x193   :  { %8100 = vmatpush3.bf16.msra.mxu0 %v8857_v20 }
 0x194   :  { %8101 = vmatprep.subr.bf16.mxu0 %v8860_v23  ;;  %v8897_v23 = vld [vmem:[%s11070_s1 + $0xd70] sm:$0xff]  }
 0x195   :  { %v7799_v24 = vpop.f32.mrb[20].mxu0  ;;  %8122 = vmatpush3.bf16.msra.mxu1 %v8859_v22  ;;  %v8896_v22 = vld [vmem:[%s11070_s1 + $0xda8] sm:$0xff]  }
 0x196   :  { %v7800_v26 = vpop.f32.mrb[21].mxu0  ;;  %8123 = vmatprep.subr.bf16.mxu1 %v8862_v27 }
 0x197   :  { %v7801_v28 = vadd.f32 %v7800_v26, %v7799_v24  ;;  %v7802_v29 = vpop.f32.mrb[22].mxu0  ;;  %v7821_v30 = vpop.f32.mrb[20].mxu1  ;;  %8102 = vmatpush3.bf16.msra.mxu0 %v8861_v25 }
 0x198   :  { %v7803_v31 = vpop.f32.mrb[23].mxu0  ;;  %v7822_v32 = vpop.f32.mrb[21].mxu1  ;;  %8103 = vmatprep.subr.bf16.mxu0 %v8864_v35  ;;  %v8898_v29 = vld [vmem:[%s11070_s1 + $0xd30] sm:$0xff]   ;;  %v8901_v35 = vld [vmem:[%s11070_s1 + $0xd78] sm:$0xff]  }
 0x199   :  { %v5775_v36 = vadd.f32 %v7801_v28, %v10306_v51  ;;  %v7823_v37 = vadd.f32 %v7822_v32, %v7821_v30  ;;  %v7824_v38 = vpop.f32.mrb[22].mxu1  ;;  %8124 = vmatpush3.bf16.msra.mxu1 %v8863_v33  ;;  %v8872_v51 = vld [vmem:[%s11070_s1 + $0xd40] sm:$0xff]   ;;  %v8899_v31 = vld [vmem:[%s11070_s1 + $0xdf0] sm:$0xff]  }
 0x19a   :  { %v7825_v40 = vpop.f32.mrb[23].mxu1  ;;  %8125 = vmatprep.subr.bf16.mxu1 %v8866_v41  ;;  %v8900_v33 = vld [vmem:[%s11070_s1 + $0xdb0] sm:$0xff]   ;;  %v36_v38 = vld [vmem:[%s11071_s0 + $0x68] sm:$0xff] }
 0x19b   :  { %v10410_v42 = vadd.f32 %v7823_v37, %v5775_v36  ;;  %8104 = vmatpush3.bf16.msra.mxu0 %v8865_v39  ;;  %v8902_v36 = vld [vmem:[%s11070_s1 + $0xd38] sm:$0xff]   ;;  %v289_v39 = vrot.slane %v36_v38, %v9184_v34  ;;  %v282_v41 = vcombine.high %v36_v38, %v36_v38  ;;  %v8941_v38 = vld [vmem:[%s11070_s1 + $0xfc0] sm:$0xff]  }
 0x19c   :  { %8105 = vmatprep.subr.bf16.mxu0 %v8868_v44  ;;  %v8903_v37 = vld [vmem:[%s11070_s1 + $0xdf8] sm:$0xff]  }
 0x19d   :  { %8126 = vmatpush3.bf16.msra.mxu1 %v8867_v43  ;;  %v8904_v40 = vld [vmem:[%s11070_s1 + $0xdb8] sm:$0xff]   ;;  %v297_v43 = vcombine.high %v289_v39, %v289_v39  ;;  %v296_v44 = vrot.slane %v282_v41, %v9184_v34  ;;  %v8942_v41 = vld [vmem:[%s11070_s1 + $0xf80] sm:$0xff]  }
 0x19e   :  { %8127 = vmatprep.subr.bf16.mxu1 %v8870_v46  ;;  %v510_v46 = vpack.c.bf16 %v289_v39, %v289_v39 }
 0x19f   :  { %8106 = vmatpush3.bf16.msra.mxu0 %v8869_v45  ;;  %v8907_v45 = vld [vmem:[%s11070_s1 + $0xe00] sm:$0xff]   ;;  %v511_v48 = vpack.c.bf16 %v297_v43, %v297_v43  ;;  %v8943_v43 = vld [vmem:[%s11070_s1 + $0xf48] sm:$0xff]  }
 0x1a0   :  { %8135 = vmatprep.subr.bf16.mxu0 %v8872_v51  ;;  %v512_v51 = vpack.c.bf16 %v296_v44, %v296_v44 }
 0x1a1   :  { %8128 = vmatpush3.bf16.msra.mxu1 %v8871_v49  ;;  %v298_v49 = vcombine.high %v296_v44, %v296_v44 }
 0x1a2   :  { %8157 = vmatprep.subr.bf16.mxu1 %v8875_v56  ;;  %6333 = vmatmul.mubr.bf16.vlgmr.msra.gmra.mrb[48].mxu0 %v506_v55  ;;  %v8912_v55 = vld [vmem:[%s11070_s1 + $0xec8] sm:$0xff]  }
 0x1a3   :  { %8136 = vmatpush3.bf16.msra.mxu0 %v8874_v54  ;;  %6412 = vmatprep.mubr.bf16.mxu0 %v511_v48  ;;  %v513_v53 = vpack.c.bf16 %v298_v49, %v298_v49  ;;  %v8911_v54 = vld [vmem:[%s11070_s1 + $0xe08] sm:$0xff]   ;;  %v8947_v48 = vld [vmem:[%s11070_s1 + $0xf50] sm:$0xff]  }
 0x1a4   :  { %6373 = vmatmul.mubr.bf16.vlgmr.msra.gmra.mrb[48].mxu1 %v508_v60  ;;  %8137 = vmatprep.subr.bf16.mxu0 %v8877_v61  ;;  %v8913_v56 = vld [vmem:[%s11070_s1 + $0xe88] sm:$0xff]   ;;  %v8917_v60 = vld [vmem:[%s11070_s1 + $0xe90] sm:$0xff]   ;;  %v8918_v61 = vld [vmem:[%s11070_s1 + $0xe58] sm:$0xff]  }
 0x1a5   :  { %8158 = vmatpush3.bf16.msra.mxu1 %v8876_v59  ;;  %6452 = vmatprep.mubr.bf16.mxu1 %v513_v53  ;;  %v8916_v59 = vld [vmem:[%s11070_s1 + $0xed0] sm:$0xff]   ;;  %v8952_v53 = vld [vmem:[%s11070_s1 + $0xf18] sm:$0xff]  }
 0x1a6   :  { %8159 = vmatprep.subr.bf16.mxu1 %v8879_v0  ;;  %v8921_v0 = vld [vmem:[%s11070_s1 + $0xe98] sm:$0xff]   ;;  %v8948_v49 = vld [vmem:[%s11070_s1 + $0xf10] sm:$0xff]  }
 0x1a7   :  { %8138 = vmatpush3.bf16.msra.mxu0 %v8878_v63  ;;  %v8920_v63 = vld [vmem:[%s11070_s1 + $0xed8] sm:$0xff]  }
 0x1a8   :  { %8139 = vmatprep.subr.bf16.mxu0 %v8881_v2  ;;  %v8923_v2 = vld [vmem:[%s11070_s1 + $0xe20] sm:$0xff]  }
 0x1a9   :  { %8160 = vmatpush3.bf16.msra.mxu1 %v8880_v1  ;;  %v8922_v1 = vld [vmem:[%s11070_s1 + $0xe60] sm:$0xff]  }
 0x1aa   :  { %8161 = vmatprep.subr.bf16.mxu1 %v8883_v4  ;;  %v8925_v4 = vld [vmem:[%s11070_s1 + $0xea0] sm:$0xff]  }
 0x1ab   :  { %8140 = vmatpush3.bf16.msra.mxu0 %v8882_v3  ;;  %v8924_v3 = vld [vmem:[%s11070_s1 + $0xee0] sm:$0xff]  }
 0x1ac   :  { %8141 = vmatprep.subr.bf16.mxu0 %v8885_v6 }
 0x1ad   :  { %8162 = vmatpush3.bf16.msra.mxu1 %v8884_v5  ;;  %v8926_v5 = vld [vmem:[%s11070_s1 + $0xe68] sm:$0xff]  }
 0x1ae   :  { %8163 = vmatprep.subr.bf16.mxu1 %v8887_v8 }
 0x1af   :  { %8142 = vmatpush3.bf16.msra.mxu0 %v8886_v7  ;;  %v8927_v7 = vld [vmem:[%s11070_s1 + $0xe28] sm:$0xff]  }
 0x1b0   :  { %8143 = vmatprep.subr.bf16.mxu0 %v8889_v10 }
 0x1b1   :  { %8164 = vmatpush3.bf16.msra.mxu1 %v8888_v9  ;;  %v8928_v9 = vld [vmem:[%s11070_s1 + $0xee8] sm:$0xff]  }
 0x1b2   :  { %8165 = vmatprep.subr.bf16.mxu1 %v8891_v12 }
 0x1b3   :  { %8144 = vmatpush3.bf16.msra.mxu0 %v8890_v11 }
 0x1b4   :  { %8145 = vmatprep.subr.bf16.mxu0 %v8893_v14  ;;  %v8930_v14 = vld [vmem:[%s11070_s1 + $0xe70] sm:$0xff]  }
 0x1b5   :  { %v7843_v15 = vpop.f32.mrb[24].mxu0  ;;  %8166 = vmatpush3.bf16.msra.mxu1 %v8892_v13  ;;  %v8929_v13 = vld [vmem:[%s11070_s1 + $0xea8] sm:$0xff]  }
 0x1b6   :  { %v7844_v17 = vpop.f32.mrb[25].mxu0  ;;  %8167 = vmatprep.subr.bf16.mxu1 %v8895_v18 }
 0x1b7   :  { %v7845_v19 = vadd.f32 %v7844_v17, %v7843_v15  ;;  %v7846_v20 = vpop.f32.mrb[26].mxu0  ;;  %v7865_v21 = vpop.f32.mrb[24].mxu1  ;;  %8146 = vmatpush3.bf16.msra.mxu0 %v8894_v16 }
 0x1b8   :  { %v7847_v24 = vpop.f32.mrb[27].mxu0  ;;  %v7866_v25 = vpop.f32.mrb[25].mxu1  ;;  %8147 = vmatprep.subr.bf16.mxu0 %v8897_v23  ;;  %v8931_v20 = vld [vmem:[%s11070_s1 + $0xe30] sm:$0xff]  }
 0x1b9   :  { %v5855_v26 = vadd.f32 %v7845_v19, %v10410_v42  ;;  %v7867_v27 = vadd.f32 %v7866_v25, %v7865_v21  ;;  %v7868_v28 = vpop.f32.mrb[26].mxu1  ;;  %8168 = vmatpush3.bf16.msra.mxu1 %v8896_v22  ;;  %v8905_v42 = vld [vmem:[%s11070_s1 + $0xe40] sm:$0xff]   ;;  %v8932_v22 = vld [vmem:[%s11070_s1 + $0xef0] sm:$0xff]   ;;  %v8934_v25 = vld [vmem:[%s11070_s1 + $0xe78] sm:$0xff]  }
 0x1ba   :  { %v7869_v30 = vpop.f32.mrb[27].mxu1  ;;  %8169 = vmatprep.subr.bf16.mxu1 %v8899_v31  ;;  %v8933_v24 = vld [vmem:[%s11070_s1 + $0xeb0] sm:$0xff]  }
 0x1bb   :  { %v10514_v32 = vadd.f32 %v7867_v27, %v5855_v26  ;;  %8148 = vmatpush3.bf16.msra.mxu0 %v8898_v29  ;;  %v8935_v26 = vld [vmem:[%s11070_s1 + $0xe38] sm:$0xff]   ;;  %v37_v28 = vld [vmem:[%s11071_s0 + $0x70] sm:$0xff] }
 0x1bc   :  { %8149 = vmatprep.subr.bf16.mxu0 %v8901_v35  ;;  %v8936_v27 = vld [vmem:[%s11070_s1 + $0xef8] sm:$0xff]   ;;  %v306_v29 = vrot.slane %v37_v28, %v9184_v34  ;;  %v299_v31 = vcombine.high %v37_v28, %v37_v28  ;;  %v8974_v28 = vld [vmem:[%s11070_s1 + $0x10c0] sm:$0xff]  }
 0x1bd   :  { %8170 = vmatpush3.bf16.msra.mxu1 %v8900_v33  ;;  %v8937_v30 = vld [vmem:[%s11070_s1 + $0xeb8] sm:$0xff]  }
 0x1be   :  { %8171 = vmatprep.subr.bf16.mxu1 %v8903_v37  ;;  %v314_v33 = vcombine.high %v306_v29, %v306_v29  ;;  %v313_v35 = vrot.slane %v299_v31, %v9184_v34  ;;  %v514_v37 = vpack.c.bf16 %v306_v29, %v306_v29  ;;  %v8975_v31 = vld [vmem:[%s11070_s1 + $0x1080] sm:$0xff]  }
 0x1bf   :  { %8150 = vmatpush3.bf16.msra.mxu0 %v8902_v36  ;;  %v8940_v36 = vld [vmem:[%s11070_s1 + $0xf00] sm:$0xff]  }
 0x1c0   :  { %8179 = vmatprep.subr.bf16.mxu0 %v8905_v42  ;;  %v515_v39 = vpack.c.bf16 %v314_v33, %v314_v33  ;;  %v516_v42 = vpack.c.bf16 %v313_v35, %v313_v35  ;;  %v8976_v33 = vld [vmem:[%s11070_s1 + $0x1048] sm:$0xff]  }
 0x1c1   :  { %8172 = vmatpush3.bf16.msra.mxu1 %v8904_v40  ;;  %v315_v40 = vcombine.high %v313_v35, %v313_v35 }
 0x1c2   :  { %8201 = vmatprep.subr.bf16.mxu1 %v8908_v47  ;;  %6413 = vmatmul.mubr.bf16.vlgmr.msra.gmra.mrb[52].mxu0 %v510_v46  ;;  %v8945_v46 = vld [vmem:[%s11070_s1 + $0xfc8] sm:$0xff]  }
 0x1c3   :  { %8180 = vmatpush3.bf16.msra.mxu0 %v8907_v45  ;;  %6492 = vmatprep.mubr.bf16.mxu0 %v515_v39  ;;  %v517_v44 = vpack.c.bf16 %v315_v40, %v315_v40  ;;  %v8944_v45 = vld [vmem:[%s11070_s1 + $0xf08] sm:$0xff]   ;;  %v8980_v39 = vld [vmem:[%s11070_s1 + $0x1050] sm:$0xff]  }
 0x1c4   :  { %6453 = vmatmul.mubr.bf16.vlgmr.msra.gmra.mrb[52].mxu1 %v512_v51  ;;  %8181 = vmatprep.subr.bf16.mxu0 %v8910_v52  ;;  %v8946_v47 = vld [vmem:[%s11070_s1 + $0xf88] sm:$0xff]   ;;  %v8950_v51 = vld [vmem:[%s11070_s1 + $0xf90] sm:$0xff]   ;;  %v8951_v52 = vld [vmem:[%s11070_s1 + $0xf58] sm:$0xff]  }
 0x1c5   :  { %8202 = vmatpush3.bf16.msra.mxu1 %v8909_v50  ;;  %6532 = vmatprep.mubr.bf16.mxu1 %v517_v44  ;;  %v8949_v50 = vld [vmem:[%s11070_s1 + $0xfd0] sm:$0xff]   ;;  %v8985_v44 = vld [vmem:[%s11070_s1 + $0x1018] sm:$0xff]  }
 0x1c6   :  { %8203 = vmatprep.subr.bf16.mxu1 %v8912_v55  ;;  %v8954_v55 = vld [vmem:[%s11070_s1 + $0xf98] sm:$0xff]   ;;  %v8981_v40 = vld [vmem:[%s11070_s1 + $0x1010] sm:$0xff]  }
 0x1c7   :  { %8182 = vmatpush3.bf16.msra.mxu0 %v8911_v54  ;;  %v8953_v54 = vld [vmem:[%s11070_s1 + $0xfd8] sm:$0xff]  }
 0x1c8   :  { %8183 = vmatprep.subr.bf16.mxu0 %v8914_v57  ;;  %v8956_v57 = vld [vmem:[%s11070_s1 + $0xf20] sm:$0xff]  }
 0x1c9   :  { %8204 = vmatpush3.bf16.msra.mxu1 %v8913_v56  ;;  %v8955_v56 = vld [vmem:[%s11070_s1 + $0xf60] sm:$0xff]  }
 0x1ca   :  { %8205 = vmatprep.subr.bf16.mxu1 %v8916_v59  ;;  %v8958_v59 = vld [vmem:[%s11070_s1 + $0xfa0] sm:$0xff]  }
 0x1cb   :  { %8184 = vmatpush3.bf16.msra.mxu0 %v8915_v58  ;;  %v8957_v58 = vld [vmem:[%s11070_s1 + $0xfe0] sm:$0xff]  }
 0x1cc   :  { %8185 = vmatprep.subr.bf16.mxu0 %v8918_v61 }
 0x1cd   :  { %8206 = vmatpush3.bf16.msra.mxu1 %v8917_v60  ;;  %v8959_v60 = vld [vmem:[%s11070_s1 + $0xf68] sm:$0xff]  }
 0x1ce   :  { %8207 = vmatprep.subr.bf16.mxu1 %v8920_v63 }
 0x1cf   :  { %8186 = vmatpush3.bf16.msra.mxu0 %v8919_v62  ;;  %v8960_v62 = vld [vmem:[%s11070_s1 + $0xf28] sm:$0xff]  }
 0x1d0   :  { %8187 = vmatprep.subr.bf16.mxu0 %v8922_v1 }
 0x1d1   :  { %8208 = vmatpush3.bf16.msra.mxu1 %v8921_v0  ;;  %v8961_v0 = vld [vmem:[%s11070_s1 + $0xfe8] sm:$0xff]  }
 0x1d2   :  { %8209 = vmatprep.subr.bf16.mxu1 %v8924_v3 }
 0x1d3   :  { %8188 = vmatpush3.bf16.msra.mxu0 %v8923_v2 }
 0x1d4   :  { %8189 = vmatprep.subr.bf16.mxu0 %v8926_v5 }
 0x1d5   :  { %v7887_v6 = vpop.f32.mrb[28].mxu0  ;;  %8210 = vmatpush3.bf16.msra.mxu1 %v8925_v4 }
 0x1d6   :  { %v7888_v8 = vpop.f32.mrb[29].mxu0  ;;  %8211 = vmatprep.subr.bf16.mxu1 %v8928_v9 }
 0x1d7   :  { %v7889_v10 = vadd.f32 %v7888_v8, %v7887_v6  ;;  %v7890_v11 = vpop.f32.mrb[30].mxu0  ;;  %v7909_v12 = vpop.f32.mrb[28].mxu1  ;;  %8190 = vmatpush3.bf16.msra.mxu0 %v8927_v7  ;;  %v8962_v6 = vld [vmem:[%s11070_s1 + $0xfa8] sm:$0xff]   ;;  %v8963_v7 = vld [vmem:[%s11070_s1 + $0xf70] sm:$0xff]  }
 0x1d8   :  { %v7891_v15 = vpop.f32.mrb[31].mxu0  ;;  %v7910_v16 = vpop.f32.mrb[29].mxu1  ;;  %8191 = vmatprep.subr.bf16.mxu0 %v8930_v14  ;;  %v8964_v11 = vld [vmem:[%s11070_s1 + $0xf30] sm:$0xff]  }
 0x1d9   :  { %v5935_v17 = vadd.f32 %v7889_v10, %v10514_v32  ;;  %v7911_v18 = vadd.f32 %v7910_v16, %v7909_v12  ;;  %v7912_v19 = vpop.f32.mrb[30].mxu1  ;;  %8212 = vmatpush3.bf16.msra.mxu1 %v8929_v13  ;;  %v8938_v32 = vld [vmem:[%s11070_s1 + $0xf40] sm:$0xff]   ;;  %v8965_v13 = vld [vmem:[%s11070_s1 + $0xff0] sm:$0xff]   ;;  %v8967_v16 = vld [vmem:[%s11070_s1 + $0xf78] sm:$0xff]  }
 0x1da   :  { %v7913_v21 = vpop.f32.mrb[31].mxu1  ;;  %8213 = vmatprep.subr.bf16.mxu1 %v8932_v22  ;;  %v8966_v15 = vld [vmem:[%s11070_s1 + $0xfb0] sm:$0xff]   ;;  %v38_v19 = vld [vmem:[%s11071_s0 + $0x78] sm:$0xff] }
 0x1db   :  { %v10618_v23 = vadd.f32 %v7911_v18, %v5935_v17  ;;  %8192 = vmatpush3.bf16.msra.mxu0 %v8931_v20  ;;  %v8968_v17 = vld [vmem:[%s11070_s1 + $0xf38] sm:$0xff]   ;;  %v323_v20 = vrot.slane %v38_v19, %v9184_v34  ;;  %v316_v22 = vcombine.high %v38_v19, %v38_v19 }
 0x1dc   :  { %8193 = vmatprep.subr.bf16.mxu0 %v8934_v25  ;;  %v8969_v18 = vld [vmem:[%s11070_s1 + $0xff8] sm:$0xff]  }
 0x1dd   :  { %8214 = vmatpush3.bf16.msra.mxu1 %v8933_v24  ;;  %v8970_v21 = vld [vmem:[%s11070_s1 + $0xfb8] sm:$0xff]   ;;  %v331_v24 = vcombine.high %v323_v20, %v323_v20  ;;  %v330_v25 = vrot.slane %v316_v22, %v9184_v34 }
 0x1de   :  { %8215 = vmatprep.subr.bf16.mxu1 %v8936_v27  ;;  %v518_v27 = vpack.c.bf16 %v323_v20, %v323_v20 }
 0x1df   :  { %8194 = vmatpush3.bf16.msra.mxu0 %v8935_v26  ;;  %v8973_v26 = vld [vmem:[%s11070_s1 + $0x1000] sm:$0xff]   ;;  %v519_v29 = vpack.c.bf16 %v331_v24, %v331_v24 }
 0x1e0   :  { %8223 = vmatprep.subr.bf16.mxu0 %v8938_v32  ;;  %v520_v32 = vpack.c.bf16 %v330_v25, %v330_v25 }
 0x1e1   :  { %8216 = vmatpush3.bf16.msra.mxu1 %v8937_v30  ;;  %v332_v30 = vcombine.high %v330_v25, %v330_v25  ;;  %v9008_v25 = vld [vmem:[%s11070_s1 + $0x1180] sm:$0xff]  }
 0x1e2   :  { %6493 = vmatmul.mubr.bf16.vlgmr.msra.gmra.mrb[56].mxu0 %v514_v37  ;;  %8245 = vmatprep.subr.bf16.mxu1 %v8941_v38  ;;  %v8978_v37 = vld [vmem:[%s11070_s1 + $0x10c8] sm:$0xff]  }
 0x1e3   :  { %8224 = vmatpush3.bf16.msra.mxu0 %v8940_v36  ;;  %6572 = vmatprep.mubr.bf16.mxu0 %v519_v29  ;;  %v521_v35 = vpack.c.bf16 %v332_v30, %v332_v30  ;;  %v8977_v36 = vld [vmem:[%s11070_s1 + $0x1008] sm:$0xff]   ;;  %v9015_v30 = vld [vmem:[%s11070_s1 + $0x11d0] sm:$0xff]  }
 0x1e4   :  { %6533 = vmatmul.mubr.bf16.vlgmr.msra.gmra.mrb[56].mxu1 %v516_v42  ;;  %8225 = vmatprep.subr.bf16.mxu0 %v8943_v43  ;;  %v8979_v38 = vld [vmem:[%s11070_s1 + $0x1088] sm:$0xff]   ;;  %v8983_v42 = vld [vmem:[%s11070_s1 + $0x1090] sm:$0xff]   ;;  %v8984_v43 = vld [vmem:[%s11070_s1 + $0x1058] sm:$0xff]  }
 0x1e5   :  { %8246 = vmatpush3.bf16.msra.mxu1 %v8942_v41  ;;  %6612 = vmatprep.mubr.bf16.mxu1 %v521_v35  ;;  %v8982_v41 = vld [vmem:[%s11070_s1 + $0x10d0] sm:$0xff]   ;;  %v9012_v29 = vld [vmem:[%s11070_s1 + $0x1188] sm:$0xff]   ;;  %v9019_v35 = vld [vmem:[%s11070_s1 + $0x11d8] sm:$0xff]  }
 0x1e6   :  { %8247 = vmatprep.subr.bf16.mxu1 %v8945_v46  ;;  %v8987_v46 = vld [vmem:[%s11070_s1 + $0x1098] sm:$0xff]  }
 0x1e7   :  { %8226 = vmatpush3.bf16.msra.mxu0 %v8944_v45  ;;  %v8986_v45 = vld [vmem:[%s11070_s1 + $0x10d8] sm:$0xff]  }
 0x1e8   :  { %8227 = vmatprep.subr.bf16.mxu0 %v8947_v48  ;;  %v8989_v48 = vld [vmem:[%s11070_s1 + $0x1020] sm:$0xff]  }
 0x1e9   :  { %8248 = vmatpush3.bf16.msra.mxu1 %v8946_v47  ;;  %v8988_v47 = vld [vmem:[%s11070_s1 + $0x1060] sm:$0xff]  }
 0x1ea   :  { %8249 = vmatprep.subr.bf16.mxu1 %v8949_v50  ;;  %v8991_v50 = vld [vmem:[%s11070_s1 + $0x10a0] sm:$0xff]  }
 0x1eb   :  { %8228 = vmatpush3.bf16.msra.mxu0 %v8948_v49  ;;  %v8990_v49 = vld [vmem:[%s11070_s1 + $0x10e0] sm:$0xff]  }
 0x1ec   :  { %8229 = vmatprep.subr.bf16.mxu0 %v8951_v52 }
 0x1ed   :  { %8250 = vmatpush3.bf16.msra.mxu1 %v8950_v51  ;;  %v8992_v51 = vld [vmem:[%s11070_s1 + $0x1068] sm:$0xff]  }
 0x1ee   :  { %8251 = vmatprep.subr.bf16.mxu1 %v8953_v54 }
 0x1ef   :  { %8230 = vmatpush3.bf16.msra.mxu0 %v8952_v53  ;;  %v8993_v53 = vld [vmem:[%s11070_s1 + $0x1028] sm:$0xff]  }
 0x1f0   :  { %8231 = vmatprep.subr.bf16.mxu0 %v8955_v56 }
 0x1f1   :  { %8252 = vmatpush3.bf16.msra.mxu1 %v8954_v55  ;;  %v8994_v55 = vld [vmem:[%s11070_s1 + $0x10e8] sm:$0xff]  }
 0x1f2   :  { %8253 = vmatprep.subr.bf16.mxu1 %v8957_v58 }
 0x1f3   :  { %8232 = vmatpush3.bf16.msra.mxu0 %v8956_v57 }
 0x1f4   :  { %8233 = vmatprep.subr.bf16.mxu0 %v8959_v60  ;;  %v8996_v60 = vld [vmem:[%s11070_s1 + $0x1070] sm:$0xff]  }
 0x1f5   :  { %v7931_v61 = vpop.f32.mrb[32].mxu0  ;;  %8254 = vmatpush3.bf16.msra.mxu1 %v8958_v59  ;;  %v8995_v59 = vld [vmem:[%s11070_s1 + $0x10a8] sm:$0xff]  }
 0x1f6   :  { %v7932_v63 = vpop.f32.mrb[33].mxu0  ;;  %8255 = vmatprep.subr.bf16.mxu1 %v8961_v0 }
 0x1f7   :  { %v7933_v1 = vadd.f32 %v7932_v63, %v7931_v61  ;;  %v7934_v2 = vpop.f32.mrb[34].mxu0  ;;  %v7953_v3 = vpop.f32.mrb[32].mxu1  ;;  %8234 = vmatpush3.bf16.msra.mxu0 %v8960_v62 }
 0x1f8   :  { %v7935_v4 = vpop.f32.mrb[35].mxu0  ;;  %v7954_v5 = vpop.f32.mrb[33].mxu1  ;;  %8235 = vmatprep.subr.bf16.mxu0 %v8963_v7  ;;  %v8997_v2 = vld [vmem:[%s11070_s1 + $0x1030] sm:$0xff]   ;;  %v9000_v7 = vld [vmem:[%s11070_s1 + $0x1078] sm:$0xff]  }
 0x1f9   :  { %v6015_v8 = vadd.f32 %v7933_v1, %v10618_v23  ;;  %v7955_v9 = vadd.f32 %v7954_v5, %v7953_v3  ;;  %v7956_v10 = vpop.f32.mrb[34].mxu1  ;;  %8256 = vmatpush3.bf16.msra.mxu1 %v8962_v6  ;;  %v8971_v23 = vld [vmem:[%s11070_s1 + $0x1040] sm:$0xff]   ;;  %v8998_v4 = vld [vmem:[%s11070_s1 + $0x10f0] sm:$0xff]  }
 0x1fa   :  { %v7957_v12 = vpop.f32.mrb[35].mxu1  ;;  %8257 = vmatprep.subr.bf16.mxu1 %v8965_v13  ;;  %v8999_v6 = vld [vmem:[%s11070_s1 + $0x10b0] sm:$0xff]   ;;  %v39_v10 = vld [vmem:[%s11071_s0 + $0x80] sm:$0xff] }
 0x1fb   :  { %v10722_v14 = vadd.f32 %v7955_v9, %v6015_v8  ;;  %8236 = vmatpush3.bf16.msra.mxu0 %v8964_v11  ;;  %v9001_v8 = vld [vmem:[%s11070_s1 + $0x1038] sm:$0xff]   ;;  %v340_v11 = vrot.slane %v39_v10, %v9184_v34  ;;  %v333_v13 = vcombine.high %v39_v10, %v39_v10 }
 0x1fc   :  { %8237 = vmatprep.subr.bf16.mxu0 %v8967_v16  ;;  %v9002_v9 = vld [vmem:[%s11070_s1 + $0x10f8] sm:$0xff]  }
 0x1fd   :  { %8258 = vmatpush3.bf16.msra.mxu1 %v8966_v15  ;;  %v9003_v12 = vld [vmem:[%s11070_s1 + $0x10b8] sm:$0xff]   ;;  %v348_v15 = vcombine.high %v340_v11, %v340_v11  ;;  %v347_v16 = vrot.slane %v333_v13, %v9184_v34  ;;  %v9041_v13 = vld [vmem:[%s11070_s1 + $0x1248] sm:$0xff]  }
 0x1fe   :  { %8259 = vmatprep.subr.bf16.mxu1 %v8969_v18  ;;  %v9007_v18 = vld [vmem:[%s11070_s1 + $0x11c0] sm:$0xff]  }
 0x1ff   :  { %8238 = vmatpush3.bf16.msra.mxu0 %v8968_v17  ;;  %v522_v17 = vpack.c.bf16 %v340_v11, %v340_v11  ;;  %v523_v19 = vpack.c.bf16 %v348_v15, %v348_v15  ;;  %v349_v20 = vcombine.high %v347_v16, %v347_v16  ;;  %v524_v22 = vpack.c.bf16 %v347_v16, %v347_v16  ;;  %v9039_v11 = vld [vmem:[%s11070_s1 + $0x1200] sm:$0xff]  }
 0x200   :  { %8267 = vmatprep.subr.bf16.mxu0 %v8971_v23  ;;  %v9009_v23 = vld [vmem:[%s11070_s1 + $0x1148] sm:$0xff]   ;;  %v9040_v15 = vld [vmem:[%s11070_s1 + $0x1280] sm:$0xff]   ;;  %v9064_v16 = vmov 0.0  }
 0x201   :  { %8260 = vmatpush3.bf16.msra.mxu1 %v8970_v21  ;;  %v9006_v21 = vld [vmem:[%s11070_s1 + $0x1100] sm:$0xff]   ;;  %v525_v24 = vpack.c.bf16 %v349_v20, %v349_v20  ;;  %v9045_v20 = vld [vmem:[%s11070_s1 + $0x1210] sm:$0xff]  }
 0x202   :  { %8289 = vmatprep.subr.bf16.mxu1 %v8974_v28  ;;  %6573 = vmatmul.mubr.bf16.vlgmr.msra.gmra.mrb[60].mxu0 %v518_v27  ;;  %v9010_v27 = vld [vmem:[%s11070_s1 + $0x1108] sm:$0xff]   ;;  %v9013_v28 = vld [vmem:[%s11070_s1 + $0x1150] sm:$0xff]  }
 0x203   :  { %8268 = vmatpush3.bf16.msra.mxu0 %v8973_v26  ;;  %6652 = vmatprep.mubr.bf16.mxu0 %v523_v19  ;;  %v9011_v26 = vld [vmem:[%s11070_s1 + $0x11c8] sm:$0xff]  }
 0x204   :  { %6613 = vmatmul.mubr.bf16.vlgmr.msra.gmra.mrb[60].mxu1 %v520_v32  ;;  %8269 = vmatprep.subr.bf16.mxu0 %v8976_v33  ;;  %v9017_v32 = vld [vmem:[%s11070_s1 + $0x1158] sm:$0xff]   ;;  %v9016_v33 = vld [vmem:[%s11070_s1 + $0x1190] sm:$0xff]   ;;  %v9043_v19 = vld [vmem:[%s11070_s1 + $0x1288] sm:$0xff]  }
 0x205   :  { %8290 = vmatpush3.bf16.msra.mxu1 %v8975_v31  ;;  %6692 = vmatprep.mubr.bf16.mxu1 %v525_v24  ;;  %v9014_v31 = vld [vmem:[%s11070_s1 + $0x1110] sm:$0xff]   ;;  %v9050_v24 = vld [vmem:[%s11070_s1 + $0x1260] sm:$0xff]  }
 0x206   :  { %8291 = vmatprep.subr.bf16.mxu1 %v8978_v37  ;;  %v9021_v37 = vld [vmem:[%s11070_s1 + $0x1160] sm:$0xff]  }
 0x207   :  { %8270 = vmatpush3.bf16.msra.mxu0 %v8977_v36  ;;  %v9018_v36 = vld [vmem:[%s11070_s1 + $0x1118] sm:$0xff]  }
 0x208   :  { %8271 = vmatprep.subr.bf16.mxu0 %v8980_v39  ;;  %v9023_v39 = vld [vmem:[%s11070_s1 + $0x11e0] sm:$0xff]  }
 0x209   :  { %8292 = vmatpush3.bf16.msra.mxu1 %v8979_v38  ;;  %v9020_v38 = vld [vmem:[%s11070_s1 + $0x1198] sm:$0xff]  }
 0x20a   :  { %8293 = vmatprep.subr.bf16.mxu1 %v8982_v41  ;;  %v9025_v41 = vld [vmem:[%s11070_s1 + $0x1168] sm:$0xff]  }
 0x20b   :  { %8272 = vmatpush3.bf16.msra.mxu0 %v8981_v40  ;;  %v9022_v40 = vld [vmem:[%s11070_s1 + $0x1120] sm:$0xff]  }
 0x20c   :  { %8273 = vmatprep.subr.bf16.mxu0 %v8984_v43  ;;  %v9024_v43 = vld [vmem:[%s11070_s1 + $0x11a0] sm:$0xff]  }
 0x20d   :  { %8294 = vmatpush3.bf16.msra.mxu1 %v8983_v42 }
 0x20e   :  { %8295 = vmatprep.subr.bf16.mxu1 %v8986_v45  ;;  %v9027_v45 = vld [vmem:[%s11070_s1 + $0x11e8] sm:$0xff]  }
 0x20f   :  { %8274 = vmatpush3.bf16.msra.mxu0 %v8985_v44 }
 0x210   :  { %8275 = vmatprep.subr.bf16.mxu0 %v8988_v47 }
 0x211   :  { %8296 = vmatpush3.bf16.msra.mxu1 %v8987_v46 }
 0x212   :  { %8297 = vmatprep.subr.bf16.mxu1 %v8990_v49  ;;  %v9026_v49 = vld [vmem:[%s11070_s1 + $0x1128] sm:$0xff]  }
 0x213   :  { %8276 = vmatpush3.bf16.msra.mxu0 %v8989_v48 }
 0x214   :  { %8277 = vmatprep.subr.bf16.mxu0 %v8992_v51 }
 0x215   :  { %v7975_v52 = vpop.f32.mrb[36].mxu0  ;;  %8298 = vmatpush3.bf16.msra.mxu1 %v8991_v50  ;;  %v9029_v50 = vld [vmem:[%s11070_s1 + $0x1170] sm:$0xff]  }
 0x216   :  { %v7976_v54 = vpop.f32.mrb[37].mxu0  ;;  %8299 = vmatprep.subr.bf16.mxu1 %v8994_v55  ;;  %v9028_v55 = vld [vmem:[%s11070_s1 + $0x11a8] sm:$0xff]  }
 0x217   :  { %v7977_v56 = vadd.f32 %v7976_v54, %v7975_v52  ;;  %v7978_v57 = vpop.f32.mrb[38].mxu0  ;;  %v7997_v58 = vpop.f32.mrb[36].mxu1  ;;  %8278 = vmatpush3.bf16.msra.mxu0 %v8993_v53 }
 0x218   :  { %v7979_v61 = vpop.f32.mrb[39].mxu0  ;;  %v7998_v62 = vpop.f32.mrb[37].mxu1  ;;  %8279 = vmatprep.subr.bf16.mxu0 %v8996_v60  ;;  %v9030_v60 = vld [vmem:[%s11070_s1 + $0x1130] sm:$0xff]  }
 0x219   :  { %v6095_v63 = vadd.f32 %v7977_v56, %v10722_v14  ;;  %v7999_v0 = vadd.f32 %v7998_v62, %v7997_v58  ;;  %v8000_v1 = vpop.f32.mrb[38].mxu1  ;;  %8300 = vmatpush3.bf16.msra.mxu1 %v8995_v59  ;;  %v9004_v14 = vld [vmem:[%s11070_s1 + $0x1140] sm:$0xff]   ;;  %v9031_v58 = vld [vmem:[%s11070_s1 + $0x11f0] sm:$0xff]   ;;  %v9033_v61 = vld [vmem:[%s11070_s1 + $0x1178] sm:$0xff]  }
 0x21a   :  { %v8001_v3 = vpop.f32.mrb[39].mxu1  ;;  %8301 = vmatprep.subr.bf16.mxu1 %v8998_v4  ;;  %v9032_v62 = vld [vmem:[%s11070_s1 + $0x11b0] sm:$0xff]   ;;  %v9034_v1 = vld [vmem:[%s11070_s1 + $0x1138] sm:$0xff]   ;;  %v9037_v4 = vld [vmem:[%s11070_s1 + $0x1240] sm:$0xff]  }
 0x21b   :  { %v10826_v5 = vadd.f32 %v7999_v0, %v6095_v63  ;;  %8280 = vmatpush3.bf16.msra.mxu0 %v8997_v2  ;;  %v9035_v63 = vld [vmem:[%s11070_s1 + $0x11f8] sm:$0xff]   ;;  %v40_v0 = vld [vmem:[%s11071_s0 + $0x88] sm:$0xff] }
 0x21c   :  { %8281 = vmatprep.subr.bf16.mxu0 %v9000_v7  ;;  %v357_v2 = vrot.slane %v40_v0, %v9184_v34  ;;  %v350_v3 = vcombine.high %v40_v0, %v40_v0 }
 0x21d   :  { %8302 = vmatpush3.bf16.msra.mxu1 %v8999_v6  ;;  %v9036_v6 = vld [vmem:[%s11070_s1 + $0x11b8] sm:$0xff]  }
 0x21e   :  { %8303 = vmatprep.subr.bf16.mxu1 %v9002_v9  ;;  %v364_v7 = vrot.slane %v350_v3, %v9184_v34 }
 0x21f   :  { %8282 = vmatpush3.bf16.msra.mxu0 %v9001_v8  ;;  %v526_v8 = vpack.c.bf16 %v357_v2, %v357_v2 }
 0x220   :  { %8311 = vmatprep.subr.bf16.mxu0 %v9004_v14  ;;  %v366_v10 = vcombine.high %v364_v7, %v364_v7 }
 0x221   :  { %8304 = vmatpush3.bf16.msra.mxu1 %v9003_v12  ;;  %v528_v12 = vpack.c.bf16 %v364_v7, %v364_v7 }
 0x222   :  { %8333 = vmatprep.subr.bf16.mxu1 %v9007_v18  ;;  %6653 = vmatmul.mubr.bf16.vlgmr.msra.gmra.mrb[64].mxu0 %v522_v17  ;;  %v529_v14 = vpack.c.bf16 %v366_v10, %v366_v10  ;;  %v9042_v17 = vld [vmem:[%s11070_s1 + $0x1208] sm:$0xff]   ;;  %v9044_v18 = vld [vmem:[%s11070_s1 + $0x1250] sm:$0xff]  }
 0x223   :  { %8312 = vmatpush3.bf16.msra.mxu0 %v9006_v21  ;;  %v9047_v21 = vld [vmem:[%s11070_s1 + $0x1258] sm:$0xff]  }
 0x224   :  { %6693 = vmatmul.mubr.bf16.vlgmr.msra.gmra.mrb[64].mxu1 %v524_v22  ;;  %8313 = vmatprep.subr.bf16.mxu0 %v9009_v23  ;;  %v9046_v22 = vld [vmem:[%s11070_s1 + $0x1290] sm:$0xff]   ;;  %v9048_v23 = vld [vmem:[%s11070_s1 + $0x1218] sm:$0xff]  }
 0x225   :  { %8334 = vmatpush3.bf16.msra.mxu1 %v9008_v25  ;;  %6772 = vmatprep.mubr.bf16.mxu1 %v529_v14  ;;  %v9049_v25 = vld [vmem:[%s11070_s1 + $0x1298] sm:$0xff]  }
 0x226   :  { %8335 = vmatprep.subr.bf16.mxu1 %v9011_v26  ;;  %v9051_v26 = vld [vmem:[%s11070_s1 + $0x1220] sm:$0xff]  }
 0x227   :  { %8314 = vmatpush3.bf16.msra.mxu0 %v9010_v27  ;;  %v9053_v27 = vld [vmem:[%s11070_s1 + $0x1268] sm:$0xff]  }
 0x228   :  { %8315 = vmatprep.subr.bf16.mxu0 %v9013_v28 }
 0x229   :  { %8336 = vmatpush3.bf16.msra.mxu1 %v9012_v29  ;;  %v9052_v29 = vld [vmem:[%s11070_s1 + $0x12a0] sm:$0xff]  }
 0x22a   :  { %8337 = vmatprep.subr.bf16.mxu1 %v9015_v30 }
 0x22b   :  { %8316 = vmatpush3.bf16.msra.mxu0 %v9014_v31  ;;  %v9054_v31 = vld [vmem:[%s11070_s1 + $0x1228] sm:$0xff]  }
 0x22c   :  { %8317 = vmatprep.subr.bf16.mxu0 %v9017_v32 }
 0x22d   :  { %8338 = vmatpush3.bf16.msra.mxu1 %v9016_v33 }
 0x22e   :  { %8339 = vmatprep.subr.bf16.mxu1 %v9019_v35 }
 0x22f   :  { %8318 = vmatpush3.bf16.msra.mxu0 %v9018_v36  ;;  %v41_v36 = vld [vmem:[%s11071_s0 + $0x90] sm:$0x3f] }
 0x230   :  { %8319 = vmatprep.subr.bf16.mxu0 %v9021_v37 }
 0x231   :  { %8340 = vmatpush3.bf16.msra.mxu1 %v9020_v38 }
 0x232   :  { %8341 = vmatprep.subr.bf16.mxu1 %v9023_v39  ;;  %v9056_v39 = vld [vmem:[%s11070_s1 + $0x1270] sm:$0xff]  }
 0x233   :  { %8320 = vmatpush3.bf16.msra.mxu0 %v9022_v40  ;;  %v374_v40 = vrot.slane %v41_v36, %v9184_v34 }
 0x234   :  { %8321 = vmatprep.subr.bf16.mxu0 %v9025_v41 }
 0x235   :  { %v8019_v42 = vpop.f32.mrb[40].mxu0  ;;  %8342 = vmatpush3.bf16.msra.mxu1 %v9024_v43  ;;  %v9055_v43 = vld [vmem:[%s11070_s1 + $0x12a8] sm:$0xff]  }
 0x236   :  { %v8020_v44 = vpop.f32.mrb[41].mxu0  ;;  %8343 = vmatprep.subr.bf16.mxu1 %v9027_v45 }
 0x237   :  { %v8021_v46 = vadd.f32 %v8020_v44, %v8019_v42  ;;  %v8022_v47 = vpop.f32.mrb[42].mxu0  ;;  %v8041_v48 = vpop.f32.mrb[40].mxu1  ;;  %8322 = vmatpush3.bf16.msra.mxu0 %v9026_v49  ;;  %v9059_v49 = vld [vmem:[%s11070_s1 + $0x1278] sm:$0xff]  }
 0x238   :  { %v8023_v51 = vpop.f32.mrb[43].mxu0  ;;  %v8042_v52 = vpop.f32.mrb[41].mxu1  ;;  %8323 = vmatprep.subr.bf16.mxu0 %v9029_v50  ;;  %v367_v50 = vcombine.high %v41_v36, %v41_v36  ;;  %v6865_v36 = vld [vmem:[%s11073_s3 + $0x20] sm:$0xff] }
 0x239   :  { %v6175_v53 = vadd.f32 %v8021_v46, %v10826_v5  ;;  %v8043_v54 = vadd.f32 %v8042_v52, %v8041_v48  ;;  %v8044_v56 = vpop.f32.mrb[42].mxu1  ;;  %8344 = vmatpush3.bf16.msra.mxu1 %v9028_v55  ;;  %v365_v5 = vcombine.high %v357_v2, %v357_v2  ;;  %v382_v46 = vcombine.high %v374_v40, %v374_v40  ;;  %v9057_v48 = vld [vmem:[%s11070_s1 + $0x1230] sm:$0xff]   ;;  %v9062_v55 = vld [vmem:[%s11070_s1 + $0x12b8] sm:$0xff]  }
 0x23a   :  { %v8045_v57 = vpop.f32.mrb[43].mxu1  ;;  %8345 = vmatprep.subr.bf16.mxu1 %v9031_v58  ;;  %v9058_v52 = vld [vmem:[%s11070_s1 + $0x12b0] sm:$0xff]   ;;  %v530_v56 = vpack.c.bf16 %v374_v40, %v374_v40 }
 0x23b   :  { %v10927_v59 = vadd.f32 %v8043_v54, %v6175_v53  ;;  %8324 = vmatpush3.bf16.msra.mxu0 %v9030_v60  ;;  %v527_v9 = vpack.c.bf16 %v365_v5, %v365_v5  ;;  %v531_v51 = vpack.c.bf16 %v382_v46, %v382_v46  ;;  %v9060_v53 = vld [vmem:[%s11070_s1 + $0x1238] sm:$0xff]   ;;  %v381_v54 = vrot.slane %v367_v50, %v9184_v34 }
 0x23c   :  { %8325 = vmatprep.subr.bf16.mxu0 %v9033_v61 }
 0x23d   :  { %8346 = vmatpush3.bf16.msra.mxu1 %v9032_v62  ;;  %6732 = vmatprep.mubr.bf16.mxu0 %v527_v9  ;;  %v532_v57 = vpack.c.bf16 %v381_v54, %v381_v54 }
 0x23e   :  { %8347 = vmatprep.subr.bf16.mxu1 %v9035_v63 }
 0x23f   :  { %8326 = vmatpush3.bf16.msra.mxu0 %v9034_v1 }
 0x240   :  { %8355 = vmatprep.subr.bf16.mxu0 %v9037_v4 }
 0x241   :  { %8348 = vmatpush3.bf16.msra.mxu1 %v9036_v6 }
 0x242   :  { %6733 = vmatmul.mubr.bf16.vlgmr.msra.gmra.mrb[68].mxu0 %v526_v8  ;;  %8394 = vmatprep.subr.bf16.mxu1 %v9064_v16 }
 0x243   :  { %8356 = vmatpush3.bf16.msra.mxu0 %v9039_v11  ;;  %6812 = vmatprep.mubr.bf16.mxu0 %v531_v51 }
 0x244   :  { %6773 = vmatmul.mubr.bf16.vlgmr.msra.gmra.mrb[68].mxu1 %v528_v12  ;;  %8357 = vmatprep.subr.bf16.mxu0 %v9041_v13 }
 0x245   :  { %8395 = vmatpush3.bf16.msra.mxu1 %v9040_v15  ;;  %8410 = vmatprep.mubr.msk.bf16.mxu1 %vm9065_vm0, %v9064_v16 }
 0x246   :  { %8396 = vmatprep.subr.bf16.mxu1 %v9064_v16 }
 0x247   :  { %8358 = vmatpush3.bf16.msra.mxu0 %v9042_v17 }
 0x248   :  { %8359 = vmatprep.subr.bf16.mxu0 %v9044_v18  ;;  %v9066_v18 = vmov 0.0|0.0  }
 0x249   :  { %8397 = vmatpush3.bf16.msra.mxu1 %v9043_v19  ;;  %v6861_v19 = vld [vmem:[%s11073_s3] sm:$0xff] }
 0x24a   :  { %8398 = vmatprep.subr.bf16.mxu1 %v9064_v16 }
 0x24b   :  { %8360 = vmatpush3.bf16.msra.mxu0 %v9045_v20  ;;  %v6862_v20 = vld [vmem:[%s11073_s3 + $0x8] sm:$0xff] }
 0x24c   :  { %8361 = vmatprep.subr.bf16.mxu0 %v9047_v21  ;;  %v8432_v21 = vpack.c.bf16 %v6862_v20, %v6861_v19 }
 0x24d   :  { %8399 = vmatpush3.bf16.msra.mxu1 %v9046_v22 }
 0x24e   :  { %8400 = vmatprep.subr.bf16.mxu1 %v9064_v16 }
 0x24f   :  { %8362 = vmatpush3.bf16.msra.mxu0 %v9048_v23  ;;  %v6863_v23 = vld [vmem:[%s11073_s3 + $0x10] sm:$0xff] }
 0x250   :  { %8363 = vmatprep.subr.bf16.mxu0 %v9050_v24  ;;  %v6864_v24 = vld [vmem:[%s11073_s3 + $0x18] sm:$0xff] }
 0x251   :  { %8401 = vmatpush3.bf16.msra.mxu1 %v9049_v25 }
 0x252   :  { %8402 = vmatprep.subr.bf16.mxu1 %v9064_v16 }
 0x253   :  { %8364 = vmatpush3.bf16.msra.mxu0 %v9051_v26  ;;  %v8435_v26 = vpack.c.bf16 %v6864_v24, %v6863_v23 }
 0x254   :  { %8365 = vmatprep.subr.bf16.mxu0 %v9053_v27 }
 0x255   :  { %v8063_v28 = vpop.f32.mrb[44].mxu0  ;;  %8403 = vmatpush3.bf16.msra.mxu1 %v9052_v29 }
 0x256   :  { %v8064_v30 = vpop.f32.mrb[45].mxu0  ;;  %8404 = vmatprep.subr.bf16.mxu1 %v9064_v16 }
 0x257   :  { %v8065_v32 = vadd.f32 %v8064_v30, %v8063_v28  ;;  %v8066_v33 = vpop.f32.mrb[46].mxu0  ;;  %v8085_v35 = vpop.f32.mrb[44].mxu1  ;;  %8366 = vmatpush3.bf16.msra.mxu0 %v9054_v31 }
 0x258   :  { %v8067_v37 = vpop.f32.mrb[47].mxu0  ;;  %v8086_v38 = vpop.f32.mrb[45].mxu1  ;;  %8367 = vmatprep.subr.bf16.mxu0 %v9056_v39 }
 0x259   :  { %v6255_v41 = vadd.f32 %v8065_v32, %v10927_v59  ;;  %v8087_v42 = vadd.f32 %v8086_v38, %v8085_v35  ;;  %v8088_v44 = vpop.f32.mrb[46].mxu1  ;;  %8405 = vmatpush3.bf16.msra.mxu1 %v9055_v43  ;;  %v6866_v37 = vld [vmem:[%s11073_s3 + $0x28] sm:$0xff] }
 0x25a   :  { %v8089_v45 = vpop.f32.mrb[47].mxu1  ;;  %8406 = vmatprep.subr.bf16.mxu1 %v9064_v16  ;;  %v8438_v39 = vpack.c.bf16 %v6866_v37, %v6865_v36 }
 0x25b   :  { %v6295_v47 = vadd.f32 %v8087_v42, %v6255_v41  ;;  %8368 = vmatpush3.bf16.msra.mxu0 %v9057_v48  ;;  %v6867_v41 = vld [vmem:[%s11073_s3 + $0x30] sm:$0x3]  ;;  %v10_v42 = vstv %s11074_s4 }
 0x25c   :  { %8369 = vmatprep.subr.bf16.mxu0 %v9059_v49  ;;  %11 = vst [vmem:[#allocation2] sm:$0x1] %v10_v42 }
 0x25d   :  { %8407 = vmatpush3.bf16.msra.mxu1 %v9058_v52 }
 0x25e   :  { %8408 = vmatprep.subr.bf16.mxu1 %v9064_v16 }
 0x25f   :  { %8370 = vmatpush3.bf16.msra.mxu0 %v9060_v53 }
 0x260   :  { %8431 = vmatprep.subr.bf16.mxu0 %v9066_v18 }
 0x261   :  { %8409 = vmatpush3.bf16.msra.mxu1 %v9062_v55 }
 0x262   :  { %6813 = vmatmul.mubr.bf16.vlgmr.msra.gmra.mrb[72].mxu0 %v530_v56 }
 0x263   :  { %8428 = vmatprep.mubr.msk.f32.mxu0 %vm9065_vm0, %v9064_v16  ;;  %8433 = vmatpush3.bf16.msra.mxu0 %v8432_v21 }
 0x264   :  { %8411 = vmatmul.mubr.bf16.vlgmr.msra.gmra.mrb[72].mxu1 %v532_v57  ;;  %8434 = vmatprep.subr.bf16.mxu0 %v9066_v18 }
 0x267   :  { %8436 = vmatpush3.bf16.msra.mxu0 %v8435_v26  ;;  %v7560_v26 = vld [vmem:[#allocation2] ss:$0 sm:$0xff] }
 0x268   :  { %8437 = vmatprep.subr.bf16.mxu0 %v9066_v18 }
 0x26b   :  { %8439 = vmatpush3.bf16.msra.mxu0 %v8438_v39 }
 0x26c   :  { %8426 = vmatprep.subr.mxu0 %v9064_v16 }
 0x26f   :  { %8427 = vmatpush3.msk.msra.mxu0 %vm6879_vm1, %v6867_v41 }
 0x275   :  { %v8107_v58 = vpop.f32.mrb[48].mxu0 }
 0x276   :  { %v8108_v59 = vpop.f32.mrb[49].mxu0 }
 0x277   :  { %v8109_v60 = vadd.f32 %v8108_v59, %v8107_v58  ;;  %v8110_v34 = vpop.f32.mrb[50].mxu0  ;;  %v8129_v61 = vpop.f32.mrb[48].mxu1 }
 0x278   :  { %v8111_v62 = vpop.f32.mrb[51].mxu0  ;;  %v8130_v63 = vpop.f32.mrb[49].mxu1 }
 0x279   :  { %v6335_v0 = vadd.f32 %v8109_v60, %v6295_v47  ;;  %v8131_v1 = vadd.f32 %v8130_v63, %v8129_v61  ;;  %v8132_v2 = vpop.f32.mrb[50].mxu1 }
 0x27a   :  { %v8133_v3 = vpop.f32.mrb[51].mxu1 }
 0x27b   :  { %v6375_v4 = vadd.f32 %v8131_v1, %v6335_v0 }
 0x295   :  { %v8151_v5 = vpop.f32.mrb[52].mxu0 }
 0x296   :  { %v8152_v6 = vpop.f32.mrb[53].mxu0 }
 0x297   :  { %v8153_v7 = vadd.f32 %v8152_v6, %v8151_v5  ;;  %v8154_v8 = vpop.f32.mrb[54].mxu0  ;;  %v8173_v9 = vpop.f32.mrb[52].mxu1 }
 0x298   :  { %v8155_v10 = vpop.f32.mrb[55].mxu0  ;;  %v8174_v11 = vpop.f32.mrb[53].mxu1 }
 0x299   :  { %v6415_v12 = vadd.f32 %v8153_v7, %v6375_v4  ;;  %v8175_v13 = vadd.f32 %v8174_v11, %v8173_v9  ;;  %v8176_v14 = vpop.f32.mrb[54].mxu1 }
 0x29a   :  { %v8177_v15 = vpop.f32.mrb[55].mxu1 }
 0x29b   :  { %v6455_v17 = vadd.f32 %v8175_v13, %v6415_v12 }
 0x2b5   :  { %v8195_v22 = vpop.f32.mrb[56].mxu0 }
 0x2b6   :  { %v8196_v25 = vpop.f32.mrb[57].mxu0 }
 0x2b7   :  { %v8197_v27 = vadd.f32 %v8196_v25, %v8195_v22  ;;  %v8198_v28 = vpop.f32.mrb[58].mxu0  ;;  %v8217_v29 = vpop.f32.mrb[56].mxu1 }
 0x2b8   :  { %v8199_v30 = vpop.f32.mrb[59].mxu0  ;;  %v8218_v31 = vpop.f32.mrb[57].mxu1 }
 0x2b9   :  { %v6495_v32 = vadd.f32 %v8197_v27, %v6455_v17  ;;  %v8219_v33 = vadd.f32 %v8218_v31, %v8217_v29  ;;  %v8220_v35 = vpop.f32.mrb[58].mxu1 }
 0x2ba   :  { %v8221_v38 = vpop.f32.mrb[59].mxu1 }
 0x2bb   :  { %v6535_v40 = vadd.f32 %v8219_v33, %v6495_v32 }
 0x2d5   :  { %v8239_v43 = vpop.f32.mrb[60].mxu0 }
 0x2d6   :  { %v8240_v44 = vpop.f32.mrb[61].mxu0 }
 0x2d7   :  { %v8241_v45 = vadd.f32 %v8240_v44, %v8239_v43  ;;  %v8242_v46 = vpop.f32.mrb[62].mxu0  ;;  %v8261_v47 = vpop.f32.mrb[60].mxu1 }
 0x2d8   :  { %v8243_v48 = vpop.f32.mrb[63].mxu0  ;;  %v8262_v49 = vpop.f32.mrb[61].mxu1 }
 0x2d9   :  { %v6575_v50 = vadd.f32 %v8241_v45, %v6535_v40  ;;  %v8263_v16 = vadd.f32 %v8262_v49, %v8261_v47  ;;  %v8264_v51 = vpop.f32.mrb[62].mxu1 }
 0x2da   :  { %v8265_v52 = vpop.f32.mrb[63].mxu1 }
 0x2db   :  { %v6615_v53 = vadd.f32 %v8263_v16, %v6575_v50 }
 0x2f5   :  { %v8283_v54 = vpop.f32.mrb[64].mxu0 }
 0x2f6   :  { %v8284_v55 = vpop.f32.mrb[65].mxu0 }
 0x2f7   :  { %v8285_v56 = vadd.f32 %v8284_v55, %v8283_v54  ;;  %v8286_v57 = vpop.f32.mrb[66].mxu0  ;;  %v8305_v58 = vpop.f32.mrb[64].mxu1 }
 0x2f8   :  { %v8287_v59 = vpop.f32.mrb[67].mxu0  ;;  %v8306_v60 = vpop.f32.mrb[65].mxu1 }
 0x2f9   :  { %v6655_v34 = vadd.f32 %v8285_v56, %v6615_v53  ;;  %v8307_v61 = vadd.f32 %v8306_v60, %v8305_v58  ;;  %v8308_v62 = vpop.f32.mrb[66].mxu1 }
 0x2fa   :  { %v8309_v63 = vpop.f32.mrb[67].mxu1 }
 0x2fb   :  { %v6695_v0 = vadd.f32 %v8307_v61, %v6655_v34 }
 0x315   :  { %v8327_v1 = vpop.f32.mrb[68].mxu0 }
 0x316   :  { %v8328_v2 = vpop.f32.mrb[69].mxu0 }
 0x317   :  { %v8329_v3 = vadd.f32 %v8328_v2, %v8327_v1  ;;  %v8330_v4 = vpop.f32.mrb[70].mxu0  ;;  %v8349_v5 = vpop.f32.mrb[68].mxu1 }
 0x318   :  { %v8331_v6 = vpop.f32.mrb[71].mxu0  ;;  %v8350_v7 = vpop.f32.mrb[69].mxu1 }
 0x319   :  { %v6735_v8 = vadd.f32 %v8329_v3, %v6695_v0  ;;  %v8351_v9 = vadd.f32 %v8350_v7, %v8349_v5  ;;  %v8352_v10 = vpop.f32.mrb[70].mxu1 }
 0x31a   :  { %v8353_v11 = vpop.f32.mrb[71].mxu1 }
 0x31b   :  { %v6775_v12 = vadd.f32 %v8351_v9, %v6735_v8 }
 0x335   :  { %v8371_v13 = vpop.f32.mrb[72].mxu0 }
 0x336   :  { %v8372_v14 = vpop.f32.mrb[73].mxu0 }
 0x337   :  { %v8373_v15 = vadd.f32 %v8372_v14, %v8371_v13  ;;  %v8374_v17 = vpop.f32.mrb[74].mxu0  ;;  %v6854_v18 = vpop.f32.mrb[72].mxu1 }
 0x338   :  { %v8375_v19 = vpop.f32.mrb[75].mxu0  ;;  %v8412_v20 = vpop.f32.mrb[73].mxu1 }
 0x339   :  { %v6815_v21 = vadd.f32 %v8373_v15, %v6775_v12  ;;  %v6857_v22 = vpop.f32.mrb[74].mxu1 }
 0x33a   :  { %v8413_v23 = vpop.f32.mrb[75].mxu1 }
 0x33b   :  { %v6855_v24 = vadd.f32 %v6854_v18, %v6815_v21 }
 0x33d   :  { %v6860_v25 = vmax.f32 %v6855_v24, 0.0 }
 0x33f   :  { %8429 = vmatmul.mubr.msk.f32.vlgmr.msra.gmra.mrb[76].mxu0 %vm6875_vm2, %v6860_v25 }
 0x412   :  { %v6949_v27 = vpop.f32.mrb[76].mxu0 }
 0x413   :  { %v6950_v28 = vadd.f32 %v7560_v26, %v6949_v27  ;;  %v8430_v29 = vpop.f32.mrb[77].mxu0 }
 0x415   :  { %6954 = vst.msk [vmem:[%s11075_s5] sm:$0x3] %vm6953_vm3, %v6950_v28 }

</bundles_post_ra>
